<compile_context>
chip_gen: v6e
topology: v6e:2x2x1
jax: 0.10.0
libtpu: 0.0.40
codegen_flags: <defaults>
</compile_context>

<pallas_src>
import jax
import jax.numpy as jnp
import numpy as np
from jax import lax
from jax.experimental import pallas as pl
from jax.experimental.pallas import tpu as pltpu


# ---------------------------------------------------------------------------
# Pallas kernels
# ---------------------------------------------------------------------------
def _matmul_bias_relu_kernel(x_ref, w_ref, b_ref, o_ref):
    # x_ref: (tm, K), w_ref: (N, K)  [PyTorch (out, in) layout], b_ref: (1, N)
    acc = lax.dot_general(
        x_ref[...], w_ref[...],
        dimension_numbers=(((1,), (1,)), ((), ())),      # contract K with K
        preferred_element_type=jnp.float32)
    o_ref[...] = jnp.maximum(acc + b_ref[...], 0.0).astype(o_ref.dtype)


def matmul_bias_relu(x, w_nk, b, *, tm):
    """relu(x @ w_nk.T + b); w_nk is (N, K). Tiled over M (parallel axis)."""
    M, K = x.shape
    N, Kw = w_nk.shape
    assert K == Kw
    grid_m = pl.cdiv(M, tm)
    return pl.pallas_call(
        _matmul_bias_relu_kernel,
        out_shape=jax.ShapeDtypeStruct((M, N), jnp.float32),
        grid_spec=pltpu.PrefetchScalarGridSpec(
            num_scalar_prefetch=0,
            grid=(grid_m,),
            in_specs=[
                pl.BlockSpec((tm, K), lambda i: (i, 0)),   # row tile
                pl.BlockSpec((N, K), lambda i: (0, 0)),    # full weight, resident
                pl.BlockSpec((1, N), lambda i: (0, 0)),    # bias
            ],
            out_specs=pl.BlockSpec((tm, N), lambda i: (i, 0)),
        ),
        compiler_params=pltpu.CompilerParams(
            dimension_semantics=("parallel",)),
    )(x, w_nk, b.reshape(1, N))


def _fc_fused_kernel(x_ref, w1_ref, b1_ref, w2_ref, b2_ref, o_ref, acc_ref):
    # Grid axis tiles fc1's output features (= fc2's contraction dim).
    j = pl.program_id(0)

    @pl.when(j == 0)
    def _():
        acc_ref[...] = jnp.zeros_like(acc_ref)

    w1 = w1_ref[...].astype(jnp.float32)                  # bf16 -> f32 in VMEM
    h = lax.dot_general(x_ref[...], w1,
                        dimension_numbers=(((1,), (1,)), ((), ())),
                        preferred_element_type=jnp.float32)
    h = jnp.maximum(h + b1_ref[...], 0.0)                 # (B, tn) fc1 tile

    w2 = w2_ref[...].astype(jnp.float32)
    acc_ref[...] += lax.dot_general(h, w2,
                                    dimension_numbers=(((1,), (1,)), ((), ())),
                                    preferred_element_type=jnp.float32)

    @pl.when(j == pl.num_programs(0) - 1)
    def _():
        o_ref[...] = acc_ref[...] + b2_ref[...]


def fc1_fc2_fused(x, w1_nk, b1, w2_nk, b2, *, tn=512):
    """logits = fc2(relu(fc1(x))) in one pallas_call.

    Weights stay in (out, in) layout (no transpose) and stream as bf16; the
    (B, 2048) intermediate lives only in VMEM.
    """
    M, K = x.shape
    H, Kw = w1_nk.shape
    N, Hw = w2_nk.shape
    assert K == Kw and H == Hw and H % tn == 0
    return pl.pallas_call(
        _fc_fused_kernel,
        out_shape=jax.ShapeDtypeStruct((M, N), jnp.float32),
        grid_spec=pltpu.PrefetchScalarGridSpec(
            num_scalar_prefetch=0,
            grid=(H // tn,),
            in_specs=[
                pl.BlockSpec((M, K), lambda j: (0, 0)),    # activations, resident
                pl.BlockSpec((tn, K), lambda j: (j, 0)),   # fc1 weight tile (bf16)
                pl.BlockSpec((1, tn), lambda j: (0, j)),   # fc1 bias tile
                pl.BlockSpec((N, tn), lambda j: (0, j)),   # fc2 weight tile (bf16)
                pl.BlockSpec((1, N), lambda j: (0, 0)),    # fc2 bias
            ],
            out_specs=pl.BlockSpec((M, N), lambda j: (0, 0)),
            scratch_shapes=[pltpu.VMEM((M, N), jnp.float32)],
        ),
        compiler_params=pltpu.CompilerParams(
            dimension_semantics=("arbitrary",)),           # reduction over fc1 tiles
    )(x, w1_nk, b1.reshape(1, H), w2_nk, b2.reshape(1, N))


def _maxpool2x2_kernel(x_ref, o_ref):
    # x_ref block: (1, H2, 2, W2, 2*C); o_ref block: (1, H2, W2, C)
    C = o_ref.shape[-1]
    x = x_ref[...]
    r = jnp.maximum(x[:, :, 0, :, :], x[:, :, 1, :, :])   # max over the H pair
    o_ref[...] = jnp.maximum(r[..., :C], r[..., C:])      # max over the W pair


def maxpool2x2(x_nhwc):
    """2x2 max pool, stride 2, floor semantics (matches nn.MaxPool2d)."""
    B, H, W, C = x_nhwc.shape
    H2, W2 = H // 2, W // 2
    x = x_nhwc[:, :2 * H2, :2 * W2, :]          # drop odd row/col (no-op if even)
    # Zero-copy row-major reshape: (B, 2*H2, 2*W2, C) -> (B, H2, 2, W2, 2*C)
    xr = x.reshape(B, H2, 2, W2, 2 * C)
    return pl.pallas_call(
        _maxpool2x2_kernel,
        out_shape=jax.ShapeDtypeStruct((B, H2, W2, C), x_nhwc.dtype),
        grid_spec=pltpu.PrefetchScalarGridSpec(
            num_scalar_prefetch=0,
            grid=(B,),
            in_specs=[pl.BlockSpec((1, H2, 2, W2, 2 * C),
                                   lambda b: (b, 0, 0, 0, 0))],
            out_specs=pl.BlockSpec((1, H2, W2, C), lambda b: (b, 0, 0, 0)),
        ),
        compiler_params=pltpu.CompilerParams(
            dimension_semantics=("parallel",)),
    )(xr)


# ---------------------------------------------------------------------------
# Layers (glue + Pallas hot path)
# ---------------------------------------------------------------------------
def conv2d_relu(x_nhwc, w_oihw, bias, pad, *, tm):
    """5x5 conv (stride 1, symmetric padding) + bias + ReLU via im2col matmul."""
    B, H, W, C = x_nhwc.shape
    OC, IC, KH, KW = w_oihw.shape
    assert IC == C
    xp = jnp.pad(x_nhwc, ((0, 0), (pad, pad), (pad, pad), (0, 0)))
    OH = H + 2 * pad - KH + 1
    OW = W + 2 * pad - KW + 1
    # im2col: feature order (C, KH, KW) to match w.reshape(OC, IC*KH*KW).
    # TODO(synk): at large batch move im2col into the kernel as a 25-tap
    # "arbitrary" reduction axis to avoid the 25x activation blow-up in HBM.
    patches = []
    for i in range(KH):
        for j in range(KW):
            patches.append(xp[:, i:i + OH, j:j + OW, :])   # (B, OH, OW, C)
    p = jnp.stack(patches, axis=3)                          # (B, OH, OW, KH*KW, C)
    p = jnp.transpose(p, (0, 1, 2, 4, 3))                   # (B, OH, OW, C, KH*KW)
    p = p.reshape(B * OH * OW, C * KH * KW)
    w_nk = w_oihw.reshape(OC, IC * KH * KW)                 # (N, K) - no transpose
    y = matmul_bias_relu(p, w_nk, bias, tm=tm)              # (B*OH*OW, OC)
    return y.reshape(B, OH, OW, OC)


def cnn_femnist_forward(x_nchw, params):
    w1, b1, w2, b2, fw1, fb1, fw2, fb2 = params
    x = jnp.transpose(x_nchw, (0, 2, 3, 1))                 # NCHW -> NHWC
    x = conv2d_relu(x, w1, b1, pad=1, tm=512)               # (B, 26, 26, 32)
    x = maxpool2x2(x)                                       # (B, 13, 13, 32)
    x = conv2d_relu(x, w2, b2, pad=1, tm=128)               # (B, 11, 11, 64)
    x = maxpool2x2(x)                                       # (B, 5, 5, 64)
    # PyTorch flattens NCHW order: (C, H, W)
    x = jnp.transpose(x, (0, 3, 1, 2)).reshape(x.shape[0], -1)   # (B, 1600)
    return fc1_fc2_fused(x, fw1, fb1, fw2, fb2, tn=512)     # (B, 62)


# ---------------------------------------------------------------------------
# Pure-JAX reference (for correctness check only; uses the same bf16 weights)
# ---------------------------------------------------------------------------
def reference_forward(x, params):
    w1, b1, w2, b2, fw1, fb1, fw2, fb2 = params
    dn = ('NCHW', 'OIHW', 'NCHW')
    y = lax.conv_general_dilated(x, w1, (1, 1), ((1, 1), (1, 1)),
                                 dimension_numbers=dn) + b1[None, :, None, None]
    y = jnp.maximum(y, 0.0)
    y = lax.reduce_window(y, -jnp.inf, lax.max, (1, 1, 2, 2), (1, 1, 2, 2), 'VALID')
    y = lax.conv_general_dilated(y, w2, (1, 1), ((1, 1), (1, 1)),
                                 dimension_numbers=dn) + b2[None, :, None, None]
    y = jnp.maximum(y, 0.0)
    y = lax.reduce_window(y, -jnp.inf, lax.max, (1, 1, 2, 2), (1, 1, 2, 2), 'VALID')
    y = y.reshape(y.shape[0], -1)
    y = jnp.maximum(y @ fw1.astype(jnp.float32).T + fb1, 0.0)
    y = y @ fw2.astype(jnp.float32).T + fb2
    return y


# ---------------------------------------------------------------------------
# Main
# ---------------------------------------------------------------------------
if __name__ == "__main__":
    key = jax.random.PRNGKey(0)
    ks = jax.random.split(key, 9)

    # Deterministic synthetic parameters (shapes from CNNFEMNIST.__init__).
    w1 = jax.random.normal(ks[0], (32, 1, 5, 5), jnp.float32) * 0.1
    b1 = jax.random.normal(ks[1], (32,), jnp.float32) * 0.1
    w2 = jax.random.normal(ks[2], (64, 32, 5, 5), jnp.float32) * 0.05
    b2 = jax.random.normal(ks[3], (64,), jnp.float32) * 0.05
    # FC weights prepared ONCE outside the jitted forward: native (out, in)
    # layout (no in-jit transpose) and bf16 (half the HBM bytes of FC1).
    fw1 = (jax.random.normal(ks[4], (2048, 1600), jnp.float32) * 0.02
           ).astype(jnp.bfloat16)
    fb1 = jax.random.normal(ks[5], (2048,), jnp.float32) * 0.02
    fw2 = (jax.random.normal(ks[6], (62, 2048), jnp.float32) * 0.02
           ).astype(jnp.bfloat16)
    fb2 = jax.random.normal(ks[7], (62,), jnp.float32) * 0.02
    params = (w1, b1, w2, b2, fw1, fb1, fw2, fb2)

    # Input: the module requires 1x28x28 images (fc1 dims depend on it).
    x = jax.random.normal(ks[8], (2, 1, 28, 28), jnp.float32)

    out = jax.block_until_ready(jax.jit(cnn_femnist_forward)(x, params))
    assert out.shape == (2, 62), out.shape

    ref = jax.block_until_ready(jax.jit(reference_forward)(x, params))
    np.testing.assert_allclose(np.asarray(out), np.asarray(ref),
                               rtol=2e-3, atol=2e-3)

    print("KERNEL_OK")
</pallas_src>

<mosaic_0001>
module attributes {stable_mosaic.version = 11 : i64} {
  func.func @_matmul_bias_relu_kernel(%arg0: i32, %arg1: memref<512x25xf32, #tpu.memory_space<vmem>>, %arg2: memref<32x25xf32, #tpu.memory_space<vmem>>, %arg3: memref<1x32xf32, #tpu.memory_space<vmem>>, %arg4: memref<512x32xf32, #tpu.memory_space<vmem>>) attributes {dimension_semantics = [#tpu.dimension_semantics<parallel>], iteration_bounds = array<i64: 3>, scalar_prefetch = 0 : i64, scratch_operands = 0 : i64, tpu.core_type = #tpu.core_type<tc>, window_params = [{transform_indices = @transform_0, window_bounds = array<i64: 512, 25>}, {pipeline_mode = #tpu.pipeline_mode<synchronous>, transform_indices = @transform_1, window_bounds = array<i64: 32, 25>}, {pipeline_mode = #tpu.pipeline_mode<synchronous>, transform_indices = @transform_2, window_bounds = array<i64: 1, 32>}, {transform_indices = @transform_3, window_bounds = array<i64: 512, 32>}]} {
    %c0 = arith.constant 0 : index
    %c0_0 = arith.constant 0 : index
    %0 = vector.load %arg1[%c0, %c0_0] : memref<512x25xf32, #tpu.memory_space<vmem>>, vector<512x25xf32>
    %c0_1 = arith.constant 0 : index
    %c0_2 = arith.constant 0 : index
    %1 = vector.load %arg2[%c0_1, %c0_2] : memref<32x25xf32, #tpu.memory_space<vmem>>, vector<32x25xf32>
    %cst = arith.constant dense<0.000000e+00> : vector<512x32xf32>
    %2 = tpu.matmul %0, %1, %cst {dimension_numbers = #tpu.dot_dimension_numbers<[1], [1], [0], [0], [0, 0, 1, 0], [], []>} : vector<512x25xf32>, vector<32x25xf32>, vector<512x32xf32> -> vector<512x32xf32>
    %c0_3 = arith.constant 0 : index
    %c0_4 = arith.constant 0 : index
    %3 = vector.load %arg3[%c0_3, %c0_4] : memref<1x32xf32, #tpu.memory_space<vmem>>, vector<1x32xf32>
    %4 = vector.broadcast %3 : vector<1x32xf32> to vector<512x32xf32>
    %5 = arith.addf %2, %4 : vector<512x32xf32>
    %cst_5 = arith.constant 0.000000e+00 : f32
    %6 = vector.broadcast %cst_5 : f32 to vector<512x32xf32>
    %7 = arith.maximumf %5, %6 : vector<512x32xf32>
    %c0_6 = arith.constant 0 : index
    %c0_7 = arith.constant 0 : index
    %8 = vector.load %arg4[%c0_6, %c0_7] : memref<512x32xf32, #tpu.memory_space<vmem>>, vector<512x32xf32>
    tpu.vector_store %arg4[%c0_6, %c0_7], %7 {strides = array<i32>} : memref<512x32xf32, #tpu.memory_space<vmem>>, vector<512x32xf32>,
    return
  }
  func.func @transform_0(%arg0: i32) -> (i32, i32) {
    %c0_i32 = arith.constant 0 : i32
    %c0_i32_0 = arith.constant 0 : i32
    return %arg0, %c0_i32 : i32, i32
  }
  func.func @transform_1(%arg0: i32) -> (i32, i32) {
    %c0_i32 = arith.constant 0 : i32
    %c0_i32_0 = arith.constant 0 : i32
    %c0_i32_1 = arith.constant 0 : i32
    return %c0_i32, %c0_i32_0 : i32, i32
  }
  func.func @transform_2(%arg0: i32) -> (i32, i32) {
    %c0_i32 = arith.constant 0 : i32
    %c0_i32_0 = arith.constant 0 : i32
    %c0_i32_1 = arith.constant 0 : i32
    return %c0_i32, %c0_i32_0 : i32, i32
  }
  func.func @transform_3(%arg0: i32) -> (i32, i32) {
    %c0_i32 = arith.constant 0 : i32
    %c0_i32_0 = arith.constant 0 : i32
    return %arg0, %c0_i32 : i32, i32
  }
}

module attributes {stable_mosaic.version = 11 : i64} {
  func.func @_maxpool2x2_kernel(%arg0: i32, %arg1: memref<1x13x2x13x64xf32, #tpu.memory_space<vmem>>, %arg2: memref<1x13x13x32xf32, #tpu.memory_space<vmem>>) attributes {dimension_semantics = [#tpu.dimension_semantics<parallel>], iteration_bounds = array<i64: 2>, scalar_prefetch = 0 : i64, scratch_operands = 0 : i64, tpu.core_type = #tpu.core_type<tc>, window_params = [{transform_indices = @transform_0, window_bounds = array<i64: 1, 13, 2, 13, 64>}, {transform_indices = @transform_1, window_bounds = array<i64: 1, 13, 13, 32>}]} {
    %c0 = arith.constant 0 : index
    %c0_0 = arith.constant 0 : index
    %c0_1 = arith.constant 0 : index
    %c0_2 = arith.constant 0 : index
    %c0_3 = arith.constant 0 : index
    %0 = vector.load %arg1[%c0, %c0_0, %c0_1, %c0_2, %c0_3] : memref<1x13x2x13x64xf32, #tpu.memory_space<vmem>>, vector<1x13x2x13x64xf32>
    %1 = vector.extract_strided_slice %0 {offsets = [0, 0, 0, 0, 0], sizes = [1, 13, 1, 13, 64], strides = [1, 1, 1, 1, 1]} : vector<1x13x2x13x64xf32> to vector<1x13x1x13x64xf32>
    %2 = vector.shape_cast %1 : vector<1x13x1x13x64xf32> to vector<1x13x13x64xf32>
    %3 = vector.extract_strided_slice %0 {offsets = [0, 0, 1, 0, 0], sizes = [1, 13, 1, 13, 64], strides = [1, 1, 1, 1, 1]} : vector<1x13x2x13x64xf32> to vector<1x13x1x13x64xf32>
    %4 = vector.shape_cast %3 : vector<1x13x1x13x64xf32> to vector<1x13x13x64xf32>
    %5 = arith.maximumf %2, %4 : vector<1x13x13x64xf32>
    %6 = vector.extract_strided_slice %5 {offsets = [0, 0, 0, 0], sizes = [1, 13, 13, 32], strides = [1, 1, 1, 1]} : vector<1x13x13x64xf32> to vector<1x13x13x32xf32>
    %7 = vector.extract_strided_slice %5 {offsets = [0, 0, 0, 32], sizes = [1, 13, 13, 32], strides = [1, 1, 1, 1]} : vector<1x13x13x64xf32> to vector<1x13x13x32xf32>
    %8 = arith.maximumf %6, %7 : vector<1x13x13x32xf32>
    %c0_4 = arith.constant 0 : index
    %c0_5 = arith.constant 0 : index
    %c0_6 = arith.constant 0 : index
    %c0_7 = arith.constant 0 : index
    %9 = vector.load %arg2[%c0_4, %c0_5, %c0_6, %c0_7] : memref<1x13x13x32xf32, #tpu.memory_space<vmem>>, vector<1x13x13x32xf32>
    tpu.vector_store %arg2[%c0_4, %c0_5, %c0_6, %c0_7], %8 {strides = array<i32>} : memref<1x13x13x32xf32, #tpu.memory_space<vmem>>, vector<1x13x13x32xf32>,
    return
  }
  func.func @transform_0(%arg0: i32) -> (i32, i32, i32, i32, i32) {
    %c0_i32 = arith.constant 0 : i32
    %c0_i32_0 = arith.constant 0 : i32
    %c0_i32_1 = arith.constant 0 : i32
    %c0_i32_2 = arith.constant 0 : i32
    %c0_i32_3 = arith.constant 0 : i32
    return %arg0, %c0_i32, %c0_i32_0, %c0_i32_1, %c0_i32_2 : i32, i32, i32, i32, i32
  }
  func.func @transform_1(%arg0: i32) -> (i32, i32, i32, i32) {
    %c0_i32 = arith.constant 0 : i32
    %c0_i32_0 = arith.constant 0 : i32
    %c0_i32_1 = arith.constant 0 : i32
    %c0_i32_2 = arith.constant 0 : i32
    return %arg0, %c0_i32, %c0_i32_0, %c0_i32_1 : i32, i32, i32, i32
  }
}

module attributes {stable_mosaic.version = 11 : i64} {
  func.func @_matmul_bias_relu_kernel(%arg0: i32, %arg1: memref<128x800xf32, #tpu.memory_space<vmem>>, %arg2: memref<64x800xf32, #tpu.memory_space<vmem>>, %arg3: memref<1x64xf32, #tpu.memory_space<vmem>>, %arg4: memref<128x64xf32, #tpu.memory_space<vmem>>) attributes {dimension_semantics = [#tpu.dimension_semantics<parallel>], iteration_bounds = array<i64: 2>, scalar_prefetch = 0 : i64, scratch_operands = 0 : i64, tpu.core_type = #tpu.core_type<tc>, window_params = [{transform_indices = @transform_0, window_bounds = array<i64: 128, 800>}, {pipeline_mode = #tpu.pipeline_mode<synchronous>, transform_indices = @transform_1, window_bounds = array<i64: 64, 800>}, {pipeline_mode = #tpu.pipeline_mode<synchronous>, transform_indices = @transform_2, window_bounds = array<i64: 1, 64>}, {transform_indices = @transform_3, window_bounds = array<i64: 128, 64>}]} {
    %c0 = arith.constant 0 : index
    %c0_0 = arith.constant 0 : index
    %0 = vector.load %arg1[%c0, %c0_0] : memref<128x800xf32, #tpu.memory_space<vmem>>, vector<128x800xf32>
    %c0_1 = arith.constant 0 : index
    %c0_2 = arith.constant 0 : index
    %1 = vector.load %arg2[%c0_1, %c0_2] : memref<64x800xf32, #tpu.memory_space<vmem>>, vector<64x800xf32>
    %cst = arith.constant dense<0.000000e+00> : vector<128x64xf32>
    %2 = tpu.matmul %0, %1, %cst {dimension_numbers = #tpu.dot_dimension_numbers<[1], [1], [0], [0], [0, 0, 1, 0], [], []>} : vector<128x800xf32>, vector<64x800xf32>, vector<128x64xf32> -> vector<128x64xf32>
    %c0_3 = arith.constant 0 : index
    %c0_4 = arith.constant 0 : index
    %3 = vector.load %arg3[%c0_3, %c0_4] : memref<1x64xf32, #tpu.memory_space<vmem>>, vector<1x64xf32>
    %4 = vector.broadcast %3 : vector<1x64xf32> to vector<128x64xf32>
    %5 = arith.addf %2, %4 : vector<128x64xf32>
    %cst_5 = arith.constant 0.000000e+00 : f32
    %6 = vector.broadcast %cst_5 : f32 to vector<128x64xf32>
    %7 = arith.maximumf %5, %6 : vector<128x64xf32>
    %c0_6 = arith.constant 0 : index
    %c0_7 = arith.constant 0 : index
    %8 = vector.load %arg4[%c0_6, %c0_7] : memref<128x64xf32, #tpu.memory_space<vmem>>, vector<128x64xf32>
    tpu.vector_store %arg4[%c0_6, %c0_7], %7 {strides = array<i32>} : memref<128x64xf32, #tpu.memory_space<vmem>>, vector<128x64xf32>,
    return
  }
  func.func @transform_0(%arg0: i32) -> (i32, i32) {
    %c0_i32 = arith.constant 0 : i32
    %c0_i32_0 = arith.constant 0 : i32
    return %arg0, %c0_i32 : i32, i32
  }
  func.func @transform_1(%arg0: i32) -> (i32, i32) {
    %c0_i32 = arith.constant 0 : i32
    %c0_i32_0 = arith.constant 0 : i32
    %c0_i32_1 = arith.constant 0 : i32
    return %c0_i32, %c0_i32_0 : i32, i32
  }
  func.func @transform_2(%arg0: i32) -> (i32, i32) {
    %c0_i32 = arith.constant 0 : i32
    %c0_i32_0 = arith.constant 0 : i32
    %c0_i32_1 = arith.constant 0 : i32
    return %c0_i32, %c0_i32_0 : i32, i32
  }
  func.func @transform_3(%arg0: i32) -> (i32, i32) {
    %c0_i32 = arith.constant 0 : i32
    %c0_i32_0 = arith.constant 0 : i32
    return %arg0, %c0_i32 : i32, i32
  }
}

module attributes {stable_mosaic.version = 11 : i64} {
  func.func @_maxpool2x2_kernel(%arg0: i32, %arg1: memref<1x5x2x5x128xf32, #tpu.memory_space<vmem>>, %arg2: memref<1x5x5x64xf32, #tpu.memory_space<vmem>>) attributes {dimension_semantics = [#tpu.dimension_semantics<parallel>], iteration_bounds = array<i64: 2>, scalar_prefetch = 0 : i64, scratch_operands = 0 : i64, tpu.core_type = #tpu.core_type<tc>, window_params = [{transform_indices = @transform_0, window_bounds = array<i64: 1, 5, 2, 5, 128>}, {transform_indices = @transform_1, window_bounds = array<i64: 1, 5, 5, 64>}]} {
    %c0 = arith.constant 0 : index
    %c0_0 = arith.constant 0 : index
    %c0_1 = arith.constant 0 : index
    %c0_2 = arith.constant 0 : index
    %c0_3 = arith.constant 0 : index
    %0 = vector.load %arg1[%c0, %c0_0, %c0_1, %c0_2, %c0_3] : memref<1x5x2x5x128xf32, #tpu.memory_space<vmem>>, vector<1x5x2x5x128xf32>
    %1 = vector.extract_strided_slice %0 {offsets = [0, 0, 0, 0, 0], sizes = [1, 5, 1, 5, 128], strides = [1, 1, 1, 1, 1]} : vector<1x5x2x5x128xf32> to vector<1x5x1x5x128xf32>
    %2 = vector.shape_cast %1 : vector<1x5x1x5x128xf32> to vector<1x5x5x128xf32>
    %3 = vector.extract_strided_slice %0 {offsets = [0, 0, 1, 0, 0], sizes = [1, 5, 1, 5, 128], strides = [1, 1, 1, 1, 1]} : vector<1x5x2x5x128xf32> to vector<1x5x1x5x128xf32>
    %4 = vector.shape_cast %3 : vector<1x5x1x5x128xf32> to vector<1x5x5x128xf32>
    %5 = arith.maximumf %2, %4 : vector<1x5x5x128xf32>
    %6 = vector.extract_strided_slice %5 {offsets = [0, 0, 0, 0], sizes = [1, 5, 5, 64], strides = [1, 1, 1, 1]} : vector<1x5x5x128xf32> to vector<1x5x5x64xf32>
    %7 = vector.extract_strided_slice %5 {offsets = [0, 0, 0, 64], sizes = [1, 5, 5, 64], strides = [1, 1, 1, 1]} : vector<1x5x5x128xf32> to vector<1x5x5x64xf32>
    %8 = arith.maximumf %6, %7 : vector<1x5x5x64xf32>
    %c0_4 = arith.constant 0 : index
    %c0_5 = arith.constant 0 : index
    %c0_6 = arith.constant 0 : index
    %c0_7 = arith.constant 0 : index
    %9 = vector.load %arg2[%c0_4, %c0_5, %c0_6, %c0_7] : memref<1x5x5x64xf32, #tpu.memory_space<vmem>>, vector<1x5x5x64xf32>
    tpu.vector_store %arg2[%c0_4, %c0_5, %c0_6, %c0_7], %8 {strides = array<i32>} : memref<1x5x5x64xf32, #tpu.memory_space<vmem>>, vector<1x5x5x64xf32>,
    return
  }
  func.func @transform_0(%arg0: i32) -> (i32, i32, i32, i32, i32) {
    %c0_i32 = arith.constant 0 : i32
    %c0_i32_0 = arith.constant 0 : i32
    %c0_i32_1 = arith.constant 0 : i32
    %c0_i32_2 = arith.constant 0 : i32
    %c0_i32_3 = arith.constant 0 : i32
    return %arg0, %c0_i32, %c0_i32_0, %c0_i32_1, %c0_i32_2 : i32, i32, i32, i32, i32
  }
  func.func @transform_1(%arg0: i32) -> (i32, i32, i32, i32) {
    %c0_i32 = arith.constant 0 : i32
    %c0_i32_0 = arith.constant 0 : i32
    %c0_i32_1 = arith.constant 0 : i32
    %c0_i32_2 = arith.constant 0 : i32
    return %arg0, %c0_i32, %c0_i32_0, %c0_i32_1 : i32, i32, i32, i32
  }
}

module attributes {stable_mosaic.version = 11 : i64} {
  func.func @_fc_fused_kernel(%arg0: i32, %arg1: memref<2x1600xf32, #tpu.memory_space<vmem>>, %arg2: memref<512x1600xbf16, #tpu.memory_space<vmem>>, %arg3: memref<1x512xf32, #tpu.memory_space<vmem>>, %arg4: memref<62x512xbf16, #tpu.memory_space<vmem>>, %arg5: memref<1x62xf32, #tpu.memory_space<vmem>>, %arg6: memref<2x62xf32, #tpu.memory_space<vmem>>, %arg7: memref<2x62xf32, #tpu.memory_space<vmem>>) attributes {dimension_semantics = [#tpu.dimension_semantics<arbitrary>], iteration_bounds = array<i64: 4>, scalar_prefetch = 0 : i64, scratch_operands = 1 : i64, tpu.core_type = #tpu.core_type<tc>, window_params = [{pipeline_mode = #tpu.pipeline_mode<synchronous>, transform_indices = @transform_0, window_bounds = array<i64: 2, 1600>}, {transform_indices = @transform_1, window_bounds = array<i64: 512, 1600>}, {transform_indices = @transform_2, window_bounds = array<i64: 1, 512>}, {transform_indices = @transform_3, window_bounds = array<i64: 62, 512>}, {pipeline_mode = #tpu.pipeline_mode<synchronous>, transform_indices = @transform_4, window_bounds = array<i64: 1, 62>}, {pipeline_mode = #tpu.pipeline_mode<synchronous>, transform_indices = @transform_5, window_bounds = array<i64: 2, 62>}]} {
    %c0_i32 = arith.constant 0 : i32
    %0 = arith.cmpi eq, %arg0, %c0_i32 : i32
    %1 = arith.extui %0 : i1 to i32
    %c0_i32_0 = arith.constant 0 : i32
    %2 = arith.cmpi ne, %1, %c0_i32_0 : i32
    scf.if %2 {
      %cst_15 = arith.constant 0.000000e+00 : f32
      %21 = vector.broadcast %cst_15 : f32 to vector<2x62xf32>
      %c0_16 = arith.constant 0 : index
      %c0_17 = arith.constant 0 : index
      %22 = vector.load %arg7[%c0_16, %c0_17] : memref<2x62xf32, #tpu.memory_space<vmem>>, vector<2x62xf32>
      tpu.vector_store %arg7[%c0_16, %c0_17], %21 {strides = array<i32>} : memref<2x62xf32, #tpu.memory_space<vmem>>, vector<2x62xf32>,
    } else {
    }
    %c0 = arith.constant 0 : index
    %c0_1 = arith.constant 0 : index
    %3 = vector.load %arg2[%c0, %c0_1] : memref<512x1600xbf16, #tpu.memory_space<vmem>>, vector<512x1600xbf16>
    %4 = arith.extf %3 : vector<512x1600xbf16> to vector<512x1600xf32>
    %c0_2 = arith.constant 0 : index
    %c0_3 = arith.constant 0 : index
    %5 = vector.load %arg1[%c0_2, %c0_3] : memref<2x1600xf32, #tpu.memory_space<vmem>>, vector<2x1600xf32>
    %cst = arith.constant dense<0.000000e+00> : vector<2x512xf32>
    %6 = tpu.matmul %5, %4, %cst {dimension_numbers = #tpu.dot_dimension_numbers<[1], [1], [0], [0], [0, 0, 1, 0], [], []>} : vector<2x1600xf32>, vector<512x1600xf32>, vector<2x512xf32> -> vector<2x512xf32>
    %c0_4 = arith.constant 0 : index
    %c0_5 = arith.constant 0 : index
    %7 = vector.load %arg3[%c0_4, %c0_5] : memref<1x512xf32, #tpu.memory_space<vmem>>, vector<1x512xf32>
    %8 = vector.broadcast %7 : vector<1x512xf32> to vector<2x512xf32>
    %9 = arith.addf %6, %8 : vector<2x512xf32>
    %cst_6 = arith.constant 0.000000e+00 : f32
    %10 = vector.broadcast %cst_6 : f32 to vector<2x512xf32>
    %11 = arith.maximumf %9, %10 : vector<2x512xf32>
    %c0_7 = arith.constant 0 : index
    %c0_8 = arith.constant 0 : index
    %12 = vector.load %arg4[%c0_7, %c0_8] : memref<62x512xbf16, #tpu.memory_space<vmem>>, vector<62x512xbf16>
    %13 = arith.extf %12 : vector<62x512xbf16> to vector<62x512xf32>
    %c0_9 = arith.constant 0 : index
    %c0_10 = arith.constant 0 : index
    %14 = vector.load %arg7[%c0_9, %c0_10] : memref<2x62xf32, #tpu.memory_space<vmem>>, vector<2x62xf32>
    %cst_11 = arith.constant dense<0.000000e+00> : vector<2x62xf32>
    %15 = tpu.matmul %11, %13, %cst_11 {dimension_numbers = #tpu.dot_dimension_numbers<[1], [1], [0], [0], [0, 0, 1, 0], [], []>} : vector<2x512xf32>, vector<62x512xf32>, vector<2x62xf32> -> vector<2x62xf32>
    %16 = arith.addf %14, %15 : vector<2x62xf32>
    %c0_12 = arith.constant 0 : index
    %c0_13 = arith.constant 0 : index
    %17 = vector.load %arg7[%c0_12, %c0_13] : memref<2x62xf32, #tpu.memory_space<vmem>>, vector<2x62xf32>
    tpu.vector_store %arg7[%c0_12, %c0_13], %16 {strides = array<i32>} : memref<2x62xf32, #tpu.memory_space<vmem>>, vector<2x62xf32>,
    %c3_i32 = arith.constant 3 : i32
    %18 = arith.cmpi eq, %arg0, %c3_i32 : i32
    %19 = arith.extui %18 : i1 to i32
    %c0_i32_14 = arith.constant 0 : i32
    %20 = arith.cmpi ne, %19, %c0_i32_14 : i32
    scf.if %20 {
      %c0_15 = arith.constant 0 : index
      %c0_16 = arith.constant 0 : index
      %21 = vector.load %arg7[%c0_15, %c0_16] : memref<2x62xf32, #tpu.memory_space<vmem>>, vector<2x62xf32>
      %c0_17 = arith.constant 0 : index
      %c0_18 = arith.constant 0 : index
      %22 = vector.load %arg5[%c0_17, %c0_18] : memref<1x62xf32, #tpu.memory_space<vmem>>, vector<1x62xf32>
      %23 = vector.broadcast %22 : vector<1x62xf32> to vector<2x62xf32>
      %24 = arith.addf %21, %23 : vector<2x62xf32>
      %c0_19 = arith.constant 0 : index
      %c0_20 = arith.constant 0 : index
      %25 = vector.load %arg6[%c0_19, %c0_20] : memref<2x62xf32, #tpu.memory_space<vmem>>, vector<2x62xf32>
      tpu.vector_store %arg6[%c0_19, %c0_20], %24 {strides = array<i32>} : memref<2x62xf32, #tpu.memory_space<vmem>>, vector<2x62xf32>,
    } else {
    }
    return
  }
  func.func @transform_0(%arg0: i32) -> (i32, i32) {
    %c0_i32 = arith.constant 0 : i32
    %c0_i32_0 = arith.constant 0 : i32
    %c0_i32_1 = arith.constant 0 : i32
    return %c0_i32, %c0_i32_0 : i32, i32
  }
  func.func @transform_1(%arg0: i32) -> (i32, i32) {
    %c0_i32 = arith.constant 0 : i32
    %c0_i32_0 = arith.constant 0 : i32
    return %arg0, %c0_i32 : i32, i32
  }
  func.func @transform_2(%arg0: i32) -> (i32, i32) {
    %c0_i32 = arith.constant 0 : i32
    %c0_i32_0 = arith.constant 0 : i32
    return %c0_i32, %arg0 : i32, i32
  }
  func.func @transform_3(%arg0: i32) -> (i32, i32) {
    %c0_i32 = arith.constant 0 : i32
    %c0_i32_0 = arith.constant 0 : i32
    return %c0_i32, %arg0 : i32, i32
  }
  func.func @transform_4(%arg0: i32) -> (i32, i32) {
    %c0_i32 = arith.constant 0 : i32
    %c0_i32_0 = arith.constant 0 : i32
    %c0_i32_1 = arith.constant 0 : i32
    return %c0_i32, %c0_i32_0 : i32, i32
  }
  func.func @transform_5(%arg0: i32) -> (i32, i32) {
    %c0_i32 = arith.constant 0 : i32
    %c0_i32_0 = arith.constant 0 : i32
    %c0_i32_1 = arith.constant 0 : i32
    return %c0_i32, %c0_i32_0 : i32, i32
  }
}

</mosaic_0001>

<bundles_post_ra>
// kernel: cnn_femnist_forward.6
= control target key start
LH: loop header
LB: loop body
LE: loop exit
PB: predicated region body
PF: predicated region fallthrough
CT: control target
= control target key end

     0   :  { %s447_s6 = smov 0   ;;  %s706_s0 = inlined_call_operand.vmem [shape: f32[2,13,2,13,64], index: 0, kind: input, shape index: {}]   ;;  %s707_s1 = inlined_call_operand.vmem [shape: f32[2,13,13,32], index: 1, kind: output, shape index: {}]  }
   0x1 LB: > { %s408_s7 = sadd.s32 4294967295, %s434_s6   ;;  %p412_p0 = scmp.ge.s32.totalorder %s434_s6, 1  ;;  %s434_s6 = sphi %s447_s6, %s11_s6  }
   0x2   : > { %p87_p1 = scmp.lt.s32.totalorder %s434_s6, 3 }
   0x4   : > { %p88_p2 = pnand %p412_p0, %p87_p1 }
   0x5   : > { %p107_p3 = scmp.lt.s32.totalorder (!%p88_p2), %s408_s7, 1  ;;  %s436_s12 = smov (!%p88_p2), 96  }
   0x6   : > { %91 = sbr.rel (%p88_p2) target bundleno = 185 (0xb9), region = 24 }
   0xb   : > { %s709_s7 = smov (!%p107_p3, %s408_s7), 1  ;;  %vm325_vm0 = vcmask 261120   ;;  %vm327_vm1 = vcmask 258048  }
   0xc   : > { %s417_s8 = smul.u32 416, %s709_s7 }
   0xd   : > { %s418_s13 = smul.u32 208, %s709_s7 }
   0xe   : > { %s461_s11 = scalar_lea.vmem %s706_s0, %s417_s8 }
   0xf   : > { %v121_v0 = vld [vmem:[%s461_s11 + $0x20] sm:$0xff]  ;;  %v123_v1 = vld [vmem:[%s461_s11 + $0x30] sm:$0xff]  ;;  %v122_v5 = vld [vmem:[%s461_s11 + $0x28] sm:$0x1f]  ;;  %s623_s16 = scalar_lea.vmem %s707_s1, %s418_s13 }
  0x10   : > { %v117_v2 = vld [vmem:[%s461_s11] sm:$0xff]  ;;  %v466_v3 = vmax.f32 %v121_v0, %v123_v1  ;;  %v119_v4 = vld [vmem:[%s461_s11 + $0x10] sm:$0xff]  ;;  %v124_v6 = vld [vmem:[%s461_s11 + $0x38] sm:$0x1f] }
  0x11   : > { %v471_v7 = vmax.f32 %v117_v2, %v119_v4  ;;  %v118_v8 = vld [vmem:[%s461_s11 + $0x8] sm:$0x1f]  ;;  %v120_v9 = vld [vmem:[%s461_s11 + $0x18] sm:$0x1f]  ;;  %v477_v10 = vmax.f32 %v122_v5, %v124_v6  ;;  %v125_v14 = vld [vmem:[%s461_s11 + $0x40] sm:$0xff] }
  0x12   : > { %225 = vrot.lane.b32.xlu1 %v466_v3, %s436_s12  ;;  %v481_v11 = vmax.f32 %v118_v8, %v120_v9  ;;  %v126_v12 = vld [vmem:[%s461_s11 + $0x48] sm:$0x1f]  ;;  %v128_v13 = vld [vmem:[%s461_s11 + $0x58] sm:$0x1f]  ;;  %v127_v15 = vld [vmem:[%s461_s11 + $0x50] sm:$0xff] }
  0x13   : > { %221 = vrot.lane.b32.xlu0 %v471_v7, %s436_s12  ;;  %v489_v16 = vmax.f32 %v126_v12, %v128_v13  ;;  %v493_v17 = vmax.f32 %v125_v14, %v127_v15  ;;  %v130_v18 = vld [vmem:[%s461_s11 + $0x68] sm:$0x1f]  ;;  %v132_v19 = vld [vmem:[%s461_s11 + $0x78] sm:$0x1f]  ;;  %v129_v20 = vld [vmem:[%s461_s11 + $0x60] sm:$0xff] }
  0x14   : > { %v131_v21 = vld [vmem:[%s461_s11 + $0x70] sm:$0xff]  ;;  %v501_v22 = vmax.f32 %v130_v18, %v132_v19  ;;  %v134_v24 = vld [vmem:[%s461_s11 + $0x88] sm:$0x1f]  ;;  %v136_v25 = vld [vmem:[%s461_s11 + $0x98] sm:$0x1f] }
  0x15   : > { %v505_v23 = vmax.f32 %v129_v20, %v131_v21  ;;  %v133_v26 = vld [vmem:[%s461_s11 + $0x80] sm:$0xff]  ;;  %v135_v27 = vld [vmem:[%s461_s11 + $0x90] sm:$0xff]  ;;  %v513_v28 = vmax.f32 %v134_v24, %v136_v25  ;;  %v138_v30 = vld [vmem:[%s461_s11 + $0xa8] sm:$0x1f] }
  0x16   : > { %227 = vrot.lane.b32.xlu1 %v477_v10, %s436_s12  ;;  %v517_v29 = vmax.f32 %v133_v26, %v135_v27  ;;  %v140_v31 = vld [vmem:[%s461_s11 + $0xb8] sm:$0x1f]  ;;  %v137_v32 = vld [vmem:[%s461_s11 + $0xa0] sm:$0xff]  ;;  %v139_v33 = vld [vmem:[%s461_s11 + $0xb0] sm:$0xff] }
  0x17   : > { %223 = vrot.lane.b32.xlu0 %v481_v11, %s436_s12  ;;  %v525_v34 = vmax.f32 %v138_v30, %v140_v31  ;;  %v529_v35 = vmax.f32 %v137_v32, %v139_v33  ;;  %v142_v36 = vld [vmem:[%s461_s11 + $0xc8] sm:$0x1f]  ;;  %v144_v37 = vld [vmem:[%s461_s11 + $0xd8] sm:$0x1f]  ;;  %v141_v38 = vld [vmem:[%s461_s11 + $0xc0] sm:$0xff] }
  0x18   : > { %v143_v39 = vld [vmem:[%s461_s11 + $0xd0] sm:$0xff]  ;;  %v537_v40 = vmax.f32 %v142_v36, %v144_v37  ;;  %v146_v42 = vld [vmem:[%s461_s11 + $0xe8] sm:$0x1f]  ;;  %v148_v43 = vld [vmem:[%s461_s11 + $0xf8] sm:$0x1f] }
  0x19   : > { %v541_v41 = vmax.f32 %v141_v38, %v143_v39  ;;  %v145_v44 = vld [vmem:[%s461_s11 + $0xe0] sm:$0xff]  ;;  %v147_v45 = vld [vmem:[%s461_s11 + $0xf0] sm:$0xff]  ;;  %v549_v46 = vmax.f32 %v146_v42, %v148_v43  ;;  %v150_v48 = vld [vmem:[%s461_s11 + $0x108] sm:$0x1f] }
  0x1a   : > { %231 = vrot.lane.b32.xlu1 %v489_v16, %s436_s12  ;;  %v553_v47 = vmax.f32 %v145_v44, %v147_v45  ;;  %v152_v49 = vld [vmem:[%s461_s11 + $0x118] sm:$0x1f]  ;;  %v149_v50 = vld [vmem:[%s461_s11 + $0x100] sm:$0xff]  ;;  %v151_v51 = vld [vmem:[%s461_s11 + $0x110] sm:$0xff] }
  0x1b   : > { %229 = vrot.lane.b32.xlu0 %v493_v17, %s436_s12  ;;  %v561_v52 = vmax.f32 %v150_v48, %v152_v49  ;;  %v565_v53 = vmax.f32 %v149_v50, %v151_v51  ;;  %v154_v54 = vld [vmem:[%s461_s11 + $0x128] sm:$0x1f]  ;;  %v156_v55 = vld [vmem:[%s461_s11 + $0x138] sm:$0x1f]  ;;  %v153_v56 = vld [vmem:[%s461_s11 + $0x120] sm:$0xff] }
  0x1c   : > { %v155_v57 = vld [vmem:[%s461_s11 + $0x130] sm:$0xff]  ;;  %v573_v58 = vmax.f32 %v154_v54, %v156_v55  ;;  %v158_v60 = vld [vmem:[%s461_s11 + $0x148] sm:$0x1f]  ;;  %v160_v61 = vld [vmem:[%s461_s11 + $0x158] sm:$0x1f] }
  0x1d   : > { %v577_v59 = vmax.f32 %v153_v56, %v155_v57  ;;  %v157_v62 = vld [vmem:[%s461_s11 + $0x140] sm:$0xff]  ;;  %v159_v63 = vld [vmem:[%s461_s11 + $0x150] sm:$0xff]  ;;  %v585_v0 = vmax.f32 %v158_v60, %v160_v61  ;;  %v162_v2 = vld [vmem:[%s461_s11 + $0x168] sm:$0x1f] }
  0x1e   : > { %235 = vrot.lane.b32.xlu1 %v501_v22, %s436_s12  ;;  %v589_v1 = vmax.f32 %v157_v62, %v159_v63  ;;  %v164_v4 = vld [vmem:[%s461_s11 + $0x178] sm:$0x1f]  ;;  %v161_v5 = vld [vmem:[%s461_s11 + $0x160] sm:$0xff]  ;;  %v163_v6 = vld [vmem:[%s461_s11 + $0x170] sm:$0xff] }
  0x1f   : > { %233 = vrot.lane.b32.xlu0 %v505_v23, %s436_s12  ;;  %v597_v8 = vmax.f32 %v162_v2, %v164_v4  ;;  %v601_v9 = vmax.f32 %v161_v5, %v163_v6  ;;  %v166_v12 = vld [vmem:[%s461_s11 + $0x188] sm:$0x1f]  ;;  %v168_v13 = vld [vmem:[%s461_s11 + $0x198] sm:$0x1f]  ;;  %v165_v14 = vld [vmem:[%s461_s11 + $0x180] sm:$0xff] }
  0x20   : > { %v167_v15 = vld [vmem:[%s461_s11 + $0x190] sm:$0xff]  ;;  %v609_v18 = vmax.f32 %v166_v12, %v168_v13 }
  0x21   : > { %v613_v19 = vmax.f32 %v165_v14, %v167_v15 }
  0x22   : > { %239 = vrot.lane.b32.xlu1 %v513_v28, %s436_s12 }
  0x23   : > { %237 = vrot.lane.b32.xlu0 %v517_v29, %s436_s12 }
  0x26   : > { %243 = vrot.lane.b32.xlu1 %v525_v34, %s436_s12 }
  0x27   : > { %241 = vrot.lane.b32.xlu0 %v529_v35, %s436_s12 }
  0x2a   : > { %247 = vrot.lane.b32.xlu1 %v537_v40, %s436_s12 }
  0x2b   : > { %245 = vrot.lane.b32.xlu0 %v541_v41, %s436_s12 }
  0x2e   : > { %251 = vrot.lane.b32.xlu1 %v549_v46, %s436_s12 }
  0x2f   : > { %249 = vrot.lane.b32.xlu0 %v553_v47, %s436_s12 }
  0x32   : > { %255 = vrot.lane.b32.xlu1 %v561_v52, %s436_s12 }
  0x33   : > { %253 = vrot.lane.b32.xlu0 %v565_v53, %s436_s12 }
  0x36   : > { %259 = vrot.lane.b32.xlu1 %v573_v58, %s436_s12 }
  0x37   : > { %257 = vrot.lane.b32.xlu0 %v577_v59, %s436_s12 }
  0x3a   : > { %263 = vrot.lane.b32.xlu1 %v585_v0, %s436_s12 }
  0x3b   : > { %261 = vrot.lane.b32.xlu0 %v589_v1, %s436_s12 }
  0x3e   : > { %267 = vrot.lane.b32.xlu1 %v597_v8, %s436_s12 }
  0x3f   : > { %265 = vrot.lane.b32.xlu0 %v601_v9, %s436_s12 }
  0x42   : > { %271 = vrot.lane.b32.xlu1 %v609_v18, %s436_s12 }
  0x43   : > { %269 = vrot.lane.b32.xlu0 %v613_v19, %s436_s12 }
  0x84   : > { %v226_v20 = vpop.permute.xlu1 %225 }
  0x85   : > { %v301_v21 = vmax.f32 %v466_v3, %v226_v20  ;;  %v222_v24 = vpop.permute.xlu0 %221 }
  0x86   : > { %v299_v25 = vmax.f32 %v471_v7, %v222_v24 }
  0x87   : > { %329 = vst.msk [vmem:[%s623_s16 + $0x10] sm:$0xff] %vm325_vm0, %v301_v21 }
  0x88   : > { %326 = vst.msk [vmem:[%s623_s16] sm:$0xff] %vm325_vm0, %v299_v25  ;;  %v228_v26 = vpop.permute.xlu1 %227 }
  0x89   : > { %v302_v27 = vmax.f32 %v477_v10, %v228_v26  ;;  %v224_v30 = vpop.permute.xlu0 %223 }
  0x8a   : > { %v300_v31 = vmax.f32 %v481_v11, %v224_v30 }
  0x8b   : > { %330 = vst.msk [vmem:[%s623_s16 + $0x18] sm:$0x1f] %vm327_vm1, %v302_v27 }
  0x8c   : > { %328 = vst.msk [vmem:[%s623_s16 + $0x8] sm:$0x1f] %vm327_vm1, %v300_v31  ;;  %v232_v3 = vpop.permute.xlu1 %231 }
  0x8d   : > { %v304_v7 = vmax.f32 %v489_v16, %v232_v3  ;;  %v230_v32 = vpop.permute.xlu0 %229 }
  0x8e   : > { %v303_v33 = vmax.f32 %v493_v17, %v230_v32 }
  0x8f   : > { %332 = vst.msk [vmem:[%s623_s16 + $0x28] sm:$0x1f] %vm327_vm1, %v304_v7 }
  0x90   : > { %331 = vst.msk [vmem:[%s623_s16 + $0x20] sm:$0xff] %vm325_vm0, %v303_v33  ;;  %v236_v10 = vpop.permute.xlu1 %235 }
  0x91   : > { %v306_v11 = vmax.f32 %v501_v22, %v236_v10  ;;  %v234_v36 = vpop.permute.xlu0 %233 }
  0x92   : > { %v305_v37 = vmax.f32 %v505_v23, %v234_v36 }
  0x93   : > { %334 = vst.msk [vmem:[%s623_s16 + $0x38] sm:$0x1f] %vm327_vm1, %v306_v11 }
  0x94   : > { %333 = vst.msk [vmem:[%s623_s16 + $0x30] sm:$0xff] %vm325_vm0, %v305_v37  ;;  %v240_v16 = vpop.permute.xlu1 %239 }
  0x95   : > { %v308_v17 = vmax.f32 %v513_v28, %v240_v16  ;;  %v238_v38 = vpop.permute.xlu0 %237 }
  0x96   : > { %v307_v39 = vmax.f32 %v517_v29, %v238_v38 }
  0x97   : > { %336 = vst.msk [vmem:[%s623_s16 + $0x48] sm:$0x1f] %vm327_vm1, %v308_v17 }
  0x98   : > { %335 = vst.msk [vmem:[%s623_s16 + $0x40] sm:$0xff] %vm325_vm0, %v307_v39  ;;  %v244_v22 = vpop.permute.xlu1 %243 }
  0x99   : > { %v310_v23 = vmax.f32 %v525_v34, %v244_v22  ;;  %v242_v42 = vpop.permute.xlu0 %241 }
  0x9a   : > { %v309_v43 = vmax.f32 %v529_v35, %v242_v42 }
  0x9b   : > { %338 = vst.msk [vmem:[%s623_s16 + $0x58] sm:$0x1f] %vm327_vm1, %v310_v23 }
  0x9c   : > { %337 = vst.msk [vmem:[%s623_s16 + $0x50] sm:$0xff] %vm325_vm0, %v309_v43  ;;  %v248_v28 = vpop.permute.xlu1 %247 }
  0x9d   : > { %v312_v29 = vmax.f32 %v537_v40, %v248_v28  ;;  %v246_v44 = vpop.permute.xlu0 %245 }
  0x9e   : > { %v311_v45 = vmax.f32 %v541_v41, %v246_v44 }
  0x9f   : > { %340 = vst.msk [vmem:[%s623_s16 + $0x68] sm:$0x1f] %vm327_vm1, %v312_v29 }
  0xa0   : > { %339 = vst.msk [vmem:[%s623_s16 + $0x60] sm:$0xff] %vm325_vm0, %v311_v45  ;;  %v252_v34 = vpop.permute.xlu1 %251 }
  0xa1   : > { %v314_v35 = vmax.f32 %v549_v46, %v252_v34  ;;  %v250_v48 = vpop.permute.xlu0 %249 }
  0xa2   : > { %v313_v49 = vmax.f32 %v553_v47, %v250_v48 }
  0xa3   : > { %342 = vst.msk [vmem:[%s623_s16 + $0x78] sm:$0x1f] %vm327_vm1, %v314_v35 }
  0xa4   : > { %341 = vst.msk [vmem:[%s623_s16 + $0x70] sm:$0xff] %vm325_vm0, %v313_v49  ;;  %v256_v40 = vpop.permute.xlu1 %255 }
  0xa5   : > { %v316_v41 = vmax.f32 %v561_v52, %v256_v40  ;;  %v254_v50 = vpop.permute.xlu0 %253 }
  0xa6   : > { %v315_v51 = vmax.f32 %v565_v53, %v254_v50 }
  0xa7   : > { %344 = vst.msk [vmem:[%s623_s16 + $0x88] sm:$0x1f] %vm327_vm1, %v316_v41 }
  0xa8   : > { %343 = vst.msk [vmem:[%s623_s16 + $0x80] sm:$0xff] %vm325_vm0, %v315_v51  ;;  %v260_v46 = vpop.permute.xlu1 %259 }
  0xa9   : > { %v318_v47 = vmax.f32 %v573_v58, %v260_v46  ;;  %v258_v54 = vpop.permute.xlu0 %257 }
  0xaa   : > { %v317_v55 = vmax.f32 %v577_v59, %v258_v54 }
  0xab   : > { %346 = vst.msk [vmem:[%s623_s16 + $0x98] sm:$0x1f] %vm327_vm1, %v318_v47 }
  0xac   : > { %345 = vst.msk [vmem:[%s623_s16 + $0x90] sm:$0xff] %vm325_vm0, %v317_v55  ;;  %v264_v52 = vpop.permute.xlu1 %263 }
  0xad   : > { %v320_v53 = vmax.f32 %v585_v0, %v264_v52  ;;  %v262_v56 = vpop.permute.xlu0 %261 }
  0xae   : > { %v319_v57 = vmax.f32 %v589_v1, %v262_v56 }
  0xaf   : > { %348 = vst.msk [vmem:[%s623_s16 + $0xa8] sm:$0x1f] %vm327_vm1, %v320_v53 }
  0xb0   : > { %347 = vst.msk [vmem:[%s623_s16 + $0xa0] sm:$0xff] %vm325_vm0, %v319_v57  ;;  %v268_v58 = vpop.permute.xlu1 %267 }
  0xb1   : > { %v322_v60 = vmax.f32 %v597_v8, %v268_v58  ;;  %v266_v59 = vpop.permute.xlu0 %265 }
  0xb2   : > { %v321_v61 = vmax.f32 %v601_v9, %v266_v59 }
  0xb3   : > { %350 = vst.msk [vmem:[%s623_s16 + $0xb8] sm:$0x1f] %vm327_vm1, %v322_v60 }
  0xb4   : > { %349 = vst.msk [vmem:[%s623_s16 + $0xb0] sm:$0xff] %vm325_vm0, %v321_v61  ;;  %v272_v62 = vpop.permute.xlu1 %271 }
  0xb5   : > { %v324_v63 = vmax.f32 %v609_v18, %v272_v62  ;;  %v270_v0 = vpop.permute.xlu0 %269 }
  0xb6   : > { %v323_v1 = vmax.f32 %v613_v19, %v270_v0 }
  0xb7   : > { %352 = vst.msk [vmem:[%s623_s16 + $0xc8] sm:$0x1f] %vm327_vm1, %v324_v63 }
  0xb8   : > { %351 = vst.msk [vmem:[%s623_s16 + $0xc0] sm:$0xff] %vm325_vm0, %v323_v1 }
  0xb9 PF: > { %s11_s6 = sadd.s32 1, %s434_s6  }
  0xba   : > { %p8_p4 = scmp.ge.s32.totalorder %s11_s6, 4  }
  0xbc   :  { %10 = sbr.rel (!%p8_p4) target bundleno = 1 (0x1), region = 54 }

// kernel: cnn_femnist_forward.5
= control target key start
LH: loop header
LB: loop body
LE: loop exit
PB: predicated region body
PF: predicated region fallthrough
CT: control target
= control target key end

     0   :  { %8 = vsyncpa [#allocation3], 0  ;;  %s1995_s12 = smov 0   ;;  %s1997_s13 = smov 0   ;;  %s2611_s0 = inlined_call_operand.vmem [shape: f32[1352,25], index: 0, kind: input, shape index: {}]   ;;  %s2612_s1 = inlined_call_operand.vmem [shape: f32[32,25], index: 1, kind: input, shape index: {}]   ;;  %s2613_s2 = inlined_call_operand.hbm [shape: f32[1,32], index: 2, kind: input, shape index: {}]   ;;  %s2614_s3 = inlined_call_operand.vmem [shape: f32[1352,32], index: 3, kind: output, shape index: {}]  }
   0x1   :  { %s1999_s14 = smov 0  }
   0x2 LB: > { %s2008_s15 = sadd.s32 4294967295, %s1940_s14   ;;  %s2010_s16 = sadd.s32 1, %s1940_s14   ;;  %s1940_s14 = sphi %s1999_s14, %s2624_s14   ;;  %s1936_s13 = sphi %s1997_s13, %s2623_s13   ;;  %s1932_s12 = sphi %s1995_s12, %s2622_s12  }
   0x3   : > { %s86_s17 = ssub.s32 %s1940_s14, %s2010_s16  ;;  %s89_s18 = sadd.s32 1, %s1936_s13 }
   0x4   : > { %p87_p0 = scmp.eq.s32.totalorder %s86_s17, 0  ;;  %p99_p1 = scmp.ne.s32.totalorder %s1936_s13, %s1932_s12 }
   0x5   : > { %p100_p2 = scmp.eq.s32.totalorder %s2008_s15, 2  ;;  %p1480_p3 = scmp.ge.s32.totalorder %s1940_s14, 1 }
   0x6   : > { %s2018_s19 = scalar_select %p87_p0, %s1936_s13, %s89_s18  }
   0x7   : > { %p2020_p4 = por %p100_p2, %p99_p1  ;;  %p113_p5 = scmp.lt.s32.totalorder %s1940_s14, 4 }
   0x8   : > { %p1765_p6 = scmp.eq.s32.totalorder %s2008_s15, 0  ;;  %s1974_s22 = smov [#allocation2]  }
   0x9   : > { %p2025_p7 = pnand %p1480_p3, %p113_p5  ;;  %s129_s23 = sshll.u32 %s1974_s22, 4  ;;  %s130_s23 = int_to_ptr.vmem [resolvable:$true] %s129_s23 }
   0xa   : > { %s1867_s24 = scalar_lea.vmem %s130_s23, 16  ;;  %s1874_s25 = scalar_lea.vmem %s130_s23, 32 }
   0xb   : > { %p1761_p8 = pneg %p2025_p7  ;;  %p1868_p11 = scmp.ne.s32.totalorder %s130_s23, %s1867_s24 }
   0xc   : > { %p1875_p0 = scmp.lt.s32.totalorder %s130_s23, %s130_s23  ;;  %p1876_p1 = scmp.lt.s32.totalorder %s1874_s25, %s1867_s24 }
   0xd   : > { %p1762_p9 = pnand %p1765_p6, %p1761_p8 }
   0xe   : > { %p1877_p2 = por %p1876_p1, %p1875_p0 }
   0xf   : > { %p1858_p10 = pneg %p1762_p9 }
  0x11   : > { %p1870_p12 = pnand %p1868_p11, %p1858_p10 }
  0x13   : > { %p1871_p13 = pneg %p1870_p12 }
  0x15   : > { %p1878_p3 = pnand %p1877_p2, %p1871_p13 }
  0x17   : > { %1881 = shalt.err (!%p1878_p3)
}
  0x18   : > { %1764 = dma.hbm_to_vmem [thread:$0]  (!%p1762_p9), %s2613_s2, 16, %s130_s23, [#allocation3]  }
  0x19   : > { %159 = sbr.rel (%p2025_p7) target bundleno = 372 (0x174), region = 32 }
  0x1e   : > { %1927 = dma.done.wait (%p1765_p6), [#allocation3], 16  }
  0x1f   : > { %1929 = vsyncadd (%p1765_p6), [#allocation3], 4294967280  ;;  %s2043_s28 = sshll.u32 %s2008_s15, 6  ;;  %vm280_vm0 = vcmask 203776   ;;  %v272_v0 = vld [vmem:[%s2612_s1 + $0x18] sm:$0xff]  ;;  %v271_v1 = vld [vmem:[%s2612_s1 + $0x10] sm:$0xff] }
  0x20   : > { %p191_p5 = scmp.lt.s32.totalorder %s2043_s28, 168  ;;  %1645 = vmatprep.subr.msk.mxu0 %vm280_vm0, %v272_v0  ;;  %1749 = vmatprep.subr.msk.mxu1 %vm280_vm0, %v272_v0  ;;  %v270_v4 = vld [vmem:[%s2612_s1 + $0x8] sm:$0xff]  ;;  %v269_v5 = vld [vmem:[%s2612_s1] sm:$0xff]  ;;  %s183_s21 = sand.u32 1, %s1932_s12   ;;  %vm934_vm1 = vcmask 261120  }
  0x21   : > { %1646 = vmatpush3.xpose.msk.msra.mxu0 %vm280_vm0, %v272_v0  ;;  %1753 = vmatpush3.xpose.msk.msra.mxu1 %vm280_vm0, %v272_v0  ;;  %s1485_s22 = sshll.u32 %s183_s21, 9  ;;  %s1007_s23 = ssub.s32 (%p2020_p4), 169, %s2043_s28 }
  0x22   : > { %s192_s29 = scalar_select %p191_p5, %s2043_s28, 168  ;;  %1647 = vmatprep.subr.msk.mxu0 %vm280_vm0, %v271_v1  ;;  %1750 = vmatprep.subr.msk.mxu1 %vm280_vm0, %v271_v1 }
  0x23   : > { %s2215_s12 = scalar_lea.vmem [#allocation4], %s1485_s22   ;;  %s1574_s24 = sshll.u32 (%p2020_p4), %s2008_s15, 9 }
  0x24   : > { %s1487_s30 = sshll.u32 %s192_s29, 3  ;;  %p1008_p6 = scmp.lt.s32.totalorder (%p2020_p4), %s1007_s23, 64 }
  0x25   : > { %s2050_s6 = scalar_lea.vmem %s2611_s0, %s1487_s30  ;;  %1648 = vmatpush3.xpose.msk.msra.mxu0 %vm280_vm0, %v271_v1  ;;  %1754 = vmatpush3.xpose.msk.msra.mxu1 %vm280_vm0, %v271_v1  ;;  %s2412_s27 = scalar_lea.vmem (%p2020_p4), %s2614_s3, %s1574_s24  }
  0x26   : > { %v205_v2 = vld [vmem:[%s2050_s6] sm:$0xff]  ;;  %1649 = vmatprep.subr.msk.mxu0 %vm280_vm0, %v270_v4  ;;  %1751 = vmatprep.subr.msk.mxu1 %vm280_vm0, %v270_v4  ;;  %v206_v6 = vld [vmem:[%s2050_s6 + $0x8] sm:$0xff]  ;;  %v207_v8 = vld [vmem:[%s2050_s6 + $0x10] sm:$0xff] }
  0x27   : > { %v237_v3 = vld [vmem:[%s2050_s6 + $0x100] sm:$0xff]  ;;  %1653 = vmatprep.mubr.msk.f32.mxu0 %vm280_vm0, %v205_v2  ;;  %v238_v7 = vld [vmem:[%s2050_s6 + $0x108] sm:$0xff]  ;;  %v239_v9 = vld [vmem:[%s2050_s6 + $0x110] sm:$0xff] }
  0x28   : > { %1701 = vmatprep.mubr.msk.f32.mxu1 %vm280_vm0, %v237_v3  ;;  %v208_v10 = vld [vmem:[%s2050_s6 + $0x18] sm:$0xff]  ;;  %v209_v12 = vld [vmem:[%s2050_s6 + $0x20] sm:$0xff]  ;;  %v210_v14 = vld [vmem:[%s2050_s6 + $0x28] sm:$0xff] }
  0x29   : > { %1650 = vmatpush3.xpose.msk.msra.mxu0 %vm280_vm0, %v270_v4  ;;  %1755 = vmatpush3.xpose.msk.msra.mxu1 %vm280_vm0, %v270_v4  ;;  %v240_v11 = vld [vmem:[%s2050_s6 + $0x118] sm:$0xff]  ;;  %v241_v13 = vld [vmem:[%s2050_s6 + $0x120] sm:$0xff]  ;;  %v242_v15 = vld [vmem:[%s2050_s6 + $0x128] sm:$0xff] }
  0x2a   : > { %1651 = vmatprep.subr.msk.mxu0 %vm280_vm0, %v269_v5  ;;  %1752 = vmatprep.subr.msk.mxu1 %vm280_vm0, %v269_v5  ;;  %v211_v16 = vld [vmem:[%s2050_s6 + $0x30] sm:$0xff]  ;;  %v212_v18 = vld [vmem:[%s2050_s6 + $0x38] sm:$0xff]  ;;  %v213_v20 = vld [vmem:[%s2050_s6 + $0x40] sm:$0xff] }
  0x2b   : > { %v243_v17 = vld [vmem:[%s2050_s6 + $0x130] sm:$0xff]  ;;  %v244_v19 = vld [vmem:[%s2050_s6 + $0x138] sm:$0xff]  ;;  %v245_v21 = vld [vmem:[%s2050_s6 + $0x140] sm:$0xff] }
  0x2c   : > { %v214_v22 = vld [vmem:[%s2050_s6 + $0x48] sm:$0xff]  ;;  %v215_v24 = vld [vmem:[%s2050_s6 + $0x50] sm:$0xff]  ;;  %v216_v26 = vld [vmem:[%s2050_s6 + $0x58] sm:$0xff] }
  0x2d   : > { %1652 = vmatpush3.xpose.msk.msra.mxu0 %vm280_vm0, %v269_v5  ;;  %1756 = vmatpush3.xpose.msk.msra.mxu1 %vm280_vm0, %v269_v5  ;;  %v246_v23 = vld [vmem:[%s2050_s6 + $0x148] sm:$0xff]  ;;  %v247_v25 = vld [vmem:[%s2050_s6 + $0x150] sm:$0xff]  ;;  %v248_v27 = vld [vmem:[%s2050_s6 + $0x158] sm:$0xff] }
  0x2e   : > { %v217_v28 = vld [vmem:[%s2050_s6 + $0x60] sm:$0xff]  ;;  %v218_v30 = vld [vmem:[%s2050_s6 + $0x68] sm:$0xff]  ;;  %v219_v32 = vld [vmem:[%s2050_s6 + $0x70] sm:$0xff] }
  0x2f   : > { %v249_v29 = vld [vmem:[%s2050_s6 + $0x160] sm:$0xff]  ;;  %v250_v31 = vld [vmem:[%s2050_s6 + $0x168] sm:$0xff]  ;;  %v251_v33 = vld [vmem:[%s2050_s6 + $0x170] sm:$0xff] }
  0x30   : > { %1654 = vmatmul.mubr.msk.f32.vlgmr.msra.gmra.mxu0 %vm280_vm0, %v206_v6  ;;  %1702 = vmatmul.mubr.msk.f32.vlgmr.msra.gmra.mxu1 %vm280_vm0, %v238_v7  ;;  %v220_v34 = vld [vmem:[%s2050_s6 + $0x78] sm:$0xff]  ;;  %v221_v36 = vld [vmem:[%s2050_s6 + $0x80] sm:$0xff]  ;;  %v222_v38 = vld [vmem:[%s2050_s6 + $0x88] sm:$0xff] }
  0x31   : > { %1656 = vmatprep.mubr.msk.f32.mxu0 %vm280_vm0, %v207_v8  ;;  %1704 = vmatprep.mubr.msk.f32.mxu1 %vm280_vm0, %v239_v9  ;;  %v252_v35 = vld [vmem:[%s2050_s6 + $0x178] sm:$0xff]  ;;  %v253_v37 = vld [vmem:[%s2050_s6 + $0x180] sm:$0xff]  ;;  %v254_v39 = vld [vmem:[%s2050_s6 + $0x188] sm:$0xff] }
  0x32   : > { %v223_v40 = vld [vmem:[%s2050_s6 + $0x90] sm:$0xff]  ;;  %v224_v42 = vld [vmem:[%s2050_s6 + $0x98] sm:$0xff]  ;;  %v225_v44 = vld [vmem:[%s2050_s6 + $0xa0] sm:$0xff] }
  0x33   : > { %v255_v41 = vld [vmem:[%s2050_s6 + $0x190] sm:$0xff]  ;;  %v256_v43 = vld [vmem:[%s2050_s6 + $0x198] sm:$0xff]  ;;  %v257_v45 = vld [vmem:[%s2050_s6 + $0x1a0] sm:$0xff] }
  0x34   : > { %1657 = vmatmul.mubr.msk.f32.gmra.mxu0 %vm280_vm0, %v208_v10  ;;  %1705 = vmatmul.mubr.msk.f32.gmra.mxu1 %vm280_vm0, %v240_v11  ;;  %v226_v46 = vld [vmem:[%s2050_s6 + $0xa8] sm:$0xff]  ;;  %v227_v48 = vld [vmem:[%s2050_s6 + $0xb0] sm:$0xff]  ;;  %v228_v50 = vld [vmem:[%s2050_s6 + $0xb8] sm:$0xff] }
  0x35   : > { %1659 = vmatprep.mubr.msk.f32.mxu0 %vm280_vm0, %v209_v12  ;;  %1707 = vmatprep.mubr.msk.f32.mxu1 %vm280_vm0, %v241_v13  ;;  %v258_v47 = vld [vmem:[%s2050_s6 + $0x1a8] sm:$0xff]  ;;  %v259_v49 = vld [vmem:[%s2050_s6 + $0x1b0] sm:$0xff]  ;;  %v260_v51 = vld [vmem:[%s2050_s6 + $0x1b8] sm:$0xff] }
  0x36   : > { %v229_v52 = vld [vmem:[%s2050_s6 + $0xc0] sm:$0xff]  ;;  %v230_v54 = vld [vmem:[%s2050_s6 + $0xc8] sm:$0xff]  ;;  %v231_v56 = vld [vmem:[%s2050_s6 + $0xd0] sm:$0xff] }
  0x37   : > { %v261_v53 = vld [vmem:[%s2050_s6 + $0x1c0] sm:$0xff]  ;;  %v262_v55 = vld [vmem:[%s2050_s6 + $0x1c8] sm:$0xff]  ;;  %v263_v57 = vld [vmem:[%s2050_s6 + $0x1d0] sm:$0xff] }
  0x38   : > { %1660 = vmatmul.mubr.msk.f32.gmra.mxu0 %vm280_vm0, %v210_v14  ;;  %1708 = vmatmul.mubr.msk.f32.gmra.mxu1 %vm280_vm0, %v242_v15  ;;  %v232_v58 = vld [vmem:[%s2050_s6 + $0xd8] sm:$0xff]  ;;  %v233_v60 = vld [vmem:[%s2050_s6 + $0xe0] sm:$0xff]  ;;  %v234_v62 = vld [vmem:[%s2050_s6 + $0xe8] sm:$0xff] }
  0x39   : > { %1662 = vmatprep.mubr.msk.f32.mxu0 %vm280_vm0, %v211_v16  ;;  %1710 = vmatprep.mubr.msk.f32.mxu1 %vm280_vm0, %v243_v17  ;;  %v264_v59 = vld [vmem:[%s2050_s6 + $0x1d8] sm:$0xff]  ;;  %v265_v61 = vld [vmem:[%s2050_s6 + $0x1e0] sm:$0xff]  ;;  %v266_v63 = vld [vmem:[%s2050_s6 + $0x1e8] sm:$0xff] }
  0x3a   : > { %v235_v0 = vld [vmem:[%s2050_s6 + $0xf0] sm:$0xff]  ;;  %v236_v2 = vld [vmem:[%s2050_s6 + $0xf8] sm:$0xff]  ;;  %v2209_v4 = vld [vmem:[#allocation2] ss:$0 sm:$0xff] }
  0x3b   : > { %v267_v1 = vld [vmem:[%s2050_s6 + $0x1f0] sm:$0xff]  ;;  %v268_v3 = vld [vmem:[%s2050_s6 + $0x1f8] sm:$0xff] }
  0x3c   : > { %1663 = vmatmul.mubr.msk.f32.gmra.mxu0 %vm280_vm0, %v212_v18  ;;  %1711 = vmatmul.mubr.msk.f32.gmra.mxu1 %vm280_vm0, %v244_v19 }
  0x3d   : > { %1665 = vmatprep.mubr.msk.f32.mxu0 %vm280_vm0, %v213_v20  ;;  %1713 = vmatprep.mubr.msk.f32.mxu1 %vm280_vm0, %v245_v21 }
  0x40   : > { %1666 = vmatmul.mubr.msk.f32.gmra.mxu0 %vm280_vm0, %v214_v22  ;;  %1714 = vmatmul.mubr.msk.f32.gmra.mxu1 %vm280_vm0, %v246_v23 }
  0x41   : > { %1668 = vmatprep.mubr.msk.f32.mxu0 %vm280_vm0, %v215_v24  ;;  %1716 = vmatprep.mubr.msk.f32.mxu1 %vm280_vm0, %v247_v25 }
  0x44   : > { %1669 = vmatmul.mubr.msk.f32.gmra.mxu0 %vm280_vm0, %v216_v26  ;;  %1717 = vmatmul.mubr.msk.f32.gmra.mxu1 %vm280_vm0, %v248_v27 }
  0x45   : > { %1671 = vmatprep.mubr.msk.f32.mxu0 %vm280_vm0, %v217_v28  ;;  %1719 = vmatprep.mubr.msk.f32.mxu1 %vm280_vm0, %v249_v29 }
  0x48   : > { %1672 = vmatmul.mubr.msk.f32.gmra.mxu0 %vm280_vm0, %v218_v30  ;;  %1720 = vmatmul.mubr.msk.f32.gmra.mxu1 %vm280_vm0, %v250_v31 }
  0x49   : > { %1674 = vmatprep.mubr.msk.f32.mxu0 %vm280_vm0, %v219_v32  ;;  %1722 = vmatprep.mubr.msk.f32.mxu1 %vm280_vm0, %v251_v33 }
  0x4c   : > { %1675 = vmatmul.mubr.msk.f32.gmra.mxu0 %vm280_vm0, %v220_v34  ;;  %1723 = vmatmul.mubr.msk.f32.gmra.mxu1 %vm280_vm0, %v252_v35 }
  0x4d   : > { %1677 = vmatprep.mubr.msk.f32.mxu0 %vm280_vm0, %v221_v36  ;;  %1725 = vmatprep.mubr.msk.f32.mxu1 %vm280_vm0, %v253_v37 }
  0x50   : > { %1678 = vmatmul.mubr.msk.f32.gmra.mxu0 %vm280_vm0, %v222_v38  ;;  %1726 = vmatmul.mubr.msk.f32.gmra.mxu1 %vm280_vm0, %v254_v39 }
  0x51   : > { %1680 = vmatprep.mubr.msk.f32.mxu0 %vm280_vm0, %v223_v40  ;;  %1728 = vmatprep.mubr.msk.f32.mxu1 %vm280_vm0, %v255_v41 }
  0x54   : > { %1681 = vmatmul.mubr.msk.f32.gmra.mxu0 %vm280_vm0, %v224_v42  ;;  %1729 = vmatmul.mubr.msk.f32.gmra.mxu1 %vm280_vm0, %v256_v43 }
  0x55   : > { %1683 = vmatprep.mubr.msk.f32.mxu0 %vm280_vm0, %v225_v44  ;;  %1731 = vmatprep.mubr.msk.f32.mxu1 %vm280_vm0, %v257_v45 }
  0x58   : > { %1684 = vmatmul.mubr.msk.f32.gmra.mxu0 %vm280_vm0, %v226_v46  ;;  %1732 = vmatmul.mubr.msk.f32.gmra.mxu1 %vm280_vm0, %v258_v47 }
  0x59   : > { %1686 = vmatprep.mubr.msk.f32.mxu0 %vm280_vm0, %v227_v48  ;;  %1734 = vmatprep.mubr.msk.f32.mxu1 %vm280_vm0, %v259_v49 }
  0x5c   : > { %1687 = vmatmul.mubr.msk.f32.gmra.mxu0 %vm280_vm0, %v228_v50  ;;  %1735 = vmatmul.mubr.msk.f32.gmra.mxu1 %vm280_vm0, %v260_v51 }
  0x5d   : > { %1689 = vmatprep.mubr.msk.f32.mxu0 %vm280_vm0, %v229_v52  ;;  %1737 = vmatprep.mubr.msk.f32.mxu1 %vm280_vm0, %v261_v53 }
  0x60   : > { %1690 = vmatmul.mubr.msk.f32.gmra.mxu0 %vm280_vm0, %v230_v54  ;;  %1738 = vmatmul.mubr.msk.f32.gmra.mxu1 %vm280_vm0, %v262_v55 }
  0x61   : > { %1692 = vmatprep.mubr.msk.f32.mxu0 %vm280_vm0, %v231_v56  ;;  %1740 = vmatprep.mubr.msk.f32.mxu1 %vm280_vm0, %v263_v57 }
  0x64   : > { %1693 = vmatmul.mubr.msk.f32.gmra.mxu0 %vm280_vm0, %v232_v58  ;;  %1741 = vmatmul.mubr.msk.f32.gmra.mxu1 %vm280_vm0, %v264_v59 }
  0x65   : > { %1695 = vmatprep.mubr.msk.f32.mxu0 %vm280_vm0, %v233_v60  ;;  %1743 = vmatprep.mubr.msk.f32.mxu1 %vm280_vm0, %v265_v61 }
  0x68   : > { %1696 = vmatmul.mubr.msk.f32.gmra.mxu0 %vm280_vm0, %v234_v62  ;;  %1744 = vmatmul.mubr.msk.f32.gmra.mxu1 %vm280_vm0, %v266_v63 }
  0x69   : > { %1698 = vmatprep.mubr.msk.f32.mxu0 %vm280_vm0, %v235_v0  ;;  %1746 = vmatprep.mubr.msk.f32.mxu1 %vm280_vm0, %v267_v1 }
  0x6c   : > { %1699 = vmatmul.mubr.msk.f32.gmra.mxu0 %vm280_vm0, %v236_v2  ;;  %1747 = vmatmul.mubr.msk.f32.gmra.mxu1 %vm280_vm0, %v268_v3 }
  0xf0   : > { %v1655_v5 = vpop.f32.mrf.mxu0  ;;  %v1703_v6 = vpop.f32.mrf.mxu1 }
  0xf1   : > { %v557_v7 = vadd.f32 %v1655_v5, %v2209_v4  ;;  %v717_v8 = vadd.f32 %v1703_v6, %v2209_v4 }
  0xf2   : > { %v551_v9 = vpop.f32.mrf.mxu0  ;;  %v711_v10 = vpop.f32.mrf.mxu1 }
  0xf3   : > { %v871_v11 = vmax.f32 %v557_v7, 0.0  ;;  %v903_v12 = vmax.f32 %v717_v8, 0.0  ;;  %v552_v13 = vadd.f32 %v2209_v4, %v551_v9  ;;  %v712_v14 = vadd.f32 %v2209_v4, %v711_v10 }
  0xf4   : > { %v1658_v15 = vpop.f32.mrf.mxu0  ;;  %v1706_v16 = vpop.f32.mrf.mxu1 }
  0xf5   : > { %936 = vst.msk [vmem:[%s2215_s12 + $0x8] sm:$0xff] %vm934_vm1, %v871_v11  ;;  %968 = vst.msk [vmem:[%s2215_s12 + $0x108] sm:$0xff] %vm934_vm1, %v903_v12  ;;  %v870_v17 = vmax.f32 %v552_v13, 0.0  ;;  %v902_v18 = vmax.f32 %v712_v14, 0.0  ;;  %v567_v19 = vadd.f32 %v1658_v15, %v2209_v4  ;;  %v727_v20 = vadd.f32 %v1706_v16, %v2209_v4 }
  0xf6   : > { %v561_v21 = vpop.f32.mrf.mxu0  ;;  %v721_v22 = vpop.f32.mrf.mxu1 }
  0xf7   : > { %935 = vst.msk [vmem:[%s2215_s12] sm:$0xff] %vm934_vm1, %v870_v17  ;;  %967 = vst.msk [vmem:[%s2215_s12 + $0x100] sm:$0xff] %vm934_vm1, %v902_v18  ;;  %v873_v23 = vmax.f32 %v567_v19, 0.0  ;;  %v905_v24 = vmax.f32 %v727_v20, 0.0  ;;  %v562_v25 = vadd.f32 %v2209_v4, %v561_v21  ;;  %v722_v26 = vadd.f32 %v2209_v4, %v721_v22 }
  0xf8   : > { %v1661_v27 = vpop.f32.mrf.mxu0  ;;  %v1709_v28 = vpop.f32.mrf.mxu1 }
  0xf9   : > { %938 = vst.msk [vmem:[%s2215_s12 + $0x18] sm:$0xff] %vm934_vm1, %v873_v23  ;;  %970 = vst.msk [vmem:[%s2215_s12 + $0x118] sm:$0xff] %vm934_vm1, %v905_v24  ;;  %v872_v29 = vmax.f32 %v562_v25, 0.0  ;;  %v904_v30 = vmax.f32 %v722_v26, 0.0  ;;  %v577_v31 = vadd.f32 %v1661_v27, %v2209_v4  ;;  %v737_v32 = vadd.f32 %v1709_v28, %v2209_v4 }
  0xfa   : > { %v571_v33 = vpop.f32.mrf.mxu0  ;;  %v731_v34 = vpop.f32.mrf.mxu1 }
  0xfb   : > { %937 = vst.msk [vmem:[%s2215_s12 + $0x10] sm:$0xff] %vm934_vm1, %v872_v29  ;;  %969 = vst.msk [vmem:[%s2215_s12 + $0x110] sm:$0xff] %vm934_vm1, %v904_v30  ;;  %v875_v35 = vmax.f32 %v577_v31, 0.0  ;;  %v907_v36 = vmax.f32 %v737_v32, 0.0  ;;  %v572_v37 = vadd.f32 %v2209_v4, %v571_v33  ;;  %v732_v38 = vadd.f32 %v2209_v4, %v731_v34 }
  0xfc   : > { %v1664_v39 = vpop.f32.mrf.mxu0  ;;  %v1712_v40 = vpop.f32.mrf.mxu1 }
  0xfd   : > { %940 = vst.msk [vmem:[%s2215_s12 + $0x28] sm:$0xff] %vm934_vm1, %v875_v35  ;;  %972 = vst.msk [vmem:[%s2215_s12 + $0x128] sm:$0xff] %vm934_vm1, %v907_v36  ;;  %v874_v41 = vmax.f32 %v572_v37, 0.0  ;;  %v906_v42 = vmax.f32 %v732_v38, 0.0  ;;  %v587_v43 = vadd.f32 %v1664_v39, %v2209_v4  ;;  %v747_v44 = vadd.f32 %v1712_v40, %v2209_v4 }
  0xfe   : > { %v581_v45 = vpop.f32.mrf.mxu0  ;;  %v741_v46 = vpop.f32.mrf.mxu1 }
  0xff   : > { %939 = vst.msk [vmem:[%s2215_s12 + $0x20] sm:$0xff] %vm934_vm1, %v874_v41  ;;  %971 = vst.msk [vmem:[%s2215_s12 + $0x120] sm:$0xff] %vm934_vm1, %v906_v42  ;;  %v877_v47 = vmax.f32 %v587_v43, 0.0  ;;  %v909_v48 = vmax.f32 %v747_v44, 0.0  ;;  %v582_v49 = vadd.f32 %v2209_v4, %v581_v45  ;;  %v742_v50 = vadd.f32 %v2209_v4, %v741_v46 }
 0x100   : > { %v1667_v51 = vpop.f32.mrf.mxu0  ;;  %v1715_v52 = vpop.f32.mrf.mxu1 }
 0x101   : > { %942 = vst.msk [vmem:[%s2215_s12 + $0x38] sm:$0xff] %vm934_vm1, %v877_v47  ;;  %974 = vst.msk [vmem:[%s2215_s12 + $0x138] sm:$0xff] %vm934_vm1, %v909_v48  ;;  %v876_v53 = vmax.f32 %v582_v49, 0.0  ;;  %v908_v54 = vmax.f32 %v742_v50, 0.0  ;;  %v597_v55 = vadd.f32 %v1667_v51, %v2209_v4  ;;  %v757_v56 = vadd.f32 %v1715_v52, %v2209_v4 }
 0x102   : > { %v591_v57 = vpop.f32.mrf.mxu0  ;;  %v751_v58 = vpop.f32.mrf.mxu1 }
 0x103   : > { %941 = vst.msk [vmem:[%s2215_s12 + $0x30] sm:$0xff] %vm934_vm1, %v876_v53  ;;  %973 = vst.msk [vmem:[%s2215_s12 + $0x130] sm:$0xff] %vm934_vm1, %v908_v54  ;;  %v879_v59 = vmax.f32 %v597_v55, 0.0  ;;  %v911_v60 = vmax.f32 %v757_v56, 0.0  ;;  %v592_v61 = vadd.f32 %v2209_v4, %v591_v57  ;;  %v752_v62 = vadd.f32 %v2209_v4, %v751_v58 }
 0x104   : > { %v1670_v63 = vpop.f32.mrf.mxu0  ;;  %v1718_v0 = vpop.f32.mrf.mxu1 }
 0x105   : > { %944 = vst.msk [vmem:[%s2215_s12 + $0x48] sm:$0xff] %vm934_vm1, %v879_v59  ;;  %976 = vst.msk [vmem:[%s2215_s12 + $0x148] sm:$0xff] %vm934_vm1, %v911_v60  ;;  %v878_v1 = vmax.f32 %v592_v61, 0.0  ;;  %v910_v2 = vmax.f32 %v752_v62, 0.0  ;;  %v607_v3 = vadd.f32 %v1670_v63, %v2209_v4  ;;  %v767_v5 = vadd.f32 %v1718_v0, %v2209_v4 }
 0x106   : > { %v601_v6 = vpop.f32.mrf.mxu0  ;;  %v761_v7 = vpop.f32.mrf.mxu1 }
 0x107   : > { %943 = vst.msk [vmem:[%s2215_s12 + $0x40] sm:$0xff] %vm934_vm1, %v878_v1  ;;  %975 = vst.msk [vmem:[%s2215_s12 + $0x140] sm:$0xff] %vm934_vm1, %v910_v2  ;;  %v881_v8 = vmax.f32 %v607_v3, 0.0  ;;  %v913_v9 = vmax.f32 %v767_v5, 0.0  ;;  %v602_v10 = vadd.f32 %v2209_v4, %v601_v6  ;;  %v762_v11 = vadd.f32 %v2209_v4, %v761_v7 }
 0x108   : > { %v1673_v12 = vpop.f32.mrf.mxu0  ;;  %v1721_v13 = vpop.f32.mrf.mxu1 }
 0x109   : > { %946 = vst.msk [vmem:[%s2215_s12 + $0x58] sm:$0xff] %vm934_vm1, %v881_v8  ;;  %978 = vst.msk [vmem:[%s2215_s12 + $0x158] sm:$0xff] %vm934_vm1, %v913_v9  ;;  %v880_v14 = vmax.f32 %v602_v10, 0.0  ;;  %v912_v15 = vmax.f32 %v762_v11, 0.0  ;;  %v617_v16 = vadd.f32 %v1673_v12, %v2209_v4  ;;  %v777_v17 = vadd.f32 %v1721_v13, %v2209_v4 }
 0x10a   : > { %v611_v18 = vpop.f32.mrf.mxu0  ;;  %v771_v19 = vpop.f32.mrf.mxu1 }
 0x10b   : > { %945 = vst.msk [vmem:[%s2215_s12 + $0x50] sm:$0xff] %vm934_vm1, %v880_v14  ;;  %977 = vst.msk [vmem:[%s2215_s12 + $0x150] sm:$0xff] %vm934_vm1, %v912_v15  ;;  %v883_v20 = vmax.f32 %v617_v16, 0.0  ;;  %v915_v21 = vmax.f32 %v777_v17, 0.0  ;;  %v612_v22 = vadd.f32 %v2209_v4, %v611_v18  ;;  %v772_v23 = vadd.f32 %v2209_v4, %v771_v19 }
 0x10c   : > { %v1676_v24 = vpop.f32.mrf.mxu0  ;;  %v1724_v25 = vpop.f32.mrf.mxu1 }
 0x10d   : > { %948 = vst.msk [vmem:[%s2215_s12 + $0x68] sm:$0xff] %vm934_vm1, %v883_v20  ;;  %980 = vst.msk [vmem:[%s2215_s12 + $0x168] sm:$0xff] %vm934_vm1, %v915_v21  ;;  %v882_v26 = vmax.f32 %v612_v22, 0.0  ;;  %v914_v27 = vmax.f32 %v772_v23, 0.0  ;;  %v627_v28 = vadd.f32 %v1676_v24, %v2209_v4  ;;  %v787_v29 = vadd.f32 %v1724_v25, %v2209_v4 }
 0x10e   : > { %v621_v30 = vpop.f32.mrf.mxu0  ;;  %v781_v31 = vpop.f32.mrf.mxu1 }
 0x10f   : > { %947 = vst.msk [vmem:[%s2215_s12 + $0x60] sm:$0xff] %vm934_vm1, %v882_v26  ;;  %979 = vst.msk [vmem:[%s2215_s12 + $0x160] sm:$0xff] %vm934_vm1, %v914_v27  ;;  %v885_v32 = vmax.f32 %v627_v28, 0.0  ;;  %v917_v33 = vmax.f32 %v787_v29, 0.0  ;;  %v622_v34 = vadd.f32 %v2209_v4, %v621_v30  ;;  %v782_v35 = vadd.f32 %v2209_v4, %v781_v31 }
 0x110   : > { %v1679_v36 = vpop.f32.mrf.mxu0  ;;  %v1727_v37 = vpop.f32.mrf.mxu1 }
 0x111   : > { %950 = vst.msk [vmem:[%s2215_s12 + $0x78] sm:$0xff] %vm934_vm1, %v885_v32  ;;  %982 = vst.msk [vmem:[%s2215_s12 + $0x178] sm:$0xff] %vm934_vm1, %v917_v33  ;;  %v884_v38 = vmax.f32 %v622_v34, 0.0  ;;  %v916_v39 = vmax.f32 %v782_v35, 0.0  ;;  %v637_v40 = vadd.f32 %v1679_v36, %v2209_v4  ;;  %v797_v41 = vadd.f32 %v1727_v37, %v2209_v4 }
 0x112   : > { %v631_v42 = vpop.f32.mrf.mxu0  ;;  %v791_v43 = vpop.f32.mrf.mxu1 }
 0x113   : > { %949 = vst.msk [vmem:[%s2215_s12 + $0x70] sm:$0xff] %vm934_vm1, %v884_v38  ;;  %981 = vst.msk [vmem:[%s2215_s12 + $0x170] sm:$0xff] %vm934_vm1, %v916_v39  ;;  %v887_v44 = vmax.f32 %v637_v40, 0.0  ;;  %v919_v45 = vmax.f32 %v797_v41, 0.0  ;;  %v632_v46 = vadd.f32 %v2209_v4, %v631_v42  ;;  %v792_v47 = vadd.f32 %v2209_v4, %v791_v43 }
 0x114   : > { %v1682_v48 = vpop.f32.mrf.mxu0  ;;  %v1730_v49 = vpop.f32.mrf.mxu1 }
 0x115   : > { %952 = vst.msk [vmem:[%s2215_s12 + $0x88] sm:$0xff] %vm934_vm1, %v887_v44  ;;  %984 = vst.msk [vmem:[%s2215_s12 + $0x188] sm:$0xff] %vm934_vm1, %v919_v45  ;;  %v886_v50 = vmax.f32 %v632_v46, 0.0  ;;  %v918_v51 = vmax.f32 %v792_v47, 0.0  ;;  %v647_v52 = vadd.f32 %v1682_v48, %v2209_v4  ;;  %v807_v53 = vadd.f32 %v1730_v49, %v2209_v4 }
 0x116   : > { %v641_v54 = vpop.f32.mrf.mxu0  ;;  %v801_v55 = vpop.f32.mrf.mxu1 }
 0x117   : > { %951 = vst.msk [vmem:[%s2215_s12 + $0x80] sm:$0xff] %vm934_vm1, %v886_v50  ;;  %983 = vst.msk [vmem:[%s2215_s12 + $0x180] sm:$0xff] %vm934_vm1, %v918_v51  ;;  %v889_v56 = vmax.f32 %v647_v52, 0.0  ;;  %v921_v57 = vmax.f32 %v807_v53, 0.0  ;;  %v642_v58 = vadd.f32 %v2209_v4, %v641_v54  ;;  %v802_v59 = vadd.f32 %v2209_v4, %v801_v55 }
 0x118   : > { %v1685_v60 = vpop.f32.mrf.mxu0  ;;  %v1733_v61 = vpop.f32.mrf.mxu1 }
 0x119   : > { %954 = vst.msk [vmem:[%s2215_s12 + $0x98] sm:$0xff] %vm934_vm1, %v889_v56  ;;  %986 = vst.msk [vmem:[%s2215_s12 + $0x198] sm:$0xff] %vm934_vm1, %v921_v57  ;;  %v888_v62 = vmax.f32 %v642_v58, 0.0  ;;  %v920_v63 = vmax.f32 %v802_v59, 0.0  ;;  %v657_v0 = vadd.f32 %v1685_v60, %v2209_v4  ;;  %v817_v1 = vadd.f32 %v1733_v61, %v2209_v4 }
 0x11a   : > { %v651_v2 = vpop.f32.mrf.mxu0  ;;  %v811_v3 = vpop.f32.mrf.mxu1 }
 0x11b   : > { %953 = vst.msk [vmem:[%s2215_s12 + $0x90] sm:$0xff] %vm934_vm1, %v888_v62  ;;  %985 = vst.msk [vmem:[%s2215_s12 + $0x190] sm:$0xff] %vm934_vm1, %v920_v63  ;;  %v891_v5 = vmax.f32 %v657_v0, 0.0  ;;  %v923_v6 = vmax.f32 %v817_v1, 0.0  ;;  %v652_v7 = vadd.f32 %v2209_v4, %v651_v2  ;;  %v812_v8 = vadd.f32 %v2209_v4, %v811_v3 }
 0x11c   : > { %v1688_v9 = vpop.f32.mrf.mxu0  ;;  %v1736_v10 = vpop.f32.mrf.mxu1 }
 0x11d   : > { %956 = vst.msk [vmem:[%s2215_s12 + $0xa8] sm:$0xff] %vm934_vm1, %v891_v5  ;;  %988 = vst.msk [vmem:[%s2215_s12 + $0x1a8] sm:$0xff] %vm934_vm1, %v923_v6  ;;  %v890_v11 = vmax.f32 %v652_v7, 0.0  ;;  %v922_v12 = vmax.f32 %v812_v8, 0.0  ;;  %v667_v13 = vadd.f32 %v1688_v9, %v2209_v4  ;;  %v827_v14 = vadd.f32 %v1736_v10, %v2209_v4 }
 0x11e   : > { %v661_v15 = vpop.f32.mrf.mxu0  ;;  %v821_v16 = vpop.f32.mrf.mxu1 }
 0x11f   : > { %955 = vst.msk [vmem:[%s2215_s12 + $0xa0] sm:$0xff] %vm934_vm1, %v890_v11  ;;  %987 = vst.msk [vmem:[%s2215_s12 + $0x1a0] sm:$0xff] %vm934_vm1, %v922_v12  ;;  %v893_v17 = vmax.f32 %v667_v13, 0.0  ;;  %v925_v18 = vmax.f32 %v827_v14, 0.0  ;;  %v662_v19 = vadd.f32 %v2209_v4, %v661_v15  ;;  %v822_v20 = vadd.f32 %v2209_v4, %v821_v16 }
 0x120   : > { %v1691_v21 = vpop.f32.mrf.mxu0  ;;  %v1739_v22 = vpop.f32.mrf.mxu1 }
 0x121   : > { %958 = vst.msk [vmem:[%s2215_s12 + $0xb8] sm:$0xff] %vm934_vm1, %v893_v17  ;;  %990 = vst.msk [vmem:[%s2215_s12 + $0x1b8] sm:$0xff] %vm934_vm1, %v925_v18  ;;  %v892_v23 = vmax.f32 %v662_v19, 0.0  ;;  %v924_v24 = vmax.f32 %v822_v20, 0.0  ;;  %v677_v25 = vadd.f32 %v1691_v21, %v2209_v4  ;;  %v837_v26 = vadd.f32 %v1739_v22, %v2209_v4 }
 0x122   : > { %v671_v27 = vpop.f32.mrf.mxu0  ;;  %v831_v28 = vpop.f32.mrf.mxu1 }
 0x123   : > { %957 = vst.msk [vmem:[%s2215_s12 + $0xb0] sm:$0xff] %vm934_vm1, %v892_v23  ;;  %989 = vst.msk [vmem:[%s2215_s12 + $0x1b0] sm:$0xff] %vm934_vm1, %v924_v24  ;;  %v895_v29 = vmax.f32 %v677_v25, 0.0  ;;  %v927_v30 = vmax.f32 %v837_v26, 0.0  ;;  %v672_v31 = vadd.f32 %v2209_v4, %v671_v27  ;;  %v832_v32 = vadd.f32 %v2209_v4, %v831_v28 }
 0x124   : > { %v1694_v33 = vpop.f32.mrf.mxu0  ;;  %v1742_v34 = vpop.f32.mrf.mxu1 }
 0x125   : > { %960 = vst.msk [vmem:[%s2215_s12 + $0xc8] sm:$0xff] %vm934_vm1, %v895_v29  ;;  %992 = vst.msk [vmem:[%s2215_s12 + $0x1c8] sm:$0xff] %vm934_vm1, %v927_v30  ;;  %v894_v35 = vmax.f32 %v672_v31, 0.0  ;;  %v926_v36 = vmax.f32 %v832_v32, 0.0  ;;  %v687_v37 = vadd.f32 %v1694_v33, %v2209_v4  ;;  %v847_v38 = vadd.f32 %v1742_v34, %v2209_v4 }
 0x126   : > { %v681_v39 = vpop.f32.mrf.mxu0  ;;  %v841_v40 = vpop.f32.mrf.mxu1 }
 0x127   : > { %959 = vst.msk [vmem:[%s2215_s12 + $0xc0] sm:$0xff] %vm934_vm1, %v894_v35  ;;  %991 = vst.msk [vmem:[%s2215_s12 + $0x1c0] sm:$0xff] %vm934_vm1, %v926_v36  ;;  %v897_v41 = vmax.f32 %v687_v37, 0.0  ;;  %v929_v42 = vmax.f32 %v847_v38, 0.0  ;;  %v682_v43 = vadd.f32 %v2209_v4, %v681_v39  ;;  %v842_v44 = vadd.f32 %v2209_v4, %v841_v40 }
 0x128   : > { %v1697_v45 = vpop.f32.mrf.mxu0  ;;  %v1745_v46 = vpop.f32.mrf.mxu1 }
 0x129   : > { %962 = vst.msk [vmem:[%s2215_s12 + $0xd8] sm:$0xff] %vm934_vm1, %v897_v41  ;;  %994 = vst.msk [vmem:[%s2215_s12 + $0x1d8] sm:$0xff] %vm934_vm1, %v929_v42  ;;  %v896_v47 = vmax.f32 %v682_v43, 0.0  ;;  %v928_v48 = vmax.f32 %v842_v44, 0.0  ;;  %v697_v49 = vadd.f32 %v1697_v45, %v2209_v4  ;;  %v857_v50 = vadd.f32 %v1745_v46, %v2209_v4 }
 0x12a   : > { %v691_v51 = vpop.f32.mrf.mxu0  ;;  %v851_v52 = vpop.f32.mrf.mxu1 }
 0x12b   : > { %961 = vst.msk [vmem:[%s2215_s12 + $0xd0] sm:$0xff] %vm934_vm1, %v896_v47  ;;  %993 = vst.msk [vmem:[%s2215_s12 + $0x1d0] sm:$0xff] %vm934_vm1, %v928_v48  ;;  %v899_v53 = vmax.f32 %v697_v49, 0.0  ;;  %v931_v54 = vmax.f32 %v857_v50, 0.0  ;;  %v692_v55 = vadd.f32 %v2209_v4, %v691_v51  ;;  %v852_v56 = vadd.f32 %v2209_v4, %v851_v52 }
 0x12c   : > { %v1700_v57 = vpop.f32.mrf.mxu0  ;;  %v1748_v58 = vpop.f32.mrf.mxu1 }
 0x12d   : > { %964 = vst.msk [vmem:[%s2215_s12 + $0xe8] sm:$0xff] %vm934_vm1, %v899_v53  ;;  %996 = vst.msk [vmem:[%s2215_s12 + $0x1e8] sm:$0xff] %vm934_vm1, %v931_v54  ;;  %v898_v59 = vmax.f32 %v692_v55, 0.0  ;;  %v930_v60 = vmax.f32 %v852_v56, 0.0  ;;  %v707_v61 = vadd.f32 %v1700_v57, %v2209_v4  ;;  %v867_v62 = vadd.f32 %v1748_v58, %v2209_v4 }
 0x12e   : > { %v701_v63 = vpop.f32.mrf.mxu0  ;;  %v861_v0 = vpop.f32.mrf.mxu1 }
 0x12f   : > { %963 = vst.msk [vmem:[%s2215_s12 + $0xe0] sm:$0xff] %vm934_vm1, %v898_v59  ;;  %995 = vst.msk [vmem:[%s2215_s12 + $0x1e0] sm:$0xff] %vm934_vm1, %v930_v60  ;;  %v901_v1 = vmax.f32 %v707_v61, 0.0  ;;  %v933_v2 = vmax.f32 %v867_v62, 0.0  ;;  %v702_v3 = vadd.f32 %v2209_v4, %v701_v63  ;;  %v862_v5 = vadd.f32 %v2209_v4, %v861_v0  ;;  %1005 = sbr.rel (!%p2020_p4) target bundleno = 372 (0x174), region = 40 }
 0x131   : > { %966 = vst.msk [vmem:[%s2215_s12 + $0xf8] sm:$0xff] %vm934_vm1, %v901_v1  ;;  %998 = vst.msk [vmem:[%s2215_s12 + $0x1f8] sm:$0xff] %vm934_vm1, %v933_v2  ;;  %v900_v6 = vmax.f32 %v702_v3, 0.0  ;;  %v932_v7 = vmax.f32 %v862_v5, 0.0 }
 0x133   : > { %965 = vst.msk [vmem:[%s2215_s12 + $0xf0] sm:$0xff] %vm934_vm1, %v900_v6  ;;  %997 = vst.msk [vmem:[%s2215_s12 + $0x1f0] sm:$0xff] %vm934_vm1, %v932_v7 }
 0x134   : > { %s2626_s23 = smov (!%p1008_p6, %s1007_s23), 64 }
 0x135   : > { %s1559_s29 = sshll.u32 %s2626_s23, 7 }
 0x136   : > { %p1562_p7 = scmp.eq.s32.totalorder %s1559_s29, 0 }
 0x137   : > { %s2418_s30 = sshrl.u32 (!%p1562_p7), %s2626_s23, 6 }
 0x138   : > { %1016 = sbr.rel (%p1562_p7) target bundleno = 372 (0x174), region = 44  ;;  %p1563_p4 = scmp.le.s32.totalorder (!%p1562_p7), %s2418_s30, 0 }
 0x13d   : > { %1426 = sbr.rel (%p1563_p4) target bundleno = 355 (0x163), region = 121  ;;  %s2617_s15 = smov (!%p1563_p4), %s2412_s27 }
 0x13e   : > { %s2618_s20 = smov (!%p1563_p4), %s2215_s12  ;;  %s2427_s28 = smov (!%p1563_p4), 0  }
 0x13f   : > { %s2429_s4 = smov (!%p1563_p4), 0  }
 0x142 LB: >> { %v1205_v4 = vld [vmem:[%s1948_s20] sm:$0xff]  ;;  %v1207_v8 = vld [vmem:[%s1948_s20 + $0x8] sm:$0xff]  ;;  %v1209_v9 = vld [vmem:[%s1948_s20 + $0x10] sm:$0xff]  ;;  %s1333_s5 = sadd.s32 1, %s1952_s28  ;;  %s1199_s4 = sadd.s32 1, %s1956_s4   ;;  %s1956_s4 = sphi %s2429_s4, %s1199_s4   ;;  %s1952_s28 = sphi %s2427_s28, %s2621_s28   ;;  %s1948_s20 = sphi %s2618_s20, %s2620_s20   ;;  %s1944_s15 = sphi %s2617_s15, %s2619_s15  }
 0x143   : >> { %1206 = vst [vmem:[%s1944_s15] sm:$0xff] %v1205_v4  ;;  %1208 = vst [vmem:[%s1944_s15 + $0x8] sm:$0xff] %v1207_v8  ;;  %v1211_v10 = vld [vmem:[%s1948_s20 + $0x18] sm:$0xff]  ;;  %v1213_v11 = vld [vmem:[%s1948_s20 + $0x20] sm:$0xff]  ;;  %p1334_p8 = scmp.ge.s32.totalorder %s1333_s5, %s2418_s30  ;;  %p1198_p9 = scmp.ge.s32.totalorder %s1199_s4, %s2418_s30 }
 0x144   : >> { %1210 = vst [vmem:[%s1944_s15 + $0x10] sm:$0xff] %v1209_v9  ;;  %v1215_v12 = vld [vmem:[%s1948_s20 + $0x28] sm:$0xff]  ;;  %1212 = vst [vmem:[%s1944_s15 + $0x18] sm:$0xff] %v1211_v10  ;;  %v1217_v13 = vld [vmem:[%s1948_s20 + $0x30] sm:$0xff] }
 0x145   : >> { %1214 = vst [vmem:[%s1944_s15 + $0x20] sm:$0xff] %v1213_v11  ;;  %1216 = vst [vmem:[%s1944_s15 + $0x28] sm:$0xff] %v1215_v12  ;;  %v1219_v14 = vld [vmem:[%s1948_s20 + $0x38] sm:$0xff]  ;;  %v1221_v15 = vld [vmem:[%s1948_s20 + $0x40] sm:$0xff]  ;;  %s2628_s5 = smov (%p1334_p8, %s1333_s5), 0 }
 0x146   : >> { %1218 = vst [vmem:[%s1944_s15 + $0x30] sm:$0xff] %v1217_v13  ;;  %1220 = vst [vmem:[%s1944_s15 + $0x38] sm:$0xff] %v1219_v14  ;;  %v1223_v16 = vld [vmem:[%s1948_s20 + $0x48] sm:$0xff]  ;;  %v1225_v17 = vld [vmem:[%s1948_s20 + $0x50] sm:$0xff]  ;;  %s1564_s6 = sshll.u32 %s2628_s5, 9  ;;  %s2621_s28 = smov %s2628_s5 }
 0x147   : >> { %1222 = vst [vmem:[%s1944_s15 + $0x40] sm:$0xff] %v1221_v15  ;;  %v1227_v18 = vld [vmem:[%s1948_s20 + $0x58] sm:$0xff]  ;;  %1224 = vst [vmem:[%s1944_s15 + $0x48] sm:$0xff] %v1223_v16  ;;  %v1229_v19 = vld [vmem:[%s1948_s20 + $0x60] sm:$0xff]  ;;  %s2485_s7 = scalar_lea.vmem %s2215_s12, %s1564_s6 [#allocation4]   ;;  %s2488_s8 = scalar_lea.vmem %s2412_s27, %s1564_s6  }
 0x148   : >> { %1226 = vst [vmem:[%s1944_s15 + $0x50] sm:$0xff] %v1225_v17  ;;  %1228 = vst [vmem:[%s1944_s15 + $0x58] sm:$0xff] %v1227_v18  ;;  %v1231_v20 = vld [vmem:[%s1948_s20 + $0x68] sm:$0xff]  ;;  %v1233_v21 = vld [vmem:[%s1948_s20 + $0x70] sm:$0xff] }
 0x149   : >> { %1230 = vst [vmem:[%s1944_s15 + $0x60] sm:$0xff] %v1229_v19  ;;  %1232 = vst [vmem:[%s1944_s15 + $0x68] sm:$0xff] %v1231_v20  ;;  %v1235_v22 = vld [vmem:[%s1948_s20 + $0x78] sm:$0xff]  ;;  %v1237_v23 = vld [vmem:[%s1948_s20 + $0x80] sm:$0xff] }
 0x14a   : >> { %1234 = vst [vmem:[%s1944_s15 + $0x70] sm:$0xff] %v1233_v21  ;;  %v1239_v24 = vld [vmem:[%s1948_s20 + $0x88] sm:$0xff]  ;;  %1236 = vst [vmem:[%s1944_s15 + $0x78] sm:$0xff] %v1235_v22  ;;  %v1241_v25 = vld [vmem:[%s1948_s20 + $0x90] sm:$0xff] }
 0x14b   : >> { %1238 = vst [vmem:[%s1944_s15 + $0x80] sm:$0xff] %v1237_v23  ;;  %1240 = vst [vmem:[%s1944_s15 + $0x88] sm:$0xff] %v1239_v24  ;;  %v1243_v26 = vld [vmem:[%s1948_s20 + $0x98] sm:$0xff]  ;;  %v1245_v27 = vld [vmem:[%s1948_s20 + $0xa0] sm:$0xff] }
 0x14c   : >> { %1242 = vst [vmem:[%s1944_s15 + $0x90] sm:$0xff] %v1241_v25  ;;  %1244 = vst [vmem:[%s1944_s15 + $0x98] sm:$0xff] %v1243_v26  ;;  %v1247_v28 = vld [vmem:[%s1948_s20 + $0xa8] sm:$0xff]  ;;  %v1249_v29 = vld [vmem:[%s1948_s20 + $0xb0] sm:$0xff] }
 0x14d   : >> { %1246 = vst [vmem:[%s1944_s15 + $0xa0] sm:$0xff] %v1245_v27  ;;  %v1251_v30 = vld [vmem:[%s1948_s20 + $0xb8] sm:$0xff]  ;;  %1248 = vst [vmem:[%s1944_s15 + $0xa8] sm:$0xff] %v1247_v28  ;;  %v1253_v31 = vld [vmem:[%s1948_s20 + $0xc0] sm:$0xff] }
 0x14e   : >> { %1250 = vst [vmem:[%s1944_s15 + $0xb0] sm:$0xff] %v1249_v29  ;;  %1252 = vst [vmem:[%s1944_s15 + $0xb8] sm:$0xff] %v1251_v30  ;;  %v1255_v32 = vld [vmem:[%s1948_s20 + $0xc8] sm:$0xff]  ;;  %v1257_v33 = vld [vmem:[%s1948_s20 + $0xd0] sm:$0xff] }
 0x14f   : >> { %1254 = vst [vmem:[%s1944_s15 + $0xc0] sm:$0xff] %v1253_v31  ;;  %1256 = vst [vmem:[%s1944_s15 + $0xc8] sm:$0xff] %v1255_v32  ;;  %v1259_v34 = vld [vmem:[%s1948_s20 + $0xd8] sm:$0xff]  ;;  %v1261_v35 = vld [vmem:[%s1948_s20 + $0xe0] sm:$0xff] }
 0x150   : >> { %1258 = vst [vmem:[%s1944_s15 + $0xd0] sm:$0xff] %v1257_v33  ;;  %v1263_v36 = vld [vmem:[%s1948_s20 + $0xe8] sm:$0xff]  ;;  %1260 = vst [vmem:[%s1944_s15 + $0xd8] sm:$0xff] %v1259_v34  ;;  %v1265_v37 = vld [vmem:[%s1948_s20 + $0xf0] sm:$0xff] }
 0x151   : >> { %1262 = vst [vmem:[%s1944_s15 + $0xe0] sm:$0xff] %v1261_v35  ;;  %1264 = vst [vmem:[%s1944_s15 + $0xe8] sm:$0xff] %v1263_v36  ;;  %v1267_v38 = vld [vmem:[%s1948_s20 + $0xf8] sm:$0xff]  ;;  %v1269_v39 = vld [vmem:[%s1948_s20 + $0x100] sm:$0xff] }
 0x152   : >> { %1266 = vst [vmem:[%s1944_s15 + $0xf0] sm:$0xff] %v1265_v37  ;;  %1268 = vst [vmem:[%s1944_s15 + $0xf8] sm:$0xff] %v1267_v38  ;;  %v1271_v40 = vld [vmem:[%s1948_s20 + $0x108] sm:$0xff]  ;;  %v1273_v41 = vld [vmem:[%s1948_s20 + $0x110] sm:$0xff] }
 0x153   : >> { %1270 = vst [vmem:[%s1944_s15 + $0x100] sm:$0xff] %v1269_v39  ;;  %v1275_v42 = vld [vmem:[%s1948_s20 + $0x118] sm:$0xff]  ;;  %1272 = vst [vmem:[%s1944_s15 + $0x108] sm:$0xff] %v1271_v40  ;;  %v1277_v43 = vld [vmem:[%s1948_s20 + $0x120] sm:$0xff] }
 0x154   : >> { %1274 = vst [vmem:[%s1944_s15 + $0x110] sm:$0xff] %v1273_v41  ;;  %1276 = vst [vmem:[%s1944_s15 + $0x118] sm:$0xff] %v1275_v42  ;;  %v1279_v44 = vld [vmem:[%s1948_s20 + $0x128] sm:$0xff]  ;;  %v1281_v45 = vld [vmem:[%s1948_s20 + $0x130] sm:$0xff] }
 0x155   : >> { %1278 = vst [vmem:[%s1944_s15 + $0x120] sm:$0xff] %v1277_v43  ;;  %1280 = vst [vmem:[%s1944_s15 + $0x128] sm:$0xff] %v1279_v44  ;;  %v1283_v46 = vld [vmem:[%s1948_s20 + $0x138] sm:$0xff]  ;;  %v1285_v47 = vld [vmem:[%s1948_s20 + $0x140] sm:$0xff] }
 0x156   : >> { %1282 = vst [vmem:[%s1944_s15 + $0x130] sm:$0xff] %v1281_v45  ;;  %v1287_v48 = vld [vmem:[%s1948_s20 + $0x148] sm:$0xff]  ;;  %1284 = vst [vmem:[%s1944_s15 + $0x138] sm:$0xff] %v1283_v46  ;;  %v1289_v49 = vld [vmem:[%s1948_s20 + $0x150] sm:$0xff] }
 0x157   : >> { %1286 = vst [vmem:[%s1944_s15 + $0x140] sm:$0xff] %v1285_v47  ;;  %1288 = vst [vmem:[%s1944_s15 + $0x148] sm:$0xff] %v1287_v48  ;;  %v1291_v50 = vld [vmem:[%s1948_s20 + $0x158] sm:$0xff]  ;;  %v1293_v51 = vld [vmem:[%s1948_s20 + $0x160] sm:$0xff] }
 0x158   : >> { %1290 = vst [vmem:[%s1944_s15 + $0x150] sm:$0xff] %v1289_v49  ;;  %1292 = vst [vmem:[%s1944_s15 + $0x158] sm:$0xff] %v1291_v50  ;;  %v1295_v52 = vld [vmem:[%s1948_s20 + $0x168] sm:$0xff]  ;;  %v1297_v53 = vld [vmem:[%s1948_s20 + $0x170] sm:$0xff] }
 0x159   : >> { %1294 = vst [vmem:[%s1944_s15 + $0x160] sm:$0xff] %v1293_v51  ;;  %v1299_v54 = vld [vmem:[%s1948_s20 + $0x178] sm:$0xff]  ;;  %1296 = vst [vmem:[%s1944_s15 + $0x168] sm:$0xff] %v1295_v52  ;;  %v1301_v55 = vld [vmem:[%s1948_s20 + $0x180] sm:$0xff] }
 0x15a   : >> { %1298 = vst [vmem:[%s1944_s15 + $0x170] sm:$0xff] %v1297_v53  ;;  %1300 = vst [vmem:[%s1944_s15 + $0x178] sm:$0xff] %v1299_v54  ;;  %v1303_v56 = vld [vmem:[%s1948_s20 + $0x188] sm:$0xff]  ;;  %v1305_v57 = vld [vmem:[%s1948_s20 + $0x190] sm:$0xff] }
 0x15b   : >> { %1302 = vst [vmem:[%s1944_s15 + $0x180] sm:$0xff] %v1301_v55  ;;  %1304 = vst [vmem:[%s1944_s15 + $0x188] sm:$0xff] %v1303_v56  ;;  %v1307_v58 = vld [vmem:[%s1948_s20 + $0x198] sm:$0xff]  ;;  %v1309_v59 = vld [vmem:[%s1948_s20 + $0x1a0] sm:$0xff] }
 0x15c   : >> { %1306 = vst [vmem:[%s1944_s15 + $0x190] sm:$0xff] %v1305_v57  ;;  %v1311_v60 = vld [vmem:[%s1948_s20 + $0x1a8] sm:$0xff]  ;;  %1308 = vst [vmem:[%s1944_s15 + $0x198] sm:$0xff] %v1307_v58  ;;  %v1313_v61 = vld [vmem:[%s1948_s20 + $0x1b0] sm:$0xff] }
 0x15d   : >> { %1310 = vst [vmem:[%s1944_s15 + $0x1a0] sm:$0xff] %v1309_v59  ;;  %1312 = vst [vmem:[%s1944_s15 + $0x1a8] sm:$0xff] %v1311_v60  ;;  %v1315_v62 = vld [vmem:[%s1948_s20 + $0x1b8] sm:$0xff]  ;;  %v1317_v63 = vld [vmem:[%s1948_s20 + $0x1c0] sm:$0xff] }
 0x15e   : >> { %1314 = vst [vmem:[%s1944_s15 + $0x1b0] sm:$0xff] %v1313_v61  ;;  %1316 = vst [vmem:[%s1944_s15 + $0x1b8] sm:$0xff] %v1315_v62  ;;  %v1319_v0 = vld [vmem:[%s1948_s20 + $0x1c8] sm:$0xff]  ;;  %v1321_v1 = vld [vmem:[%s1948_s20 + $0x1d0] sm:$0xff]  ;;  %1201 = sbr.rel (!%p1198_p9) target bundleno = 322 (0x142), region = 127 }
 0x15f   : >> { %1318 = vst [vmem:[%s1944_s15 + $0x1c0] sm:$0xff] %v1317_v63  ;;  %v1323_v2 = vld [vmem:[%s1948_s20 + $0x1d8] sm:$0xff]  ;;  %1320 = vst [vmem:[%s1944_s15 + $0x1c8] sm:$0xff] %v1319_v0  ;;  %v1325_v3 = vld [vmem:[%s1948_s20 + $0x1e0] sm:$0xff] }
 0x160   : >> { %1322 = vst [vmem:[%s1944_s15 + $0x1d0] sm:$0xff] %v1321_v1  ;;  %1324 = vst [vmem:[%s1944_s15 + $0x1d8] sm:$0xff] %v1323_v2  ;;  %v1327_v5 = vld [vmem:[%s1948_s20 + $0x1e8] sm:$0xff]  ;;  %v1329_v6 = vld [vmem:[%s1948_s20 + $0x1f0] sm:$0xff] }
 0x161   : >> { %1326 = vst [vmem:[%s1944_s15 + $0x1e0] sm:$0xff] %v1325_v3  ;;  %1328 = vst [vmem:[%s1944_s15 + $0x1e8] sm:$0xff] %v1327_v5  ;;  %v1331_v7 = vld [vmem:[%s1948_s20 + $0x1f8] sm:$0xff]  ;;  %s2620_s20 = smov %s2485_s7 }
 0x162   : >> { %1330 = vst [vmem:[%s1944_s15 + $0x1f0] sm:$0xff] %v1329_v6  ;;  %1332 = vst [vmem:[%s1944_s15 + $0x1f8] sm:$0xff] %v1331_v7  ;;  %s2619_s15 = smov %s2488_s8 }
 0x163 PF: > { %s2593_s9 = sand.u32 63, %s2626_s23   ;;  %s1575_s10 = sshll.u32 %s2418_s30, 9 }
 0x164   : > { %s1344_s11 = scalar_lea.vmem %s2215_s12, %s1575_s10 [#allocation4]   ;;  %s1346_s14 = scalar_lea.vmem %s2412_s27, %s1575_s10  }
 0x165   : > { %p1569_p10 = scmp.le.s32.totalorder %s2593_s9, 0 }
 0x166   : > { %s1958_s17 = smov (!%p1569_p10), %s1346_s14   ;;  %s1962_s18 = smov (!%p1569_p10), %s1344_s11  }
 0x167   : > { %1440 = sbr.rel (%p1569_p10) target bundleno = 372 (0x174), region = 132  ;;  %s1966_s21 = smov (!%p1569_p10), 0  }
 0x168   : > { %s1970_s22 = smov (!%p1569_p10), 0  }
 0x16c LB: >> { %v1356_v4 = vld [vmem:[%s1964_s18] sm:$0xff]  ;;  %s1358_s23 = sadd.s32 1, %s1968_s21  ;;  %s1350_s22 = sadd.s32 1, %s1972_s22   ;;  %s1972_s22 = sphi %s1970_s22, %s1350_s22   ;;  %s1968_s21 = sphi %s1966_s21, %s1967_s21   ;;  %s1964_s18 = sphi %s1962_s18, %s1363_s18   ;;  %s1960_s17 = sphi %s1958_s17, %s1364_s17  }
 0x16d   : >> { %1357 = vst [vmem:[%s1960_s17] sm:$0xff] %v1356_v4  ;;  %p1359_p11 = scmp.ge.s32.totalorder %s1358_s23, %s2593_s9  ;;  %p1349_p12 = scmp.ge.s32.totalorder %s1350_s22, %s2593_s9 }
 0x16f   : >> { %s2630_s23 = smov (%p1359_p11, %s1358_s23), 0  ;;  %1352 = sbr.rel (!%p1349_p12) target bundleno = 364 (0x16c), region = 138 }
 0x170   : >> { %s1570_s12 = sshll.u32 %s2630_s23, 3  ;;  %s1967_s21 = smov %s2630_s23  }
 0x171   : >> { %s1363_s18 = scalar_lea.vmem %s1344_s11, %s1570_s12 [#allocation4]   ;;  %s1364_s17 = scalar_lea.vmem %s1346_s14, %s1570_s12  }
 0x174 PF: > { %p11_p13 = scmp.ge.s32.totalorder %s2010_s16, 5   ;;  %s2622_s12 = smov %s1936_s13 }
 0x175   : > { %s2623_s13 = smov %s2018_s19  ;;  %s2624_s14 = smov %s2010_s16 }
 0x176   :  { %13 = sbr.rel (!%p11_p13) target bundleno = 2 (0x2), region = 149 }
 0x17b   :  { %1380 = vsyncpa [#allocation3], 1 }
 0x17c   :  { %1382 = vsyncpa [#allocation3 + $0x1], 1 }

// kernel: cnn_femnist_forward.8
= control target key start
LH: loop header
LB: loop body
LE: loop exit
PB: predicated region body
PF: predicated region fallthrough
CT: control target
= control target key end

     0   :  { %s257_s6 = smov 0   ;;  %s274_s0 = inlined_call_operand.vmem [shape: f32[2,5,2,5,128], index: 0, kind: input, shape index: {}]   ;;  %s275_s1 = inlined_call_operand.vmem [shape: f32[2,5,5,64], index: 1, kind: output, shape index: {}]  }
   0x1 LB: > { %s218_s7 = sadd.s32 4294967295, %s244_s6   ;;  %p222_p0 = scmp.ge.s32.totalorder %s244_s6, 1  ;;  %s244_s6 = sphi %s257_s6, %s11_s6  }
   0x2   : > { %p87_p1 = scmp.lt.s32.totalorder %s244_s6, 3 }
   0x4   : > { %p88_p2 = pnand %p222_p0, %p87_p1 }
   0x5   : > { %p107_p3 = scmp.lt.s32.totalorder (!%p88_p2), %s218_s7, 1  ;;  %s246_s12 = smov (!%p88_p2), 64  }
   0x6   : > { %91 = sbr.rel (%p88_p2) target bundleno = 144 (0x90), region = 24 }
   0xb   : > { %s277_s7 = smov (!%p107_p3, %s218_s7), 1  ;;  %vm157_vm0 = vcmask 520192  }
   0xc   : > { %s227_s8 = smul.u32 80, %s277_s7 }
   0xd   : > { %s228_s13 = smul.u32 40, %s277_s7 }
   0xe   : > { %s111_s11 = scalar_lea.vmem %s274_s0, %s227_s8 }
   0xf   : > { %v117_v0 = vld [vmem:[%s111_s11] sm:$0x1f]  ;;  %v118_v1 = vld [vmem:[%s111_s11 + $0x8] sm:$0x1f]  ;;  %v119_v5 = vld [vmem:[%s111_s11 + $0x10] sm:$0x1f]  ;;  %s116_s16 = scalar_lea.vmem %s275_s1, %s228_s13 }
  0x10   : > { %v121_v2 = vld [vmem:[%s111_s11 + $0x20] sm:$0x1f]  ;;  %v127_v3 = vmax.f32 %v117_v0, %v118_v1  ;;  %v122_v4 = vld [vmem:[%s111_s11 + $0x28] sm:$0x1f]  ;;  %v120_v6 = vld [vmem:[%s111_s11 + $0x18] sm:$0x1f] }
  0x11   : > { %v129_v7 = vmax.f32 %v121_v2, %v122_v4  ;;  %v123_v8 = vld [vmem:[%s111_s11 + $0x30] sm:$0x1f]  ;;  %v124_v9 = vld [vmem:[%s111_s11 + $0x38] sm:$0x1f]  ;;  %v128_v10 = vmax.f32 %v119_v5, %v120_v6  ;;  %v125_v12 = vld [vmem:[%s111_s11 + $0x40] sm:$0x1f] }
  0x12   : > { %137 = vrot.lane.b32.xlu0 %v127_v3, %s246_s12  ;;  %v130_v11 = vmax.f32 %v123_v8, %v124_v9  ;;  %v126_v13 = vld [vmem:[%s111_s11 + $0x48] sm:$0x1f] }
  0x13   : > { %141 = vrot.lane.b32.xlu1 %v129_v7, %s246_s12  ;;  %v131_v14 = vmax.f32 %v125_v12, %v126_v13 }
  0x16   : > { %139 = vrot.lane.b32.xlu0 %v128_v10, %s246_s12 }
  0x17   : > { %143 = vrot.lane.b32.xlu1 %v130_v11, %s246_s12 }
  0x1a   : > { %145 = vrot.lane.b32.xlu0 %v131_v14, %s246_s12 }
  0x84   : > { %v138_v15 = vpop.permute.xlu0 %137 }
  0x85   : > { %v152_v16 = vmax.f32 %v127_v3, %v138_v15  ;;  %v142_v17 = vpop.permute.xlu1 %141 }
  0x86   : > { %v154_v18 = vmax.f32 %v129_v7, %v142_v17 }
  0x87   : > { %158 = vst.msk [vmem:[%s116_s16] sm:$0x1f] %vm157_vm0, %v152_v16 }
  0x88   : > { %160 = vst.msk [vmem:[%s116_s16 + $0x10] sm:$0x1f] %vm157_vm0, %v154_v18  ;;  %v140_v19 = vpop.permute.xlu0 %139 }
  0x89   : > { %v153_v20 = vmax.f32 %v128_v10, %v140_v19  ;;  %v144_v21 = vpop.permute.xlu1 %143 }
  0x8a   : > { %v155_v22 = vmax.f32 %v130_v11, %v144_v21 }
  0x8b   : > { %159 = vst.msk [vmem:[%s116_s16 + $0x8] sm:$0x1f] %vm157_vm0, %v153_v20 }
  0x8c   : > { %161 = vst.msk [vmem:[%s116_s16 + $0x18] sm:$0x1f] %vm157_vm0, %v155_v22  ;;  %v146_v23 = vpop.permute.xlu0 %145 }
  0x8d   : > { %v156_v24 = vmax.f32 %v131_v14, %v146_v23 }
  0x8f   : > { %162 = vst.msk [vmem:[%s116_s16 + $0x20] sm:$0x1f] %vm157_vm0, %v156_v24 }
  0x90 PF: > { %s11_s6 = sadd.s32 1, %s244_s6  }
  0x91   : > { %p8_p4 = scmp.ge.s32.totalorder %s11_s6, 4  }
  0x93   :  { %10 = sbr.rel (!%p8_p4) target bundleno = 1 (0x1), region = 54 }

// kernel: cnn_femnist_forward.7
= control target key start
LH: loop header
LB: loop body
LE: loop exit
PB: predicated region body
PF: predicated region fallthrough
CT: control target
= control target key end

     0   :  { %s1650_s12 = smov 0   ;;  %s1652_s13 = smov 0   ;;  %s2250_s0 = inlined_call_operand.vmem [shape: f32[242,800], index: 0, kind: input, shape index: {}]   ;;  %s2251_s1 = inlined_call_operand.vmem [shape: f32[64,800], index: 1, kind: input, shape index: {}]   ;;  %s2252_s2 = inlined_call_operand.vmem [shape: f32[1,64], index: 2, kind: input, shape index: {}]   ;;  %s2253_s3 = inlined_call_operand.vmem [shape: f32[242,64], index: 3, kind: output, shape index: {}]  }
   0x1   :  { %s1654_s14 = smov 0  }
   0x2 LB: > { %s1663_s15 = sadd.s32 4294967295, %s1596_s14   ;;  %s1665_s16 = sadd.s32 1, %s1596_s14   ;;  %s1596_s14 = sphi %s1654_s14, %s2260_s14   ;;  %s1592_s13 = sphi %s1652_s13, %s2259_s13   ;;  %s1588_s12 = sphi %s1650_s12, %s2258_s12  }
   0x3   : > { %s85_s17 = ssub.s32 %s1596_s14, %s1665_s16  ;;  %s88_s18 = sadd.s32 1, %s1592_s13 }
   0x4   : > { %p86_p0 = scmp.eq.s32.totalorder %s85_s17, 0  ;;  %p98_p1 = scmp.ne.s32.totalorder %s1592_s13, %s1588_s12 }
   0x5   : > { %p99_p2 = scmp.eq.s32.totalorder %s1663_s15, 1  ;;  %p1340_p3 = scmp.ge.s32.totalorder %s1596_s14, 1 }
   0x6   : > { %s1673_s19 = scalar_select %p86_p0, %s1592_s13, %s88_s18  }
   0x7   : > { %p1675_p4 = por %p99_p2, %p98_p1  ;;  %p149_p5 = scmp.lt.s32.totalorder %s1596_s14, 3 }
   0x9   : > { %p150_p6 = pnand %p1340_p3, %p149_p5 }
   0xa   : > { %s1689_s27 = sshll.u32 (!%p150_p6), %s1663_s15, 4  ;;  %s175_s23 = sand.u32 (!%p150_p6), 1, %s1588_s12  }
   0xb   : > { %153 = sbr.rel (%p150_p6) target bundleno = 414 (0x19e), region = 32  ;;  %p184_p7 = scmp.lt.s32.totalorder (!%p150_p6), %s1689_s27, 30 }
   0xc   : > { %s1341_s24 = sshll.u32 (!%p150_p6), %s175_s23, 7 }
   0xd   : > { %s2079_s12 = scalar_lea.vmem (!%p150_p6), [#allocation2], %s1341_s24  }
  0x10   : > { %v362_v0 = vld [vmem:[%s2251_s1 + $0x190] sm:$0xff]  ;;  %v364_v1 = vld [vmem:[%s2251_s1 + $0x1a0] sm:$0xff]  ;;  %v361_v2 = vld [vmem:[%s2251_s1 + $0x188] sm:$0xff]  ;;  %s185_s11 = scalar_select %p184_p7, %s1689_s27, 30  ;;  %vm375_vm0 = vcmask 261120   ;;  %vm1044_vm1 = vcmask 523264  }
  0x11   : > { %464 = vmatprep.subr.mxu0 %v362_v0  ;;  %609 = vmatprep.subr.mxu1 %v364_v1  ;;  %v363_v3 = vld [vmem:[%s2251_s1 + $0x198] sm:$0xff]  ;;  %v357_v5 = vld [vmem:[%s2251_s1 + $0x168] sm:$0xff]  ;;  %v354_v6 = vld [vmem:[%s2251_s1 + $0x150] sm:$0xff]  ;;  %s1069_s25 = ssub.s32 (%p1675_p4), 31, %s1689_s27  ;;  %s1386_s26 = sshll.u32 (%p1675_p4), %s1663_s15, 7 }
  0x12   : > { %v355_v4 = vld [vmem:[%s2251_s1 + $0x158] sm:$0xff]  ;;  %465 = vmatpush1.xpose.msra.mxu0 %v361_v2  ;;  %610 = vmatpush1.xpose.msra.mxu1 %v363_v3  ;;  %v356_v7 = vld [vmem:[%s2251_s1 + $0x160] sm:$0xff]  ;;  %v350_v9 = vld [vmem:[%s2251_s1 + $0x130] sm:$0xff]  ;;  %s1453_s22 = smul.u32 56, %s185_s11  ;;  %p1070_p8 = scmp.lt.s32.totalorder (%p1675_p4), %s1069_s25, 16 }
  0x13   : > { %466 = vmatprep.subr.mxu0 %v355_v4  ;;  %611 = vmatprep.subr.mxu1 %v357_v5  ;;  %v348_v8 = vld [vmem:[%s2251_s1 + $0x120] sm:$0xff]  ;;  %v347_v10 = vld [vmem:[%s2251_s1 + $0x118] sm:$0xff]  ;;  %v349_v11 = vld [vmem:[%s2251_s1 + $0x128] sm:$0xff]  ;;  %s2157_s4 = scalar_lea.vmem (%p1675_p4), %s2253_s3, %s1386_s26  }
  0x14   : > { %s1723_s30 = scalar_lea.vmem %s2250_s0, %s1453_s22  ;;  %v341_v12 = vld [vmem:[%s2251_s1 + $0xe8] sm:$0xff]  ;;  %v343_v13 = vld [vmem:[%s2251_s1 + $0xf8] sm:$0xff]  ;;  %v340_v15 = vld [vmem:[%s2251_s1 + $0xe0] sm:$0xff] }
  0x15   : > { %v201_v14 = vld [vmem:[%s1723_s30 + $0x8] sm:$0xff]  ;;  %v342_v16 = vld [vmem:[%s2251_s1 + $0xf0] sm:$0xff]  ;;  %v203_v17 = vld [vmem:[%s1723_s30 + $0x18] sm:$0xff] }
  0x16   : > { %467 = vmatpush1.xpose.msra.mxu0 %v354_v6  ;;  %612 = vmatpush1.xpose.msra.mxu1 %v356_v7  ;;  %v334_v18 = vld [vmem:[%s2251_s1 + $0xb0] sm:$0xff]  ;;  %v336_v19 = vld [vmem:[%s2251_s1 + $0xc0] sm:$0xff]  ;;  %v333_v20 = vld [vmem:[%s2251_s1 + $0xa8] sm:$0xff] }
  0x17   : > { %468 = vmatprep.subr.mxu0 %v348_v8  ;;  %613 = vmatprep.subr.mxu1 %v350_v9  ;;  %v335_v21 = vld [vmem:[%s2251_s1 + $0xb8] sm:$0xff]  ;;  %v329_v23 = vld [vmem:[%s2251_s1 + $0x88] sm:$0xff]  ;;  %v326_v24 = vld [vmem:[%s2251_s1 + $0x70] sm:$0xff] }
  0x18   : > { %512 = vmatprep.mubr.f32.mxu0 %v201_v14  ;;  %657 = vmatprep.mubr.f32.mxu1 %v203_v17  ;;  %v327_v22 = vld [vmem:[%s2251_s1 + $0x78] sm:$0xff]  ;;  %v328_v25 = vld [vmem:[%s2251_s1 + $0x80] sm:$0xff]  ;;  %v322_v27 = vld [vmem:[%s2251_s1 + $0x50] sm:$0xff] }
  0x19   : > { %v320_v26 = vld [vmem:[%s2251_s1 + $0x40] sm:$0xff]  ;;  %v319_v28 = vld [vmem:[%s2251_s1 + $0x38] sm:$0xff]  ;;  %v321_v29 = vld [vmem:[%s2251_s1 + $0x48] sm:$0xff] }
  0x1a   : > { %469 = vmatpush1.xpose.msra.mxu0 %v347_v10  ;;  %614 = vmatpush1.xpose.msra.mxu1 %v349_v11  ;;  %v313_v30 = vld [vmem:[%s2251_s1 + $0x8] sm:$0xff]  ;;  %v315_v31 = vld [vmem:[%s2251_s1 + $0x18] sm:$0xff]  ;;  %v312_v32 = vld [vmem:[%s2251_s1] sm:$0xff] }
  0x1b   : > { %470 = vmatprep.subr.mxu0 %v341_v12  ;;  %615 = vmatprep.subr.mxu1 %v343_v13  ;;  %v314_v33 = vld [vmem:[%s2251_s1 + $0x10] sm:$0xff]  ;;  %v367_v35 = vld [vmem:[%s2251_s1 + $0x1b8] sm:$0xff]  ;;  %v200_v36 = vld [vmem:[%s1723_s30] sm:$0xff] }
  0x1c   : > { %v366_v34 = vld [vmem:[%s2251_s1 + $0x1b0] sm:$0xff]  ;;  %v365_v38 = vld [vmem:[%s2251_s1 + $0x1a8] sm:$0xff]  ;;  %v208_v39 = vld [vmem:[%s1723_s30 + $0x40] sm:$0xff] }
  0x1d   : > { %v202_v37 = vld [vmem:[%s1723_s30 + $0x10] sm:$0xff]  ;;  %v359_v41 = vld [vmem:[%s2251_s1 + $0x178] sm:$0xff]  ;;  %v209_v43 = vld [vmem:[%s1723_s30 + $0x48] sm:$0xff] }
  0x1e   : > { %471 = vmatpush1.xpose.msra.mxu0 %v340_v15  ;;  %616 = vmatpush1.xpose.msra.mxu1 %v342_v16  ;;  %v210_v40 = vld [vmem:[%s1723_s30 + $0x50] sm:$0xff]  ;;  %v207_v42 = vld [vmem:[%s1723_s30 + $0x38] sm:$0xff]  ;;  %v217_v45 = vld [vmem:[%s1723_s30 + $0x88] sm:$0xff] }
  0x1f   : > { %472 = vmatprep.subr.mxu0 %v334_v18  ;;  %617 = vmatprep.subr.mxu1 %v336_v19  ;;  %v215_v44 = vld [vmem:[%s1723_s30 + $0x78] sm:$0xff]  ;;  %v358_v46 = vld [vmem:[%s2251_s1 + $0x170] sm:$0xff]  ;;  %v360_v47 = vld [vmem:[%s2251_s1 + $0x180] sm:$0xff] }
  0x20   : > { %v352_v48 = vld [vmem:[%s2251_s1 + $0x140] sm:$0xff]  ;;  %v214_v49 = vld [vmem:[%s1723_s30 + $0x70] sm:$0xff]  ;;  %v351_v53 = vld [vmem:[%s2251_s1 + $0x138] sm:$0xff] }
  0x21   : > { %v216_v50 = vld [vmem:[%s1723_s30 + $0x80] sm:$0xff]  ;;  %v222_v51 = vld [vmem:[%s1723_s30 + $0xb0] sm:$0xff]  ;;  %v353_v54 = vld [vmem:[%s2251_s1 + $0x148] sm:$0xff] }
  0x22   : > { %473 = vmatpush1.xpose.msra.mxu0 %v333_v20  ;;  %618 = vmatpush1.xpose.msra.mxu1 %v335_v21  ;;  %v224_v52 = vld [vmem:[%s1723_s30 + $0xc0] sm:$0xff]  ;;  %v345_v55 = vld [vmem:[%s2251_s1 + $0x108] sm:$0xff]  ;;  %v223_v57 = vld [vmem:[%s1723_s30 + $0xb8] sm:$0xff] }
  0x23   : > { %474 = vmatprep.subr.mxu0 %v327_v22  ;;  %619 = vmatprep.subr.mxu1 %v329_v23  ;;  %v221_v56 = vld [vmem:[%s1723_s30 + $0xa8] sm:$0xff]  ;;  %v231_v59 = vld [vmem:[%s1723_s30 + $0xf8] sm:$0xff]  ;;  %v344_v60 = vld [vmem:[%s2251_s1 + $0x100] sm:$0xff] }
  0x24   : > { %v229_v58 = vld [vmem:[%s1723_s30 + $0xe8] sm:$0xff]  ;;  %v346_v61 = vld [vmem:[%s2251_s1 + $0x110] sm:$0xff]  ;;  %v228_v63 = vld [vmem:[%s1723_s30 + $0xe0] sm:$0xff] }
  0x25   : > { %v338_v62 = vld [vmem:[%s2251_s1 + $0xd0] sm:$0xff]  ;;  %v236_v1 = vld [vmem:[%s1723_s30 + $0x120] sm:$0xff]  ;;  %v337_v3 = vld [vmem:[%s2251_s1 + $0xc8] sm:$0xff] }
  0x26   : > { %475 = vmatpush1.xpose.msra.mxu0 %v326_v24  ;;  %620 = vmatpush1.xpose.msra.mxu1 %v328_v25  ;;  %v230_v0 = vld [vmem:[%s1723_s30 + $0xf0] sm:$0xff]  ;;  %v339_v4 = vld [vmem:[%s2251_s1 + $0xd8] sm:$0xff]  ;;  %v237_v7 = vld [vmem:[%s1723_s30 + $0x128] sm:$0xff] }
  0x27   : > { %476 = vmatprep.subr.mxu0 %v320_v26  ;;  %621 = vmatprep.subr.mxu1 %v322_v27  ;;  %v238_v2 = vld [vmem:[%s1723_s30 + $0x130] sm:$0xff]  ;;  %v331_v5 = vld [vmem:[%s2251_s1 + $0x98] sm:$0xff]  ;;  %v245_v9 = vld [vmem:[%s1723_s30 + $0x168] sm:$0xff] }
  0x28   : > { %v235_v6 = vld [vmem:[%s1723_s30 + $0x118] sm:$0xff]  ;;  %v330_v10 = vld [vmem:[%s2251_s1 + $0x90] sm:$0xff]  ;;  %v332_v11 = vld [vmem:[%s2251_s1 + $0xa0] sm:$0xff] }
  0x29   : > { %v243_v8 = vld [vmem:[%s1723_s30 + $0x158] sm:$0xff]  ;;  %v324_v12 = vld [vmem:[%s2251_s1 + $0x60] sm:$0xff]  ;;  %v242_v13 = vld [vmem:[%s1723_s30 + $0x150] sm:$0xff] }
  0x2a   : > { %477 = vmatpush1.xpose.msra.mxu0 %v319_v28  ;;  %622 = vmatpush1.xpose.msra.mxu1 %v321_v29  ;;  %v244_v14 = vld [vmem:[%s1723_s30 + $0x160] sm:$0xff]  ;;  %v250_v15 = vld [vmem:[%s1723_s30 + $0x190] sm:$0xff]  ;;  %v323_v17 = vld [vmem:[%s2251_s1 + $0x58] sm:$0xff] }
  0x2b   : > { %478 = vmatprep.subr.mxu0 %v313_v30  ;;  %623 = vmatprep.subr.mxu1 %v315_v31  ;;  %v252_v16 = vld [vmem:[%s1723_s30 + $0x1a0] sm:$0xff]  ;;  %v325_v18 = vld [vmem:[%s2251_s1 + $0x68] sm:$0xff]  ;;  %v251_v21 = vld [vmem:[%s1723_s30 + $0x198] sm:$0xff] }
  0x2c   : > { %v317_v19 = vld [vmem:[%s2251_s1 + $0x28] sm:$0xff]  ;;  %v259_v23 = vld [vmem:[%s1723_s30 + $0x1d8] sm:$0xff]  ;;  %v316_v24 = vld [vmem:[%s2251_s1 + $0x20] sm:$0xff] }
  0x2d   : > { %v249_v20 = vld [vmem:[%s1723_s30 + $0x188] sm:$0xff]  ;;  %v318_v25 = vld [vmem:[%s2251_s1 + $0x30] sm:$0xff]  ;;  %v256_v26 = vld [vmem:[%s1723_s30 + $0x1c0] sm:$0xff] }
  0x2e   : > { %479 = vmatpush1.xpose.msra.mxu0 %v312_v32  ;;  %624 = vmatpush1.xpose.msra.mxu1 %v314_v33  ;;  %v257_v22 = vld [vmem:[%s1723_s30 + $0x1c8] sm:$0xff]  ;;  %v258_v27 = vld [vmem:[%s1723_s30 + $0x1d0] sm:$0xff]  ;;  %v264_v28 = vld [vmem:[%s1723_s30 + $0x200] sm:$0xff] }
  0x2f   : > { %754 = vmatprep.subr.mxu0 %v366_v34  ;;  %1413 = vmatprep.subr.msk.mxu1 %vm375_vm0, %v367_v35  ;;  %v266_v29 = vld [vmem:[%s1723_s30 + $0x210] sm:$0xff]  ;;  %v263_v30 = vld [vmem:[%s1723_s30 + $0x1f8] sm:$0xff]  ;;  %v265_v31 = vld [vmem:[%s1723_s30 + $0x208] sm:$0xff] }
  0x30   : > { %v271_v32 = vld [vmem:[%s1723_s30 + $0x238] sm:$0xff]  ;;  %v273_v33 = vld [vmem:[%s1723_s30 + $0x248] sm:$0xff]  ;;  %v270_v34 = vld [vmem:[%s1723_s30 + $0x230] sm:$0xff] }
  0x31   : > { %513 = vmatmul.mubr.f32.vlgmr.msra.gmra.mxu0 %v200_v36  ;;  %658 = vmatmul.mubr.f32.vlgmr.msra.gmra.mxu1 %v202_v37  ;;  %v278_v36 = vld [vmem:[%s1723_s30 + $0x270] sm:$0xff]  ;;  %v280_v37 = vld [vmem:[%s1723_s30 + $0x280] sm:$0xff] }
  0x32   : > { %755 = vmatpush1.xpose.msra.mxu0 %v365_v38  ;;  %517 = vmatprep.mubr.f32.mxu0 %v208_v39  ;;  %v277_v38 = vld [vmem:[%s1723_s30 + $0x268] sm:$0xff]  ;;  %v279_v39 = vld [vmem:[%s1723_s30 + $0x278] sm:$0xff] }
  0x33   : > { %662 = vmatprep.mubr.f32.mxu1 %v210_v40  ;;  %756 = vmatprep.subr.mxu0 %v359_v41  ;;  %v285_v40 = vld [vmem:[%s1723_s30 + $0x2a8] sm:$0xff]  ;;  %v287_v41 = vld [vmem:[%s1723_s30 + $0x2b8] sm:$0xff] }
  0x34   : > { %1414 = vmatpush3.xpose.msk.msra.mxu1 %vm375_vm0, %v367_v35  ;;  %v272_v35 = vld [vmem:[%s1723_s30 + $0x240] sm:$0xff] }
  0x35   : > { %518 = vmatmul.mubr.f32.gmra.mxu0 %v207_v42  ;;  %663 = vmatmul.mubr.f32.gmra.mxu1 %v209_v43  ;;  %v284_v42 = vld [vmem:[%s1723_s30 + $0x2a0] sm:$0xff]  ;;  %v286_v43 = vld [vmem:[%s1723_s30 + $0x2b0] sm:$0xff] }
  0x36   : > { %522 = vmatprep.mubr.f32.mxu0 %v215_v44  ;;  %667 = vmatprep.mubr.f32.mxu1 %v217_v45  ;;  %v292_v44 = vld [vmem:[%s1723_s30 + $0x2e0] sm:$0xff]  ;;  %v294_v45 = vld [vmem:[%s1723_s30 + $0x2f0] sm:$0xff] }
  0x37   : > { %757 = vmatpush1.xpose.msra.mxu0 %v358_v46  ;;  %1415 = vmatprep.subr.msk.mxu1 %vm375_vm0, %v360_v47  ;;  %v291_v46 = vld [vmem:[%s1723_s30 + $0x2d8] sm:$0xff] }
  0x38   : > { %758 = vmatprep.subr.mxu0 %v352_v48  ;;  %1416 = vmatpush3.xpose.msk.msra.mxu1 %vm375_vm0, %v360_v47  ;;  %v293_v47 = vld [vmem:[%s1723_s30 + $0x2e8] sm:$0xff]  ;;  %v299_v48 = vld [vmem:[%s1723_s30 + $0x318] sm:$0xff] }
  0x39   : > { %523 = vmatmul.mubr.f32.gmra.mxu0 %v214_v49  ;;  %668 = vmatmul.mubr.f32.gmra.mxu1 %v216_v50  ;;  %v301_v49 = vld [vmem:[%s1723_s30 + $0x328] sm:$0xff]  ;;  %v298_v50 = vld [vmem:[%s1723_s30 + $0x310] sm:$0xff] }
  0x3a   : > { %527 = vmatprep.mubr.f32.mxu0 %v222_v51  ;;  %672 = vmatprep.mubr.f32.mxu1 %v224_v52  ;;  %v300_v51 = vld [vmem:[%s1723_s30 + $0x320] sm:$0xff]  ;;  %v306_v52 = vld [vmem:[%s1723_s30 + $0x350] sm:$0xff] }
  0x3b   : > { %759 = vmatpush1.xpose.msra.mxu0 %v351_v53  ;;  %1417 = vmatprep.subr.msk.mxu1 %vm375_vm0, %v353_v54  ;;  %v308_v53 = vld [vmem:[%s1723_s30 + $0x360] sm:$0xff] }
  0x3c   : > { %760 = vmatprep.subr.mxu0 %v345_v55  ;;  %1418 = vmatpush3.xpose.msk.msra.mxu1 %vm375_vm0, %v353_v54  ;;  %v305_v54 = vld [vmem:[%s1723_s30 + $0x348] sm:$0xff]  ;;  %v307_v55 = vld [vmem:[%s1723_s30 + $0x358] sm:$0xff] }
  0x3d   : > { %528 = vmatmul.mubr.f32.gmra.mxu0 %v221_v56  ;;  %673 = vmatmul.mubr.f32.gmra.mxu1 %v223_v57  ;;  %v205_v56 = vld [vmem:[%s1723_s30 + $0x28] sm:$0xff]  ;;  %v206_v57 = vld [vmem:[%s1723_s30 + $0x30] sm:$0xff] }
  0x3e   : > { %532 = vmatprep.mubr.f32.mxu0 %v229_v58  ;;  %677 = vmatprep.mubr.f32.mxu1 %v231_v59  ;;  %v204_v58 = vld [vmem:[%s1723_s30 + $0x20] sm:$0xff]  ;;  %v213_v59 = vld [vmem:[%s1723_s30 + $0x68] sm:$0xff] }
  0x3f   : > { %761 = vmatpush1.xpose.msra.mxu0 %v344_v60  ;;  %1419 = vmatprep.subr.msk.mxu1 %vm375_vm0, %v346_v61  ;;  %v212_v60 = vld [vmem:[%s1723_s30 + $0x60] sm:$0xff] }
  0x40   : > { %762 = vmatprep.subr.mxu0 %v338_v62  ;;  %1420 = vmatpush3.xpose.msk.msra.mxu1 %vm375_vm0, %v346_v61  ;;  %v220_v61 = vld [vmem:[%s1723_s30 + $0xa0] sm:$0xff]  ;;  %v211_v62 = vld [vmem:[%s1723_s30 + $0x58] sm:$0xff] }
  0x41   : > { %533 = vmatmul.mubr.f32.gmra.mxu0 %v228_v63  ;;  %678 = vmatmul.mubr.f32.gmra.mxu1 %v230_v0  ;;  %v227_v63 = vld [vmem:[%s1723_s30 + $0xd8] sm:$0xff] }
  0x42   : > { %537 = vmatprep.mubr.f32.mxu0 %v236_v1  ;;  %682 = vmatprep.mubr.f32.mxu1 %v238_v2  ;;  %v219_v0 = vld [vmem:[%s1723_s30 + $0x98] sm:$0xff]  ;;  %v234_v1 = vld [vmem:[%s1723_s30 + $0x110] sm:$0xff] }
  0x43   : > { %763 = vmatpush1.xpose.msra.mxu0 %v337_v3  ;;  %1421 = vmatprep.subr.msk.mxu1 %vm375_vm0, %v339_v4  ;;  %v218_v2 = vld [vmem:[%s1723_s30 + $0x90] sm:$0xff]  ;;  %v241_v3 = vld [vmem:[%s1723_s30 + $0x148] sm:$0xff] }
  0x44   : > { %764 = vmatprep.subr.mxu0 %v331_v5  ;;  %1422 = vmatpush3.xpose.msk.msra.mxu1 %vm375_vm0, %v339_v4  ;;  %v226_v4 = vld [vmem:[%s1723_s30 + $0xd0] sm:$0xff]  ;;  %v248_v5 = vld [vmem:[%s1723_s30 + $0x180] sm:$0xff] }
  0x45   : > { %538 = vmatmul.mubr.f32.gmra.mxu0 %v235_v6  ;;  %683 = vmatmul.mubr.f32.gmra.mxu1 %v237_v7  ;;  %v225_v6 = vld [vmem:[%s1723_s30 + $0xc8] sm:$0xff]  ;;  %v255_v7 = vld [vmem:[%s1723_s30 + $0x1b8] sm:$0xff] }
  0x46   : > { %542 = vmatprep.mubr.f32.mxu0 %v243_v8  ;;  %687 = vmatprep.mubr.f32.mxu1 %v245_v9  ;;  %v233_v8 = vld [vmem:[%s1723_s30 + $0x108] sm:$0xff]  ;;  %v262_v9 = vld [vmem:[%s1723_s30 + $0x1f0] sm:$0xff] }
  0x47   : > { %765 = vmatpush1.xpose.msra.mxu0 %v330_v10  ;;  %1423 = vmatprep.subr.msk.mxu1 %vm375_vm0, %v332_v11  ;;  %v232_v10 = vld [vmem:[%s1723_s30 + $0x100] sm:$0xff] }
  0x48   : > { %766 = vmatprep.subr.mxu0 %v324_v12  ;;  %1424 = vmatpush3.xpose.msk.msra.mxu1 %vm375_vm0, %v332_v11  ;;  %v269_v11 = vld [vmem:[%s1723_s30 + $0x228] sm:$0xff]  ;;  %v240_v12 = vld [vmem:[%s1723_s30 + $0x140] sm:$0xff] }
  0x49   : > { %543 = vmatmul.mubr.f32.gmra.mxu0 %v242_v13  ;;  %688 = vmatmul.mubr.f32.gmra.mxu1 %v244_v14  ;;  %v276_v13 = vld [vmem:[%s1723_s30 + $0x260] sm:$0xff]  ;;  %v239_v14 = vld [vmem:[%s1723_s30 + $0x138] sm:$0xff] }
  0x4a   : > { %547 = vmatprep.mubr.f32.mxu0 %v250_v15  ;;  %692 = vmatprep.mubr.f32.mxu1 %v252_v16  ;;  %v283_v15 = vld [vmem:[%s1723_s30 + $0x298] sm:$0xff] }
  0x4b   : > { %767 = vmatpush1.xpose.msra.mxu0 %v323_v17  ;;  %1425 = vmatprep.subr.msk.mxu1 %vm375_vm0, %v325_v18  ;;  %v247_v16 = vld [vmem:[%s1723_s30 + $0x178] sm:$0xff]  ;;  %v290_v17 = vld [vmem:[%s1723_s30 + $0x2d0] sm:$0xff] }
  0x4c   : > { %768 = vmatprep.subr.mxu0 %v317_v19  ;;  %1426 = vmatpush3.xpose.msk.msra.mxu1 %vm375_vm0, %v325_v18  ;;  %v246_v18 = vld [vmem:[%s1723_s30 + $0x170] sm:$0xff]  ;;  %v297_v19 = vld [vmem:[%s1723_s30 + $0x308] sm:$0xff] }
  0x4d   : > { %548 = vmatmul.mubr.f32.gmra.mxu0 %v249_v20  ;;  %693 = vmatmul.mubr.f32.gmra.mxu1 %v251_v21  ;;  %v254_v20 = vld [vmem:[%s1723_s30 + $0x1b0] sm:$0xff]  ;;  %v304_v21 = vld [vmem:[%s1723_s30 + $0x340] sm:$0xff] }
  0x4e   : > { %552 = vmatprep.mubr.f32.mxu0 %v257_v22  ;;  %697 = vmatprep.mubr.f32.mxu1 %v259_v23  ;;  %v253_v22 = vld [vmem:[%s1723_s30 + $0x1a8] sm:$0xff]  ;;  %v311_v23 = vld [vmem:[%s1723_s30 + $0x378] sm:$0xff] }
  0x4f   : > { %769 = vmatpush1.xpose.msra.mxu0 %v316_v24  ;;  %1427 = vmatprep.subr.msk.mxu1 %vm375_vm0, %v318_v25  ;;  %v261_v24 = vld [vmem:[%s1723_s30 + $0x1e8] sm:$0xff] }
  0x50   : > { %1428 = vmatpush3.xpose.msk.msra.mxu1 %vm375_vm0, %v318_v25  ;;  %v260_v25 = vld [vmem:[%s1723_s30 + $0x1e0] sm:$0xff] }
  0x51   : > { %553 = vmatmul.mubr.f32.gmra.mxu0 %v256_v26  ;;  %698 = vmatmul.mubr.f32.gmra.mxu1 %v258_v27  ;;  %v268_v26 = vld [vmem:[%s1723_s30 + $0x220] sm:$0xff]  ;;  %v267_v27 = vld [vmem:[%s1723_s30 + $0x218] sm:$0xff] }
  0x52   : > { %557 = vmatprep.mubr.f32.mxu0 %v264_v28  ;;  %702 = vmatprep.mubr.f32.mxu1 %v266_v29  ;;  %v275_v28 = vld [vmem:[%s1723_s30 + $0x258] sm:$0xff]  ;;  %v274_v29 = vld [vmem:[%s1723_s30 + $0x250] sm:$0xff] }
  0x55   : > { %558 = vmatmul.mubr.f32.gmra.mxu0 %v263_v30  ;;  %703 = vmatmul.mubr.f32.gmra.mxu1 %v265_v31  ;;  %v282_v30 = vld [vmem:[%s1723_s30 + $0x290] sm:$0xff]  ;;  %v281_v31 = vld [vmem:[%s1723_s30 + $0x288] sm:$0xff] }
  0x56   : > { %562 = vmatprep.mubr.f32.mxu0 %v271_v32  ;;  %707 = vmatprep.mubr.f32.mxu1 %v273_v33  ;;  %v289_v32 = vld [vmem:[%s1723_s30 + $0x2c8] sm:$0xff]  ;;  %v288_v33 = vld [vmem:[%s1723_s30 + $0x2c0] sm:$0xff] }
  0x59   : > { %563 = vmatmul.mubr.f32.gmra.mxu0 %v270_v34  ;;  %708 = vmatmul.mubr.f32.gmra.mxu1 %v272_v35  ;;  %v296_v34 = vld [vmem:[%s1723_s30 + $0x300] sm:$0xff]  ;;  %v295_v35 = vld [vmem:[%s1723_s30 + $0x2f8] sm:$0xff] }
  0x5a   : > { %567 = vmatprep.mubr.f32.mxu0 %v278_v36  ;;  %712 = vmatprep.mubr.f32.mxu1 %v280_v37  ;;  %v303_v36 = vld [vmem:[%s1723_s30 + $0x338] sm:$0xff]  ;;  %v302_v37 = vld [vmem:[%s1723_s30 + $0x330] sm:$0xff] }
  0x5d   : > { %568 = vmatmul.mubr.f32.gmra.mxu0 %v277_v38  ;;  %713 = vmatmul.mubr.f32.gmra.mxu1 %v279_v39  ;;  %v310_v38 = vld [vmem:[%s1723_s30 + $0x370] sm:$0xff]  ;;  %v309_v39 = vld [vmem:[%s1723_s30 + $0x368] sm:$0xff] }
  0x5e   : > { %572 = vmatprep.mubr.f32.mxu0 %v285_v40  ;;  %717 = vmatprep.mubr.f32.mxu1 %v287_v41 }
  0x61   : > { %573 = vmatmul.mubr.f32.gmra.mxu0 %v284_v42  ;;  %718 = vmatmul.mubr.f32.gmra.mxu1 %v286_v43 }
  0x62   : > { %577 = vmatprep.mubr.f32.mxu0 %v292_v44  ;;  %722 = vmatprep.mubr.f32.mxu1 %v294_v45 }
  0x65   : > { %578 = vmatmul.mubr.f32.gmra.mxu0 %v291_v46  ;;  %723 = vmatmul.mubr.f32.gmra.mxu1 %v293_v47 }
  0x66   : > { %582 = vmatprep.mubr.f32.mxu0 %v299_v48  ;;  %727 = vmatprep.mubr.f32.mxu1 %v301_v49 }
  0x69   : > { %583 = vmatmul.mubr.f32.gmra.mxu0 %v298_v50  ;;  %728 = vmatmul.mubr.f32.gmra.mxu1 %v300_v51 }
  0x6a   : > { %587 = vmatprep.mubr.f32.mxu0 %v306_v52  ;;  %732 = vmatprep.mubr.f32.mxu1 %v308_v53 }
  0x6d   : > { %588 = vmatmul.mubr.f32.gmra.mxu0 %v305_v54  ;;  %733 = vmatmul.mubr.f32.gmra.mxu1 %v307_v55 }
  0x6e   : > { %802 = vmatprep.mubr.f32.mxu0 %v205_v56  ;;  %1429 = vmatprep.mubr.msk.f32.mxu1 %vm375_vm0, %v206_v57 }
  0x71   : > { %803 = vmatmul.mubr.f32.vlgmr.msra.gmra.mxu0 %v204_v58  ;;  %1430 = vmatmul.mubr.msk.f32.vlgmr.msra.gmra.mxu1 %vm375_vm0, %v213_v59 }
  0x72   : > { %807 = vmatprep.mubr.f32.mxu0 %v212_v60  ;;  %1432 = vmatprep.mubr.msk.f32.mxu1 %vm375_vm0, %v220_v61 }
  0x75   : > { %808 = vmatmul.mubr.f32.gmra.mxu0 %v211_v62  ;;  %1433 = vmatmul.mubr.msk.f32.gmra.mxu1 %vm375_vm0, %v227_v63 }
  0x76   : > { %812 = vmatprep.mubr.f32.mxu0 %v219_v0  ;;  %1435 = vmatprep.mubr.msk.f32.mxu1 %vm375_vm0, %v234_v1 }
  0x79   : > { %813 = vmatmul.mubr.f32.gmra.mxu0 %v218_v2  ;;  %1436 = vmatmul.mubr.msk.f32.gmra.mxu1 %vm375_vm0, %v241_v3 }
  0x7a   : > { %817 = vmatprep.mubr.f32.mxu0 %v226_v4  ;;  %1438 = vmatprep.mubr.msk.f32.mxu1 %vm375_vm0, %v248_v5 }
  0x7d   : > { %818 = vmatmul.mubr.f32.gmra.mxu0 %v225_v6  ;;  %1439 = vmatmul.mubr.msk.f32.gmra.mxu1 %vm375_vm0, %v255_v7 }
  0x7e   : > { %822 = vmatprep.mubr.f32.mxu0 %v233_v8  ;;  %1441 = vmatprep.mubr.msk.f32.mxu1 %vm375_vm0, %v262_v9 }
  0x81   : > { %823 = vmatmul.mubr.f32.gmra.mxu0 %v232_v10  ;;  %1442 = vmatmul.mubr.msk.f32.gmra.mxu1 %vm375_vm0, %v269_v11 }
  0x82   : > { %827 = vmatprep.mubr.f32.mxu0 %v240_v12  ;;  %1444 = vmatprep.mubr.msk.f32.mxu1 %vm375_vm0, %v276_v13 }
  0x85   : > { %828 = vmatmul.mubr.f32.gmra.mxu0 %v239_v14  ;;  %1445 = vmatmul.mubr.msk.f32.gmra.mxu1 %vm375_vm0, %v283_v15 }
  0x86   : > { %832 = vmatprep.mubr.f32.mxu0 %v247_v16  ;;  %1447 = vmatprep.mubr.msk.f32.mxu1 %vm375_vm0, %v290_v17 }
  0x89   : > { %833 = vmatmul.mubr.f32.gmra.mxu0 %v246_v18  ;;  %1448 = vmatmul.mubr.msk.f32.gmra.mxu1 %vm375_vm0, %v297_v19 }
  0x8a   : > { %837 = vmatprep.mubr.f32.mxu0 %v254_v20  ;;  %1450 = vmatprep.mubr.msk.f32.mxu1 %vm375_vm0, %v304_v21 }
  0x8d   : > { %838 = vmatmul.mubr.f32.gmra.mxu0 %v253_v22  ;;  %1451 = vmatmul.mubr.msk.f32.gmra.mxu1 %vm375_vm0, %v311_v23 }
  0x8e   : > { %842 = vmatprep.mubr.f32.mxu0 %v261_v24 }
  0x91   : > { %843 = vmatmul.mubr.f32.gmra.mxu0 %v260_v25 }
  0x92   : > { %847 = vmatprep.mubr.f32.mxu0 %v268_v26 }
  0x95   : > { %848 = vmatmul.mubr.f32.gmra.mxu0 %v267_v27 }
  0x96   : > { %852 = vmatprep.mubr.f32.mxu0 %v275_v28 }
  0x99   : > { %853 = vmatmul.mubr.f32.gmra.mxu0 %v274_v29 }
  0x9a   : > { %857 = vmatprep.mubr.f32.mxu0 %v282_v30 }
  0x9d   : > { %858 = vmatmul.mubr.f32.gmra.mxu0 %v281_v31 }
  0x9e   : > { %862 = vmatprep.mubr.f32.mxu0 %v289_v32  ;;  %v2058_v32 = vld [vmem:[%s2252_s2] ss:$0 sm:$0xff] }
  0xa1   : > { %863 = vmatmul.mubr.f32.gmra.mxu0 %v288_v33 }
  0xa2   : > { %867 = vmatprep.mubr.f32.mxu0 %v296_v34 }
  0xa5   : > { %868 = vmatmul.mubr.f32.gmra.mxu0 %v295_v35 }
  0xa6   : > { %872 = vmatprep.mubr.f32.mxu0 %v303_v36 }
  0xa9   : > { %873 = vmatmul.mubr.f32.gmra.mxu0 %v302_v37 }
  0xaa   : > { %877 = vmatprep.mubr.f32.mxu0 %v310_v38 }
  0xad   : > { %878 = vmatmul.mubr.f32.gmra.mxu0 %v309_v39 }
  0xf1   : > { %v514_v40 = vpop.f32.mrf.mxu0  ;;  %v2001_v41 = vpop.f32.mrf.mxu1 }
  0xf2   : > { %v515_v37 = vadd.f32 %v2058_v32, %v514_v40 }
  0xf3   : > { %v516_v42 = vpop.f32.mrf.mxu0  ;;  %v661_v43 = vpop.f32.mrf.mxu1 }
  0xf5   : > { %v2003_v44 = vpop.f32.mrf.mxu0  ;;  %v2005_v45 = vpop.f32.mrf.mxu1 }
  0xf7   : > { %v521_v46 = vpop.f32.mrf.mxu0  ;;  %v666_v47 = vpop.f32.mrf.mxu1 }
  0xf8   : > { %v660_v46 = vadd.f32 %v2001_v41, %v515_v37  ;;  %v520_v47 = vadd.f32 %v2058_v32, %v2003_v44 }
  0xf9   : > { %v2007_v48 = vpop.f32.mrf.mxu0  ;;  %v2009_v49 = vpop.f32.mrf.mxu1 }
  0xfa   : > { %v665_v40 = vadd.f32 %v2005_v45, %v520_v47 }
  0xfb   : > { %v526_v50 = vpop.f32.mrf.mxu0  ;;  %v671_v51 = vpop.f32.mrf.mxu1 }
  0xfd   : > { %v2011_v52 = vpop.f32.mrf.mxu0  ;;  %v2013_v53 = vpop.f32.mrf.mxu1 }
  0xff   : > { %v531_v54 = vpop.f32.mrf.mxu0  ;;  %v676_v55 = vpop.f32.mrf.mxu1 }
 0x101   : > { %v2015_v56 = vpop.f32.mrf.mxu0  ;;  %v2017_v57 = vpop.f32.mrf.mxu1 }
 0x103   : > { %v536_v58 = vpop.f32.mrf.mxu0  ;;  %v681_v59 = vpop.f32.mrf.mxu1 }
 0x104   : > { %v525_v59 = vadd.f32 %v2058_v32, %v2007_v48 }
 0x105   : > { %v2019_v60 = vpop.f32.mrf.mxu0  ;;  %v2021_v61 = vpop.f32.mrf.mxu1 }
 0x106   : > { %v670_v44 = vadd.f32 %v2009_v49, %v525_v59  ;;  %v535_v49 = vadd.f32 %v2058_v32, %v2015_v56 }
 0x107   : > { %v541_v62 = vpop.f32.mrf.mxu0  ;;  %v686_v63 = vpop.f32.mrf.mxu1 }
 0x109   : > { %v2023_v0 = vpop.f32.mrf.mxu0  ;;  %v2025_v1 = vpop.f32.mrf.mxu1 }
 0x10b   : > { %v546_v2 = vpop.f32.mrf.mxu0  ;;  %v691_v3 = vpop.f32.mrf.mxu1 }
 0x10d   : > { %v2027_v4 = vpop.f32.mrf.mxu0  ;;  %v2029_v5 = vpop.f32.mrf.mxu1 }
 0x10f   : > { %v551_v6 = vpop.f32.mrf.mxu0  ;;  %v696_v7 = vpop.f32.mrf.mxu1 }
 0x110   : > { %v530_v7 = vadd.f32 %v2058_v32, %v2011_v52 }
 0x111   : > { %v2031_v8 = vpop.f32.mrf.mxu0  ;;  %v2033_v9 = vpop.f32.mrf.mxu1 }
 0x113   : > { %v556_v10 = vpop.f32.mrf.mxu0  ;;  %v701_v11 = vpop.f32.mrf.mxu1 }
 0x115   : > { %v2035_v12 = vpop.f32.mrf.mxu0  ;;  %v2037_v13 = vpop.f32.mrf.mxu1 }
 0x117   : > { %v561_v14 = vpop.f32.mrf.mxu0  ;;  %v706_v15 = vpop.f32.mrf.mxu1 }
 0x119   : > { %v2039_v16 = vpop.f32.mrf.mxu0  ;;  %v2041_v17 = vpop.f32.mrf.mxu1 }
 0x11b   : > { %v566_v18 = vpop.f32.mrf.mxu0  ;;  %v711_v19 = vpop.f32.mrf.mxu1 }
 0x11c   : > { %v675_v18 = vadd.f32 %v2013_v53, %v530_v7 }
 0x11d   : > { %v2043_v20 = vpop.f32.mrf.mxu0  ;;  %v2045_v21 = vpop.f32.mrf.mxu1 }
 0x11f   : > { %v571_v22 = vpop.f32.mrf.mxu0  ;;  %v716_v23 = vpop.f32.mrf.mxu1 }
 0x121   : > { %v2047_v24 = vpop.f32.mrf.mxu0  ;;  %v2049_v25 = vpop.f32.mrf.mxu1 }
 0x123   : > { %v576_v26 = vpop.f32.mrf.mxu0  ;;  %v721_v27 = vpop.f32.mrf.mxu1 }
 0x125   : > { %v2051_v28 = vpop.f32.mrf.mxu0  ;;  %v2053_v29 = vpop.f32.mrf.mxu1 }
 0x127   : > { %v581_v30 = vpop.f32.mrf.mxu0  ;;  %v726_v31 = vpop.f32.mrf.mxu1 }
 0x128   : > { %v680_v30 = vadd.f32 %v2017_v57, %v535_v49  ;;  %v540_v31 = vadd.f32 %v2058_v32, %v2019_v60  ;;  %v565_v49 = vadd.f32 %v2058_v32, %v2039_v16 }
 0x129   : > { %v2060_v33 = vpop.f32.mrf.mxu0  ;;  %v2062_v34 = vpop.f32.mrf.mxu1 }
 0x12b   : > { %v586_v35 = vpop.f32.mrf.mxu0  ;;  %v731_v36 = vpop.f32.mrf.mxu1 }
 0x12d   : > { %v2065_v38 = vpop.f32.mrf.mxu0  ;;  %v2067_v39 = vpop.f32.mrf.mxu1 }
 0x12f   : > { %v591_v42 = vpop.f32.mrf.mxu0  ;;  %v736_v43 = vpop.f32.mrf.mxu1 }
 0x130   : > { %v685_v43 = vadd.f32 %v2021_v61, %v540_v31 }
 0x131   : > { %v804_v50 = vpop.f32.mrf.mxu0  ;;  %v1431_v51 = vpop.f32.mrf.mxu1 }
 0x132   : > { %v805_v54 = vadd.f32 %v804_v50, %v660_v46  ;;  %v545_v46 = vadd.f32 %v2058_v32, %v2023_v0 }
 0x133   : > { %v806_v55 = vpop.f32.mrf.mxu0  ;;  %v949_v58 = vpop.f32.mrf.mxu1 }
 0x134   : > { %v950_v62 = vadd.f32 %v949_v58, %v805_v54  ;;  %v690_v55 = vadd.f32 %v2025_v1, %v545_v46  ;;  %v550_v58 = vadd.f32 %v2058_v32, %v2027_v4 }
 0x135   : > { %v809_v63 = vpop.f32.mrf.mxu0  ;;  %v1434_v2 = vpop.f32.mrf.mxu1 }
 0x136   : > { %v1028_v3 = vmax.f32 %v950_v62, 0.0  ;;  %v810_v41 = vadd.f32 %v809_v63, %v665_v40 }
 0x137   : > { %v811_v6 = vpop.f32.mrf.mxu0  ;;  %v959_v10 = vpop.f32.mrf.mxu1 }
 0x138   : > { %1045 = vst.msk [vmem:[%s2079_s12] sm:$0xff] %vm1044_vm1, %v1028_v3  ;;  %v955_v45 = vadd.f32 %v1431_v51, %v810_v41  ;;  %v555_v3 = vadd.f32 %v2058_v32, %v2031_v8 }
 0x139   : > { %v814_v48 = vpop.f32.mrf.mxu0  ;;  %v1437_v22 = vpop.f32.mrf.mxu1 }
 0x13a   : > { %v1029_v11 = vmax.f32 %v955_v45, 0.0  ;;  %v815_v14 = vadd.f32 %v814_v48, %v670_v44  ;;  %v700_v45 = vadd.f32 %v2033_v9, %v555_v3  ;;  %v560_v48 = vadd.f32 %v2058_v32, %v2035_v12 }
 0x13b   : > { %v816_v15 = vpop.f32.mrf.mxu0  ;;  %v969_v56 = vpop.f32.mrf.mxu1 }
 0x13c   : > { %1046 = vst.msk [vmem:[%s2079_s12 + $0x8] sm:$0xff] %vm1044_vm1, %v1029_v11  ;;  %v960_v52 = vadd.f32 %v959_v10, %v815_v14 }
 0x13d   : > { %v819_v19 = vpop.f32.mrf.mxu0  ;;  %v1440_v60 = vpop.f32.mrf.mxu1 }
 0x13e   : > { %v1030_v23 = vmax.f32 %v960_v52, 0.0  ;;  %v820_v26 = vadd.f32 %v819_v19, %v675_v18  ;;  %v705_v18 = vadd.f32 %v2037_v13, %v560_v48 }
 0x13f   : > { %v821_v27 = vpop.f32.mrf.mxu0  ;;  %v979_v0 = vpop.f32.mrf.mxu1 }
 0x140   : > { %1047 = vst.msk [vmem:[%s2079_s12 + $0x10] sm:$0xff] %vm1044_vm1, %v1030_v23  ;;  %v965_v53 = vadd.f32 %v1434_v2, %v820_v26  ;;  %v695_v2 = vadd.f32 %v2029_v5, %v550_v58  ;;  %v710_v26 = vadd.f32 %v2041_v17, %v565_v49  ;;  %v570_v27 = vadd.f32 %v2058_v32, %v2043_v20 }
 0x141   : > { %v824_v35 = vpop.f32.mrf.mxu0  ;;  %v1443_v4 = vpop.f32.mrf.mxu1  ;;  %v585_v58 = vadd.f32 %v2058_v32, %v2060_v33 }
 0x142   : > { %v1031_v36 = vmax.f32 %v965_v53, 0.0  ;;  %v825_v37 = vadd.f32 %v824_v35, %v680_v30 }
 0x143   : > { %v826_v42 = vpop.f32.mrf.mxu0  ;;  %v989_v8 = vpop.f32.mrf.mxu1 }
 0x144   : > { %1048 = vst.msk [vmem:[%s2079_s12 + $0x18] sm:$0xff] %vm1044_vm1, %v1031_v36  ;;  %v970_v57 = vadd.f32 %v969_v56, %v825_v37  ;;  %v715_v56 = vadd.f32 %v2045_v21, %v570_v27  ;;  %v575_v36 = vadd.f32 %v2058_v32, %v2047_v24 }
 0x145   : > { %v829_v47 = vpop.f32.mrf.mxu0  ;;  %v1446_v12 = vpop.f32.mrf.mxu1 }
 0x146   : > { %v1032_v50 = vmax.f32 %v970_v57, 0.0  ;;  %v830_v51 = vadd.f32 %v829_v47, %v685_v43  ;;  %v720_v57 = vadd.f32 %v2049_v25, %v575_v36  ;;  %v580_v47 = vadd.f32 %v2058_v32, %v2051_v28 }
 0x147   : > { %v831_v54 = vpop.f32.mrf.mxu0  ;;  %v999_v16 = vpop.f32.mrf.mxu1 }
 0x148   : > { %1049 = vst.msk [vmem:[%s2079_s12 + $0x20] sm:$0xff] %vm1044_vm1, %v1032_v50  ;;  %v975_v61 = vadd.f32 %v1437_v22, %v830_v51 }
 0x149   : > { %v834_v40 = vpop.f32.mrf.mxu0  ;;  %v1449_v20 = vpop.f32.mrf.mxu1 }
 0x14a   : > { %v1033_v59 = vmax.f32 %v975_v61, 0.0  ;;  %v835_v62 = vadd.f32 %v834_v40, %v690_v55  ;;  %v725_v55 = vadd.f32 %v2053_v29, %v580_v47 }
 0x14b   : > { %v836_v63 = vpop.f32.mrf.mxu0  ;;  %v1009_v24 = vpop.f32.mrf.mxu1 }
 0x14c   : > { %1050 = vst.msk [vmem:[%s2079_s12 + $0x28] sm:$0xff] %vm1044_vm1, %v1033_v59  ;;  %v980_v1 = vadd.f32 %v979_v0, %v835_v62  ;;  %v730_v62 = vadd.f32 %v2062_v34, %v585_v58  ;;  %v590_v63 = vadd.f32 %v2058_v32, %v2065_v38 }
 0x14d   : > { %v839_v41 = vpop.f32.mrf.mxu0  ;;  %v1452_v28 = vpop.f32.mrf.mxu1 }
 0x14e   : > { %v1034_v6 = vmax.f32 %v980_v1, 0.0  ;;  %v840_v44 = vadd.f32 %v839_v41, %v695_v2 }
 0x14f   : > { %v841_v7 = vpop.f32.mrf.mxu0  ;;  %v1019_v2 = vpop.f32.mrf.mxu1 }
 0x150   : > { %1051 = vst.msk [vmem:[%s2079_s12 + $0x30] sm:$0xff] %vm1044_vm1, %v1034_v6  ;;  %v985_v5 = vadd.f32 %v1440_v60, %v840_v44 }
 0x151   : > { %v844_v10 = vpop.f32.mrf.mxu0 }
 0x152   : > { %v1035_v11 = vmax.f32 %v985_v5, 0.0  ;;  %v845_v14 = vadd.f32 %v844_v10, %v700_v45 }
 0x153   : > { %v846_v15 = vpop.f32.mrf.mxu0 }
 0x154   : > { %1052 = vst.msk [vmem:[%s2079_s12 + $0x38] sm:$0xff] %vm1044_vm1, %v1035_v11  ;;  %v990_v9 = vadd.f32 %v989_v8, %v845_v14 }
 0x155   : > { %v849_v52 = vpop.f32.mrf.mxu0 }
 0x156   : > { %v1036_v19 = vmax.f32 %v990_v9, 0.0  ;;  %v850_v22 = vadd.f32 %v849_v52, %v705_v18 }
 0x157   : > { %v851_v23 = vpop.f32.mrf.mxu0 }
 0x158   : > { %1053 = vst.msk [vmem:[%s2079_s12 + $0x40] sm:$0xff] %vm1044_vm1, %v1036_v19  ;;  %v995_v13 = vadd.f32 %v1443_v4, %v850_v22  ;;  %v735_v4 = vadd.f32 %v2067_v39, %v590_v63 }
 0x159   : > { %v854_v30 = vpop.f32.mrf.mxu0 }
 0x15a   : > { %v1037_v31 = vmax.f32 %v995_v13, 0.0  ;;  %v855_v53 = vadd.f32 %v854_v30, %v710_v26 }
 0x15b   : > { %v856_v35 = vpop.f32.mrf.mxu0 }
 0x15c   : > { %1054 = vst.msk [vmem:[%s2079_s12 + $0x48] sm:$0xff] %vm1044_vm1, %v1037_v31  ;;  %v1000_v17 = vadd.f32 %v999_v16, %v855_v53 }
 0x15d   : > { %v859_v37 = vpop.f32.mrf.mxu0 }
 0x15e   : > { %v1038_v42 = vmax.f32 %v1000_v17, 0.0  ;;  %v860_v43 = vadd.f32 %v859_v37, %v715_v56 }
 0x15f   : > { %v861_v46 = vpop.f32.mrf.mxu0 }
 0x160   : > { %1055 = vst.msk [vmem:[%s2079_s12 + $0x50] sm:$0xff] %vm1044_vm1, %v1038_v42  ;;  %v1005_v21 = vadd.f32 %v1446_v12, %v860_v43 }
 0x161   : > { %v864_v60 = vpop.f32.mrf.mxu0 }
 0x162   : > { %v1039_v50 = vmax.f32 %v1005_v21, 0.0  ;;  %v865_v51 = vadd.f32 %v864_v60, %v720_v57 }
 0x163   : > { %v866_v54 = vpop.f32.mrf.mxu0 }
 0x164   : > { %1056 = vst.msk [vmem:[%s2079_s12 + $0x58] sm:$0xff] %vm1044_vm1, %v1039_v50  ;;  %v1010_v25 = vadd.f32 %v1009_v24, %v865_v51 }
 0x165   : > { %v869_v61 = vpop.f32.mrf.mxu0 }
 0x166   : > { %v1040_v40 = vmax.f32 %v1010_v25, 0.0  ;;  %v870_v0 = vadd.f32 %v869_v61, %v725_v55 }
 0x167   : > { %v871_v59 = vpop.f32.mrf.mxu0 }
 0x168   : > { %1057 = vst.msk [vmem:[%s2079_s12 + $0x60] sm:$0xff] %vm1044_vm1, %v1040_v40  ;;  %v1015_v29 = vadd.f32 %v1449_v20, %v870_v0 }
 0x169   : > { %v874_v33 = vpop.f32.mrf.mxu0 }
 0x16a   : > { %v1041_v3 = vmax.f32 %v1015_v29, 0.0  ;;  %v875_v1 = vadd.f32 %v874_v33, %v730_v62 }
 0x16b   : > { %v876_v41 = vpop.f32.mrf.mxu0 }
 0x16c   : > { %1058 = vst.msk [vmem:[%s2079_s12 + $0x68] sm:$0xff] %vm1044_vm1, %v1041_v3  ;;  %v1020_v6 = vadd.f32 %v1019_v2, %v875_v1 }
 0x16d   : > { %v879_v44 = vpop.f32.mrf.mxu0 }
 0x16e   : > { %v1042_v34 = vmax.f32 %v1020_v6, 0.0  ;;  %v880_v7 = vadd.f32 %v879_v44, %v735_v4 }
 0x16f   : > { %v881_v45 = vpop.f32.mrf.mxu0 }
 0x170   : > { %1059 = vst.msk [vmem:[%s2079_s12 + $0x70] sm:$0xff] %vm1044_vm1, %v1042_v34  ;;  %v1025_v32 = vadd.f32 %v1452_v28, %v880_v7  ;;  %1067 = sbr.rel (!%p1675_p4) target bundleno = 414 (0x19e), region = 36 }
 0x172   : > { %v1043_v38 = vmax.f32 %v1025_v32, 0.0 }
 0x174   : > { %1060 = vst.msk [vmem:[%s2079_s12 + $0x78] sm:$0xff] %vm1044_vm1, %v1043_v38 }
 0x175   : > { %s2262_s25 = smov (!%p1070_p8, %s1069_s25), 16 }
 0x176   : > { %s1371_s5 = sshll.u32 %s2262_s25, 7 }
 0x177   : > { %p1374_p9 = scmp.eq.s32.totalorder %s1371_s5, 0 }
 0x178   : > { %s2163_s6 = sshrl.u32 (!%p1374_p9), %s2262_s25, 4 }
 0x179   : > { %1078 = sbr.rel (%p1374_p9) target bundleno = 414 (0x19e), region = 40  ;;  %p1375_p10 = scmp.le.s32.totalorder (!%p1374_p9), %s2163_s6, 0 }
 0x17e   : > { %1293 = sbr.rel (%p1375_p10) target bundleno = 397 (0x18d), region = 116  ;;  %s2255_s15 = smov (!%p1375_p10), %s2157_s4 }
 0x17f   : > { %s2256_s20 = smov (!%p1375_p10), %s2079_s12  ;;  %s2172_s27 = smov (!%p1375_p10), 0  }
 0x180   : > { %s2174_s7 = smov (!%p1375_p10), 0  }
 0x183 LB: >> { %v1171_v39 = vld [vmem:[%s1604_s20] sm:$0xff]  ;;  %v1173_v48 = vld [vmem:[%s1604_s20 + $0x8] sm:$0xff]  ;;  %v1175_v5 = vld [vmem:[%s1604_s20 + $0x10] sm:$0xff]  ;;  %s1203_s8 = sadd.s32 1, %s1608_s27  ;;  %s1165_s7 = sadd.s32 1, %s1612_s7   ;;  %s1612_s7 = sphi %s2174_s7, %s1165_s7   ;;  %s1608_s27 = sphi %s2172_s27, %s2257_s27   ;;  %s1604_s20 = sphi %s2256_s20, %s1208_s20   ;;  %s1600_s15 = sphi %s2255_s15, %s1209_s15  }
 0x184   : >> { %1172 = vst [vmem:[%s1600_s15] sm:$0xff] %v1171_v39  ;;  %1174 = vst [vmem:[%s1600_s15 + $0x8] sm:$0xff] %v1173_v48  ;;  %v1177_v10 = vld [vmem:[%s1604_s20 + $0x18] sm:$0xff]  ;;  %v1179_v8 = vld [vmem:[%s1604_s20 + $0x20] sm:$0xff]  ;;  %p1204_p11 = scmp.ge.s32.totalorder %s1203_s8, %s2163_s6  ;;  %p1164_p12 = scmp.ge.s32.totalorder %s1165_s7, %s2163_s6 }
 0x185   : >> { %1176 = vst [vmem:[%s1600_s15 + $0x10] sm:$0xff] %v1175_v5  ;;  %v1181_v11 = vld [vmem:[%s1604_s20 + $0x28] sm:$0xff]  ;;  %1178 = vst [vmem:[%s1600_s15 + $0x18] sm:$0xff] %v1177_v10  ;;  %v1183_v14 = vld [vmem:[%s1604_s20 + $0x30] sm:$0xff] }
 0x186   : >> { %1180 = vst [vmem:[%s1600_s15 + $0x20] sm:$0xff] %v1179_v8  ;;  %1182 = vst [vmem:[%s1600_s15 + $0x28] sm:$0xff] %v1181_v11  ;;  %v1185_v15 = vld [vmem:[%s1604_s20 + $0x38] sm:$0xff]  ;;  %v1187_v18 = vld [vmem:[%s1604_s20 + $0x40] sm:$0xff]  ;;  %s2264_s8 = smov (%p1204_p11, %s1203_s8), 0 }
 0x187   : >> { %1184 = vst [vmem:[%s1600_s15 + $0x30] sm:$0xff] %v1183_v14  ;;  %1186 = vst [vmem:[%s1600_s15 + $0x38] sm:$0xff] %v1185_v15  ;;  %v1189_v49 = vld [vmem:[%s1604_s20 + $0x48] sm:$0xff]  ;;  %v1191_v9 = vld [vmem:[%s1604_s20 + $0x50] sm:$0xff]  ;;  %s1376_s9 = sshll.u32 %s2264_s8, 7  ;;  %s2257_s27 = smov %s2264_s8 }
 0x188   : >> { %1188 = vst [vmem:[%s1600_s15 + $0x40] sm:$0xff] %v1187_v18  ;;  %v1193_v52 = vld [vmem:[%s1604_s20 + $0x58] sm:$0xff]  ;;  %1190 = vst [vmem:[%s1600_s15 + $0x48] sm:$0xff] %v1189_v49  ;;  %v1195_v12 = vld [vmem:[%s1604_s20 + $0x60] sm:$0xff]  ;;  %1167 = sbr.rel (!%p1164_p12) target bundleno = 387 (0x183), region = 122 }
 0x189   : >> { %1192 = vst [vmem:[%s1600_s15 + $0x50] sm:$0xff] %v1191_v9  ;;  %1194 = vst [vmem:[%s1600_s15 + $0x58] sm:$0xff] %v1193_v52  ;;  %v1197_v19 = vld [vmem:[%s1604_s20 + $0x68] sm:$0xff]  ;;  %v1199_v22 = vld [vmem:[%s1604_s20 + $0x70] sm:$0xff] }
 0x18a   : >> { %1196 = vst [vmem:[%s1600_s15 + $0x60] sm:$0xff] %v1195_v12  ;;  %1198 = vst [vmem:[%s1600_s15 + $0x68] sm:$0xff] %v1197_v19  ;;  %v1201_v23 = vld [vmem:[%s1604_s20 + $0x78] sm:$0xff]  ;;  %s1208_s20 = scalar_lea.vmem %s2079_s12, %s1376_s9 [#allocation2]  }
 0x18b   : >> { %1200 = vst [vmem:[%s1600_s15 + $0x70] sm:$0xff] %v1199_v22  ;;  %1202 = vst [vmem:[%s1600_s15 + $0x78] sm:$0xff] %v1201_v23  ;;  %s1209_s15 = scalar_lea.vmem %s2157_s4, %s1376_s9  }
 0x18d PF: > { %s2232_s10 = sand.u32 15, %s2262_s25   ;;  %s1387_s11 = sshll.u32 %s2163_s6, 7 }
 0x18e   : > { %s1214_s14 = scalar_lea.vmem %s2079_s12, %s1387_s11 [#allocation2]   ;;  %s1216_s17 = scalar_lea.vmem %s2157_s4, %s1387_s11  }
 0x18f   : > { %p1381_p13 = scmp.le.s32.totalorder %s2232_s10, 0 }
 0x190   : > { %s1614_s18 = smov (!%p1381_p13), %s1216_s17   ;;  %s1618_s21 = smov (!%p1381_p13), %s1214_s14  }
 0x191   : > { %1307 = sbr.rel (%p1381_p13) target bundleno = 414 (0x19e), region = 127  ;;  %s1622_s30 = smov (!%p1381_p13), 0  }
 0x192   : > { %s1626_s22 = smov (!%p1381_p13), 0  }
 0x196 LB: >> { %v1226_v26 = vld [vmem:[%s1620_s21] sm:$0xff]  ;;  %s1228_s23 = sadd.s32 1, %s1624_s30  ;;  %s1220_s22 = sadd.s32 1, %s1628_s22   ;;  %s1628_s22 = sphi %s1626_s22, %s1220_s22   ;;  %s1624_s30 = sphi %s1622_s30, %s1623_s30   ;;  %s1620_s21 = sphi %s1618_s21, %s1233_s21   ;;  %s1616_s18 = sphi %s1614_s18, %s1234_s18  }
 0x197   : >> { %1227 = vst [vmem:[%s1616_s18] sm:$0xff] %v1226_v26  ;;  %p1229_p0 = scmp.ge.s32.totalorder %s1228_s23, %s2232_s10  ;;  %p1219_p1 = scmp.ge.s32.totalorder %s1220_s22, %s2232_s10 }
 0x199   : >> { %s2266_s23 = smov (%p1229_p0, %s1228_s23), 0  ;;  %1222 = sbr.rel (!%p1219_p1) target bundleno = 406 (0x196), region = 133 }
 0x19a   : >> { %s1382_s24 = sshll.u32 %s2266_s23, 3  ;;  %s1623_s30 = smov %s2266_s23  }
 0x19b   : >> { %s1233_s21 = scalar_lea.vmem %s1214_s14, %s1382_s24 [#allocation2]   ;;  %s1234_s18 = scalar_lea.vmem %s1216_s17, %s1382_s24  }
 0x19e PF: > { %p10_p2 = scmp.ge.s32.totalorder %s1665_s16, 4   ;;  %s2258_s12 = smov %s1592_s13 }
 0x19f   : > { %s2259_s13 = smov %s1673_s19  ;;  %s2260_s14 = smov %s1665_s16 }
 0x1a0   :  { %12 = sbr.rel (!%p10_p2) target bundleno = 2 (0x2), region = 144 }

// kernel: cnn_femnist_forward.9
= control target key start
LH: loop header
LB: loop body
LE: loop exit
PB: predicated region body
PF: predicated region fallthrough
CT: control target
= control target key end

     0   :  { %10 = vsyncpa [#allocation5], 0  ;;  %s3441_s18 = smov 0   ;;  %s3443_s19 = smov 0   ;;  %s4170_s0 = inlined_call_operand.vmem [shape: f32[2,1600], index: 0, kind: input, shape index: {}]   ;;  %s4171_s1 = inlined_call_operand.vmem [shape: bf16[2048,1600], index: 1, kind: input, shape index: {}]   ;;  %s4172_s2 = inlined_call_operand.vmem [shape: f32[1,2048], index: 2, kind: input, shape index: {}]   ;;  %s4173_s3 = inlined_call_operand.vmem [shape: bf16[62,2048], index: 3, kind: input, shape index: {}]   ;;  %s4174_s4 = inlined_call_operand.vmem [shape: f32[1,62], index: 4, kind: input, shape index: {}]   ;;  %s4175_s5 = inlined_call_operand.hbm [shape: f32[2,62], index: 5, kind: output, shape index: {}]  }
   0x1   :  { %s3445_s20 = smov 0  }
   0x2 LB: > { %s3457_s21 = sadd.s32 4294967295, %s3406_s20   ;;  %s3460_s22 = sadd.s32 1, %s3406_s20   ;;  %s3406_s20 = sphi %s3445_s20, %s4178_s20   ;;  %s3402_s19 = sphi %s3443_s19, %s4177_s19   ;;  %s3398_s18 = sphi %s3441_s18, %s4176_s18  }
   0x3   : > { %s93_s23 = ssub.s32 %s3406_s20, %s3460_s22  ;;  %s96_s24 = sadd.s32 1, %s3402_s19 }
   0x4   : > { %p94_p0 = scmp.eq.s32.totalorder %s93_s23, 0  ;;  %p103_p1 = scmp.ne.s32.totalorder %s3402_s19, %s3398_s18 }
   0x5   : > { %p104_p2 = scmp.eq.s32.totalorder %s3406_s20, 0  ;;  %p3166_p4 = scmp.ge.s32.totalorder %s3406_s20, 4 }
   0x6   : > { %s3469_s25 = scalar_select %p94_p0, %s3402_s19, %s96_s24  }
   0x7   : > { %p105_p3 = por %p104_p2, %p103_p1  ;;  %177 = sbr.rel (%p3166_p4) target bundleno = 24 (0x18), region = 24 }
   0xc   : > { %198 = sbr.rel (!%p105_p3) target bundleno = 24 (0x18), region = 36  ;;  %s200_s26 = sand.u32 (%p105_p3), 1, %s3402_s19  }
   0xd   : > { %s3249_s27 = sshll.u32 (%p105_p3), %s3406_s20, 4  ;;  %s3167_s28 = sshll.u32 (%p105_p3), %s200_s26, 7 }
   0xe   : > { %s3477_s6 = scalar_lea.vmem (%p105_p3), %s4173_s3, %s3249_s27  ;;  %s202_s7 = scalar_lea.vmem (%p105_p3), [#allocation3], %s3167_s28 }
   0xf   : > { %v218_v0 = vld [vmem:[%s3477_s6] sm:$0xff] (%p105_p3)  ;;  %v220_v1 = vld [vmem:[%s3477_s6 + $0x8] sm:$0xff] (%p105_p3) }
  0x10   : > { %v222_v2 = vld [vmem:[%s3477_s6 + $0x40] sm:$0xff] (%p105_p3)  ;;  %219 = vst [vmem:[%s202_s7] sm:$0xff] (%p105_p3), %v218_v0  ;;  %221 = vst [vmem:[%s202_s7 + $0x8] sm:$0xff] (%p105_p3), %v220_v1  ;;  %v224_v3 = vld [vmem:[%s3477_s6 + $0x48] sm:$0xff] (%p105_p3) }
  0x11   : > { %223 = vst [vmem:[%s202_s7 + $0x10] sm:$0xff] %v222_v2  ;;  %v226_v4 = vld [vmem:[%s3477_s6 + $0x80] sm:$0xff]  ;;  %v228_v5 = vld [vmem:[%s3477_s6 + $0x88] sm:$0xff]  ;;  %225 = vst [vmem:[%s202_s7 + $0x18] sm:$0xff] %v224_v3 }
  0x12   : > { %227 = vst [vmem:[%s202_s7 + $0x20] sm:$0xff] %v226_v4  ;;  %229 = vst [vmem:[%s202_s7 + $0x28] sm:$0xff] %v228_v5  ;;  %v230_v6 = vld [vmem:[%s3477_s6 + $0xc0] sm:$0xff]  ;;  %v232_v7 = vld [vmem:[%s3477_s6 + $0xc8] sm:$0xff] }
  0x13   : > { %v234_v8 = vld [vmem:[%s3477_s6 + $0x100] sm:$0xff]  ;;  %231 = vst [vmem:[%s202_s7 + $0x30] sm:$0xff] %v230_v6  ;;  %233 = vst [vmem:[%s202_s7 + $0x38] sm:$0xff] %v232_v7  ;;  %v236_v9 = vld [vmem:[%s3477_s6 + $0x108] sm:$0xff] }
  0x14   : > { %235 = vst [vmem:[%s202_s7 + $0x40] sm:$0xff] %v234_v8  ;;  %v238_v10 = vld [vmem:[%s3477_s6 + $0x140] sm:$0xff]  ;;  %v240_v11 = vld [vmem:[%s3477_s6 + $0x148] sm:$0xff]  ;;  %237 = vst [vmem:[%s202_s7 + $0x48] sm:$0xff] %v236_v9 }
  0x15   : > { %239 = vst [vmem:[%s202_s7 + $0x50] sm:$0xff] %v238_v10  ;;  %241 = vst [vmem:[%s202_s7 + $0x58] sm:$0xff] %v240_v11  ;;  %v242_v12 = vld [vmem:[%s3477_s6 + $0x180] sm:$0xff]  ;;  %v244_v13 = vld [vmem:[%s3477_s6 + $0x188] sm:$0xff] }
  0x16   : > { %v246_v14 = vld [vmem:[%s3477_s6 + $0x1c0] sm:$0xff]  ;;  %243 = vst [vmem:[%s202_s7 + $0x60] sm:$0xff] %v242_v12  ;;  %245 = vst [vmem:[%s202_s7 + $0x68] sm:$0xff] %v244_v13  ;;  %v248_v15 = vld [vmem:[%s3477_s6 + $0x1c8] sm:$0xff] }
  0x17   : > { %247 = vst [vmem:[%s202_s7 + $0x70] sm:$0xff] %v246_v14  ;;  %249 = vst [vmem:[%s202_s7 + $0x78] sm:$0xff] %v248_v15 }
  0x18 PF: > { %p3170_p5 = scmp.ge.s32.totalorder %s3406_s20, 1  ;;  %p254_p6 = scmp.lt.s32.totalorder %s3406_s20, 5 }
  0x1a   : > { %p255_p7 = pnand %p3170_p5, %p254_p6 }
  0x1b   : > { %s261_s8 = sand.u32 (!%p255_p7), 1, %s3398_s18   ;;  %s3172_s9 = sshll.u32 (!%p255_p7), %s3457_s21, 6 }
  0x1c   : > { %258 = sbr.rel (%p255_p7) target bundleno = 1302 (0x516), region = 59  ;;  %s3171_s10 = sshll.u32 (!%p255_p7), %s261_s8, 7 }
  0x1d   : > { %p294_p8 = scmp.lt.s32.totalorder (!%p255_p7), %s3172_s9, 255  ;;  %s3174_s11 = sshll.u32 (!%p255_p7), %s3457_s21, 2 }
  0x1e   : > { %p301_p9 = scmp.lt.s32.totalorder (!%p255_p7), %s3174_s11, 15  ;;  %s3511_s18 = scalar_lea.vmem (!%p255_p7), [#allocation3], %s3171_s10 }
  0x1f   : > { %p3175_p10 = scmp.ne.s32.totalorder (!%p255_p7), %s3457_s21, 0 }
  0x21   : > { %s4180_s9 = smov (!%p294_p8, %s3172_s9), 255  ;;  %s4182_s11 = smov (!%p301_p9, %s3174_s11), 15 }
  0x22   : > { %s3318_s12 = smul.u32 52, %s4180_s9  ;;  %s303_s20 = scalar_lea.vmem %s4172_s2, %s4182_s11 }
  0x23   : > { %309 = sbr.rel (%p3175_p10) target bundleno = 42 (0x2a), region = 67 }
  0x24   : > { %s3505_s15 = scalar_lea.vmem %s4171_s1, %s3318_s12 }
  0x28   : > { %vm310_vm0 = vcmask 500736   ;;  %v3408_v16 = vmov 0.0  }
  0x29   : > { %311 = vst.msk [vmem:[#allocation2] sm:$0x3] %vm310_vm0, %v3408_v16 }
  0x2a PF: > { %v417_v17 = vld [vmem:[%s3505_s15 + $0x30c] sm:$0xff]  ;;  %v418_v18 = vld [vmem:[%s3505_s15 + $0x314] sm:$0xff]  ;;  %v411_v24 = vld [vmem:[%s3505_s15 + $0x2e0] sm:$0xff]  ;;  %v1598_v5 = vlaneseq  ;;  %v3409_v14 = vmov 1983009808   ;;  %vm1692_vm1 = vcmask 523264  }
  0x2b   : > { %v410_v19 = vld [vmem:[%s3505_s15 + $0x2d8] sm:$0xff]  ;;  %v956_v20 = vunpack.c.h.bf16 %v417_v17  ;;  %v958_v21 = vunpack.c.h.bf16 %v418_v18  ;;  %v955_v22 = vunpack.c.l.bf16 %v417_v17  ;;  %v957_v23 = vunpack.c.l.bf16 %v418_v18  ;;  %v403_v27 = vld [vmem:[%s3505_s15 + $0x2a4] sm:$0xff]  ;;  %v404_v28 = vld [vmem:[%s3505_s15 + $0x2ac] sm:$0xff]  ;;  %p3243_p11 = scmp.ne.s32.totalorder %s3457_s21, 3 }
  0x2c   : > { %v943_v25 = vunpack.c.h.bf16 %v410_v19  ;;  %v945_v26 = vunpack.c.h.bf16 %v411_v24  ;;  %v942_v29 = vunpack.c.l.bf16 %v410_v19  ;;  %v944_v30 = vunpack.c.l.bf16 %v411_v24  ;;  %v396_v33 = vld [vmem:[%s3505_s15 + $0x270] sm:$0xff]  ;;  %v397_v34 = vld [vmem:[%s3505_s15 + $0x278] sm:$0xff]  ;;  %v390_v40 = vld [vmem:[%s3505_s15 + $0x244] sm:$0xff] }
  0x2d   : > { %1887 = vmatprep.subr.mxu0 %v956_v20  ;;  %1958 = vmatprep.subr.mxu1 %v958_v21  ;;  %v930_v31 = vunpack.c.h.bf16 %v403_v27  ;;  %v932_v32 = vunpack.c.h.bf16 %v404_v28  ;;  %v929_v35 = vunpack.c.l.bf16 %v403_v27  ;;  %v931_v36 = vunpack.c.l.bf16 %v404_v28  ;;  %v389_v39 = vld [vmem:[%s3505_s15 + $0x23c] sm:$0xff]  ;;  %v382_v45 = vld [vmem:[%s3505_s15 + $0x208] sm:$0xff]  ;;  %v383_v46 = vld [vmem:[%s3505_s15 + $0x210] sm:$0xff] }
  0x2e   : > { %1888 = vmatpush1.xpose.msra.mxu0 %v955_v22  ;;  %1959 = vmatpush1.xpose.msra.mxu1 %v957_v23  ;;  %v917_v37 = vunpack.c.h.bf16 %v396_v33  ;;  %v919_v38 = vunpack.c.h.bf16 %v397_v34  ;;  %v916_v41 = vunpack.c.l.bf16 %v396_v33  ;;  %v918_v42 = vunpack.c.l.bf16 %v397_v34  ;;  %v375_v51 = vld [vmem:[%s3505_s15 + $0x1d4] sm:$0xff]  ;;  %v376_v52 = vld [vmem:[%s3505_s15 + $0x1dc] sm:$0xff]  ;;  %v369_v58 = vld [vmem:[%s3505_s15 + $0x1a8] sm:$0xff] }
  0x2f   : > { %1889 = vmatprep.subr.mxu0 %v943_v25  ;;  %1960 = vmatprep.subr.mxu1 %v945_v26  ;;  %v904_v43 = vunpack.c.h.bf16 %v389_v39  ;;  %v906_v44 = vunpack.c.h.bf16 %v390_v40  ;;  %v903_v47 = vunpack.c.l.bf16 %v389_v39  ;;  %v905_v48 = vunpack.c.l.bf16 %v390_v40  ;;  %v368_v57 = vld [vmem:[%s3505_s15 + $0x1a0] sm:$0xff]  ;;  %v361_v63 = vld [vmem:[%s3505_s15 + $0x16c] sm:$0xff]  ;;  %v362_v0 = vld [vmem:[%s3505_s15 + $0x174] sm:$0xff] }
  0x30   : > { %v891_v49 = vunpack.c.h.bf16 %v382_v45  ;;  %v893_v50 = vunpack.c.h.bf16 %v383_v46  ;;  %v890_v53 = vunpack.c.l.bf16 %v382_v45  ;;  %v892_v54 = vunpack.c.l.bf16 %v383_v46  ;;  %v354_v6 = vld [vmem:[%s3505_s15 + $0x138] sm:$0xff]  ;;  %v355_v7 = vld [vmem:[%s3505_s15 + $0x140] sm:$0xff]  ;;  %v348_v17 = vld [vmem:[%s3505_s15 + $0x10c] sm:$0xff] }
  0x31   : > { %v878_v55 = vunpack.c.h.bf16 %v375_v51  ;;  %v880_v56 = vunpack.c.h.bf16 %v376_v52  ;;  %v877_v59 = vunpack.c.l.bf16 %v375_v51  ;;  %v879_v60 = vunpack.c.l.bf16 %v376_v52  ;;  %v1592_v10 = vld [vmem:[%s4170_s0] sm:$0xff]  ;;  %v340_v25 = vld [vmem:[%s3505_s15 + $0xd0] sm:$0xff]  ;;  %v341_v26 = vld [vmem:[%s3505_s15 + $0xd8] sm:$0xff] }
  0x32   : > { %1890 = vmatpush1.xpose.msra.mxu0 %v942_v29  ;;  %1961 = vmatpush1.xpose.msra.mxu1 %v944_v30  ;;  %v865_v61 = vunpack.c.h.bf16 %v368_v57  ;;  %v867_v62 = vunpack.c.h.bf16 %v369_v58  ;;  %v864_v1 = vunpack.c.l.bf16 %v368_v57  ;;  %v866_v2 = vunpack.c.l.bf16 %v369_v58  ;;  %v347_v16 = vld [vmem:[%s3505_s15 + $0x104] sm:$0xff] }
  0x33   : > { %1891 = vmatprep.subr.mxu0 %v930_v31  ;;  %1962 = vmatprep.subr.mxu1 %v932_v32  ;;  %v852_v3 = vunpack.c.h.bf16 %v361_v63  ;;  %v854_v4 = vunpack.c.h.bf16 %v362_v0  ;;  %v851_v8 = vunpack.c.l.bf16 %v361_v63  ;;  %v853_v9 = vunpack.c.l.bf16 %v362_v0 }
  0x34   : > { %v839_v11 = vunpack.c.h.bf16 %v354_v6  ;;  %v841_v12 = vunpack.c.h.bf16 %v355_v7  ;;  %v3537_v13 = vshrl.u32 %v1598_v5, 7  ;;  %v1624_v15 = vunpack.c.l.s4 %v3409_v14  ;;  %v508_v14 = vld [vmem:[%s3505_s15 + $0x5b0] sm:$0xff] }
  0x35   : > { %v1622_v19 = vcombine.high %v1592_v10, %v1592_v10  ;;  %v838_v20 = vunpack.c.l.bf16 %v354_v6  ;;  %v840_v21 = vunpack.c.l.bf16 %v355_v7  ;;  %v826_v22 = vunpack.c.h.bf16 %v347_v16  ;;  %v515_v7 = vld [vmem:[%s3505_s15 + $0x5e4] sm:$0xff] }
  0x36   : > { %1892 = vmatpush1.xpose.msra.mxu0 %v929_v35  ;;  %1963 = vmatpush1.xpose.msra.mxu1 %v931_v36  ;;  %v1625_v18 = vunpack.c.0.s8 %v1624_v15  ;;  %v828_v23 = vunpack.c.h.bf16 %v348_v17  ;;  %v825_v29 = vunpack.c.l.bf16 %v347_v16  ;;  %v827_v30 = vunpack.c.l.bf16 %v348_v17  ;;  %v333_v35 = vld [vmem:[%s3505_s15 + $0x9c] sm:$0xff]  ;;  %v334_v36 = vld [vmem:[%s3505_s15 + $0xa4] sm:$0xff] }
  0x37   : > { %1893 = vmatprep.subr.mxu0 %v917_v37  ;;  %1964 = vmatprep.subr.mxu1 %v919_v38  ;;  %v813_v31 = vunpack.c.h.bf16 %v340_v25  ;;  %v815_v32 = vunpack.c.h.bf16 %v341_v26  ;;  %v812_v37 = vunpack.c.l.bf16 %v340_v25  ;;  %v814_v38 = vunpack.c.l.bf16 %v341_v26  ;;  %v509_v15 = vld [vmem:[%s3505_s15 + $0x5b8] sm:$0xff] }
  0x38   : > { %v3542_v24 = vsub.s32 %v1625_v18, %v3537_v13  ;;  %v800_v39 = vunpack.c.h.bf16 %v333_v35  ;;  %v802_v40 = vunpack.c.h.bf16 %v334_v36  ;;  %v1137_v16 = vunpack.c.l.bf16 %v515_v7 }
  0x39   : > { %v1125_v18 = vunpack.c.h.bf16 %v508_v14  ;;  %vm3075_vm2 = vcmask 500736  }
  0x3a   : > { %1894 = vmatpush1.xpose.msra.mxu0 %v916_v41  ;;  %1965 = vmatpush1.xpose.msra.mxu1 %v918_v42  ;;  %v3547_v27 = vrot.slane %v1592_v10, %v3542_v24  ;;  %v3550_v28 = vrot.slane %v1622_v19, %v3542_v24  ;;  %v326_v41 = vld [vmem:[%s3505_s15 + $0x68] sm:$0xff]  ;;  %v327_v42 = vld [vmem:[%s3505_s15 + $0x70] sm:$0xff]  ;;  %v1127_v19 = vunpack.c.h.bf16 %v509_v15 }
  0x3b   : > { %1895 = vmatprep.subr.mxu0 %v904_v43  ;;  %1966 = vmatprep.subr.mxu1 %v906_v44  ;;  %v799_v43 = vunpack.c.l.bf16 %v333_v35  ;;  %v801_v44 = vunpack.c.l.bf16 %v334_v36  ;;  %v787_v45 = vunpack.c.h.bf16 %v326_v41  ;;  %v789_v46 = vunpack.c.h.bf16 %v327_v42 }
  0x3c   : > { %v3554_v33 = vcombine.high %v3547_v27, %v3547_v27  ;;  %v3558_v34 = vcombine.high %v3550_v28, %v3550_v28 }
  0x3e   : > { %1896 = vmatpush1.xpose.msra.mxu0 %v903_v47  ;;  %1967 = vmatpush1.xpose.msra.mxu1 %v905_v48  ;;  %v319_v47 = vld [vmem:[%s3505_s15 + $0x34] sm:$0xff]  ;;  %v320_v48 = vld [vmem:[%s3505_s15 + $0x3c] sm:$0xff] }
  0x3f   : > { %1897 = vmatprep.subr.mxu0 %v891_v49  ;;  %1968 = vmatprep.subr.mxu1 %v893_v50  ;;  %v786_v49 = vunpack.c.l.bf16 %v326_v41  ;;  %v788_v50 = vunpack.c.l.bf16 %v327_v42  ;;  %v774_v51 = vunpack.c.h.bf16 %v319_v47  ;;  %v776_v52 = vunpack.c.h.bf16 %v320_v48 }
  0x40   : > { %1951 = vmatprep.mubr.f32.mxu0 %v3554_v33  ;;  %2022 = vmatprep.mubr.f32.mxu1 %v3558_v34 }
  0x42   : > { %1898 = vmatpush1.xpose.msra.mxu0 %v890_v53  ;;  %1969 = vmatpush1.xpose.msra.mxu1 %v892_v54  ;;  %v312_v53 = vld [vmem:[%s3505_s15] sm:$0xff]  ;;  %v313_v54 = vld [vmem:[%s3505_s15 + $0x8] sm:$0xff] }
  0x43   : > { %1899 = vmatprep.subr.mxu0 %v878_v55  ;;  %1970 = vmatprep.subr.mxu1 %v880_v56  ;;  %v773_v55 = vunpack.c.l.bf16 %v319_v47  ;;  %v775_v56 = vunpack.c.l.bf16 %v320_v48  ;;  %v761_v57 = vunpack.c.h.bf16 %v312_v53  ;;  %v763_v58 = vunpack.c.h.bf16 %v313_v54 }
  0x46   : > { %1900 = vmatpush1.xpose.msra.mxu0 %v877_v59  ;;  %1971 = vmatpush1.xpose.msra.mxu1 %v879_v60  ;;  %v529_v59 = vld [vmem:[%s3505_s15 + $0x64c] sm:$0xff]  ;;  %v530_v60 = vld [vmem:[%s3505_s15 + $0x654] sm:$0xff] }
  0x47   : > { %1901 = vmatprep.subr.mxu0 %v865_v61  ;;  %1972 = vmatprep.subr.mxu1 %v867_v62  ;;  %v760_v61 = vunpack.c.l.bf16 %v312_v53  ;;  %v762_v62 = vunpack.c.l.bf16 %v313_v54  ;;  %v1164_v63 = vunpack.c.h.bf16 %v529_v59  ;;  %v1166_v0 = vunpack.c.h.bf16 %v530_v60 }
  0x4a   : > { %1902 = vmatpush1.xpose.msra.mxu0 %v864_v1  ;;  %1973 = vmatpush1.xpose.msra.mxu1 %v866_v2  ;;  %v522_v1 = vld [vmem:[%s3505_s15 + $0x618] sm:$0xff]  ;;  %v523_v2 = vld [vmem:[%s3505_s15 + $0x620] sm:$0xff] }
  0x4b   : > { %1903 = vmatprep.subr.mxu0 %v852_v3  ;;  %1974 = vmatprep.subr.mxu1 %v854_v4  ;;  %v1163_v3 = vunpack.c.l.bf16 %v529_v59  ;;  %v1165_v4 = vunpack.c.l.bf16 %v530_v60  ;;  %v1151_v5 = vunpack.c.h.bf16 %v522_v1  ;;  %v1153_v6 = vunpack.c.h.bf16 %v523_v2 }
  0x4c   : > { %v1152_v10 = vunpack.c.l.bf16 %v523_v2 }
  0x4e   : > { %1904 = vmatpush1.xpose.msra.mxu0 %v851_v8  ;;  %1975 = vmatpush1.xpose.msra.mxu1 %v853_v9  ;;  %v516_v8 = vld [vmem:[%s3505_s15 + $0x5ec] sm:$0xff]  ;;  %v1150_v9 = vunpack.c.l.bf16 %v522_v1 }
  0x4f   : > { %1905 = vmatprep.subr.mxu0 %v839_v11  ;;  %1976 = vmatprep.subr.mxu1 %v841_v12  ;;  %v1138_v11 = vunpack.c.h.bf16 %v515_v7  ;;  %v1140_v12 = vunpack.c.h.bf16 %v516_v8  ;;  %v1139_v17 = vunpack.c.l.bf16 %v516_v8 }
  0x52   : > { %1906 = vmatpush1.xpose.msra.mxu0 %v838_v20  ;;  %1977 = vmatpush1.xpose.msra.mxu1 %v840_v21  ;;  %v501_v20 = vld [vmem:[%s3505_s15 + $0x57c] sm:$0xff]  ;;  %v502_v21 = vld [vmem:[%s3505_s15 + $0x584] sm:$0xff] }
  0x53   : > { %1907 = vmatprep.subr.mxu0 %v826_v22  ;;  %1978 = vmatprep.subr.mxu1 %v828_v23  ;;  %v1124_v22 = vunpack.c.l.bf16 %v508_v14  ;;  %v1126_v23 = vunpack.c.l.bf16 %v509_v15  ;;  %v1112_v25 = vunpack.c.h.bf16 %v501_v20  ;;  %v1114_v26 = vunpack.c.h.bf16 %v502_v21 }
  0x56   : > { %1908 = vmatpush1.xpose.msra.mxu0 %v825_v29  ;;  %1979 = vmatpush1.xpose.msra.mxu1 %v827_v30  ;;  %v494_v29 = vld [vmem:[%s3505_s15 + $0x548] sm:$0xff]  ;;  %v495_v30 = vld [vmem:[%s3505_s15 + $0x550] sm:$0xff] }
  0x57   : > { %1909 = vmatprep.subr.mxu0 %v813_v31  ;;  %1980 = vmatprep.subr.mxu1 %v815_v32  ;;  %v1111_v31 = vunpack.c.l.bf16 %v501_v20  ;;  %v1113_v32 = vunpack.c.l.bf16 %v502_v21  ;;  %v1099_v35 = vunpack.c.h.bf16 %v494_v29  ;;  %v1101_v36 = vunpack.c.h.bf16 %v495_v30 }
  0x5a   : > { %1910 = vmatpush1.xpose.msra.mxu0 %v812_v37  ;;  %1981 = vmatpush1.xpose.msra.mxu1 %v814_v38  ;;  %v487_v37 = vld [vmem:[%s3505_s15 + $0x514] sm:$0xff]  ;;  %v488_v38 = vld [vmem:[%s3505_s15 + $0x51c] sm:$0xff] }
  0x5b   : > { %1911 = vmatprep.subr.mxu0 %v800_v39  ;;  %1982 = vmatprep.subr.mxu1 %v802_v40  ;;  %v1098_v39 = vunpack.c.l.bf16 %v494_v29  ;;  %v1100_v40 = vunpack.c.l.bf16 %v495_v30  ;;  %v1086_v41 = vunpack.c.h.bf16 %v487_v37  ;;  %v1088_v42 = vunpack.c.h.bf16 %v488_v38 }
  0x5e   : > { %1912 = vmatpush1.xpose.msra.mxu0 %v799_v43  ;;  %1983 = vmatpush1.xpose.msra.mxu1 %v801_v44  ;;  %v480_v43 = vld [vmem:[%s3505_s15 + $0x4e0] sm:$0xff]  ;;  %v481_v44 = vld [vmem:[%s3505_s15 + $0x4e8] sm:$0xff] }
  0x5f   : > { %1913 = vmatprep.subr.mxu0 %v787_v45  ;;  %1984 = vmatprep.subr.mxu1 %v789_v46  ;;  %v1085_v45 = vunpack.c.l.bf16 %v487_v37  ;;  %v1087_v46 = vunpack.c.l.bf16 %v488_v38  ;;  %v1073_v47 = vunpack.c.h.bf16 %v480_v43  ;;  %v1075_v48 = vunpack.c.h.bf16 %v481_v44 }
  0x62   : > { %1914 = vmatpush1.xpose.msra.mxu0 %v786_v49  ;;  %1985 = vmatpush1.xpose.msra.mxu1 %v788_v50  ;;  %v473_v49 = vld [vmem:[%s3505_s15 + $0x4ac] sm:$0xff]  ;;  %v474_v50 = vld [vmem:[%s3505_s15 + $0x4b4] sm:$0xff] }
  0x63   : > { %1915 = vmatprep.subr.mxu0 %v774_v51  ;;  %1986 = vmatprep.subr.mxu1 %v776_v52  ;;  %v1072_v51 = vunpack.c.l.bf16 %v480_v43  ;;  %v1074_v52 = vunpack.c.l.bf16 %v481_v44  ;;  %v1060_v53 = vunpack.c.h.bf16 %v473_v49  ;;  %v1062_v54 = vunpack.c.h.bf16 %v474_v50  ;;  %v1593_v43 = vld [vmem:[%s4170_s0 + $0x8] sm:$0xff] }
  0x66   : > { %1916 = vmatpush1.xpose.msra.mxu0 %v773_v55  ;;  %1987 = vmatpush1.xpose.msra.mxu1 %v775_v56  ;;  %v466_v55 = vld [vmem:[%s3505_s15 + $0x478] sm:$0xff]  ;;  %v467_v56 = vld [vmem:[%s3505_s15 + $0x480] sm:$0xff] }
  0x67   : > { %1917 = vmatprep.subr.mxu0 %v761_v57  ;;  %1988 = vmatprep.subr.mxu1 %v763_v58  ;;  %v1059_v57 = vunpack.c.l.bf16 %v473_v49  ;;  %v1061_v58 = vunpack.c.l.bf16 %v474_v50  ;;  %v1047_v59 = vunpack.c.h.bf16 %v466_v55  ;;  %v1049_v60 = vunpack.c.h.bf16 %v467_v56 }
  0x68   : > { %v1639_v49 = vcombine.high %v1593_v43, %v1593_v43 }
  0x6a   : > { %1918 = vmatpush1.xpose.msra.mxu0 %v760_v61  ;;  %1989 = vmatpush1.xpose.msra.mxu1 %v762_v62  ;;  %v459_v61 = vld [vmem:[%s3505_s15 + $0x444] sm:$0xff]  ;;  %v460_v62 = vld [vmem:[%s3505_s15 + $0x44c] sm:$0xff] }
  0x6b   : > { %1919 = vmatprep.subr.mxu0 %v1164_v63  ;;  %1990 = vmatprep.subr.mxu1 %v1166_v0  ;;  %v1046_v63 = vunpack.c.l.bf16 %v466_v55  ;;  %v1048_v0 = vunpack.c.l.bf16 %v467_v56  ;;  %v1034_v1 = vunpack.c.h.bf16 %v459_v61  ;;  %v1036_v2 = vunpack.c.h.bf16 %v460_v62  ;;  %v405_v55 = vld [vmem:[%s3505_s15 + $0x2b4] sm:$0xff]  ;;  %v406_v56 = vld [vmem:[%s3505_s15 + $0x2bc] sm:$0xff] }
  0x6e   : > { %1920 = vmatpush2.xpose.msra.mxu0 %v1163_v3  ;;  %1991 = vmatpush2.xpose.msra.mxu1 %v1165_v4  ;;  %v452_v3 = vld [vmem:[%s3505_s15 + $0x410] sm:$0xff]  ;;  %v453_v4 = vld [vmem:[%s3505_s15 + $0x418] sm:$0xff] }
  0x6f   : > { %1921 = vmatprep.subr.mxu0 %v1151_v5  ;;  %1992 = vmatprep.subr.mxu1 %v1153_v6  ;;  %v1033_v5 = vunpack.c.l.bf16 %v459_v61  ;;  %v1035_v6 = vunpack.c.l.bf16 %v460_v62  ;;  %v1021_v7 = vunpack.c.h.bf16 %v452_v3  ;;  %v1023_v8 = vunpack.c.h.bf16 %v453_v4 }
  0x70   : > { %v934_v61 = vunpack.c.h.bf16 %v405_v55  ;;  %v936_v62 = vunpack.c.h.bf16 %v406_v56 }
  0x72   : > { %1922 = vmatpush2.xpose.msra.mxu0 %v1150_v9  ;;  %1993 = vmatpush2.xpose.msra.mxu1 %v1152_v10  ;;  %v445_v9 = vld [vmem:[%s3505_s15 + $0x3dc] sm:$0xff]  ;;  %v446_v10 = vld [vmem:[%s3505_s15 + $0x3e4] sm:$0xff] }
  0x73   : > { %1923 = vmatprep.subr.mxu0 %v1138_v11  ;;  %1994 = vmatprep.subr.mxu1 %v1140_v12  ;;  %v1020_v11 = vunpack.c.l.bf16 %v452_v3  ;;  %v1022_v12 = vunpack.c.l.bf16 %v453_v4  ;;  %v1008_v14 = vunpack.c.h.bf16 %v445_v9  ;;  %v1010_v15 = vunpack.c.h.bf16 %v446_v10 }
  0x76   : > { %1924 = vmatpush2.xpose.msra.mxu0 %v1137_v16  ;;  %1995 = vmatpush2.xpose.msra.mxu1 %v1139_v17  ;;  %v438_v16 = vld [vmem:[%s3505_s15 + $0x3a8] sm:$0xff]  ;;  %v439_v17 = vld [vmem:[%s3505_s15 + $0x3b0] sm:$0xff] }
  0x77   : > { %1925 = vmatprep.subr.mxu0 %v1125_v18  ;;  %1996 = vmatprep.subr.mxu1 %v1127_v19  ;;  %v1007_v18 = vunpack.c.l.bf16 %v445_v9  ;;  %v1009_v19 = vunpack.c.l.bf16 %v446_v10  ;;  %v995_v20 = vunpack.c.h.bf16 %v438_v16  ;;  %v997_v21 = vunpack.c.h.bf16 %v439_v17 }
  0x7a   : > { %1926 = vmatpush2.xpose.msra.mxu0 %v1124_v22  ;;  %1997 = vmatpush2.xpose.msra.mxu1 %v1126_v23  ;;  %v431_v22 = vld [vmem:[%s3505_s15 + $0x374] sm:$0xff]  ;;  %v432_v23 = vld [vmem:[%s3505_s15 + $0x37c] sm:$0xff] }
  0x7b   : > { %1927 = vmatprep.subr.mxu0 %v1112_v25  ;;  %1998 = vmatprep.subr.mxu1 %v1114_v26  ;;  %v994_v25 = vunpack.c.l.bf16 %v438_v16  ;;  %v996_v26 = vunpack.c.l.bf16 %v439_v17  ;;  %v982_v29 = vunpack.c.h.bf16 %v431_v22  ;;  %v984_v30 = vunpack.c.h.bf16 %v432_v23 }
  0x7e   : > { %1928 = vmatpush2.xpose.msra.mxu0 %v1111_v31  ;;  %1999 = vmatpush2.xpose.msra.mxu1 %v1113_v32  ;;  %v424_v31 = vld [vmem:[%s3505_s15 + $0x340] sm:$0xff]  ;;  %v425_v32 = vld [vmem:[%s3505_s15 + $0x348] sm:$0xff] }
  0x7f   : > { %1929 = vmatprep.subr.mxu0 %v1099_v35  ;;  %2000 = vmatprep.subr.mxu1 %v1101_v36  ;;  %v981_v35 = vunpack.c.l.bf16 %v431_v22  ;;  %v983_v36 = vunpack.c.l.bf16 %v432_v23  ;;  %v969_v37 = vunpack.c.h.bf16 %v424_v31  ;;  %v971_v38 = vunpack.c.h.bf16 %v425_v32 }
  0x82   : > { %1930 = vmatpush2.xpose.msra.mxu0 %v1098_v39  ;;  %2001 = vmatpush2.xpose.msra.mxu1 %v1100_v40  ;;  %v419_v39 = vld [vmem:[%s3505_s15 + $0x31c] sm:$0xff]  ;;  %v420_v40 = vld [vmem:[%s3505_s15 + $0x324] sm:$0xff] }
  0x83   : > { %1931 = vmatprep.subr.mxu0 %v1086_v41  ;;  %2002 = vmatprep.subr.mxu1 %v1088_v42  ;;  %v968_v41 = vunpack.c.l.bf16 %v424_v31  ;;  %v970_v42 = vunpack.c.l.bf16 %v425_v32  ;;  %v960_v44 = vunpack.c.h.bf16 %v419_v39  ;;  %v959_v50 = vunpack.c.l.bf16 %v419_v39 }
  0x86   : > { %1932 = vmatpush2.xpose.msra.mxu0 %v1085_v45  ;;  %2003 = vmatpush2.xpose.msra.mxu1 %v1087_v46  ;;  %v962_v45 = vunpack.c.h.bf16 %v420_v40  ;;  %v412_v46 = vld [vmem:[%s3505_s15 + $0x2e8] sm:$0xff] }
  0x87   : > { %1933 = vmatprep.subr.mxu0 %v1073_v47  ;;  %2004 = vmatprep.subr.mxu1 %v1075_v48  ;;  %v413_v47 = vld [vmem:[%s3505_s15 + $0x2f0] sm:$0xff]  ;;  %v3610_v48 = vrot.slane %v1593_v43, %v3542_v24 }
  0x8a   : > { %1934 = vmatpush2.xpose.msra.mxu0 %v1072_v51  ;;  %2005 = vmatpush2.xpose.msra.mxu1 %v1074_v52  ;;  %v961_v51 = vunpack.c.l.bf16 %v420_v40  ;;  %v3613_v52 = vrot.slane %v1639_v49, %v3542_v24  ;;  %v350_v49 = vld [vmem:[%s3505_s15 + $0x11c] sm:$0xff] }
  0x8b   : > { %1935 = vmatprep.subr.mxu0 %v1060_v53  ;;  %2006 = vmatprep.subr.mxu1 %v1062_v54  ;;  %v947_v53 = vunpack.c.h.bf16 %v412_v46  ;;  %v949_v54 = vunpack.c.h.bf16 %v413_v47 }
  0x8e   : > { %1936 = vmatpush2.xpose.msra.mxu0 %v1059_v57  ;;  %2007 = vmatpush2.xpose.msra.mxu1 %v1061_v58  ;;  %v3619_v57 = vcombine.high %v3610_v48, %v3610_v48  ;;  %v3623_v58 = vcombine.high %v3613_v52, %v3613_v52 }
  0x8f   : > { %1937 = vmatprep.subr.mxu0 %v1047_v59  ;;  %2008 = vmatprep.subr.mxu1 %v1049_v60  ;;  %v946_v59 = vunpack.c.l.bf16 %v412_v46  ;;  %v948_v60 = vunpack.c.l.bf16 %v413_v47  ;;  %v349_v47 = vld [vmem:[%s3505_s15 + $0x114] sm:$0xff] }
  0x92   : > { %1938 = vmatpush2.xpose.msra.mxu0 %v1046_v63  ;;  %2009 = vmatpush2.xpose.msra.mxu1 %v1048_v0  ;;  %v398_v63 = vld [vmem:[%s3505_s15 + $0x280] sm:$0xff]  ;;  %v399_v0 = vld [vmem:[%s3505_s15 + $0x288] sm:$0xff] }
  0x93   : > { %1939 = vmatprep.subr.mxu0 %v1034_v1  ;;  %2010 = vmatprep.subr.mxu1 %v1036_v2  ;;  %v933_v1 = vunpack.c.l.bf16 %v405_v55  ;;  %v935_v2 = vunpack.c.l.bf16 %v406_v56  ;;  %v921_v3 = vunpack.c.h.bf16 %v398_v63  ;;  %v923_v4 = vunpack.c.h.bf16 %v399_v0  ;;  %v342_v55 = vld [vmem:[%s3505_s15 + $0xe0] sm:$0xff]  ;;  %v343_v56 = vld [vmem:[%s3505_s15 + $0xe8] sm:$0xff] }
  0x96   : > { %1940 = vmatpush2.xpose.msra.mxu0 %v1033_v5  ;;  %2011 = vmatpush2.xpose.msra.mxu1 %v1035_v6  ;;  %v391_v5 = vld [vmem:[%s3505_s15 + $0x24c] sm:$0xff]  ;;  %v392_v6 = vld [vmem:[%s3505_s15 + $0x254] sm:$0xff] }
  0x97   : > { %1941 = vmatprep.subr.mxu0 %v1021_v7  ;;  %2012 = vmatprep.subr.mxu1 %v1023_v8  ;;  %v920_v7 = vunpack.c.l.bf16 %v398_v63  ;;  %v922_v8 = vunpack.c.l.bf16 %v399_v0  ;;  %v908_v9 = vunpack.c.h.bf16 %v391_v5  ;;  %v910_v10 = vunpack.c.h.bf16 %v392_v6  ;;  %v335_v63 = vld [vmem:[%s3505_s15 + $0xac] sm:$0xff]  ;;  %v336_v0 = vld [vmem:[%s3505_s15 + $0xb4] sm:$0xff] }
  0x9a   : > { %1942 = vmatpush2.xpose.msra.mxu0 %v1020_v11  ;;  %2013 = vmatpush2.xpose.msra.mxu1 %v1022_v12  ;;  %v384_v11 = vld [vmem:[%s3505_s15 + $0x218] sm:$0xff]  ;;  %v385_v12 = vld [vmem:[%s3505_s15 + $0x220] sm:$0xff] }
  0x9b   : > { %1943 = vmatprep.subr.mxu0 %v1008_v14  ;;  %2014 = vmatprep.subr.mxu1 %v1010_v15  ;;  %v907_v14 = vunpack.c.l.bf16 %v391_v5  ;;  %v909_v15 = vunpack.c.l.bf16 %v392_v6  ;;  %v895_v16 = vunpack.c.h.bf16 %v384_v11  ;;  %v897_v17 = vunpack.c.h.bf16 %v385_v12  ;;  %v328_v5 = vld [vmem:[%s3505_s15 + $0x78] sm:$0xff]  ;;  %v329_v6 = vld [vmem:[%s3505_s15 + $0x80] sm:$0xff] }
  0x9e   : > { %1944 = vmatpush2.xpose.msra.mxu0 %v1007_v18  ;;  %2015 = vmatpush2.xpose.msra.mxu1 %v1009_v19  ;;  %v377_v18 = vld [vmem:[%s3505_s15 + $0x1e4] sm:$0xff]  ;;  %v378_v19 = vld [vmem:[%s3505_s15 + $0x1ec] sm:$0xff] }
  0x9f   : > { %1945 = vmatprep.subr.mxu0 %v995_v20  ;;  %2016 = vmatprep.subr.mxu1 %v997_v21  ;;  %v894_v20 = vunpack.c.l.bf16 %v384_v11  ;;  %v896_v21 = vunpack.c.l.bf16 %v385_v12  ;;  %v882_v22 = vunpack.c.h.bf16 %v377_v18  ;;  %v884_v23 = vunpack.c.h.bf16 %v378_v19  ;;  %v321_v11 = vld [vmem:[%s3505_s15 + $0x44] sm:$0xff]  ;;  %v322_v12 = vld [vmem:[%s3505_s15 + $0x4c] sm:$0xff] }
  0xa2   : > { %1946 = vmatpush2.xpose.msra.mxu0 %v994_v25  ;;  %2017 = vmatpush2.xpose.msra.mxu1 %v996_v26  ;;  %v370_v25 = vld [vmem:[%s3505_s15 + $0x1b0] sm:$0xff]  ;;  %v371_v26 = vld [vmem:[%s3505_s15 + $0x1b8] sm:$0xff] }
  0xa3   : > { %1947 = vmatprep.subr.mxu0 %v982_v29  ;;  %2018 = vmatprep.subr.mxu1 %v984_v30  ;;  %v881_v29 = vunpack.c.l.bf16 %v377_v18  ;;  %v883_v30 = vunpack.c.l.bf16 %v378_v19  ;;  %v869_v31 = vunpack.c.h.bf16 %v370_v25  ;;  %v871_v32 = vunpack.c.h.bf16 %v371_v26  ;;  %v314_v18 = vld [vmem:[%s3505_s15 + $0x10] sm:$0xff]  ;;  %v315_v19 = vld [vmem:[%s3505_s15 + $0x18] sm:$0xff] }
  0xa6   : > { %1948 = vmatpush2.xpose.msra.mxu0 %v981_v35  ;;  %2019 = vmatpush2.xpose.msra.mxu1 %v983_v36  ;;  %v363_v35 = vld [vmem:[%s3505_s15 + $0x17c] sm:$0xff]  ;;  %v364_v36 = vld [vmem:[%s3505_s15 + $0x184] sm:$0xff] }
  0xa7   : > { %1949 = vmatprep.subr.mxu0 %v969_v37  ;;  %2020 = vmatprep.subr.mxu1 %v971_v38  ;;  %v868_v37 = vunpack.c.l.bf16 %v370_v25  ;;  %v870_v38 = vunpack.c.l.bf16 %v371_v26  ;;  %v856_v39 = vunpack.c.h.bf16 %v363_v35  ;;  %v858_v40 = vunpack.c.h.bf16 %v364_v36  ;;  %v531_v25 = vld [vmem:[%s3505_s15 + $0x65c] sm:$0xff]  ;;  %v532_v26 = vld [vmem:[%s3505_s15 + $0x664] sm:$0xff] }
  0xa8   : > { %v855_v43 = vunpack.c.l.bf16 %v363_v35  ;;  %v524_v35 = vld [vmem:[%s3505_s15 + $0x628] sm:$0xff] }
  0xaa   : > { %1950 = vmatpush2.xpose.msra.mxu0 %v968_v41  ;;  %2021 = vmatpush2.xpose.msra.mxu1 %v970_v42  ;;  %v356_v41 = vld [vmem:[%s3505_s15 + $0x148] sm:$0xff]  ;;  %v357_v42 = vld [vmem:[%s3505_s15 + $0x150] sm:$0xff] }
  0xab   : > { %2029 = vmatprep.subr.mxu0 %v960_v44  ;;  %2100 = vmatprep.subr.mxu1 %v962_v45  ;;  %v857_v44 = vunpack.c.l.bf16 %v364_v36  ;;  %v843_v45 = vunpack.c.h.bf16 %v356_v41  ;;  %v845_v46 = vunpack.c.h.bf16 %v357_v42  ;;  %v525_v36 = vld [vmem:[%s3505_s15 + $0x630] sm:$0xff] }
  0xad   : > { %1952 = vmatmul.mubr.f32.vlgmr.msra.gmra.mxu0 %v3547_v27  ;;  %2023 = vmatmul.mubr.f32.vlgmr.msra.gmra.mxu1 %v3550_v28 }
  0xae   : > { %2030 = vmatpush1.xpose.msra.mxu0 %v959_v50  ;;  %2101 = vmatpush1.xpose.msra.mxu1 %v961_v51  ;;  %v842_v50 = vunpack.c.l.bf16 %v356_v41  ;;  %v844_v51 = vunpack.c.l.bf16 %v357_v42  ;;  %v517_v41 = vld [vmem:[%s3505_s15 + $0x5f4] sm:$0xff]  ;;  %v518_v42 = vld [vmem:[%s3505_s15 + $0x5fc] sm:$0xff] }
  0xaf   : > { %2031 = vmatprep.subr.mxu0 %v947_v53  ;;  %2102 = vmatprep.subr.mxu1 %v949_v54  ;;  %v830_v53 = vunpack.c.h.bf16 %v349_v47  ;;  %v832_v54 = vunpack.c.h.bf16 %v350_v49 }
  0xb0   : > { %2093 = vmatprep.mubr.f32.mxu0 %v3619_v57  ;;  %2164 = vmatprep.mubr.f32.mxu1 %v3623_v58 }
  0xb2   : > { %2032 = vmatpush1.xpose.msra.mxu0 %v946_v59  ;;  %2103 = vmatpush1.xpose.msra.mxu1 %v948_v60  ;;  %v829_v59 = vunpack.c.l.bf16 %v349_v47  ;;  %v831_v60 = vunpack.c.l.bf16 %v350_v49  ;;  %v510_v47 = vld [vmem:[%s3505_s15 + $0x5c0] sm:$0xff]  ;;  %v511_v49 = vld [vmem:[%s3505_s15 + $0x5c8] sm:$0xff] }
  0xb3   : > { %2033 = vmatprep.subr.mxu0 %v934_v61  ;;  %2104 = vmatprep.subr.mxu1 %v936_v62  ;;  %v817_v61 = vunpack.c.h.bf16 %v342_v55  ;;  %v819_v62 = vunpack.c.h.bf16 %v343_v56 }
  0xb6   : > { %2034 = vmatpush1.xpose.msra.mxu0 %v933_v1  ;;  %2105 = vmatpush1.xpose.msra.mxu1 %v935_v2  ;;  %v816_v1 = vunpack.c.l.bf16 %v342_v55  ;;  %v818_v2 = vunpack.c.l.bf16 %v343_v56  ;;  %v503_v55 = vld [vmem:[%s3505_s15 + $0x58c] sm:$0xff]  ;;  %v504_v56 = vld [vmem:[%s3505_s15 + $0x594] sm:$0xff] }
  0xb7   : > { %2035 = vmatprep.subr.mxu0 %v921_v3  ;;  %2106 = vmatprep.subr.mxu1 %v923_v4  ;;  %v804_v3 = vunpack.c.h.bf16 %v335_v63  ;;  %v806_v4 = vunpack.c.h.bf16 %v336_v0 }
  0xba   : > { %2036 = vmatpush1.xpose.msra.mxu0 %v920_v7  ;;  %2107 = vmatpush1.xpose.msra.mxu1 %v922_v8  ;;  %v803_v7 = vunpack.c.l.bf16 %v335_v63  ;;  %v805_v8 = vunpack.c.l.bf16 %v336_v0  ;;  %v496_v63 = vld [vmem:[%s3505_s15 + $0x558] sm:$0xff]  ;;  %v497_v0 = vld [vmem:[%s3505_s15 + $0x560] sm:$0xff] }
  0xbb   : > { %2037 = vmatprep.subr.mxu0 %v908_v9  ;;  %2108 = vmatprep.subr.mxu1 %v910_v10  ;;  %v791_v9 = vunpack.c.h.bf16 %v328_v5  ;;  %v793_v10 = vunpack.c.h.bf16 %v329_v6 }
  0xbe   : > { %2038 = vmatpush1.xpose.msra.mxu0 %v907_v14  ;;  %2109 = vmatpush1.xpose.msra.mxu1 %v909_v15  ;;  %v790_v14 = vunpack.c.l.bf16 %v328_v5  ;;  %v792_v15 = vunpack.c.l.bf16 %v329_v6  ;;  %v489_v5 = vld [vmem:[%s3505_s15 + $0x524] sm:$0xff]  ;;  %v490_v6 = vld [vmem:[%s3505_s15 + $0x52c] sm:$0xff] }
  0xbf   : > { %2039 = vmatprep.subr.mxu0 %v895_v16  ;;  %2110 = vmatprep.subr.mxu1 %v897_v17  ;;  %v778_v16 = vunpack.c.h.bf16 %v321_v11  ;;  %v780_v17 = vunpack.c.h.bf16 %v322_v12 }
  0xc2   : > { %2040 = vmatpush1.xpose.msra.mxu0 %v894_v20  ;;  %2111 = vmatpush1.xpose.msra.mxu1 %v896_v21  ;;  %v777_v20 = vunpack.c.l.bf16 %v321_v11  ;;  %v779_v21 = vunpack.c.l.bf16 %v322_v12  ;;  %v482_v11 = vld [vmem:[%s3505_s15 + $0x4f0] sm:$0xff]  ;;  %v483_v12 = vld [vmem:[%s3505_s15 + $0x4f8] sm:$0xff] }
  0xc3   : > { %2041 = vmatprep.subr.mxu0 %v882_v22  ;;  %2112 = vmatprep.subr.mxu1 %v884_v23  ;;  %v765_v22 = vunpack.c.h.bf16 %v314_v18  ;;  %v767_v23 = vunpack.c.h.bf16 %v315_v19 }
  0xc6   : > { %2042 = vmatpush1.xpose.msra.mxu0 %v881_v29  ;;  %2113 = vmatpush1.xpose.msra.mxu1 %v883_v30  ;;  %v764_v29 = vunpack.c.l.bf16 %v314_v18  ;;  %v766_v30 = vunpack.c.l.bf16 %v315_v19  ;;  %v475_v18 = vld [vmem:[%s3505_s15 + $0x4bc] sm:$0xff]  ;;  %v476_v19 = vld [vmem:[%s3505_s15 + $0x4c4] sm:$0xff] }
  0xc7   : > { %2043 = vmatprep.subr.mxu0 %v869_v31  ;;  %2114 = vmatprep.subr.mxu1 %v871_v32  ;;  %v1168_v31 = vunpack.c.h.bf16 %v531_v25  ;;  %v1170_v32 = vunpack.c.h.bf16 %v532_v26 }
  0xca   : > { %2044 = vmatpush1.xpose.msra.mxu0 %v868_v37  ;;  %2115 = vmatpush1.xpose.msra.mxu1 %v870_v38  ;;  %v1167_v37 = vunpack.c.l.bf16 %v531_v25  ;;  %v1169_v38 = vunpack.c.l.bf16 %v532_v26  ;;  %v468_v25 = vld [vmem:[%s3505_s15 + $0x488] sm:$0xff]  ;;  %v469_v26 = vld [vmem:[%s3505_s15 + $0x490] sm:$0xff] }
  0xcb   : > { %2045 = vmatprep.subr.mxu0 %v856_v39  ;;  %2116 = vmatprep.subr.mxu1 %v858_v40  ;;  %v1155_v39 = vunpack.c.h.bf16 %v524_v35  ;;  %v1157_v40 = vunpack.c.h.bf16 %v525_v36 }
  0xce   : > { %2046 = vmatpush1.xpose.msra.mxu0 %v855_v43  ;;  %2117 = vmatpush1.xpose.msra.mxu1 %v857_v44  ;;  %v1154_v43 = vunpack.c.l.bf16 %v524_v35  ;;  %v1156_v44 = vunpack.c.l.bf16 %v525_v36  ;;  %v461_v35 = vld [vmem:[%s3505_s15 + $0x454] sm:$0xff]  ;;  %v462_v36 = vld [vmem:[%s3505_s15 + $0x45c] sm:$0xff] }
  0xcf   : > { %2047 = vmatprep.subr.mxu0 %v843_v45  ;;  %2118 = vmatprep.subr.mxu1 %v845_v46  ;;  %v1142_v45 = vunpack.c.h.bf16 %v517_v41  ;;  %v1144_v46 = vunpack.c.h.bf16 %v518_v42 }
  0xd2   : > { %2048 = vmatpush1.xpose.msra.mxu0 %v842_v50  ;;  %2119 = vmatpush1.xpose.msra.mxu1 %v844_v51  ;;  %v1141_v50 = vunpack.c.l.bf16 %v517_v41  ;;  %v1143_v51 = vunpack.c.l.bf16 %v518_v42  ;;  %v454_v41 = vld [vmem:[%s3505_s15 + $0x420] sm:$0xff]  ;;  %v455_v42 = vld [vmem:[%s3505_s15 + $0x428] sm:$0xff] }
  0xd3   : > { %2049 = vmatprep.subr.mxu0 %v830_v53  ;;  %2120 = vmatprep.subr.mxu1 %v832_v54  ;;  %v1129_v53 = vunpack.c.h.bf16 %v510_v47  ;;  %v1131_v54 = vunpack.c.h.bf16 %v511_v49 }
  0xd6   : > { %2050 = vmatpush1.xpose.msra.mxu0 %v829_v59  ;;  %2121 = vmatpush1.xpose.msra.mxu1 %v831_v60  ;;  %v1128_v59 = vunpack.c.l.bf16 %v510_v47  ;;  %v1130_v60 = vunpack.c.l.bf16 %v511_v49  ;;  %v447_v47 = vld [vmem:[%s3505_s15 + $0x3ec] sm:$0xff]  ;;  %v448_v49 = vld [vmem:[%s3505_s15 + $0x3f4] sm:$0xff] }
  0xd7   : > { %2051 = vmatprep.subr.mxu0 %v817_v61  ;;  %2122 = vmatprep.subr.mxu1 %v819_v62  ;;  %v1116_v61 = vunpack.c.h.bf16 %v503_v55  ;;  %v1118_v62 = vunpack.c.h.bf16 %v504_v56 }
  0xda   : > { %2052 = vmatpush1.xpose.msra.mxu0 %v816_v1  ;;  %2123 = vmatpush1.xpose.msra.mxu1 %v818_v2  ;;  %v1115_v1 = vunpack.c.l.bf16 %v503_v55  ;;  %v1117_v2 = vunpack.c.l.bf16 %v504_v56  ;;  %v440_v55 = vld [vmem:[%s3505_s15 + $0x3b8] sm:$0xff]  ;;  %v441_v56 = vld [vmem:[%s3505_s15 + $0x3c0] sm:$0xff] }
  0xdb   : > { %2053 = vmatprep.subr.mxu0 %v804_v3  ;;  %2124 = vmatprep.subr.mxu1 %v806_v4  ;;  %v1103_v3 = vunpack.c.h.bf16 %v496_v63  ;;  %v1105_v4 = vunpack.c.h.bf16 %v497_v0 }
  0xde   : > { %2054 = vmatpush1.xpose.msra.mxu0 %v803_v7  ;;  %2125 = vmatpush1.xpose.msra.mxu1 %v805_v8  ;;  %v1102_v7 = vunpack.c.l.bf16 %v496_v63  ;;  %v1104_v8 = vunpack.c.l.bf16 %v497_v0  ;;  %v433_v63 = vld [vmem:[%s3505_s15 + $0x384] sm:$0xff]  ;;  %v434_v0 = vld [vmem:[%s3505_s15 + $0x38c] sm:$0xff] }
  0xdf   : > { %2055 = vmatprep.subr.mxu0 %v791_v9  ;;  %2126 = vmatprep.subr.mxu1 %v793_v10  ;;  %v1090_v9 = vunpack.c.h.bf16 %v489_v5  ;;  %v1092_v10 = vunpack.c.h.bf16 %v490_v6 }
  0xe2   : > { %2056 = vmatpush1.xpose.msra.mxu0 %v790_v14  ;;  %2127 = vmatpush1.xpose.msra.mxu1 %v792_v15  ;;  %v1089_v14 = vunpack.c.l.bf16 %v489_v5  ;;  %v1091_v15 = vunpack.c.l.bf16 %v490_v6  ;;  %v426_v5 = vld [vmem:[%s3505_s15 + $0x350] sm:$0xff]  ;;  %v427_v6 = vld [vmem:[%s3505_s15 + $0x358] sm:$0xff] }
  0xe3   : > { %2057 = vmatprep.subr.mxu0 %v778_v16  ;;  %2128 = vmatprep.subr.mxu1 %v780_v17  ;;  %v1077_v16 = vunpack.c.h.bf16 %v482_v11  ;;  %v1079_v17 = vunpack.c.h.bf16 %v483_v12 }
  0xe6   : > { %2058 = vmatpush1.xpose.msra.mxu0 %v777_v20  ;;  %2129 = vmatpush1.xpose.msra.mxu1 %v779_v21  ;;  %v1076_v20 = vunpack.c.l.bf16 %v482_v11  ;;  %v1078_v21 = vunpack.c.l.bf16 %v483_v12  ;;  %v421_v11 = vld [vmem:[%s3505_s15 + $0x32c] sm:$0xff]  ;;  %v422_v12 = vld [vmem:[%s3505_s15 + $0x334] sm:$0xff] }
  0xe7   : > { %2059 = vmatprep.subr.mxu0 %v765_v22  ;;  %2130 = vmatprep.subr.mxu1 %v767_v23  ;;  %v1064_v22 = vunpack.c.h.bf16 %v475_v18  ;;  %v1066_v23 = vunpack.c.h.bf16 %v476_v19 }
  0xea   : > { %2060 = vmatpush1.xpose.msra.mxu0 %v764_v29  ;;  %2131 = vmatpush1.xpose.msra.mxu1 %v766_v30  ;;  %v1063_v29 = vunpack.c.l.bf16 %v475_v18  ;;  %v1065_v30 = vunpack.c.l.bf16 %v476_v19  ;;  %v966_v18 = vunpack.c.h.bf16 %v422_v12  ;;  %v414_v19 = vld [vmem:[%s3505_s15 + $0x2f8] sm:$0xff] }
  0xeb   : > { %2061 = vmatprep.subr.mxu0 %v1168_v31  ;;  %2132 = vmatprep.subr.mxu1 %v1170_v32  ;;  %v1051_v31 = vunpack.c.h.bf16 %v468_v25  ;;  %v1053_v32 = vunpack.c.h.bf16 %v469_v26 }
  0xee   : > { %2062 = vmatpush2.xpose.msra.mxu0 %v1167_v37  ;;  %2133 = vmatpush2.xpose.msra.mxu1 %v1169_v38  ;;  %v1050_v37 = vunpack.c.l.bf16 %v468_v25  ;;  %v1052_v38 = vunpack.c.l.bf16 %v469_v26  ;;  %v965_v25 = vunpack.c.l.bf16 %v422_v12 }
  0xef   : > { %2063 = vmatprep.subr.mxu0 %v1155_v39  ;;  %2134 = vmatprep.subr.mxu1 %v1157_v40  ;;  %v1038_v39 = vunpack.c.h.bf16 %v461_v35  ;;  %v1040_v40 = vunpack.c.h.bf16 %v462_v36 }
  0xf2   : > { %2064 = vmatpush2.xpose.msra.mxu0 %v1154_v43  ;;  %2135 = vmatpush2.xpose.msra.mxu1 %v1156_v44  ;;  %v1037_v43 = vunpack.c.l.bf16 %v461_v35  ;;  %v1039_v44 = vunpack.c.l.bf16 %v462_v36 }
  0xf3   : > { %2065 = vmatprep.subr.mxu0 %v1142_v45  ;;  %2136 = vmatprep.subr.mxu1 %v1144_v46  ;;  %v1025_v45 = vunpack.c.h.bf16 %v454_v41  ;;  %v1027_v46 = vunpack.c.h.bf16 %v455_v42 }
  0xf6   : > { %2066 = vmatpush2.xpose.msra.mxu0 %v1141_v50  ;;  %2137 = vmatpush2.xpose.msra.mxu1 %v1143_v51  ;;  %v1024_v50 = vunpack.c.l.bf16 %v454_v41  ;;  %v1026_v51 = vunpack.c.l.bf16 %v455_v42  ;;  %v401_v41 = vld [vmem:[%s3505_s15 + $0x298] sm:$0xff] }
  0xf7   : > { %2067 = vmatprep.subr.mxu0 %v1129_v53  ;;  %2138 = vmatprep.subr.mxu1 %v1131_v54  ;;  %v1012_v53 = vunpack.c.h.bf16 %v447_v47  ;;  %v1014_v54 = vunpack.c.h.bf16 %v448_v49 }
  0xfa   : > { %2068 = vmatpush2.xpose.msra.mxu0 %v1128_v59  ;;  %2139 = vmatpush2.xpose.msra.mxu1 %v1130_v60  ;;  %v1011_v59 = vunpack.c.l.bf16 %v447_v47  ;;  %v1013_v60 = vunpack.c.l.bf16 %v448_v49  ;;  %v394_v47 = vld [vmem:[%s3505_s15 + $0x264] sm:$0xff] }
  0xfb   : > { %2069 = vmatprep.subr.mxu0 %v1116_v61  ;;  %2140 = vmatprep.subr.mxu1 %v1118_v62  ;;  %v999_v61 = vunpack.c.h.bf16 %v440_v55  ;;  %v1001_v62 = vunpack.c.h.bf16 %v441_v56 }
  0xfe   : > { %2070 = vmatpush2.xpose.msra.mxu0 %v1115_v1  ;;  %2141 = vmatpush2.xpose.msra.mxu1 %v1117_v2  ;;  %v998_v1 = vunpack.c.l.bf16 %v440_v55  ;;  %v1000_v2 = vunpack.c.l.bf16 %v441_v56  ;;  %v387_v55 = vld [vmem:[%s3505_s15 + $0x230] sm:$0xff] }
  0xff   : > { %2071 = vmatprep.subr.mxu0 %v1103_v3  ;;  %2142 = vmatprep.subr.mxu1 %v1105_v4  ;;  %v986_v3 = vunpack.c.h.bf16 %v433_v63  ;;  %v988_v4 = vunpack.c.h.bf16 %v434_v0 }
 0x102   : > { %2072 = vmatpush2.xpose.msra.mxu0 %v1102_v7  ;;  %2143 = vmatpush2.xpose.msra.mxu1 %v1104_v8  ;;  %v985_v7 = vunpack.c.l.bf16 %v433_v63  ;;  %v987_v8 = vunpack.c.l.bf16 %v434_v0  ;;  %v380_v63 = vld [vmem:[%s3505_s15 + $0x1fc] sm:$0xff] }
 0x103   : > { %2073 = vmatprep.subr.mxu0 %v1090_v9  ;;  %2144 = vmatprep.subr.mxu1 %v1092_v10  ;;  %v973_v9 = vunpack.c.h.bf16 %v426_v5  ;;  %v975_v10 = vunpack.c.h.bf16 %v427_v6 }
 0x106   : > { %2074 = vmatpush2.xpose.msra.mxu0 %v1089_v14  ;;  %2145 = vmatpush2.xpose.msra.mxu1 %v1091_v15  ;;  %v972_v14 = vunpack.c.l.bf16 %v426_v5  ;;  %v974_v15 = vunpack.c.l.bf16 %v427_v6  ;;  %v373_v5 = vld [vmem:[%s3505_s15 + $0x1c8] sm:$0xff] }
 0x107   : > { %2075 = vmatprep.subr.mxu0 %v1077_v16  ;;  %2146 = vmatprep.subr.mxu1 %v1079_v17  ;;  %v1594_v16 = vld [vmem:[%s4170_s0 + $0x10] sm:$0xff]  ;;  %v964_v17 = vunpack.c.h.bf16 %v421_v11 }
 0x10a   : > { %2076 = vmatpush2.xpose.msra.mxu0 %v1076_v20  ;;  %2147 = vmatpush2.xpose.msra.mxu1 %v1078_v21  ;;  %v415_v20 = vld [vmem:[%s3505_s15 + $0x300] sm:$0xff]  ;;  %v3695_v21 = vrot.slane %v1594_v16, %v3542_v24 }
 0x10b   : > { %2077 = vmatprep.subr.mxu0 %v1064_v22  ;;  %2148 = vmatprep.subr.mxu1 %v1066_v23  ;;  %v1656_v22 = vcombine.high %v1594_v16, %v1594_v16  ;;  %v963_v23 = vunpack.c.l.bf16 %v421_v11  ;;  %v366_v11 = vld [vmem:[%s3505_s15 + $0x194] sm:$0xff] }
 0x10c   : > { %v3704_v35 = vcombine.high %v3695_v21, %v3695_v21  ;;  %v862_v16 = vunpack.c.h.bf16 %v366_v11 }
 0x10d   : > { %v3698_v26 = vrot.slane %v1656_v22, %v3542_v24  ;;  %v950_v24 = vunpack.c.l.bf16 %v414_v19 }
 0x10e   : > { %2078 = vmatpush2.xpose.msra.mxu0 %v1063_v29  ;;  %2149 = vmatpush2.xpose.msra.mxu1 %v1065_v30  ;;  %v951_v29 = vunpack.c.h.bf16 %v414_v19  ;;  %v953_v30 = vunpack.c.h.bf16 %v415_v20 }
 0x10f   : > { %2079 = vmatprep.subr.mxu0 %v1051_v31  ;;  %2150 = vmatprep.subr.mxu1 %v1053_v32  ;;  %v407_v31 = vld [vmem:[%s3505_s15 + $0x2c4] sm:$0xff]  ;;  %v408_v32 = vld [vmem:[%s3505_s15 + $0x2cc] sm:$0xff]  ;;  %v3708_v36 = vcombine.high %v3698_v26, %v3698_v26 }
 0x110   : > { %v937_v42 = vunpack.c.l.bf16 %v407_v31 }
 0x112   : > { %2080 = vmatpush2.xpose.msra.mxu0 %v1050_v37  ;;  %2151 = vmatpush2.xpose.msra.mxu1 %v1052_v38  ;;  %v952_v37 = vunpack.c.l.bf16 %v415_v20  ;;  %v938_v38 = vunpack.c.h.bf16 %v407_v31  ;;  %v861_v20 = vunpack.c.l.bf16 %v366_v11 }
 0x113   : > { %2081 = vmatprep.subr.mxu0 %v1038_v39  ;;  %2152 = vmatprep.subr.mxu1 %v1040_v40  ;;  %v940_v39 = vunpack.c.h.bf16 %v408_v32  ;;  %v400_v40 = vld [vmem:[%s3505_s15 + $0x290] sm:$0xff] }
 0x114   : > { %v924_v49 = vunpack.c.l.bf16 %v400_v40 }
 0x116   : > { %2082 = vmatpush2.xpose.msra.mxu0 %v1037_v43  ;;  %2153 = vmatpush2.xpose.msra.mxu1 %v1039_v44  ;;  %v939_v43 = vunpack.c.l.bf16 %v408_v32  ;;  %v925_v44 = vunpack.c.h.bf16 %v400_v40 }
 0x117   : > { %2083 = vmatprep.subr.mxu0 %v1025_v45  ;;  %2154 = vmatprep.subr.mxu1 %v1027_v46  ;;  %v927_v45 = vunpack.c.h.bf16 %v401_v41  ;;  %v393_v46 = vld [vmem:[%s3505_s15 + $0x25c] sm:$0xff] }
 0x118   : > { %v911_v56 = vunpack.c.l.bf16 %v393_v46 }
 0x11a   : > { %2084 = vmatpush2.xpose.msra.mxu0 %v1024_v50  ;;  %2155 = vmatpush2.xpose.msra.mxu1 %v1026_v51  ;;  %v926_v50 = vunpack.c.l.bf16 %v401_v41  ;;  %v912_v51 = vunpack.c.h.bf16 %v393_v46 }
 0x11b   : > { %2085 = vmatprep.subr.mxu0 %v1012_v53  ;;  %2156 = vmatprep.subr.mxu1 %v1014_v54  ;;  %v914_v53 = vunpack.c.h.bf16 %v394_v47  ;;  %v386_v54 = vld [vmem:[%s3505_s15 + $0x228] sm:$0xff] }
 0x11c   : > { %v898_v0 = vunpack.c.l.bf16 %v386_v54 }
 0x11e   : > { %2086 = vmatpush2.xpose.msra.mxu0 %v1011_v59  ;;  %2157 = vmatpush2.xpose.msra.mxu1 %v1013_v60  ;;  %v913_v59 = vunpack.c.l.bf16 %v394_v47  ;;  %v899_v60 = vunpack.c.h.bf16 %v386_v54 }
 0x11f   : > { %2087 = vmatprep.subr.mxu0 %v999_v61  ;;  %2158 = vmatprep.subr.mxu1 %v1001_v62  ;;  %v901_v61 = vunpack.c.h.bf16 %v387_v55  ;;  %v379_v62 = vld [vmem:[%s3505_s15 + $0x1f4] sm:$0xff] }
 0x120   : > { %v885_v6 = vunpack.c.l.bf16 %v379_v62 }
 0x122   : > { %2088 = vmatpush2.xpose.msra.mxu0 %v998_v1  ;;  %2159 = vmatpush2.xpose.msra.mxu1 %v1000_v2  ;;  %v900_v1 = vunpack.c.l.bf16 %v387_v55  ;;  %v886_v2 = vunpack.c.h.bf16 %v379_v62 }
 0x123   : > { %2089 = vmatprep.subr.mxu0 %v986_v3  ;;  %2160 = vmatprep.subr.mxu1 %v988_v4  ;;  %v888_v3 = vunpack.c.h.bf16 %v380_v63  ;;  %v372_v4 = vld [vmem:[%s3505_s15 + $0x1c0] sm:$0xff] }
 0x124   : > { %v872_v12 = vunpack.c.l.bf16 %v372_v4 }
 0x126   : > { %2090 = vmatpush2.xpose.msra.mxu0 %v985_v7  ;;  %2161 = vmatpush2.xpose.msra.mxu1 %v987_v8  ;;  %v887_v7 = vunpack.c.l.bf16 %v380_v63  ;;  %v873_v8 = vunpack.c.h.bf16 %v372_v4 }
 0x127   : > { %2091 = vmatprep.subr.mxu0 %v973_v9  ;;  %2162 = vmatprep.subr.mxu1 %v975_v10  ;;  %v875_v9 = vunpack.c.h.bf16 %v373_v5  ;;  %v365_v10 = vld [vmem:[%s3505_s15 + $0x18c] sm:$0xff] }
 0x128   : > { %v859_v19 = vunpack.c.l.bf16 %v365_v10 }
 0x12a   : > { %2092 = vmatpush2.xpose.msra.mxu0 %v972_v14  ;;  %2163 = vmatpush2.xpose.msra.mxu1 %v974_v15  ;;  %v874_v14 = vunpack.c.l.bf16 %v373_v5  ;;  %v860_v15 = vunpack.c.h.bf16 %v365_v10 }
 0x12b   : > { %2171 = vmatprep.subr.mxu0 %v964_v17  ;;  %2242 = vmatprep.subr.mxu1 %v966_v18  ;;  %v358_v17 = vld [vmem:[%s3505_s15 + $0x158] sm:$0xff]  ;;  %v359_v18 = vld [vmem:[%s3505_s15 + $0x160] sm:$0xff] }
 0x12c   : > { %v847_v22 = vunpack.c.h.bf16 %v358_v17  ;;  %v848_v31 = vunpack.c.l.bf16 %v359_v18 }
 0x12d   : > { %2094 = vmatmul.mubr.f32.vlgmr.msra.gmra.mxu0 %v3610_v48  ;;  %2165 = vmatmul.mubr.f32.vlgmr.msra.gmra.mxu1 %v3613_v52 }
 0x12e   : > { %2172 = vmatpush1.xpose.msra.mxu0 %v963_v23  ;;  %2243 = vmatpush1.xpose.msra.mxu1 %v965_v25  ;;  %v849_v23 = vunpack.c.h.bf16 %v359_v18  ;;  %v351_v25 = vld [vmem:[%s3505_s15 + $0x124] sm:$0xff] }
 0x12f   : > { %2173 = vmatprep.subr.mxu0 %v951_v29  ;;  %2244 = vmatprep.subr.mxu1 %v953_v30  ;;  %v352_v29 = vld [vmem:[%s3505_s15 + $0x12c] sm:$0xff]  ;;  %v846_v30 = vunpack.c.l.bf16 %v358_v17  ;;  %v834_v32 = vunpack.c.h.bf16 %v351_v25 }
 0x130   : > { %2235 = vmatprep.mubr.f32.mxu0 %v3704_v35  ;;  %2306 = vmatprep.mubr.f32.mxu1 %v3708_v36  ;;  %v835_v40 = vunpack.c.l.bf16 %v352_v29 }
 0x132   : > { %2174 = vmatpush1.xpose.msra.mxu0 %v950_v24  ;;  %2245 = vmatpush1.xpose.msra.mxu1 %v952_v37  ;;  %v836_v24 = vunpack.c.h.bf16 %v352_v29  ;;  %v344_v37 = vld [vmem:[%s3505_s15 + $0xf0] sm:$0xff] }
 0x133   : > { %2175 = vmatprep.subr.mxu0 %v938_v38  ;;  %2246 = vmatprep.subr.mxu1 %v940_v39  ;;  %v345_v38 = vld [vmem:[%s3505_s15 + $0xf8] sm:$0xff]  ;;  %v833_v39 = vunpack.c.l.bf16 %v351_v25  ;;  %v821_v41 = vunpack.c.h.bf16 %v344_v37 }
 0x134   : > { %v822_v46 = vunpack.c.l.bf16 %v345_v38 }
 0x136   : > { %2176 = vmatpush1.xpose.msra.mxu0 %v937_v42  ;;  %2247 = vmatpush1.xpose.msra.mxu1 %v939_v43  ;;  %v823_v42 = vunpack.c.h.bf16 %v345_v38  ;;  %v337_v43 = vld [vmem:[%s3505_s15 + $0xbc] sm:$0xff] }
 0x137   : > { %2177 = vmatprep.subr.mxu0 %v925_v44  ;;  %2248 = vmatprep.subr.mxu1 %v927_v45  ;;  %v338_v44 = vld [vmem:[%s3505_s15 + $0xc4] sm:$0xff]  ;;  %v820_v45 = vunpack.c.l.bf16 %v344_v37  ;;  %v808_v47 = vunpack.c.h.bf16 %v337_v43 }
 0x138   : > { %v809_v54 = vunpack.c.l.bf16 %v338_v44 }
 0x13a   : > { %2178 = vmatpush1.xpose.msra.mxu0 %v924_v49  ;;  %2249 = vmatpush1.xpose.msra.mxu1 %v926_v50  ;;  %v810_v49 = vunpack.c.h.bf16 %v338_v44  ;;  %v330_v50 = vld [vmem:[%s3505_s15 + $0x88] sm:$0xff] }
 0x13b   : > { %2179 = vmatprep.subr.mxu0 %v912_v51  ;;  %2250 = vmatprep.subr.mxu1 %v914_v53  ;;  %v331_v51 = vld [vmem:[%s3505_s15 + $0x90] sm:$0xff]  ;;  %v807_v53 = vunpack.c.l.bf16 %v337_v43  ;;  %v795_v55 = vunpack.c.h.bf16 %v330_v50 }
 0x13c   : > { %v796_v62 = vunpack.c.l.bf16 %v331_v51 }
 0x13e   : > { %2180 = vmatpush1.xpose.msra.mxu0 %v911_v56  ;;  %2251 = vmatpush1.xpose.msra.mxu1 %v913_v59  ;;  %v797_v56 = vunpack.c.h.bf16 %v331_v51  ;;  %v323_v59 = vld [vmem:[%s3505_s15 + $0x54] sm:$0xff] }
 0x13f   : > { %2181 = vmatprep.subr.mxu0 %v899_v60  ;;  %2252 = vmatprep.subr.mxu1 %v901_v61  ;;  %v324_v60 = vld [vmem:[%s3505_s15 + $0x5c] sm:$0xff]  ;;  %v794_v61 = vunpack.c.l.bf16 %v330_v50  ;;  %v782_v63 = vunpack.c.h.bf16 %v323_v59 }
 0x140   : > { %v783_v4 = vunpack.c.l.bf16 %v324_v60 }
 0x142   : > { %2182 = vmatpush1.xpose.msra.mxu0 %v898_v0  ;;  %2253 = vmatpush1.xpose.msra.mxu1 %v900_v1  ;;  %v784_v0 = vunpack.c.h.bf16 %v324_v60  ;;  %v316_v1 = vld [vmem:[%s3505_s15 + $0x20] sm:$0xff] }
 0x143   : > { %2183 = vmatprep.subr.mxu0 %v886_v2  ;;  %2254 = vmatprep.subr.mxu1 %v888_v3  ;;  %v317_v2 = vld [vmem:[%s3505_s15 + $0x28] sm:$0xff]  ;;  %v781_v3 = vunpack.c.l.bf16 %v323_v59  ;;  %v769_v5 = vunpack.c.h.bf16 %v316_v1 }
 0x144   : > { %v770_v10 = vunpack.c.l.bf16 %v317_v2 }
 0x146   : > { %2184 = vmatpush1.xpose.msra.mxu0 %v885_v6  ;;  %2255 = vmatpush1.xpose.msra.mxu1 %v887_v7  ;;  %v771_v6 = vunpack.c.h.bf16 %v317_v2  ;;  %v533_v7 = vld [vmem:[%s3505_s15 + $0x66c] sm:$0xff] }
 0x147   : > { %2185 = vmatprep.subr.mxu0 %v873_v8  ;;  %2256 = vmatprep.subr.mxu1 %v875_v9  ;;  %v534_v8 = vld [vmem:[%s3505_s15 + $0x674] sm:$0xff]  ;;  %v768_v9 = vunpack.c.l.bf16 %v316_v1  ;;  %v1172_v11 = vunpack.c.h.bf16 %v533_v7 }
 0x148   : > { %v1173_v17 = vunpack.c.l.bf16 %v534_v8 }
 0x14a   : > { %2186 = vmatpush1.xpose.msra.mxu0 %v872_v12  ;;  %2257 = vmatpush1.xpose.msra.mxu1 %v874_v14  ;;  %v1174_v12 = vunpack.c.h.bf16 %v534_v8  ;;  %v526_v14 = vld [vmem:[%s3505_s15 + $0x638] sm:$0xff] }
 0x14b   : > { %2187 = vmatprep.subr.mxu0 %v860_v15  ;;  %2258 = vmatprep.subr.mxu1 %v862_v16  ;;  %v527_v15 = vld [vmem:[%s3505_s15 + $0x640] sm:$0xff]  ;;  %v1171_v16 = vunpack.c.l.bf16 %v533_v7  ;;  %v1159_v18 = vunpack.c.h.bf16 %v526_v14 }
 0x14c   : > { %v1160_v25 = vunpack.c.l.bf16 %v527_v15 }
 0x14e   : > { %2188 = vmatpush1.xpose.msra.mxu0 %v859_v19  ;;  %2259 = vmatpush1.xpose.msra.mxu1 %v861_v20  ;;  %v1161_v19 = vunpack.c.h.bf16 %v527_v15  ;;  %v519_v20 = vld [vmem:[%s3505_s15 + $0x604] sm:$0xff] }
 0x14f   : > { %2189 = vmatprep.subr.mxu0 %v847_v22  ;;  %2260 = vmatprep.subr.mxu1 %v849_v23  ;;  %v520_v22 = vld [vmem:[%s3505_s15 + $0x60c] sm:$0xff]  ;;  %v1158_v23 = vunpack.c.l.bf16 %v526_v14  ;;  %v1146_v29 = vunpack.c.h.bf16 %v519_v20 }
 0x150   : > { %v1147_v37 = vunpack.c.l.bf16 %v520_v22 }
 0x152   : > { %2190 = vmatpush1.xpose.msra.mxu0 %v846_v30  ;;  %2261 = vmatpush1.xpose.msra.mxu1 %v848_v31  ;;  %v1148_v30 = vunpack.c.h.bf16 %v520_v22  ;;  %v512_v31 = vld [vmem:[%s3505_s15 + $0x5d0] sm:$0xff] }
 0x153   : > { %2191 = vmatprep.subr.mxu0 %v834_v32  ;;  %2262 = vmatprep.subr.mxu1 %v836_v24  ;;  %v513_v32 = vld [vmem:[%s3505_s15 + $0x5d8] sm:$0xff]  ;;  %v1145_v24 = vunpack.c.l.bf16 %v519_v20  ;;  %v1133_v38 = vunpack.c.h.bf16 %v512_v31 }
 0x154   : > { %v1134_v43 = vunpack.c.l.bf16 %v513_v32 }
 0x156   : > { %2192 = vmatpush1.xpose.msra.mxu0 %v833_v39  ;;  %2263 = vmatpush1.xpose.msra.mxu1 %v835_v40  ;;  %v1135_v39 = vunpack.c.h.bf16 %v513_v32  ;;  %v505_v40 = vld [vmem:[%s3505_s15 + $0x59c] sm:$0xff] }
 0x157   : > { %2193 = vmatprep.subr.mxu0 %v821_v41  ;;  %2264 = vmatprep.subr.mxu1 %v823_v42  ;;  %v506_v41 = vld [vmem:[%s3505_s15 + $0x5a4] sm:$0xff]  ;;  %v1132_v42 = vunpack.c.l.bf16 %v512_v31  ;;  %v1120_v44 = vunpack.c.h.bf16 %v505_v40 }
 0x158   : > { %v1121_v50 = vunpack.c.l.bf16 %v506_v41 }
 0x15a   : > { %2194 = vmatpush1.xpose.msra.mxu0 %v820_v45  ;;  %2265 = vmatpush1.xpose.msra.mxu1 %v822_v46  ;;  %v1122_v45 = vunpack.c.h.bf16 %v506_v41  ;;  %v498_v46 = vld [vmem:[%s3505_s15 + $0x568] sm:$0xff] }
 0x15b   : > { %2195 = vmatprep.subr.mxu0 %v808_v47  ;;  %2266 = vmatprep.subr.mxu1 %v810_v49  ;;  %v499_v47 = vld [vmem:[%s3505_s15 + $0x570] sm:$0xff]  ;;  %v1119_v49 = vunpack.c.l.bf16 %v505_v40  ;;  %v1107_v51 = vunpack.c.h.bf16 %v498_v46 }
 0x15c   : > { %v1108_v59 = vunpack.c.l.bf16 %v499_v47 }
 0x15e   : > { %2196 = vmatpush1.xpose.msra.mxu0 %v807_v53  ;;  %2267 = vmatpush1.xpose.msra.mxu1 %v809_v54  ;;  %v1109_v53 = vunpack.c.h.bf16 %v499_v47  ;;  %v491_v54 = vld [vmem:[%s3505_s15 + $0x534] sm:$0xff] }
 0x15f   : > { %2197 = vmatprep.subr.mxu0 %v795_v55  ;;  %2268 = vmatprep.subr.mxu1 %v797_v56  ;;  %v492_v55 = vld [vmem:[%s3505_s15 + $0x53c] sm:$0xff]  ;;  %v1106_v56 = vunpack.c.l.bf16 %v498_v46  ;;  %v1094_v60 = vunpack.c.h.bf16 %v491_v54 }
 0x160   : > { %v1095_v1 = vunpack.c.l.bf16 %v492_v55 }
 0x162   : > { %2198 = vmatpush1.xpose.msra.mxu0 %v794_v61  ;;  %2269 = vmatpush1.xpose.msra.mxu1 %v796_v62  ;;  %v1096_v61 = vunpack.c.h.bf16 %v492_v55  ;;  %v484_v62 = vld [vmem:[%s3505_s15 + $0x500] sm:$0xff] }
 0x163   : > { %2199 = vmatprep.subr.mxu0 %v782_v63  ;;  %2270 = vmatprep.subr.mxu1 %v784_v0  ;;  %v485_v63 = vld [vmem:[%s3505_s15 + $0x508] sm:$0xff]  ;;  %v1093_v0 = vunpack.c.l.bf16 %v491_v54  ;;  %v1081_v2 = vunpack.c.h.bf16 %v484_v62 }
 0x164   : > { %v1082_v7 = vunpack.c.l.bf16 %v485_v63 }
 0x166   : > { %2200 = vmatpush1.xpose.msra.mxu0 %v781_v3  ;;  %2271 = vmatpush1.xpose.msra.mxu1 %v783_v4  ;;  %v1083_v3 = vunpack.c.h.bf16 %v485_v63  ;;  %v477_v4 = vld [vmem:[%s3505_s15 + $0x4cc] sm:$0xff] }
 0x167   : > { %2201 = vmatprep.subr.mxu0 %v769_v5  ;;  %2272 = vmatprep.subr.mxu1 %v771_v6  ;;  %v478_v5 = vld [vmem:[%s3505_s15 + $0x4d4] sm:$0xff]  ;;  %v1080_v6 = vunpack.c.l.bf16 %v484_v62  ;;  %v1068_v8 = vunpack.c.h.bf16 %v477_v4 }
 0x168   : > { %v1069_v14 = vunpack.c.l.bf16 %v478_v5 }
 0x16a   : > { %2202 = vmatpush1.xpose.msra.mxu0 %v768_v9  ;;  %2273 = vmatpush1.xpose.msra.mxu1 %v770_v10  ;;  %v1070_v9 = vunpack.c.h.bf16 %v478_v5  ;;  %v470_v10 = vld [vmem:[%s3505_s15 + $0x498] sm:$0xff] }
 0x16b   : > { %2203 = vmatprep.subr.mxu0 %v1172_v11  ;;  %2274 = vmatprep.subr.mxu1 %v1174_v12  ;;  %v471_v11 = vld [vmem:[%s3505_s15 + $0x4a0] sm:$0xff]  ;;  %v1067_v12 = vunpack.c.l.bf16 %v477_v4  ;;  %v1055_v15 = vunpack.c.h.bf16 %v470_v10 }
 0x16c   : > { %v1056_v20 = vunpack.c.l.bf16 %v471_v11 }
 0x16e   : > { %2204 = vmatpush2.xpose.msra.mxu0 %v1171_v16  ;;  %2275 = vmatpush2.xpose.msra.mxu1 %v1173_v17  ;;  %v1057_v16 = vunpack.c.h.bf16 %v471_v11  ;;  %v463_v17 = vld [vmem:[%s3505_s15 + $0x464] sm:$0xff] }
 0x16f   : > { %2205 = vmatprep.subr.mxu0 %v1159_v18  ;;  %2276 = vmatprep.subr.mxu1 %v1161_v19  ;;  %v464_v18 = vld [vmem:[%s3505_s15 + $0x46c] sm:$0xff]  ;;  %v1054_v19 = vunpack.c.l.bf16 %v470_v10  ;;  %v1042_v22 = vunpack.c.h.bf16 %v463_v17 }
 0x170   : > { %v1043_v31 = vunpack.c.l.bf16 %v464_v18 }
 0x172   : > { %2206 = vmatpush2.xpose.msra.mxu0 %v1158_v23  ;;  %2277 = vmatpush2.xpose.msra.mxu1 %v1160_v25  ;;  %v1044_v23 = vunpack.c.h.bf16 %v464_v18  ;;  %v456_v25 = vld [vmem:[%s3505_s15 + $0x430] sm:$0xff] }
 0x173   : > { %2207 = vmatprep.subr.mxu0 %v1146_v29  ;;  %2278 = vmatprep.subr.mxu1 %v1148_v30  ;;  %v457_v29 = vld [vmem:[%s3505_s15 + $0x438] sm:$0xff]  ;;  %v1041_v30 = vunpack.c.l.bf16 %v463_v17  ;;  %v1029_v32 = vunpack.c.h.bf16 %v456_v25 }
 0x174   : > { %v1030_v40 = vunpack.c.l.bf16 %v457_v29 }
 0x176   : > { %2208 = vmatpush2.xpose.msra.mxu0 %v1145_v24  ;;  %2279 = vmatpush2.xpose.msra.mxu1 %v1147_v37  ;;  %v1031_v24 = vunpack.c.h.bf16 %v457_v29  ;;  %v449_v37 = vld [vmem:[%s3505_s15 + $0x3fc] sm:$0xff] }
 0x177   : > { %2209 = vmatprep.subr.mxu0 %v1133_v38  ;;  %2280 = vmatprep.subr.mxu1 %v1135_v39  ;;  %v450_v38 = vld [vmem:[%s3505_s15 + $0x404] sm:$0xff]  ;;  %v1028_v39 = vunpack.c.l.bf16 %v456_v25  ;;  %v1016_v41 = vunpack.c.h.bf16 %v449_v37 }
 0x178   : > { %v1017_v46 = vunpack.c.l.bf16 %v450_v38 }
 0x17a   : > { %2210 = vmatpush2.xpose.msra.mxu0 %v1132_v42  ;;  %2281 = vmatpush2.xpose.msra.mxu1 %v1134_v43  ;;  %v1018_v42 = vunpack.c.h.bf16 %v450_v38  ;;  %v442_v43 = vld [vmem:[%s3505_s15 + $0x3c8] sm:$0xff] }
 0x17b   : > { %2211 = vmatprep.subr.mxu0 %v1120_v44  ;;  %2282 = vmatprep.subr.mxu1 %v1122_v45  ;;  %v443_v44 = vld [vmem:[%s3505_s15 + $0x3d0] sm:$0xff]  ;;  %v1015_v45 = vunpack.c.l.bf16 %v449_v37  ;;  %v1003_v47 = vunpack.c.h.bf16 %v442_v43 }
 0x17c   : > { %v1004_v54 = vunpack.c.l.bf16 %v443_v44 }
 0x17e   : > { %2212 = vmatpush2.xpose.msra.mxu0 %v1119_v49  ;;  %2283 = vmatpush2.xpose.msra.mxu1 %v1121_v50  ;;  %v1005_v49 = vunpack.c.h.bf16 %v443_v44  ;;  %v435_v50 = vld [vmem:[%s3505_s15 + $0x394] sm:$0xff] }
 0x17f   : > { %2213 = vmatprep.subr.mxu0 %v1107_v51  ;;  %2284 = vmatprep.subr.mxu1 %v1109_v53  ;;  %v436_v51 = vld [vmem:[%s3505_s15 + $0x39c] sm:$0xff]  ;;  %v1002_v53 = vunpack.c.l.bf16 %v442_v43  ;;  %v990_v55 = vunpack.c.h.bf16 %v435_v50 }
 0x180   : > { %v991_v62 = vunpack.c.l.bf16 %v436_v51 }
 0x182   : > { %2214 = vmatpush2.xpose.msra.mxu0 %v1106_v56  ;;  %2285 = vmatpush2.xpose.msra.mxu1 %v1108_v59  ;;  %v992_v56 = vunpack.c.h.bf16 %v436_v51  ;;  %v428_v59 = vld [vmem:[%s3505_s15 + $0x360] sm:$0xff] }
 0x183   : > { %2215 = vmatprep.subr.mxu0 %v1094_v60  ;;  %2286 = vmatprep.subr.mxu1 %v1096_v61  ;;  %v429_v60 = vld [vmem:[%s3505_s15 + $0x368] sm:$0xff]  ;;  %v989_v61 = vunpack.c.l.bf16 %v435_v50  ;;  %v977_v63 = vunpack.c.h.bf16 %v428_v59 }
 0x184   : > { %v978_v4 = vunpack.c.l.bf16 %v429_v60 }
 0x186   : > { %2216 = vmatpush2.xpose.msra.mxu0 %v1093_v0  ;;  %2287 = vmatpush2.xpose.msra.mxu1 %v1095_v1  ;;  %v979_v0 = vunpack.c.h.bf16 %v429_v60  ;;  %v535_v1 = vld [vmem:[%s3505_s15 + $0x648] ss:$52 sps:$4 sm:$0xff]  }
 0x187   : > { %2217 = vmatprep.subr.mxu0 %v1081_v2  ;;  %2288 = vmatprep.subr.mxu1 %v1083_v3  ;;  %v641_v2 = vld [vmem:[%s3505_s15 + $0x98c] sm:$0xff]  ;;  %v976_v3 = vunpack.c.l.bf16 %v428_v59  ;;  %v1175_v5 = vunpack.c.h.bf16 %v535_v1  ;;  %v1162_v11 = vunpack.c.l.bf16 %v535_v1 }
 0x18a   : > { %2218 = vmatpush2.xpose.msra.mxu0 %v1080_v6  ;;  %2289 = vmatpush2.xpose.msra.mxu1 %v1082_v7  ;;  %v1372_v6 = vunpack.c.h.bf16 %v641_v2  ;;  %v423_v7 = vld [vmem:[%s3505_s15 + $0x308] ss:$52 sps:$4 sm:$0xff]  }
 0x18b   : > { %2219 = vmatprep.subr.mxu0 %v1068_v8  ;;  %2290 = vmatprep.subr.mxu1 %v1070_v9  ;;  %v634_v8 = vld [vmem:[%s3505_s15 + $0x958] sm:$0xff]  ;;  %v1371_v9 = vunpack.c.l.bf16 %v641_v2  ;;  %v967_v10 = vunpack.c.h.bf16 %v423_v7  ;;  %v954_v18 = vunpack.c.l.bf16 %v423_v7 }
 0x18c   : > { %v1358_v17 = vunpack.c.l.bf16 %v634_v8 }
 0x18e   : > { %2220 = vmatpush2.xpose.msra.mxu0 %v1067_v12  ;;  %2291 = vmatpush2.xpose.msra.mxu1 %v1069_v14  ;;  %v1359_v12 = vunpack.c.h.bf16 %v634_v8  ;;  %v521_v14 = vld [vmem:[%s3505_s15 + $0x5e0] ss:$52 sps:$4 sm:$0xff]  }
 0x18f   : > { %2221 = vmatprep.subr.mxu0 %v1055_v15  ;;  %2292 = vmatprep.subr.mxu1 %v1057_v16  ;;  %v627_v15 = vld [vmem:[%s3505_s15 + $0x924] sm:$0xff]  ;;  %v3784_v16 = vld.sshfl [vmem:[%s4170_s0 + $0x18] sm:$0x3 pattern:$0x76325410] }
 0x190   : > { %v1345_v25 = vunpack.c.l.bf16 %v627_v15 }
 0x192   : > { %2222 = vmatpush2.xpose.msra.mxu0 %v1054_v19  ;;  %2293 = vmatpush2.xpose.msra.mxu1 %v1056_v20  ;;  %v1149_v19 = vunpack.c.h.bf16 %v521_v14  ;;  %v1346_v20 = vunpack.c.h.bf16 %v627_v15 }
 0x193   : > { %2223 = vmatprep.subr.mxu0 %v1042_v22  ;;  %2294 = vmatprep.subr.mxu1 %v1044_v23  ;;  %v409_v22 = vld [vmem:[%s3505_s15 + $0x2a0] ss:$52 sps:$4 sm:$0xff]  }
 0x194   : > { %v620_v23 = vld [vmem:[%s3505_s15 + $0x8f0] sm:$0xff]  ;;  %v941_v29 = vunpack.c.h.bf16 %v409_v22 }
 0x195   : > { %v1332_v37 = vunpack.c.l.bf16 %v620_v23 }
 0x196   : > { %2224 = vmatpush2.xpose.msra.mxu0 %v1041_v30  ;;  %2295 = vmatpush2.xpose.msra.mxu1 %v1043_v31  ;;  %v1136_v30 = vunpack.c.l.bf16 %v521_v14  ;;  %v1333_v31 = vunpack.c.h.bf16 %v620_v23 }
 0x197   : > { %2225 = vmatprep.subr.mxu0 %v1029_v32  ;;  %2296 = vmatprep.subr.mxu1 %v1031_v24  ;;  %v507_v32 = vld [vmem:[%s3505_s15 + $0x578] ss:$52 sps:$4 sm:$0xff]   ;;  %v613_v24 = vld [vmem:[%s3505_s15 + $0x8bc] sm:$0xff] }
 0x198   : > { %v1123_v38 = vunpack.c.h.bf16 %v507_v32  ;;  %v1110_v44 = vunpack.c.l.bf16 %v507_v32 }
 0x19a   : > { %2226 = vmatpush2.xpose.msra.mxu0 %v1028_v39  ;;  %2297 = vmatpush2.xpose.msra.mxu1 %v1030_v40  ;;  %v1320_v39 = vunpack.c.h.bf16 %v613_v24  ;;  %v395_v40 = vld [vmem:[%s3505_s15 + $0x238] ss:$52 sps:$4 sm:$0xff]  }
 0x19b   : > { %2227 = vmatprep.subr.mxu0 %v1016_v41  ;;  %2298 = vmatprep.subr.mxu1 %v1018_v42  ;;  %v606_v41 = vld [vmem:[%s3505_s15 + $0x888] sm:$0xff]  ;;  %v1319_v42 = vunpack.c.l.bf16 %v613_v24  ;;  %v915_v43 = vunpack.c.h.bf16 %v395_v40  ;;  %v902_v50 = vunpack.c.l.bf16 %v395_v40 }
 0x19e   : > { %2228 = vmatpush2.xpose.msra.mxu0 %v1015_v45  ;;  %2299 = vmatpush2.xpose.msra.mxu1 %v1017_v46  ;;  %v1307_v45 = vunpack.c.h.bf16 %v606_v41  ;;  %v493_v46 = vld [vmem:[%s3505_s15 + $0x510] ss:$52 sps:$4 sm:$0xff]  }
 0x19f   : > { %2229 = vmatprep.subr.mxu0 %v1003_v47  ;;  %2300 = vmatprep.subr.mxu1 %v1005_v49  ;;  %v599_v47 = vld [vmem:[%s3505_s15 + $0x854] sm:$0xff]  ;;  %v1306_v49 = vunpack.c.l.bf16 %v606_v41  ;;  %v1097_v51 = vunpack.c.h.bf16 %v493_v46  ;;  %v1084_v60 = vunpack.c.l.bf16 %v493_v46 }
 0x1a2   : > { %2230 = vmatpush2.xpose.msra.mxu0 %v1002_v53  ;;  %2301 = vmatpush2.xpose.msra.mxu1 %v1004_v54  ;;  %v1294_v53 = vunpack.c.h.bf16 %v599_v47  ;;  %v381_v54 = vld [vmem:[%s3505_s15 + $0x1d0] ss:$52 sps:$4 sm:$0xff]  }
 0x1a3   : > { %2231 = vmatprep.subr.mxu0 %v990_v55  ;;  %2302 = vmatprep.subr.mxu1 %v992_v56  ;;  %v592_v55 = vld [vmem:[%s3505_s15 + $0x820] sm:$0xff]  ;;  %v1293_v56 = vunpack.c.l.bf16 %v599_v47  ;;  %v889_v59 = vunpack.c.h.bf16 %v381_v54  ;;  %v876_v1 = vunpack.c.l.bf16 %v381_v54 }
 0x1a6   : > { %2232 = vmatpush2.xpose.msra.mxu0 %v989_v61  ;;  %2303 = vmatpush2.xpose.msra.mxu1 %v991_v62  ;;  %v1281_v61 = vunpack.c.h.bf16 %v592_v55  ;;  %v479_v62 = vld [vmem:[%s3505_s15 + $0x4a8] ss:$52 sps:$4 sm:$0xff]  }
 0x1a7   : > { %2233 = vmatprep.subr.mxu0 %v977_v63  ;;  %2304 = vmatprep.subr.mxu1 %v979_v0  ;;  %v585_v63 = vld [vmem:[%s3505_s15 + $0x7ec] sm:$0xff]  ;;  %v1280_v0 = vunpack.c.l.bf16 %v592_v55  ;;  %v1071_v2 = vunpack.c.h.bf16 %v479_v62  ;;  %v1058_v8 = vunpack.c.l.bf16 %v479_v62 }
 0x1aa   : > { %2234 = vmatpush2.xpose.msra.mxu0 %v976_v3  ;;  %2305 = vmatpush2.xpose.msra.mxu1 %v978_v4  ;;  %v1268_v3 = vunpack.c.h.bf16 %v585_v63  ;;  %v367_v4 = vld [vmem:[%s3505_s15 + $0x168] ss:$52 sps:$4 sm:$0xff]  }
 0x1ab   : > { %3250 = vmatprep.subr.msk.mxu0 %vm1692_vm1, %v1175_v5  ;;  %2384 = vmatprep.subr.mxu1 %v1372_v6  ;;  %v578_v5 = vld [vmem:[%s3505_s15 + $0x7b8] sm:$0xff]  ;;  %v1267_v6 = vunpack.c.l.bf16 %v585_v63  ;;  %v863_v7 = vunpack.c.h.bf16 %v367_v4  ;;  %v850_v14 = vunpack.c.l.bf16 %v367_v4 }
 0x1ad   : > { %2236 = vmatmul.mubr.f32.vlgmr.msra.gmra.mxu0 %v3695_v21  ;;  %2307 = vmatmul.mubr.f32.vlgmr.msra.gmra.mxu1 %v3698_v26 }
 0x1ae   : > { %3251 = vmatpush3.xpose.msk.msra.mxu0 %vm1692_vm1, %v967_v10  ;;  %2385 = vmatpush1.xpose.msra.mxu1 %v1371_v9  ;;  %v1255_v9 = vunpack.c.h.bf16 %v578_v5  ;;  %v465_v10 = vld [vmem:[%s3505_s15 + $0x440] ss:$52 sps:$4 sm:$0xff]  }
 0x1af   : > { %3252 = vmatprep.subr.msk.mxu0 %vm1692_vm1, %v1162_v11  ;;  %2386 = vmatprep.subr.mxu1 %v1359_v12  ;;  %v571_v11 = vld [vmem:[%s3505_s15 + $0x784] sm:$0xff]  ;;  %v1254_v12 = vunpack.c.l.bf16 %v578_v5  ;;  %v1045_v15 = vunpack.c.h.bf16 %v465_v10  ;;  %v1032_v23 = vunpack.c.l.bf16 %v465_v10 }
 0x1b0   : > { %3282 = vmatprep.mubr.msk.f32.mxu0 %vm1692_vm1, %v3784_v16  ;;  %2448 = vmatprep.mubr.f32.mxu1 %v3554_v33  ;;  %v928_v33 = vunpack.c.l.bf16 %v409_v22 }
 0x1b2   : > { %3253 = vmatpush3.xpose.msk.msra.mxu0 %vm1692_vm1, %v954_v18  ;;  %2387 = vmatpush1.xpose.msra.mxu1 %v1358_v17  ;;  %v1242_v17 = vunpack.c.h.bf16 %v571_v11  ;;  %v353_v18 = vld [vmem:[%s3505_s15 + $0x100] ss:$52 sps:$4 sm:$0xff]  }
 0x1b3   : > { %3254 = vmatprep.subr.msk.mxu0 %vm1692_vm1, %v1149_v19  ;;  %2388 = vmatprep.subr.mxu1 %v1346_v20  ;;  %v564_v19 = vld [vmem:[%s3505_s15 + $0x750] sm:$0xff]  ;;  %v1241_v20 = vunpack.c.l.bf16 %v571_v11  ;;  %v837_v22 = vunpack.c.h.bf16 %v353_v18  ;;  %v824_v32 = vunpack.c.l.bf16 %v353_v18 }
 0x1b6   : > { %3255 = vmatpush3.xpose.msk.msra.mxu0 %vm1692_vm1, %v941_v29  ;;  %2389 = vmatpush1.xpose.msra.mxu1 %v1345_v25  ;;  %v1229_v25 = vunpack.c.h.bf16 %v564_v19  ;;  %v451_v29 = vld [vmem:[%s3505_s15 + $0x3d8] ss:$52 sps:$4 sm:$0xff]  }
 0x1b7   : > { %3256 = vmatprep.subr.msk.mxu0 %vm1692_vm1, %v1136_v30  ;;  %2390 = vmatprep.subr.mxu1 %v1333_v31  ;;  %v557_v30 = vld [vmem:[%s3505_s15 + $0x71c] sm:$0xff]  ;;  %v1228_v31 = vunpack.c.l.bf16 %v564_v19  ;;  %v1019_v24 = vunpack.c.h.bf16 %v451_v29  ;;  %v1006_v41 = vunpack.c.l.bf16 %v451_v29 }
 0x1ba   : > { %3257 = vmatpush3.xpose.msk.msra.mxu0 %vm1692_vm1, %v928_v33  ;;  %2391 = vmatpush1.xpose.msra.mxu1 %v1332_v37  ;;  %v1216_v37 = vunpack.c.h.bf16 %v557_v30  ;;  %v339_v33 = vld [vmem:[%s3505_s15 + $0x98] ss:$52 sps:$4 sm:$0xff]  }
 0x1bb   : > { %3258 = vmatprep.subr.msk.mxu0 %vm1692_vm1, %v1123_v38  ;;  %2392 = vmatprep.subr.mxu1 %v1320_v39  ;;  %v550_v38 = vld [vmem:[%s3505_s15 + $0x6e8] sm:$0xff]  ;;  %v1215_v39 = vunpack.c.l.bf16 %v557_v30  ;;  %v811_v40 = vunpack.c.h.bf16 %v339_v33  ;;  %v798_v46 = vunpack.c.l.bf16 %v339_v33 }
 0x1bc   : > { %v718_v30 = vld [vmem:[%s3505_s15 + $0xbc8] sm:$0xff] }
 0x1be   : > { %3259 = vmatpush3.xpose.msk.msra.mxu0 %vm1692_vm1, %v915_v43  ;;  %2393 = vmatpush1.xpose.msra.mxu1 %v1319_v42  ;;  %v1203_v42 = vunpack.c.h.bf16 %v550_v38  ;;  %v437_v43 = vld [vmem:[%s3505_s15 + $0x370] ss:$52 sps:$4 sm:$0xff]  }
 0x1bf   : > { %3260 = vmatprep.subr.msk.mxu0 %vm1692_vm1, %v1110_v44  ;;  %2394 = vmatprep.subr.mxu1 %v1307_v45  ;;  %v543_v44 = vld [vmem:[%s3505_s15 + $0x6b4] sm:$0xff]  ;;  %v1202_v45 = vunpack.c.l.bf16 %v550_v38  ;;  %v993_v47 = vunpack.c.h.bf16 %v437_v43  ;;  %v980_v55 = vunpack.c.l.bf16 %v437_v43 }
 0x1c0   : > { %v711_v38 = vld [vmem:[%s3505_s15 + $0xb94] sm:$0xff] }
 0x1c2   : > { %3261 = vmatpush3.xpose.msk.msra.mxu0 %vm1692_vm1, %v902_v50  ;;  %2395 = vmatpush1.xpose.msra.mxu1 %v1306_v49  ;;  %v1190_v49 = vunpack.c.h.bf16 %v543_v44  ;;  %v325_v50 = vld [vmem:[%s3505_s15 + $0x30] ss:$52 sps:$4 sm:$0xff]  }
 0x1c3   : > { %3262 = vmatprep.subr.msk.mxu0 %vm1692_vm1, %v1097_v51  ;;  %2396 = vmatprep.subr.mxu1 %v1294_v53  ;;  %v536_v51 = vld [vmem:[%s3505_s15 + $0x680] sm:$0xff]  ;;  %v1189_v53 = vunpack.c.l.bf16 %v543_v44  ;;  %v785_v54 = vunpack.c.h.bf16 %v325_v50  ;;  %v772_v62 = vunpack.c.l.bf16 %v325_v50 }
 0x1c4   : > { %v704_v44 = vld [vmem:[%s3505_s15 + $0xb60] sm:$0xff] }
 0x1c6   : > { %3263 = vmatpush3.xpose.msk.msra.mxu0 %vm1692_vm1, %v889_v59  ;;  %2397 = vmatpush1.xpose.msra.mxu1 %v1293_v56  ;;  %v1177_v56 = vunpack.c.h.bf16 %v536_v51  ;;  %v753_v59 = vld [vmem:[%s3505_s15 + $0xccc] sm:$0xff] }
 0x1c7   : > { %3264 = vmatprep.subr.msk.mxu0 %vm1692_vm1, %v1084_v60  ;;  %2398 = vmatprep.subr.mxu1 %v1281_v61  ;;  %v642_v60 = vld [vmem:[%s3505_s15 + $0x994] sm:$0xff]  ;;  %v1176_v61 = vunpack.c.l.bf16 %v536_v51  ;;  %v1580_v63 = vunpack.c.h.bf16 %v753_v59  ;;  %v697_v51 = vld [vmem:[%s3505_s15 + $0xb2c] sm:$0xff] }
 0x1c8   : > { %v1373_v4 = vunpack.c.l.bf16 %v642_v60 }
 0x1ca   : > { %3265 = vmatpush3.xpose.msk.msra.mxu0 %vm1692_vm1, %v876_v1  ;;  %2399 = vmatpush1.xpose.msra.mxu1 %v1280_v0  ;;  %v1374_v0 = vunpack.c.h.bf16 %v642_v60  ;;  %v746_v1 = vld [vmem:[%s3505_s15 + $0xc98] sm:$0xff] }
 0x1cb   : > { %3266 = vmatprep.subr.msk.mxu0 %vm1692_vm1, %v1071_v2  ;;  %2400 = vmatprep.subr.mxu1 %v1268_v3  ;;  %v635_v2 = vld [vmem:[%s3505_s15 + $0x960] sm:$0xff]  ;;  %v1579_v3 = vunpack.c.l.bf16 %v753_v59  ;;  %v1567_v5 = vunpack.c.h.bf16 %v746_v1  ;;  %v690_v60 = vld [vmem:[%s3505_s15 + $0xaf8] sm:$0xff] }
 0x1cc   : > { %v1360_v10 = vunpack.c.l.bf16 %v635_v2 }
 0x1ce   : > { %3267 = vmatpush3.xpose.msk.msra.mxu0 %vm1692_vm1, %v863_v7  ;;  %2401 = vmatpush1.xpose.msra.mxu1 %v1267_v6  ;;  %v1361_v6 = vunpack.c.h.bf16 %v635_v2  ;;  %v739_v7 = vld [vmem:[%s3505_s15 + $0xc64] sm:$0xff] }
 0x1cf   : > { %3268 = vmatprep.subr.msk.mxu0 %vm1692_vm1, %v1058_v8  ;;  %2402 = vmatprep.subr.mxu1 %v1255_v9  ;;  %v628_v8 = vld [vmem:[%s3505_s15 + $0x92c] sm:$0xff]  ;;  %v1566_v9 = vunpack.c.l.bf16 %v746_v1  ;;  %v1554_v11 = vunpack.c.h.bf16 %v739_v7  ;;  %v683_v2 = vld [vmem:[%s3505_s15 + $0xac4] sm:$0xff] }
 0x1d0   : > { %v1347_v18 = vunpack.c.l.bf16 %v628_v8 }
 0x1d2   : > { %3269 = vmatpush3.xpose.msk.msra.mxu0 %vm1692_vm1, %v850_v14  ;;  %2403 = vmatpush1.xpose.msra.mxu1 %v1254_v12  ;;  %v1348_v12 = vunpack.c.h.bf16 %v628_v8  ;;  %v732_v14 = vld [vmem:[%s3505_s15 + $0xc30] sm:$0xff] }
 0x1d3   : > { %3270 = vmatprep.subr.msk.mxu0 %vm1692_vm1, %v1045_v15  ;;  %2404 = vmatprep.subr.mxu1 %v1242_v17  ;;  %v621_v15 = vld [vmem:[%s3505_s15 + $0x8f8] sm:$0xff]  ;;  %v1553_v17 = vunpack.c.l.bf16 %v739_v7  ;;  %v676_v8 = vld [vmem:[%s3505_s15 + $0xa90] sm:$0xff] }
 0x1d4   : > { %v1335_v19 = vunpack.c.h.bf16 %v621_v15 }
 0x1d6   : > { %3271 = vmatpush3.xpose.msk.msra.mxu0 %vm1692_vm1, %v837_v22  ;;  %2405 = vmatpush1.xpose.msra.mxu1 %v1241_v20  ;;  %v725_v20 = vld [vmem:[%s3505_s15 + $0xbfc] sm:$0xff]  ;;  %v614_v22 = vld [vmem:[%s3505_s15 + $0x8c4] sm:$0xff] }
 0x1d7   : > { %3272 = vmatprep.subr.msk.mxu0 %vm1692_vm1, %v1032_v23  ;;  %2406 = vmatprep.subr.mxu1 %v1229_v25  ;;  %v1540_v23 = vunpack.c.l.bf16 %v732_v14  ;;  %v1334_v25 = vunpack.c.l.bf16 %v621_v15  ;;  %v1322_v29 = vunpack.c.h.bf16 %v614_v22  ;;  %v669_v15 = vld [vmem:[%s3505_s15 + $0xa5c] sm:$0xff] }
 0x1da   : > { %3273 = vmatpush3.xpose.msk.msra.mxu0 %vm1692_vm1, %v824_v32  ;;  %2407 = vmatpush1.xpose.msra.mxu1 %v1228_v31  ;;  %v607_v31 = vld [vmem:[%s3505_s15 + $0x890] sm:$0xff]  ;;  %v1527_v32 = vunpack.c.l.bf16 %v725_v20 }
 0x1db   : > { %3274 = vmatprep.subr.msk.mxu0 %vm1692_vm1, %v1019_v24  ;;  %2408 = vmatprep.subr.mxu1 %v1216_v37  ;;  %v1321_v24 = vunpack.c.l.bf16 %v614_v22  ;;  %v1515_v37 = vunpack.c.h.bf16 %v718_v30  ;;  %v1309_v33 = vunpack.c.h.bf16 %v607_v31  ;;  %v662_v22 = vld [vmem:[%s3505_s15 + $0xa28] sm:$0xff] }
 0x1de   : > { %3275 = vmatpush3.xpose.msk.msra.mxu0 %vm1692_vm1, %v811_v40  ;;  %2409 = vmatpush1.xpose.msra.mxu1 %v1215_v39  ;;  %v600_v39 = vld [vmem:[%s3505_s15 + $0x85c] sm:$0xff]  ;;  %v1514_v40 = vunpack.c.l.bf16 %v718_v30 }
 0x1df   : > { %3276 = vmatprep.subr.msk.mxu0 %vm1692_vm1, %v1006_v41  ;;  %2410 = vmatprep.subr.mxu1 %v1203_v42  ;;  %v1308_v41 = vunpack.c.l.bf16 %v607_v31  ;;  %v1502_v42 = vunpack.c.h.bf16 %v711_v38  ;;  %v1296_v43 = vunpack.c.h.bf16 %v600_v39  ;;  %v655_v31 = vld [vmem:[%s3505_s15 + $0x9f4] sm:$0xff] }
 0x1e2   : > { %3277 = vmatpush3.xpose.msk.msra.mxu0 %vm1692_vm1, %v798_v46  ;;  %2411 = vmatpush1.xpose.msra.mxu1 %v1202_v45  ;;  %v593_v45 = vld [vmem:[%s3505_s15 + $0x828] sm:$0xff]  ;;  %v1501_v46 = vunpack.c.l.bf16 %v711_v38 }
 0x1e3   : > { %3278 = vmatprep.subr.msk.mxu0 %vm1692_vm1, %v993_v47  ;;  %2412 = vmatprep.subr.mxu1 %v1190_v49  ;;  %v1295_v47 = vunpack.c.l.bf16 %v600_v39  ;;  %v1489_v49 = vunpack.c.h.bf16 %v704_v44  ;;  %v1283_v50 = vunpack.c.h.bf16 %v593_v45  ;;  %v648_v39 = vld [vmem:[%s3505_s15 + $0x9c0] sm:$0xff] }
 0x1e6   : > { %3279 = vmatpush3.xpose.msk.msra.mxu0 %vm1692_vm1, %v785_v54  ;;  %2413 = vmatpush1.xpose.msra.mxu1 %v1189_v53  ;;  %v586_v53 = vld [vmem:[%s3505_s15 + $0x7f4] sm:$0xff]  ;;  %v1488_v54 = vunpack.c.l.bf16 %v704_v44 }
 0x1e7   : > { %3280 = vmatprep.subr.msk.mxu0 %vm1692_vm1, %v980_v55  ;;  %2414 = vmatprep.subr.mxu1 %v1177_v56  ;;  %v1282_v55 = vunpack.c.l.bf16 %v593_v45  ;;  %v1476_v56 = vunpack.c.h.bf16 %v697_v51  ;;  %v1270_v59 = vunpack.c.h.bf16 %v586_v53  ;;  %v754_v45 = vld [vmem:[%s3505_s15 + $0xcd4] sm:$0xff] }
 0x1ea   : > { %3281 = vmatpush3.xpose.msk.msra.mxu0 %vm1692_vm1, %v772_v62  ;;  %2415 = vmatpush1.xpose.msra.mxu1 %v1176_v61  ;;  %v579_v61 = vld [vmem:[%s3505_s15 + $0x7c0] sm:$0xff]  ;;  %v1475_v62 = vunpack.c.l.bf16 %v697_v51 }
 0x1eb   : > { %2416 = vmatprep.subr.mxu1 %v1580_v63  ;;  %2455 = vmatprep.subr.mxu0 %v1374_v0  ;;  %v1269_v63 = vunpack.c.l.bf16 %v586_v53  ;;  %v1463_v0 = vunpack.c.h.bf16 %v690_v60  ;;  %v1257_v1 = vunpack.c.h.bf16 %v579_v61  ;;  %v747_v53 = vld [vmem:[%s3505_s15 + $0xca0] sm:$0xff] }
 0x1ed   : > { %3283 = vmatmul.mubr.msk.f32.vlgmr.msra.gmra.mxu0 %vm1692_vm1, %v3784_v16  ;;  %v1541_v16 = vunpack.c.h.bf16 %v732_v14 }
 0x1ee   : > { %2417 = vmatpush2.xpose.msra.mxu1 %v1579_v3  ;;  %2456 = vmatpush1.xpose.msra.mxu0 %v1373_v4  ;;  %v572_v3 = vld [vmem:[%s3505_s15 + $0x78c] sm:$0xff]  ;;  %v1462_v4 = vunpack.c.l.bf16 %v690_v60 }
 0x1ef   : > { %2418 = vmatprep.subr.mxu1 %v1567_v5  ;;  %2457 = vmatprep.subr.mxu0 %v1361_v6  ;;  %v1256_v5 = vunpack.c.l.bf16 %v579_v61  ;;  %v1450_v6 = vunpack.c.h.bf16 %v683_v2  ;;  %v1244_v7 = vunpack.c.h.bf16 %v572_v3  ;;  %v740_v61 = vld [vmem:[%s3505_s15 + $0xc6c] sm:$0xff] }
 0x1f0   : > { %2519 = vmatprep.mubr.f32.mxu0 %v3558_v34  ;;  %v1528_v34 = vunpack.c.h.bf16 %v725_v20 }
 0x1f2   : > { %2419 = vmatpush2.xpose.msra.mxu1 %v1566_v9  ;;  %2458 = vmatpush1.xpose.msra.mxu0 %v1360_v10  ;;  %v565_v9 = vld [vmem:[%s3505_s15 + $0x758] sm:$0xff]  ;;  %v1449_v10 = vunpack.c.l.bf16 %v683_v2 }
 0x1f3   : > { %2420 = vmatprep.subr.mxu1 %v1554_v11  ;;  %2459 = vmatprep.subr.mxu0 %v1348_v12  ;;  %v1243_v11 = vunpack.c.l.bf16 %v572_v3  ;;  %v1437_v12 = vunpack.c.h.bf16 %v676_v8  ;;  %v1231_v14 = vunpack.c.h.bf16 %v565_v9  ;;  %v733_v3 = vld [vmem:[%s3505_s15 + $0xc38] sm:$0xff] }
 0x1f6   : > { %2421 = vmatpush2.xpose.msra.mxu1 %v1553_v17  ;;  %2460 = vmatpush1.xpose.msra.mxu0 %v1347_v18  ;;  %v558_v17 = vld [vmem:[%s3505_s15 + $0x724] sm:$0xff]  ;;  %v1436_v18 = vunpack.c.l.bf16 %v676_v8 }
 0x1f7   : > { %2422 = vmatprep.subr.mxu1 %v1541_v16  ;;  %2461 = vmatprep.subr.mxu0 %v1335_v19  ;;  %v1230_v16 = vunpack.c.l.bf16 %v565_v9  ;;  %v1424_v19 = vunpack.c.h.bf16 %v669_v15  ;;  %v1218_v20 = vunpack.c.h.bf16 %v558_v17  ;;  %v726_v8 = vld [vmem:[%s3505_s15 + $0xc04] sm:$0xff]  ;;  %v615_v9 = vld [vmem:[%s3505_s15 + $0x8cc] sm:$0xff] }
 0x1fa   : > { %2423 = vmatpush2.xpose.msra.mxu1 %v1540_v23  ;;  %2462 = vmatpush1.xpose.msra.mxu0 %v1334_v25  ;;  %v551_v23 = vld [vmem:[%s3505_s15 + $0x6f0] sm:$0xff]  ;;  %v1423_v25 = vunpack.c.l.bf16 %v669_v15  ;;  %v608_v15 = vld [vmem:[%s3505_s15 + $0x898] sm:$0xff] }
 0x1fb   : > { %2424 = vmatprep.subr.mxu1 %v1528_v34  ;;  %2463 = vmatprep.subr.mxu0 %v1322_v29  ;;  %v1217_v34 = vunpack.c.l.bf16 %v558_v17  ;;  %v1411_v29 = vunpack.c.h.bf16 %v662_v22  ;;  %v1205_v30 = vunpack.c.h.bf16 %v551_v23  ;;  %v1529_v17 = vunpack.c.l.bf16 %v726_v8 }
 0x1fe   : > { %2425 = vmatpush2.xpose.msra.mxu1 %v1527_v32  ;;  %2464 = vmatpush1.xpose.msra.mxu0 %v1321_v24  ;;  %v544_v32 = vld [vmem:[%s3505_s15 + $0x6bc] sm:$0xff]  ;;  %v1410_v24 = vunpack.c.l.bf16 %v662_v22  ;;  %v601_v22 = vld [vmem:[%s3505_s15 + $0x864] sm:$0xff] }
 0x1ff   : > { %2426 = vmatprep.subr.mxu1 %v1515_v37  ;;  %2465 = vmatprep.subr.mxu0 %v1309_v33  ;;  %v1204_v37 = vunpack.c.l.bf16 %v551_v23  ;;  %v1398_v33 = vunpack.c.h.bf16 %v655_v31  ;;  %v1192_v38 = vunpack.c.h.bf16 %v544_v32 }
 0x202   : > { %2427 = vmatpush2.xpose.msra.mxu1 %v1514_v40  ;;  %2466 = vmatpush1.xpose.msra.mxu0 %v1308_v41  ;;  %v537_v40 = vld [vmem:[%s3505_s15 + $0x688] sm:$0xff]  ;;  %v1397_v41 = vunpack.c.l.bf16 %v655_v31  ;;  %v594_v31 = vld [vmem:[%s3505_s15 + $0x830] sm:$0xff] }
 0x203   : > { %2428 = vmatprep.subr.mxu1 %v1502_v42  ;;  %2467 = vmatprep.subr.mxu0 %v1296_v43  ;;  %v1191_v42 = vunpack.c.l.bf16 %v544_v32  ;;  %v1385_v43 = vunpack.c.h.bf16 %v648_v39  ;;  %v1179_v44 = vunpack.c.h.bf16 %v537_v40 }
 0x206   : > { %2429 = vmatpush2.xpose.msra.mxu1 %v1501_v46  ;;  %2468 = vmatpush1.xpose.msra.mxu0 %v1295_v47  ;;  %v643_v46 = vld [vmem:[%s3505_s15 + $0x99c] sm:$0xff]  ;;  %v1384_v47 = vunpack.c.l.bf16 %v648_v39 }
 0x207   : > { %2430 = vmatprep.subr.mxu1 %v1489_v49  ;;  %2469 = vmatprep.subr.mxu0 %v1283_v50  ;;  %v1178_v49 = vunpack.c.l.bf16 %v537_v40  ;;  %v1582_v50 = vunpack.c.h.bf16 %v754_v45  ;;  %v1376_v51 = vunpack.c.h.bf16 %v643_v46  ;;  %v587_v39 = vld [vmem:[%s3505_s15 + $0x7fc] sm:$0xff] }
 0x20a   : > { %2431 = vmatpush2.xpose.msra.mxu1 %v1488_v54  ;;  %2470 = vmatpush1.xpose.msra.mxu0 %v1282_v55  ;;  %v636_v54 = vld [vmem:[%s3505_s15 + $0x968] sm:$0xff]  ;;  %v1581_v55 = vunpack.c.l.bf16 %v754_v45 }
 0x20b   : > { %2432 = vmatprep.subr.mxu1 %v1476_v56  ;;  %2471 = vmatprep.subr.mxu0 %v1270_v59  ;;  %v1375_v56 = vunpack.c.l.bf16 %v643_v46  ;;  %v1569_v59 = vunpack.c.h.bf16 %v747_v53  ;;  %v1363_v60 = vunpack.c.h.bf16 %v636_v54  ;;  %v580_v45 = vld [vmem:[%s3505_s15 + $0x7c8] sm:$0xff] }
 0x20e   : > { %2433 = vmatpush2.xpose.msra.mxu1 %v1475_v62  ;;  %2472 = vmatpush1.xpose.msra.mxu0 %v1269_v63  ;;  %v629_v62 = vld [vmem:[%s3505_s15 + $0x934] sm:$0xff]  ;;  %v1568_v63 = vunpack.c.l.bf16 %v747_v53 }
 0x20f   : > { %2434 = vmatprep.subr.mxu1 %v1463_v0  ;;  %2473 = vmatprep.subr.mxu0 %v1257_v1  ;;  %v1362_v0 = vunpack.c.l.bf16 %v636_v54  ;;  %v1556_v1 = vunpack.c.h.bf16 %v740_v61  ;;  %v1350_v2 = vunpack.c.h.bf16 %v629_v62  ;;  %v573_v53 = vld [vmem:[%s3505_s15 + $0x794] sm:$0xff] }
 0x212   : > { %2435 = vmatpush2.xpose.msra.mxu1 %v1462_v4  ;;  %2474 = vmatpush1.xpose.msra.mxu0 %v1256_v5  ;;  %v622_v4 = vld [vmem:[%s3505_s15 + $0x900] sm:$0xff]  ;;  %v1555_v5 = vunpack.c.l.bf16 %v740_v61 }
 0x213   : > { %2436 = vmatprep.subr.mxu1 %v1450_v6  ;;  %2475 = vmatprep.subr.mxu0 %v1244_v7  ;;  %v1349_v6 = vunpack.c.l.bf16 %v629_v62  ;;  %v1337_v7 = vunpack.c.h.bf16 %v622_v4  ;;  %v566_v61 = vld [vmem:[%s3505_s15 + $0x760] sm:$0xff] }
 0x216   : > { %2437 = vmatpush2.xpose.msra.mxu1 %v1449_v10  ;;  %2476 = vmatpush1.xpose.msra.mxu0 %v1243_v11  ;;  %v1542_v10 = vunpack.c.l.bf16 %v733_v3  ;;  %v1336_v11 = vunpack.c.l.bf16 %v622_v4 }
 0x217   : > { %2438 = vmatprep.subr.mxu1 %v1437_v12  ;;  %2477 = vmatprep.subr.mxu0 %v1231_v14  ;;  %v1324_v12 = vunpack.c.h.bf16 %v615_v9  ;;  %v719_v14 = vld [vmem:[%s3505_s15 + $0xbd0] sm:$0xff] }
 0x218   : > { %v1516_v23 = vunpack.c.l.bf16 %v719_v14 }
 0x21a   : > { %2439 = vmatpush2.xpose.msra.mxu1 %v1436_v18  ;;  %2478 = vmatpush1.xpose.msra.mxu0 %v1230_v16  ;;  %v1323_v18 = vunpack.c.l.bf16 %v615_v9  ;;  %v1517_v16 = vunpack.c.h.bf16 %v719_v14  ;;  %v545_v14 = vld [vmem:[%s3505_s15 + $0x6c4] sm:$0xff] }
 0x21b   : > { %2440 = vmatprep.subr.mxu1 %v1424_v19  ;;  %2479 = vmatprep.subr.mxu0 %v1218_v20  ;;  %v1311_v19 = vunpack.c.h.bf16 %v608_v15  ;;  %v712_v20 = vld [vmem:[%s3505_s15 + $0xb9c] sm:$0xff] }
 0x21c   : > { %v1503_v32 = vunpack.c.l.bf16 %v712_v20 }
 0x21e   : > { %2441 = vmatpush2.xpose.msra.mxu1 %v1423_v25  ;;  %2480 = vmatpush1.xpose.msra.mxu0 %v1217_v34  ;;  %v1310_v25 = vunpack.c.l.bf16 %v608_v15  ;;  %v1504_v34 = vunpack.c.h.bf16 %v712_v20  ;;  %v538_v20 = vld [vmem:[%s3505_s15 + $0x690] sm:$0xff] }
 0x21f   : > { %2442 = vmatprep.subr.mxu1 %v1411_v29  ;;  %2481 = vmatprep.subr.mxu0 %v1205_v30  ;;  %v1298_v29 = vunpack.c.h.bf16 %v601_v22  ;;  %v705_v30 = vld [vmem:[%s3505_s15 + $0xb68] sm:$0xff] }
 0x220   : > { %v1490_v40 = vunpack.c.l.bf16 %v705_v30 }
 0x222   : > { %2443 = vmatpush2.xpose.msra.mxu1 %v1410_v24  ;;  %2482 = vmatpush1.xpose.msra.mxu0 %v1204_v37  ;;  %v1297_v24 = vunpack.c.l.bf16 %v601_v22  ;;  %v1491_v37 = vunpack.c.h.bf16 %v705_v30  ;;  %v644_v30 = vld [vmem:[%s3505_s15 + $0x9a4] sm:$0xff] }
 0x223   : > { %2444 = vmatprep.subr.mxu1 %v1398_v33  ;;  %2483 = vmatprep.subr.mxu0 %v1192_v38  ;;  %v1285_v33 = vunpack.c.h.bf16 %v594_v31  ;;  %v698_v38 = vld [vmem:[%s3505_s15 + $0xb34] sm:$0xff] }
 0x224   : > { %v1477_v46 = vunpack.c.l.bf16 %v698_v38 }
 0x226   : > { %2445 = vmatpush2.xpose.msra.mxu1 %v1397_v41  ;;  %2484 = vmatpush1.xpose.msra.mxu0 %v1191_v42  ;;  %v1284_v41 = vunpack.c.l.bf16 %v594_v31  ;;  %v1478_v42 = vunpack.c.h.bf16 %v698_v38  ;;  %v637_v38 = vld [vmem:[%s3505_s15 + $0x970] sm:$0xff] }
 0x227   : > { %2446 = vmatprep.subr.mxu1 %v1385_v43  ;;  %2485 = vmatprep.subr.mxu0 %v1179_v44  ;;  %v1272_v43 = vunpack.c.h.bf16 %v587_v39  ;;  %v691_v44 = vld [vmem:[%s3505_s15 + $0xb00] sm:$0xff] }
 0x228   : > { %v1464_v54 = vunpack.c.l.bf16 %v691_v44 }
 0x22a   : > { %2447 = vmatpush2.xpose.msra.mxu1 %v1384_v47  ;;  %2486 = vmatpush1.xpose.msra.mxu0 %v1178_v49  ;;  %v1271_v47 = vunpack.c.l.bf16 %v587_v39  ;;  %v1465_v49 = vunpack.c.h.bf16 %v691_v44  ;;  %v630_v44 = vld [vmem:[%s3505_s15 + $0x93c] sm:$0xff] }
 0x22b   : > { %2487 = vmatprep.subr.mxu0 %v1582_v50  ;;  %2526 = vmatprep.subr.mxu1 %v1376_v51  ;;  %v1259_v50 = vunpack.c.h.bf16 %v580_v45  ;;  %v684_v51 = vld [vmem:[%s3505_s15 + $0xacc] sm:$0xff] }
 0x22c   : > { %v1451_v62 = vunpack.c.l.bf16 %v684_v51 }
 0x22d   : > { %2449 = vmatmul.mubr.f32.vlgmr.msra.gmra.mxu1 %v3547_v27  ;;  %v1543_v27 = vunpack.c.h.bf16 %v733_v3  ;;  %v559_v3 = vld [vmem:[%s3505_s15 + $0x72c] sm:$0xff] }
 0x22e   : > { %2488 = vmatpush2.xpose.msra.mxu0 %v1581_v55  ;;  %2527 = vmatpush1.xpose.msra.mxu1 %v1375_v56  ;;  %v1258_v55 = vunpack.c.l.bf16 %v580_v45  ;;  %v1452_v56 = vunpack.c.h.bf16 %v684_v51  ;;  %v623_v51 = vld [vmem:[%s3505_s15 + $0x908] sm:$0xff] }
 0x22f   : > { %2489 = vmatprep.subr.mxu0 %v1569_v59  ;;  %2528 = vmatprep.subr.mxu1 %v1363_v60  ;;  %v1246_v59 = vunpack.c.h.bf16 %v573_v53  ;;  %v677_v60 = vld [vmem:[%s3505_s15 + $0xa98] sm:$0xff] }
 0x230   : > { %2590 = vmatprep.mubr.f32.mxu1 %v3619_v57  ;;  %v1530_v57 = vunpack.c.h.bf16 %v726_v8  ;;  %v1438_v4 = vunpack.c.l.bf16 %v677_v60  ;;  %v552_v8 = vld [vmem:[%s3505_s15 + $0x6f8] sm:$0xff] }
 0x232   : > { %2490 = vmatpush2.xpose.msra.mxu0 %v1568_v63  ;;  %2529 = vmatpush1.xpose.msra.mxu1 %v1362_v0  ;;  %v1245_v63 = vunpack.c.l.bf16 %v573_v53  ;;  %v1439_v0 = vunpack.c.h.bf16 %v677_v60 }
 0x233   : > { %2491 = vmatprep.subr.mxu0 %v1556_v1  ;;  %2530 = vmatprep.subr.mxu1 %v1350_v2  ;;  %v1233_v1 = vunpack.c.h.bf16 %v566_v61  ;;  %v670_v2 = vld [vmem:[%s3505_s15 + $0xa64] sm:$0xff] }
 0x234   : > { %v1425_v9 = vunpack.c.l.bf16 %v670_v2 }
 0x236   : > { %2492 = vmatpush2.xpose.msra.mxu0 %v1555_v5  ;;  %2531 = vmatpush1.xpose.msra.mxu1 %v1349_v6  ;;  %v1232_v5 = vunpack.c.l.bf16 %v566_v61  ;;  %v1426_v6 = vunpack.c.h.bf16 %v670_v2  ;;  %v1338_v61 = vunpack.c.l.bf16 %v623_v51 }
 0x237   : > { %2493 = vmatprep.subr.mxu0 %v1543_v27  ;;  %2532 = vmatprep.subr.mxu1 %v1337_v7  ;;  %v1220_v27 = vunpack.c.h.bf16 %v559_v3  ;;  %v663_v7 = vld [vmem:[%s3505_s15 + $0xa30] sm:$0xff] }
 0x238   : > { %v1412_v15 = vunpack.c.l.bf16 %v663_v7 }
 0x23a   : > { %2494 = vmatpush2.xpose.msra.mxu0 %v1542_v10  ;;  %2533 = vmatpush1.xpose.msra.mxu1 %v1336_v11  ;;  %v1219_v10 = vunpack.c.l.bf16 %v559_v3  ;;  %v1413_v11 = vunpack.c.h.bf16 %v663_v7 }
 0x23b   : > { %2495 = vmatprep.subr.mxu0 %v1530_v57  ;;  %2534 = vmatprep.subr.mxu1 %v1324_v12  ;;  %v1207_v57 = vunpack.c.h.bf16 %v552_v8  ;;  %v656_v12 = vld [vmem:[%s3505_s15 + $0x9fc] sm:$0xff] }
 0x23c   : > { %v1399_v22 = vunpack.c.l.bf16 %v656_v12 }
 0x23e   : > { %2496 = vmatpush2.xpose.msra.mxu0 %v1529_v17  ;;  %2535 = vmatpush1.xpose.msra.mxu1 %v1323_v18  ;;  %v1206_v17 = vunpack.c.l.bf16 %v552_v8  ;;  %v1400_v18 = vunpack.c.h.bf16 %v656_v12 }
 0x23f   : > { %2497 = vmatprep.subr.mxu0 %v1517_v16  ;;  %2536 = vmatprep.subr.mxu1 %v1311_v19  ;;  %v1194_v16 = vunpack.c.h.bf16 %v545_v14  ;;  %v649_v19 = vld [vmem:[%s3505_s15 + $0x9c8] sm:$0xff] }
 0x240   : > { %v1386_v31 = vunpack.c.l.bf16 %v649_v19 }
 0x242   : > { %2498 = vmatpush2.xpose.msra.mxu0 %v1516_v23  ;;  %2537 = vmatpush1.xpose.msra.mxu1 %v1310_v25  ;;  %v1193_v23 = vunpack.c.l.bf16 %v545_v14  ;;  %v1387_v25 = vunpack.c.h.bf16 %v649_v19 }
 0x243   : > { %2499 = vmatprep.subr.mxu0 %v1504_v34  ;;  %2538 = vmatprep.subr.mxu1 %v1298_v29  ;;  %v1181_v34 = vunpack.c.h.bf16 %v538_v20  ;;  %v755_v29 = vld [vmem:[%s3505_s15 + $0xcdc] sm:$0xff] }
 0x244   : > { %v1583_v39 = vunpack.c.l.bf16 %v755_v29 }
 0x246   : > { %2500 = vmatpush2.xpose.msra.mxu0 %v1503_v32  ;;  %2539 = vmatpush1.xpose.msra.mxu1 %v1297_v24  ;;  %v1180_v32 = vunpack.c.l.bf16 %v538_v20  ;;  %v1584_v24 = vunpack.c.h.bf16 %v755_v29 }
 0x247   : > { %2501 = vmatprep.subr.mxu0 %v1491_v37  ;;  %2540 = vmatprep.subr.mxu1 %v1285_v33  ;;  %v1378_v37 = vunpack.c.h.bf16 %v644_v30  ;;  %v748_v33 = vld [vmem:[%s3505_s15 + $0xca8] sm:$0xff] }
 0x248   : > { %v1570_v45 = vunpack.c.l.bf16 %v748_v33 }
 0x24a   : > { %2502 = vmatpush2.xpose.msra.mxu0 %v1490_v40  ;;  %2541 = vmatpush1.xpose.msra.mxu1 %v1284_v41  ;;  %v1377_v40 = vunpack.c.l.bf16 %v644_v30  ;;  %v1571_v41 = vunpack.c.h.bf16 %v748_v33 }
 0x24b   : > { %2503 = vmatprep.subr.mxu0 %v1478_v42  ;;  %2542 = vmatprep.subr.mxu1 %v1272_v43  ;;  %v1365_v42 = vunpack.c.h.bf16 %v637_v38  ;;  %v741_v43 = vld [vmem:[%s3505_s15 + $0xc74] sm:$0xff] }
 0x24c   : > { %v1557_v53 = vunpack.c.l.bf16 %v741_v43 }
 0x24e   : > { %2504 = vmatpush2.xpose.msra.mxu0 %v1477_v46  ;;  %2543 = vmatpush1.xpose.msra.mxu1 %v1271_v47  ;;  %v1364_v46 = vunpack.c.l.bf16 %v637_v38  ;;  %v1558_v47 = vunpack.c.h.bf16 %v741_v43 }
 0x24f   : > { %2505 = vmatprep.subr.mxu0 %v1465_v49  ;;  %2544 = vmatprep.subr.mxu1 %v1259_v50  ;;  %v1352_v49 = vunpack.c.h.bf16 %v630_v44  ;;  %v734_v50 = vld [vmem:[%s3505_s15 + $0xc40] sm:$0xff] }
 0x250   : > { %v1544_v60 = vunpack.c.l.bf16 %v734_v50 }
 0x252   : > { %2506 = vmatpush2.xpose.msra.mxu0 %v1464_v54  ;;  %2545 = vmatpush1.xpose.msra.mxu1 %v1258_v55  ;;  %v1351_v54 = vunpack.c.l.bf16 %v630_v44  ;;  %v1339_v55 = vunpack.c.h.bf16 %v623_v51 }
 0x253   : > { %2507 = vmatprep.subr.mxu0 %v1452_v56  ;;  %2546 = vmatprep.subr.mxu1 %v1246_v59  ;;  %v727_v56 = vld [vmem:[%s3505_s15 + $0xc0c] sm:$0xff]  ;;  %v616_v59 = vld [vmem:[%s3505_s15 + $0x8d4] sm:$0xff] }
 0x254   : > { %v1325_v2 = vunpack.c.l.bf16 %v616_v59 }
 0x256   : > { %2508 = vmatpush2.xpose.msra.mxu0 %v1451_v62  ;;  %2547 = vmatpush1.xpose.msra.mxu1 %v1245_v63  ;;  %v1326_v62 = vunpack.c.h.bf16 %v616_v59  ;;  %v720_v63 = vld [vmem:[%s3505_s15 + $0xbd8] sm:$0xff] }
 0x257   : > { %2509 = vmatprep.subr.mxu0 %v1439_v0  ;;  %2548 = vmatprep.subr.mxu1 %v1233_v1  ;;  %v609_v0 = vld [vmem:[%s3505_s15 + $0x8a0] sm:$0xff]  ;;  %v1531_v1 = vunpack.c.l.bf16 %v727_v56  ;;  %v1519_v3 = vunpack.c.h.bf16 %v720_v63 }
 0x258   : > { %v1312_v7 = vunpack.c.l.bf16 %v609_v0 }
 0x25a   : > { %2510 = vmatpush2.xpose.msra.mxu0 %v1438_v4  ;;  %2549 = vmatpush1.xpose.msra.mxu1 %v1232_v5  ;;  %v1313_v4 = vunpack.c.h.bf16 %v609_v0  ;;  %v713_v5 = vld [vmem:[%s3505_s15 + $0xba4] sm:$0xff] }
 0x25b   : > { %2511 = vmatprep.subr.mxu0 %v1426_v6  ;;  %2550 = vmatprep.subr.mxu1 %v1220_v27  ;;  %v602_v6 = vld [vmem:[%s3505_s15 + $0x86c] sm:$0xff]  ;;  %v1518_v27 = vunpack.c.l.bf16 %v720_v63  ;;  %v1506_v8 = vunpack.c.h.bf16 %v713_v5 }
 0x25c   : > { %v1299_v12 = vunpack.c.l.bf16 %v602_v6 }
 0x25e   : > { %2512 = vmatpush2.xpose.msra.mxu0 %v1425_v9  ;;  %2551 = vmatpush1.xpose.msra.mxu1 %v1219_v10  ;;  %v1300_v9 = vunpack.c.h.bf16 %v602_v6  ;;  %v706_v10 = vld [vmem:[%s3505_s15 + $0xb70] sm:$0xff] }
 0x25f   : > { %2513 = vmatprep.subr.mxu0 %v1413_v11  ;;  %2552 = vmatprep.subr.mxu1 %v1207_v57  ;;  %v595_v11 = vld [vmem:[%s3505_s15 + $0x838] sm:$0xff]  ;;  %v1505_v57 = vunpack.c.l.bf16 %v713_v5  ;;  %v1493_v14 = vunpack.c.h.bf16 %v706_v10 }
 0x260   : > { %v1286_v19 = vunpack.c.l.bf16 %v595_v11 }
 0x262   : > { %2514 = vmatpush2.xpose.msra.mxu0 %v1412_v15  ;;  %2553 = vmatpush1.xpose.msra.mxu1 %v1206_v17  ;;  %v1287_v15 = vunpack.c.h.bf16 %v595_v11  ;;  %v699_v17 = vld [vmem:[%s3505_s15 + $0xb3c] sm:$0xff] }
 0x263   : > { %2515 = vmatprep.subr.mxu0 %v1400_v18  ;;  %2554 = vmatprep.subr.mxu1 %v1194_v16  ;;  %v588_v18 = vld [vmem:[%s3505_s15 + $0x804] sm:$0xff]  ;;  %v1492_v16 = vunpack.c.l.bf16 %v706_v10  ;;  %v1480_v20 = vunpack.c.h.bf16 %v699_v17 }
 0x264   : > { %v1273_v29 = vunpack.c.l.bf16 %v588_v18 }
 0x266   : > { %2516 = vmatpush2.xpose.msra.mxu0 %v1399_v22  ;;  %2555 = vmatpush1.xpose.msra.mxu1 %v1193_v23  ;;  %v1274_v22 = vunpack.c.h.bf16 %v588_v18  ;;  %v692_v23 = vld [vmem:[%s3505_s15 + $0xb08] sm:$0xff] }
 0x267   : > { %2517 = vmatprep.subr.mxu0 %v1387_v25  ;;  %2556 = vmatprep.subr.mxu1 %v1181_v34  ;;  %v581_v25 = vld [vmem:[%s3505_s15 + $0x7d0] sm:$0xff]  ;;  %v1479_v34 = vunpack.c.l.bf16 %v699_v17  ;;  %v1467_v30 = vunpack.c.h.bf16 %v692_v23 }
 0x268   : > { %v1260_v33 = vunpack.c.l.bf16 %v581_v25 }
 0x26a   : > { %2518 = vmatpush2.xpose.msra.mxu0 %v1386_v31  ;;  %2557 = vmatpush1.xpose.msra.mxu1 %v1180_v32  ;;  %v1261_v31 = vunpack.c.h.bf16 %v581_v25  ;;  %v685_v32 = vld [vmem:[%s3505_s15 + $0xad4] sm:$0xff] }
 0x26b   : > { %2558 = vmatprep.subr.mxu1 %v1584_v24  ;;  %2597 = vmatprep.subr.mxu0 %v1378_v37  ;;  %v574_v24 = vld [vmem:[%s3505_s15 + $0x79c] sm:$0xff]  ;;  %v1466_v37 = vunpack.c.l.bf16 %v692_v23  ;;  %v1454_v38 = vunpack.c.h.bf16 %v685_v32 }
 0x26c   : > { %v1247_v43 = vunpack.c.l.bf16 %v574_v24 }
 0x26d   : > { %2520 = vmatmul.mubr.f32.vlgmr.msra.gmra.mxu0 %v3550_v28  ;;  %v1545_v28 = vunpack.c.h.bf16 %v734_v50 }
 0x26e   : > { %2559 = vmatpush2.xpose.msra.mxu1 %v1583_v39  ;;  %2598 = vmatpush1.xpose.msra.mxu0 %v1377_v40  ;;  %v1248_v39 = vunpack.c.h.bf16 %v574_v24  ;;  %v678_v40 = vld [vmem:[%s3505_s15 + $0xaa0] sm:$0xff] }
 0x26f   : > { %2560 = vmatprep.subr.mxu1 %v1571_v41  ;;  %2599 = vmatprep.subr.mxu0 %v1365_v42  ;;  %v567_v41 = vld [vmem:[%s3505_s15 + $0x768] sm:$0xff]  ;;  %v1453_v42 = vunpack.c.l.bf16 %v685_v32  ;;  %v1441_v44 = vunpack.c.h.bf16 %v678_v40 }
 0x270   : > { %2661 = vmatprep.mubr.f32.mxu0 %v3623_v58  ;;  %v1532_v58 = vunpack.c.h.bf16 %v727_v56  ;;  %v1234_v50 = vunpack.c.l.bf16 %v567_v41 }
 0x272   : > { %2561 = vmatpush2.xpose.msra.mxu1 %v1570_v45  ;;  %2600 = vmatpush1.xpose.msra.mxu0 %v1364_v46  ;;  %v1235_v45 = vunpack.c.h.bf16 %v567_v41  ;;  %v671_v46 = vld [vmem:[%s3505_s15 + $0xa6c] sm:$0xff]  ;;  %v721_v41 = vld [vmem:[%s3505_s15 + $0xbe0] sm:$0xff] }
 0x273   : > { %2562 = vmatprep.subr.mxu1 %v1558_v47  ;;  %2601 = vmatprep.subr.mxu0 %v1352_v49  ;;  %v560_v47 = vld [vmem:[%s3505_s15 + $0x734] sm:$0xff]  ;;  %v1440_v49 = vunpack.c.l.bf16 %v678_v40  ;;  %v1428_v51 = vunpack.c.h.bf16 %v671_v46 }
 0x274   : > { %v1221_v56 = vunpack.c.l.bf16 %v560_v47 }
 0x276   : > { %2563 = vmatpush2.xpose.msra.mxu1 %v1557_v53  ;;  %2602 = vmatpush1.xpose.msra.mxu0 %v1351_v54  ;;  %v1222_v53 = vunpack.c.h.bf16 %v560_v47  ;;  %v664_v54 = vld [vmem:[%s3505_s15 + $0xa38] sm:$0xff]  ;;  %v714_v47 = vld [vmem:[%s3505_s15 + $0xbac] sm:$0xff] }
 0x277   : > { %2564 = vmatprep.subr.mxu1 %v1545_v28  ;;  %2603 = vmatprep.subr.mxu0 %v1339_v55  ;;  %v553_v28 = vld [vmem:[%s3505_s15 + $0x700] sm:$0xff]  ;;  %v1427_v55 = vunpack.c.l.bf16 %v671_v46  ;;  %v1415_v59 = vunpack.c.h.bf16 %v664_v54 }
 0x278   : > { %v1208_v63 = vunpack.c.l.bf16 %v553_v28 }
 0x27a   : > { %2565 = vmatpush2.xpose.msra.mxu1 %v1544_v60  ;;  %2604 = vmatpush1.xpose.msra.mxu0 %v1338_v61  ;;  %v1209_v60 = vunpack.c.h.bf16 %v553_v28  ;;  %v657_v61 = vld [vmem:[%s3505_s15 + $0xa04] sm:$0xff]  ;;  %v707_v28 = vld [vmem:[%s3505_s15 + $0xb78] sm:$0xff] }
 0x27b   : > { %2566 = vmatprep.subr.mxu1 %v1532_v58  ;;  %2605 = vmatprep.subr.mxu0 %v1326_v62  ;;  %v546_v58 = vld [vmem:[%s3505_s15 + $0x6cc] sm:$0xff]  ;;  %v1414_v62 = vunpack.c.l.bf16 %v664_v54  ;;  %v1402_v0 = vunpack.c.h.bf16 %v657_v61 }
 0x27c   : > { %v1195_v5 = vunpack.c.l.bf16 %v546_v58 }
 0x27e   : > { %2567 = vmatpush2.xpose.msra.mxu1 %v1531_v1  ;;  %2606 = vmatpush1.xpose.msra.mxu0 %v1325_v2  ;;  %v1196_v1 = vunpack.c.h.bf16 %v546_v58  ;;  %v650_v2 = vld [vmem:[%s3505_s15 + $0x9d0] sm:$0xff]  ;;  %v700_v58 = vld [vmem:[%s3505_s15 + $0xb44] sm:$0xff] }
 0x27f   : > { %2568 = vmatprep.subr.mxu1 %v1519_v3  ;;  %2607 = vmatprep.subr.mxu0 %v1313_v4  ;;  %v539_v3 = vld [vmem:[%s3505_s15 + $0x698] sm:$0xff]  ;;  %v1401_v4 = vunpack.c.l.bf16 %v657_v61  ;;  %v1389_v6 = vunpack.c.h.bf16 %v650_v2 }
 0x280   : > { %v1182_v10 = vunpack.c.l.bf16 %v539_v3 }
 0x282   : > { %2569 = vmatpush2.xpose.msra.mxu1 %v1518_v27  ;;  %2608 = vmatpush1.xpose.msra.mxu0 %v1312_v7  ;;  %v1183_v27 = vunpack.c.h.bf16 %v539_v3  ;;  %v756_v7 = vld [vmem:[%s3505_s15 + $0xce4] sm:$0xff]  ;;  %v693_v3 = vld [vmem:[%s3505_s15 + $0xb10] sm:$0xff] }
 0x283   : > { %2570 = vmatprep.subr.mxu1 %v1506_v8  ;;  %2609 = vmatprep.subr.mxu0 %v1300_v9  ;;  %v645_v8 = vld [vmem:[%s3505_s15 + $0x9ac] sm:$0xff]  ;;  %v1388_v9 = vunpack.c.l.bf16 %v650_v2  ;;  %v1586_v11 = vunpack.c.h.bf16 %v756_v7 }
 0x284   : > { %v1379_v17 = vunpack.c.l.bf16 %v645_v8 }
 0x286   : > { %2571 = vmatpush2.xpose.msra.mxu1 %v1505_v57  ;;  %2610 = vmatpush1.xpose.msra.mxu0 %v1299_v12  ;;  %v1380_v57 = vunpack.c.h.bf16 %v645_v8  ;;  %v749_v12 = vld [vmem:[%s3505_s15 + $0xcb0] sm:$0xff]  ;;  %v686_v8 = vld [vmem:[%s3505_s15 + $0xadc] sm:$0xff] }
 0x287   : > { %2572 = vmatprep.subr.mxu1 %v1493_v14  ;;  %2611 = vmatprep.subr.mxu0 %v1287_v15  ;;  %v638_v14 = vld [vmem:[%s3505_s15 + $0x978] sm:$0xff]  ;;  %v1585_v15 = vunpack.c.l.bf16 %v756_v7  ;;  %v1573_v18 = vunpack.c.h.bf16 %v749_v12 }
 0x288   : > { %v1366_v23 = vunpack.c.l.bf16 %v638_v14 }
 0x28a   : > { %2573 = vmatpush2.xpose.msra.mxu1 %v1492_v16  ;;  %2612 = vmatpush1.xpose.msra.mxu0 %v1286_v19  ;;  %v1367_v16 = vunpack.c.h.bf16 %v638_v14  ;;  %v742_v19 = vld [vmem:[%s3505_s15 + $0xc7c] sm:$0xff]  ;;  %v679_v14 = vld [vmem:[%s3505_s15 + $0xaa8] sm:$0xff] }
 0x28b   : > { %2574 = vmatprep.subr.mxu1 %v1480_v20  ;;  %2613 = vmatprep.subr.mxu0 %v1274_v22  ;;  %v631_v20 = vld [vmem:[%s3505_s15 + $0x944] sm:$0xff]  ;;  %v1572_v22 = vunpack.c.l.bf16 %v749_v12  ;;  %v1560_v25 = vunpack.c.h.bf16 %v742_v19 }
 0x28c   : > { %v1353_v32 = vunpack.c.l.bf16 %v631_v20 }
 0x28e   : > { %2575 = vmatpush2.xpose.msra.mxu1 %v1479_v34  ;;  %2614 = vmatpush1.xpose.msra.mxu0 %v1273_v29  ;;  %v1354_v34 = vunpack.c.h.bf16 %v631_v20  ;;  %v735_v29 = vld [vmem:[%s3505_s15 + $0xc48] sm:$0xff]  ;;  %v672_v20 = vld [vmem:[%s3505_s15 + $0xa74] sm:$0xff] }
 0x28f   : > { %2576 = vmatprep.subr.mxu1 %v1467_v30  ;;  %2615 = vmatprep.subr.mxu0 %v1261_v31  ;;  %v624_v30 = vld [vmem:[%s3505_s15 + $0x910] sm:$0xff]  ;;  %v1559_v31 = vunpack.c.l.bf16 %v742_v19 }
 0x290   : > { %v1341_v24 = vunpack.c.h.bf16 %v624_v30 }
 0x292   : > { %2577 = vmatpush2.xpose.msra.mxu1 %v1466_v37  ;;  %2616 = vmatpush1.xpose.msra.mxu0 %v1260_v33  ;;  %v728_v37 = vld [vmem:[%s3505_s15 + $0xc14] sm:$0xff]  ;;  %v617_v33 = vld [vmem:[%s3505_s15 + $0x8dc] sm:$0xff] }
 0x293   : > { %2578 = vmatprep.subr.mxu1 %v1454_v38  ;;  %2617 = vmatprep.subr.mxu0 %v1248_v39  ;;  %v1546_v38 = vunpack.c.l.bf16 %v735_v29  ;;  %v1340_v39 = vunpack.c.l.bf16 %v624_v30  ;;  %v1328_v40 = vunpack.c.h.bf16 %v617_v33  ;;  %v665_v30 = vld [vmem:[%s3505_s15 + $0xa40] sm:$0xff] }
 0x296   : > { %2579 = vmatpush2.xpose.msra.mxu1 %v1453_v42  ;;  %2618 = vmatpush1.xpose.msra.mxu0 %v1247_v43  ;;  %v610_v42 = vld [vmem:[%s3505_s15 + $0x8a8] sm:$0xff]  ;;  %v1533_v43 = vunpack.c.l.bf16 %v728_v37 }
 0x297   : > { %2580 = vmatprep.subr.mxu1 %v1441_v44  ;;  %2619 = vmatprep.subr.mxu0 %v1235_v45  ;;  %v1327_v44 = vunpack.c.l.bf16 %v617_v33  ;;  %v1521_v45 = vunpack.c.h.bf16 %v721_v41  ;;  %v1315_v46 = vunpack.c.h.bf16 %v610_v42  ;;  %v658_v33 = vld [vmem:[%s3505_s15 + $0xa0c] sm:$0xff] }
 0x29a   : > { %2581 = vmatpush2.xpose.msra.mxu1 %v1440_v49  ;;  %2620 = vmatpush1.xpose.msra.mxu0 %v1234_v50  ;;  %v603_v49 = vld [vmem:[%s3505_s15 + $0x874] sm:$0xff]  ;;  %v1520_v50 = vunpack.c.l.bf16 %v721_v41 }
 0x29b   : > { %2582 = vmatprep.subr.mxu1 %v1428_v51  ;;  %2621 = vmatprep.subr.mxu0 %v1222_v53  ;;  %v1314_v51 = vunpack.c.l.bf16 %v610_v42  ;;  %v1508_v53 = vunpack.c.h.bf16 %v714_v47  ;;  %v1302_v54 = vunpack.c.h.bf16 %v603_v49  ;;  %v651_v42 = vld [vmem:[%s3505_s15 + $0x9d8] sm:$0xff] }
 0x29e   : > { %2583 = vmatpush2.xpose.msra.mxu1 %v1427_v55  ;;  %2622 = vmatpush1.xpose.msra.mxu0 %v1221_v56  ;;  %v596_v55 = vld [vmem:[%s3505_s15 + $0x840] sm:$0xff]  ;;  %v1507_v56 = vunpack.c.l.bf16 %v714_v47 }
 0x29f   : > { %2584 = vmatprep.subr.mxu1 %v1415_v59  ;;  %2623 = vmatprep.subr.mxu0 %v1209_v60  ;;  %v1301_v59 = vunpack.c.l.bf16 %v603_v49  ;;  %v1495_v60 = vunpack.c.h.bf16 %v707_v28  ;;  %v1289_v61 = vunpack.c.h.bf16 %v596_v55  ;;  %v757_v49 = vld [vmem:[%s3505_s15 + $0xcec] sm:$0xff] }
 0x2a2   : > { %2585 = vmatpush2.xpose.msra.mxu1 %v1414_v62  ;;  %2624 = vmatpush1.xpose.msra.mxu0 %v1208_v63  ;;  %v589_v62 = vld [vmem:[%s3505_s15 + $0x80c] sm:$0xff]  ;;  %v1494_v63 = vunpack.c.l.bf16 %v707_v28 }
 0x2a3   : > { %2586 = vmatprep.subr.mxu1 %v1402_v0  ;;  %2625 = vmatprep.subr.mxu0 %v1196_v1  ;;  %v1288_v0 = vunpack.c.l.bf16 %v596_v55  ;;  %v1482_v1 = vunpack.c.h.bf16 %v700_v58  ;;  %v1276_v2 = vunpack.c.h.bf16 %v589_v62  ;;  %v750_v55 = vld [vmem:[%s3505_s15 + $0xcb8] sm:$0xff] }
 0x2a6   : > { %2587 = vmatpush2.xpose.msra.mxu1 %v1401_v4  ;;  %2626 = vmatpush1.xpose.msra.mxu0 %v1195_v5  ;;  %v582_v4 = vld [vmem:[%s3505_s15 + $0x7d8] sm:$0xff]  ;;  %v1481_v5 = vunpack.c.l.bf16 %v700_v58 }
 0x2a7   : > { %2588 = vmatprep.subr.mxu1 %v1389_v6  ;;  %2627 = vmatprep.subr.mxu0 %v1183_v27  ;;  %v1275_v6 = vunpack.c.l.bf16 %v589_v62  ;;  %v1469_v27 = vunpack.c.h.bf16 %v693_v3  ;;  %v1263_v7 = vunpack.c.h.bf16 %v582_v4  ;;  %v743_v62 = vld [vmem:[%s3505_s15 + $0xc84] sm:$0xff] }
 0x2aa   : > { %2589 = vmatpush2.xpose.msra.mxu1 %v1388_v9  ;;  %2628 = vmatpush1.xpose.msra.mxu0 %v1182_v10  ;;  %v575_v9 = vld [vmem:[%s3505_s15 + $0x7a4] sm:$0xff]  ;;  %v1468_v10 = vunpack.c.l.bf16 %v693_v3 }
 0x2ab   : > { %2629 = vmatprep.subr.mxu0 %v1586_v11  ;;  %2668 = vmatprep.subr.mxu1 %v1380_v57  ;;  %v1262_v11 = vunpack.c.l.bf16 %v582_v4  ;;  %v1456_v57 = vunpack.c.h.bf16 %v686_v8  ;;  %v1250_v12 = vunpack.c.h.bf16 %v575_v9  ;;  %v736_v4 = vld [vmem:[%s3505_s15 + $0xc50] sm:$0xff] }
 0x2ad   : > { %2591 = vmatmul.mubr.f32.vlgmr.msra.gmra.mxu1 %v3610_v48  ;;  %v1547_v48 = vunpack.c.h.bf16 %v735_v29 }
 0x2ae   : > { %2630 = vmatpush2.xpose.msra.mxu0 %v1585_v15  ;;  %2669 = vmatpush1.xpose.msra.mxu1 %v1379_v17  ;;  %v568_v15 = vld [vmem:[%s3505_s15 + $0x770] sm:$0xff]  ;;  %v1455_v17 = vunpack.c.l.bf16 %v686_v8  ;;  %v729_v8 = vld [vmem:[%s3505_s15 + $0xc1c] sm:$0xff] }
 0x2af   : > { %2631 = vmatprep.subr.mxu0 %v1573_v18  ;;  %2670 = vmatprep.subr.mxu1 %v1367_v16  ;;  %v1249_v18 = vunpack.c.l.bf16 %v575_v9  ;;  %v1443_v16 = vunpack.c.h.bf16 %v679_v14  ;;  %v1237_v19 = vunpack.c.h.bf16 %v568_v15  ;;  %v618_v9 = vld [vmem:[%s3505_s15 + $0x8e4] sm:$0xff] }
 0x2b0   : > { %2732 = vmatprep.mubr.f32.mxu1 %v3704_v35  ;;  %v1534_v35 = vunpack.c.h.bf16 %v728_v37 }
 0x2b2   : > { %2632 = vmatpush2.xpose.msra.mxu0 %v1572_v22  ;;  %2671 = vmatpush1.xpose.msra.mxu1 %v1366_v23  ;;  %v561_v22 = vld [vmem:[%s3505_s15 + $0x73c] sm:$0xff]  ;;  %v1442_v23 = vunpack.c.l.bf16 %v679_v14  ;;  %v611_v14 = vld [vmem:[%s3505_s15 + $0x8b0] sm:$0xff] }
 0x2b3   : > { %2633 = vmatprep.subr.mxu0 %v1560_v25  ;;  %2672 = vmatprep.subr.mxu1 %v1354_v34  ;;  %v1236_v25 = vunpack.c.l.bf16 %v568_v15  ;;  %v1430_v34 = vunpack.c.h.bf16 %v672_v20  ;;  %v1224_v29 = vunpack.c.h.bf16 %v561_v22  ;;  %v1535_v15 = vunpack.c.l.bf16 %v729_v8 }
 0x2b6   : > { %2634 = vmatpush2.xpose.msra.mxu0 %v1559_v31  ;;  %2673 = vmatpush1.xpose.msra.mxu1 %v1353_v32  ;;  %v554_v31 = vld [vmem:[%s3505_s15 + $0x708] sm:$0xff]  ;;  %v1429_v32 = vunpack.c.l.bf16 %v672_v20  ;;  %v604_v20 = vld [vmem:[%s3505_s15 + $0x87c] sm:$0xff] }
 0x2b7   : > { %2635 = vmatprep.subr.mxu0 %v1547_v48  ;;  %2674 = vmatprep.subr.mxu1 %v1341_v24  ;;  %v1223_v48 = vunpack.c.l.bf16 %v561_v22  ;;  %v1417_v24 = vunpack.c.h.bf16 %v665_v30  ;;  %v1211_v37 = vunpack.c.h.bf16 %v554_v31 }
 0x2ba   : > { %2636 = vmatpush2.xpose.msra.mxu0 %v1546_v38  ;;  %2675 = vmatpush1.xpose.msra.mxu1 %v1340_v39  ;;  %v547_v38 = vld [vmem:[%s3505_s15 + $0x6d4] sm:$0xff]  ;;  %v1416_v39 = vunpack.c.l.bf16 %v665_v30  ;;  %v597_v30 = vld [vmem:[%s3505_s15 + $0x848] sm:$0xff] }
 0x2bb   : > { %2637 = vmatprep.subr.mxu0 %v1534_v35  ;;  %2676 = vmatprep.subr.mxu1 %v1328_v40  ;;  %v1210_v35 = vunpack.c.l.bf16 %v554_v31  ;;  %v1404_v40 = vunpack.c.h.bf16 %v658_v33  ;;  %v1198_v41 = vunpack.c.h.bf16 %v547_v38 }
 0x2be   : > { %2638 = vmatpush2.xpose.msra.mxu0 %v1533_v43  ;;  %2677 = vmatpush1.xpose.msra.mxu1 %v1327_v44  ;;  %v540_v43 = vld [vmem:[%s3505_s15 + $0x6a0] sm:$0xff]  ;;  %v1403_v44 = vunpack.c.l.bf16 %v658_v33  ;;  %v590_v33 = vld [vmem:[%s3505_s15 + $0x814] sm:$0xff] }
 0x2bf   : > { %2639 = vmatprep.subr.mxu0 %v1521_v45  ;;  %2678 = vmatprep.subr.mxu1 %v1315_v46  ;;  %v1197_v45 = vunpack.c.l.bf16 %v547_v38  ;;  %v1391_v46 = vunpack.c.h.bf16 %v651_v42  ;;  %v1185_v47 = vunpack.c.h.bf16 %v540_v43 }
 0x2c2   : > { %2640 = vmatpush2.xpose.msra.mxu0 %v1520_v50  ;;  %2679 = vmatpush1.xpose.msra.mxu1 %v1314_v51  ;;  %v646_v50 = vld [vmem:[%s3505_s15 + $0x9b4] sm:$0xff]  ;;  %v1390_v51 = vunpack.c.l.bf16 %v651_v42  ;;  %v583_v42 = vld [vmem:[%s3505_s15 + $0x7e0] sm:$0xff] }
 0x2c3   : > { %2641 = vmatprep.subr.mxu0 %v1508_v53  ;;  %2680 = vmatprep.subr.mxu1 %v1302_v54  ;;  %v1184_v53 = vunpack.c.l.bf16 %v540_v43  ;;  %v1588_v54 = vunpack.c.h.bf16 %v757_v49  ;;  %v1382_v28 = vunpack.c.h.bf16 %v646_v50 }
 0x2c6   : > { %2642 = vmatpush2.xpose.msra.mxu0 %v1507_v56  ;;  %2681 = vmatpush1.xpose.msra.mxu1 %v1301_v59  ;;  %v639_v56 = vld [vmem:[%s3505_s15 + $0x980] sm:$0xff]  ;;  %v1587_v59 = vunpack.c.l.bf16 %v757_v49  ;;  %v576_v49 = vld [vmem:[%s3505_s15 + $0x7ac] sm:$0xff] }
 0x2c7   : > { %2643 = vmatprep.subr.mxu0 %v1495_v60  ;;  %2682 = vmatprep.subr.mxu1 %v1289_v61  ;;  %v1381_v60 = vunpack.c.l.bf16 %v646_v50  ;;  %v1575_v61 = vunpack.c.h.bf16 %v750_v55  ;;  %v1369_v58 = vunpack.c.h.bf16 %v639_v56 }
 0x2ca   : > { %2644 = vmatpush2.xpose.msra.mxu0 %v1494_v63  ;;  %2683 = vmatpush1.xpose.msra.mxu1 %v1288_v0  ;;  %v632_v63 = vld [vmem:[%s3505_s15 + $0x94c] sm:$0xff]  ;;  %v1574_v0 = vunpack.c.l.bf16 %v750_v55  ;;  %v569_v55 = vld [vmem:[%s3505_s15 + $0x778] sm:$0xff] }
 0x2cb   : > { %2645 = vmatprep.subr.mxu0 %v1482_v1  ;;  %2684 = vmatprep.subr.mxu1 %v1276_v2  ;;  %v1368_v1 = vunpack.c.l.bf16 %v639_v56  ;;  %v1562_v2 = vunpack.c.h.bf16 %v743_v62  ;;  %v1356_v3 = vunpack.c.h.bf16 %v632_v63 }
 0x2ce   : > { %2646 = vmatpush2.xpose.msra.mxu0 %v1481_v5  ;;  %2685 = vmatpush1.xpose.msra.mxu1 %v1275_v6  ;;  %v625_v5 = vld [vmem:[%s3505_s15 + $0x918] sm:$0xff]  ;;  %v1561_v6 = vunpack.c.l.bf16 %v743_v62  ;;  %v562_v62 = vld [vmem:[%s3505_s15 + $0x744] sm:$0xff] }
 0x2cf   : > { %2647 = vmatprep.subr.mxu0 %v1469_v27  ;;  %2686 = vmatprep.subr.mxu1 %v1263_v7  ;;  %v1355_v27 = vunpack.c.l.bf16 %v632_v63  ;;  %v1343_v7 = vunpack.c.h.bf16 %v625_v5 }
 0x2d2   : > { %2648 = vmatpush2.xpose.msra.mxu0 %v1468_v10  ;;  %2687 = vmatpush1.xpose.msra.mxu1 %v1262_v11  ;;  %v1548_v10 = vunpack.c.l.bf16 %v736_v4  ;;  %v1342_v11 = vunpack.c.l.bf16 %v625_v5 }
 0x2d3   : > { %2649 = vmatprep.subr.mxu0 %v1456_v57  ;;  %2688 = vmatprep.subr.mxu1 %v1250_v12  ;;  %v1330_v57 = vunpack.c.h.bf16 %v618_v9  ;;  %v722_v12 = vld [vmem:[%s3505_s15 + $0xbe8] sm:$0xff] }
 0x2d4   : > { %v1522_v22 = vunpack.c.l.bf16 %v722_v12 }
 0x2d6   : > { %2650 = vmatpush2.xpose.msra.mxu0 %v1455_v17  ;;  %2689 = vmatpush1.xpose.msra.mxu1 %v1249_v18  ;;  %v1329_v17 = vunpack.c.l.bf16 %v618_v9  ;;  %v1523_v18 = vunpack.c.h.bf16 %v722_v12  ;;  %v541_v12 = vld [vmem:[%s3505_s15 + $0x6a8] sm:$0xff] }
 0x2d7   : > { %2651 = vmatprep.subr.mxu0 %v1443_v16  ;;  %2690 = vmatprep.subr.mxu1 %v1237_v19  ;;  %v1317_v16 = vunpack.c.h.bf16 %v611_v14  ;;  %v715_v19 = vld [vmem:[%s3505_s15 + $0xbb4] sm:$0xff] }
 0x2d8   : > { %v1509_v31 = vunpack.c.l.bf16 %v715_v19 }
 0x2da   : > { %2652 = vmatpush2.xpose.msra.mxu0 %v1442_v23  ;;  %2691 = vmatpush1.xpose.msra.mxu1 %v1236_v25  ;;  %v1316_v23 = vunpack.c.l.bf16 %v611_v14  ;;  %v1510_v25 = vunpack.c.h.bf16 %v715_v19  ;;  %v759_v19 = vld [vmem:[%s3505_s15 + $0xcc8] ss:$52 sps:$4 sm:$0xff]  }
 0x2db   : > { %2653 = vmatprep.subr.mxu0 %v1430_v34  ;;  %2692 = vmatprep.subr.mxu1 %v1224_v29  ;;  %v1304_v34 = vunpack.c.h.bf16 %v604_v20  ;;  %v708_v29 = vld [vmem:[%s3505_s15 + $0xb80] sm:$0xff] }
 0x2dc   : > { %v1496_v38 = vunpack.c.l.bf16 %v708_v29 }
 0x2de   : > { %2654 = vmatpush2.xpose.msra.mxu0 %v1429_v32  ;;  %2693 = vmatpush1.xpose.msra.mxu1 %v1223_v48  ;;  %v1303_v32 = vunpack.c.l.bf16 %v604_v20  ;;  %v1497_v48 = vunpack.c.h.bf16 %v708_v29  ;;  %v751_v29 = vld [vmem:[%s3505_s15 + $0xcc0] sm:$0xff] }
 0x2df   : > { %2655 = vmatprep.subr.mxu0 %v1417_v24  ;;  %2694 = vmatprep.subr.mxu1 %v1211_v37  ;;  %v1291_v24 = vunpack.c.h.bf16 %v597_v30  ;;  %v701_v37 = vld [vmem:[%s3505_s15 + $0xb4c] sm:$0xff] }
 0x2e0   : > { %v1483_v43 = vunpack.c.l.bf16 %v701_v37 }
 0x2e2   : > { %2656 = vmatpush2.xpose.msra.mxu0 %v1416_v39  ;;  %2695 = vmatpush1.xpose.msra.mxu1 %v1210_v35  ;;  %v1290_v39 = vunpack.c.l.bf16 %v597_v30  ;;  %v1484_v35 = vunpack.c.h.bf16 %v701_v37  ;;  %v745_v37 = vld [vmem:[%s3505_s15 + $0xc60] ss:$52 sps:$4 sm:$0xff]  }
 0x2e3   : > { %2657 = vmatprep.subr.mxu0 %v1404_v40  ;;  %2696 = vmatprep.subr.mxu1 %v1198_v41  ;;  %v1278_v40 = vunpack.c.h.bf16 %v590_v33  ;;  %v694_v41 = vld [vmem:[%s3505_s15 + $0xb18] sm:$0xff] }
 0x2e4   : > { %v1470_v50 = vunpack.c.l.bf16 %v694_v41 }
 0x2e6   : > { %2658 = vmatpush2.xpose.msra.mxu0 %v1403_v44  ;;  %2697 = vmatpush1.xpose.msra.mxu1 %v1197_v45  ;;  %v1277_v44 = vunpack.c.l.bf16 %v590_v33  ;;  %v1471_v45 = vunpack.c.h.bf16 %v694_v41  ;;  %v1576_v33 = vunpack.c.l.bf16 %v751_v29  ;;  %v737_v41 = vld [vmem:[%s3505_s15 + $0xc58] sm:$0xff] }
 0x2e7   : > { %2659 = vmatprep.subr.mxu0 %v1391_v46  ;;  %2698 = vmatprep.subr.mxu1 %v1185_v47  ;;  %v1265_v46 = vunpack.c.h.bf16 %v583_v42  ;;  %v687_v47 = vld [vmem:[%s3505_s15 + $0xae4] sm:$0xff] }
 0x2e8   : > { %v1457_v56 = vunpack.c.l.bf16 %v687_v47 }
 0x2ea   : > { %2660 = vmatpush2.xpose.msra.mxu0 %v1390_v51  ;;  %2699 = vmatpush1.xpose.msra.mxu1 %v1184_v53  ;;  %v1264_v51 = vunpack.c.l.bf16 %v583_v42  ;;  %v1458_v53 = vunpack.c.h.bf16 %v687_v47  ;;  %v4032_v42 = vld.sshfl [vmem:[%s4170_s0 + $0x18] sm:$0x3 pattern:$0x76325410] }
 0x2eb   : > { %2700 = vmatprep.subr.mxu1 %v1588_v54  ;;  %2739 = vmatprep.subr.mxu0 %v1382_v28  ;;  %v1252_v54 = vunpack.c.h.bf16 %v576_v49  ;;  %v680_v28 = vld [vmem:[%s3505_s15 + $0xab0] sm:$0xff]  ;;  %v731_v47 = vld [vmem:[%s3505_s15 + $0xbf8] ss:$52 sps:$4 sm:$0xff]  }
 0x2ec   : > { %v1444_v63 = vunpack.c.l.bf16 %v680_v28 }
 0x2ed   : > { %2662 = vmatmul.mubr.f32.vlgmr.msra.gmra.mxu0 %v3613_v52  ;;  %v1549_v52 = vunpack.c.h.bf16 %v736_v4  ;;  %v555_v4 = vld [vmem:[%s3505_s15 + $0x710] sm:$0xff] }
 0x2ee   : > { %2701 = vmatpush2.xpose.msra.mxu1 %v1587_v59  ;;  %2740 = vmatpush1.xpose.msra.mxu0 %v1381_v60  ;;  %v1251_v59 = vunpack.c.l.bf16 %v576_v49  ;;  %v1445_v60 = vunpack.c.h.bf16 %v680_v28  ;;  %v1550_v49 = vunpack.c.l.bf16 %v737_v41  ;;  %v723_v28 = vld [vmem:[%s3505_s15 + $0xbf0] sm:$0xff] }
 0x2ef   : > { %2702 = vmatprep.subr.mxu1 %v1575_v61  ;;  %2741 = vmatprep.subr.mxu0 %v1369_v58  ;;  %v1239_v61 = vunpack.c.h.bf16 %v569_v55  ;;  %v673_v58 = vld [vmem:[%s3505_s15 + $0xa7c] sm:$0xff] }
 0x2f0   : > { %2803 = vmatprep.mubr.f32.mxu0 %v3708_v36  ;;  %v1536_v36 = vunpack.c.h.bf16 %v729_v8  ;;  %v1431_v5 = vunpack.c.l.bf16 %v673_v58  ;;  %v548_v8 = vld [vmem:[%s3505_s15 + $0x6dc] sm:$0xff] }
 0x2f2   : > { %2703 = vmatpush2.xpose.msra.mxu1 %v1574_v0  ;;  %2742 = vmatpush1.xpose.msra.mxu0 %v1368_v1  ;;  %v1238_v0 = vunpack.c.l.bf16 %v569_v55  ;;  %v1432_v1 = vunpack.c.h.bf16 %v673_v58  ;;  %v717_v58 = vld [vmem:[%s3505_s15 + $0xb90] ss:$52 sps:$4 sm:$0xff]  }
 0x2f3   : > { %2704 = vmatprep.subr.mxu1 %v1562_v2  ;;  %2743 = vmatprep.subr.mxu0 %v1356_v3  ;;  %v1226_v2 = vunpack.c.h.bf16 %v562_v62  ;;  %v666_v3 = vld [vmem:[%s3505_s15 + $0xa48] sm:$0xff] }
 0x2f4   : > { %v1418_v9 = vunpack.c.l.bf16 %v666_v3 }
 0x2f6   : > { %2705 = vmatpush2.xpose.msra.mxu1 %v1561_v6  ;;  %2744 = vmatpush1.xpose.msra.mxu0 %v1355_v27  ;;  %v1225_v6 = vunpack.c.l.bf16 %v562_v62  ;;  %v1419_v27 = vunpack.c.h.bf16 %v666_v3  ;;  %v1524_v62 = vunpack.c.l.bf16 %v723_v28  ;;  %v709_v3 = vld [vmem:[%s3505_s15 + $0xb88] sm:$0xff] }
 0x2f7   : > { %2706 = vmatprep.subr.mxu1 %v1549_v52  ;;  %2745 = vmatprep.subr.mxu0 %v1343_v7  ;;  %v1213_v52 = vunpack.c.h.bf16 %v555_v4  ;;  %v659_v7 = vld [vmem:[%s3505_s15 + $0xa14] sm:$0xff] }
 0x2f8   : > { %v1405_v14 = vunpack.c.l.bf16 %v659_v7 }
 0x2fa   : > { %2707 = vmatpush2.xpose.msra.mxu1 %v1548_v10  ;;  %2746 = vmatpush1.xpose.msra.mxu0 %v1342_v11  ;;  %v1212_v10 = vunpack.c.l.bf16 %v555_v4  ;;  %v1406_v11 = vunpack.c.h.bf16 %v659_v7  ;;  %v703_v7 = vld [vmem:[%s3505_s15 + $0xb28] ss:$52 sps:$4 sm:$0xff]  }
 0x2fb   : > { %2708 = vmatprep.subr.mxu1 %v1536_v36  ;;  %2747 = vmatprep.subr.mxu0 %v1330_v57  ;;  %v1200_v36 = vunpack.c.h.bf16 %v548_v8  ;;  %v652_v57 = vld [vmem:[%s3505_s15 + $0x9e0] sm:$0xff] }
 0x2fc   : > { %v1392_v20 = vunpack.c.l.bf16 %v652_v57 }
 0x2fe   : > { %2709 = vmatpush2.xpose.msra.mxu1 %v1535_v15  ;;  %2748 = vmatpush1.xpose.msra.mxu0 %v1329_v17  ;;  %v1199_v15 = vunpack.c.l.bf16 %v548_v8  ;;  %v1393_v17 = vunpack.c.h.bf16 %v652_v57  ;;  %v1498_v8 = vunpack.c.l.bf16 %v709_v3  ;;  %v695_v57 = vld [vmem:[%s3505_s15 + $0xb20] sm:$0xff] }
 0x2ff   : > { %2710 = vmatprep.subr.mxu1 %v1523_v18  ;;  %2749 = vmatprep.subr.mxu0 %v1317_v16  ;;  %v1187_v18 = vunpack.c.h.bf16 %v541_v12  ;;  %v758_v16 = vld [vmem:[%s3505_s15 + $0xcf4] sm:$0xff] }
 0x300   : > { %v1589_v30 = vunpack.c.l.bf16 %v758_v16 }
 0x302   : > { %2711 = vmatpush2.xpose.msra.mxu1 %v1522_v22  ;;  %2750 = vmatpush1.xpose.msra.mxu0 %v1316_v23  ;;  %v1186_v22 = vunpack.c.l.bf16 %v541_v12  ;;  %v1590_v23 = vunpack.c.h.bf16 %v758_v16  ;;  %v689_v16 = vld [vmem:[%s3505_s15 + $0xac0] ss:$52 sps:$4 sm:$0xff]  }
 0x303   : > { %2712 = vmatprep.subr.mxu1 %v1510_v25  ;;  %2751 = vmatprep.subr.mxu0 %v1304_v34  ;;  %v1591_v25 = vunpack.c.h.bf16 %v759_v19  ;;  %v647_v34 = vld [vmem:[%s3505_s15 + $0x988] ss:$52 sps:$4 sm:$0xff]  }
 0x306   : > { %2713 = vmatpush2.xpose.msra.mxu1 %v1509_v31  ;;  %2752 = vmatpush1.xpose.msra.mxu0 %v1303_v32  ;;  %v1383_v31 = vunpack.c.h.bf16 %v647_v34  ;;  %v1577_v32 = vunpack.c.h.bf16 %v751_v29  ;;  %v1461_v29 = vunpack.c.h.bf16 %v689_v16 }
 0x307   : > { %2714 = vmatprep.subr.mxu1 %v1497_v48  ;;  %2753 = vmatprep.subr.mxu0 %v1291_v24  ;;  %v1578_v48 = vunpack.c.l.bf16 %v759_v19  ;;  %v744_v24 = vld [vmem:[%s3505_s15 + $0xc8c] sm:$0xff]  ;;  %v1604_v19 = vsub.s32 1, %v3537_v13 }
 0x30a   : > { %2715 = vmatpush2.xpose.msra.mxu1 %v1496_v38  ;;  %2754 = vmatpush1.xpose.msra.mxu0 %v1290_v39  ;;  %v1370_v38 = vunpack.c.l.bf16 %v647_v34  ;;  %v1564_v39 = vunpack.c.h.bf16 %v744_v24 }
 0x30b   : > { %2716 = vmatprep.subr.mxu1 %v1484_v35  ;;  %2755 = vmatprep.subr.mxu0 %v1278_v40  ;;  %v1565_v35 = vunpack.c.h.bf16 %v745_v37  ;;  %v633_v40 = vld [vmem:[%s3505_s15 + $0x920] ss:$52 sps:$4 sm:$0xff]  }
 0x30e   : > { %2717 = vmatpush2.xpose.msra.mxu1 %v1483_v43  ;;  %2756 = vmatpush1.xpose.msra.mxu0 %v1277_v44  ;;  %v1357_v43 = vunpack.c.h.bf16 %v633_v40  ;;  %v1551_v44 = vunpack.c.h.bf16 %v737_v41 }
 0x30f   : > { %2718 = vmatprep.subr.mxu1 %v1471_v45  ;;  %2757 = vmatprep.subr.mxu0 %v1265_v46  ;;  %v1552_v45 = vunpack.c.l.bf16 %v745_v37  ;;  %v730_v46 = vld [vmem:[%s3505_s15 + $0xc24] sm:$0xff]  ;;  %v4080_v37 = vpop.f32.mrf.mxu1 }
 0x310   : > { %v1537_v55 = vunpack.c.l.bf16 %v730_v46 }
 0x312   : > { %2719 = vmatpush2.xpose.msra.mxu1 %v1470_v50  ;;  %2758 = vmatpush1.xpose.msra.mxu0 %v1264_v51  ;;  %v1344_v50 = vunpack.c.l.bf16 %v633_v40  ;;  %v1538_v51 = vunpack.c.h.bf16 %v730_v46  ;;  %v675_v40 = vld [vmem:[%s3505_s15 + $0xa58] ss:$52 sps:$4 sm:$0xff]  }
 0x313   : > { %2720 = vmatprep.subr.mxu1 %v1458_v53  ;;  %2759 = vmatprep.subr.mxu0 %v1252_v54  ;;  %v1539_v53 = vunpack.c.h.bf16 %v731_v47  ;;  %v619_v54 = vld [vmem:[%s3505_s15 + $0x8b8] ss:$52 sps:$4 sm:$0xff]  }
 0x316   : > { %2721 = vmatpush2.xpose.msra.mxu1 %v1457_v56  ;;  %2760 = vmatpush1.xpose.msra.mxu0 %v1251_v59  ;;  %v1331_v56 = vunpack.c.h.bf16 %v619_v54  ;;  %v1525_v59 = vunpack.c.h.bf16 %v723_v28 }
 0x317   : > { %2722 = vmatprep.subr.mxu1 %v1445_v60  ;;  %2761 = vmatprep.subr.mxu0 %v1239_v61  ;;  %v1526_v60 = vunpack.c.l.bf16 %v731_v47  ;;  %v716_v61 = vld [vmem:[%s3505_s15 + $0xbbc] sm:$0xff]  ;;  %v1435_v47 = vunpack.c.h.bf16 %v675_v40 }
 0x318   : > { %v1511_v4 = vunpack.c.l.bf16 %v716_v61 }
 0x31a   : > { %2723 = vmatpush2.xpose.msra.mxu1 %v1444_v63  ;;  %2762 = vmatpush1.xpose.msra.mxu0 %v1238_v0  ;;  %v1318_v63 = vunpack.c.l.bf16 %v619_v54  ;;  %v1512_v0 = vunpack.c.h.bf16 %v716_v61 }
 0x31b   : > { %2724 = vmatprep.subr.mxu1 %v1432_v1  ;;  %2763 = vmatprep.subr.mxu0 %v1226_v2  ;;  %v1513_v1 = vunpack.c.h.bf16 %v717_v58  ;;  %v605_v2 = vld [vmem:[%s3505_s15 + $0x850] ss:$52 sps:$4 sm:$0xff]  }
 0x31e   : > { %2725 = vmatpush2.xpose.msra.mxu1 %v1431_v5  ;;  %2764 = vmatpush1.xpose.msra.mxu0 %v1225_v6  ;;  %v1305_v5 = vunpack.c.h.bf16 %v605_v2  ;;  %v1499_v6 = vunpack.c.h.bf16 %v709_v3 }
 0x31f   : > { %2726 = vmatprep.subr.mxu1 %v1419_v27  ;;  %2765 = vmatprep.subr.mxu0 %v1213_v52  ;;  %v1500_v27 = vunpack.c.l.bf16 %v717_v58  ;;  %v702_v52 = vld [vmem:[%s3505_s15 + $0xb54] sm:$0xff]  ;;  %v660_v58 = vld [vmem:[%s3505_s15 + $0xa1c] sm:$0xff] }
 0x320   : > { %v1485_v12 = vunpack.c.l.bf16 %v702_v52 }
 0x322   : > { %2727 = vmatpush2.xpose.msra.mxu1 %v1418_v9  ;;  %2766 = vmatpush1.xpose.msra.mxu0 %v1212_v10  ;;  %v1292_v9 = vunpack.c.l.bf16 %v605_v2  ;;  %v1486_v10 = vunpack.c.h.bf16 %v702_v52  ;;  %v653_v52 = vld [vmem:[%s3505_s15 + $0x9e8] sm:$0xff] }
 0x323   : > { %2728 = vmatprep.subr.mxu1 %v1406_v11  ;;  %2767 = vmatprep.subr.mxu0 %v1200_v36  ;;  %v1487_v11 = vunpack.c.h.bf16 %v703_v7  ;;  %v591_v36 = vld [vmem:[%s3505_s15 + $0x7e8] ss:$52 sps:$4 sm:$0xff]  }
 0x326   : > { %2729 = vmatpush2.xpose.msra.mxu1 %v1405_v14  ;;  %2768 = vmatpush1.xpose.msra.mxu0 %v1199_v15  ;;  %v1279_v14 = vunpack.c.h.bf16 %v591_v36  ;;  %v1473_v15 = vunpack.c.h.bf16 %v695_v57 }
 0x327   : > { %2730 = vmatprep.subr.mxu1 %v1393_v17  ;;  %2769 = vmatprep.subr.mxu0 %v1187_v18  ;;  %v1474_v17 = vunpack.c.l.bf16 %v703_v7  ;;  %v688_v18 = vld [vmem:[%s3505_s15 + $0xaec] sm:$0xff] }
 0x328   : > { %v1460_v34 = vunpack.c.h.bf16 %v688_v18 }
 0x32a   : > { %2731 = vmatpush2.xpose.msra.mxu1 %v1392_v20  ;;  %2770 = vmatpush1.xpose.msra.mxu0 %v1186_v22  ;;  %v1472_v20 = vunpack.c.l.bf16 %v695_v57  ;;  %v1266_v22 = vunpack.c.l.bf16 %v591_v36  ;;  %v1395_v36 = vunpack.c.h.bf16 %v653_v52 }
 0x32b   : > { %2771 = vmatprep.subr.mxu0 %v1590_v23  ;;  %3284 = vmatprep.subr.msk.mxu1 %vm1692_vm1, %v1591_v25  ;;  %v4071_v23 = vld [vmem:[%s303_s20] sm:$0xf]  ;;  %v4073_v25 = vpop.f32.mrf.mxu0 }
 0x32d   : > { %2733 = vmatmul.mubr.f32.vlgmr.msra.gmra.mxu1 %v3695_v21  ;;  %v1563_v21 = vunpack.c.l.bf16 %v744_v24 }
 0x32e   : > { %2772 = vmatpush2.xpose.msra.mxu0 %v1589_v30  ;;  %3285 = vmatpush3.xpose.msk.msra.mxu1 %vm1692_vm1, %v1383_v31  ;;  %v577_v30 = vld [vmem:[%s3505_s15 + $0x780] ss:$52 sps:$4 sm:$0xff]   ;;  %v681_v31 = vld [vmem:[%s3505_s15 + $0xab8] sm:$0xff] }
 0x32f   : > { %2773 = vmatprep.subr.mxu0 %v1577_v32  ;;  %3286 = vmatprep.subr.msk.mxu1 %vm1692_vm1, %v1578_v48  ;;  %v1605_v32 = vrot.slane %v4071_v23, %v1604_v19  ;;  %v1459_v48 = vunpack.c.l.bf16 %v688_v18  ;;  %v1253_v24 = vunpack.c.h.bf16 %v577_v30 }
 0x330   : > { %3316 = vmatprep.mubr.msk.f32.mxu1 %vm1692_vm1, %v4032_v42 }
 0x332   : > { %2774 = vmatpush2.xpose.msra.mxu0 %v1576_v33  ;;  %3287 = vmatpush3.xpose.msk.msra.mxu1 %vm1692_vm1, %v1370_v38  ;;  %v1955_v33 = vpop.f32.mrf.mxu0  ;;  %v1447_v38 = vunpack.c.h.bf16 %v681_v31 }
 0x333   : > { %2775 = vmatprep.subr.mxu0 %v1564_v39  ;;  %3288 = vmatprep.subr.msk.mxu1 %vm1692_vm1, %v1565_v35  ;;  %v1448_v39 = vunpack.c.l.bf16 %v689_v16  ;;  %v674_v35 = vld [vmem:[%s3505_s15 + $0xa84] sm:$0xff] }
 0x334   : > { %v4085_v41 = vpop.f32.mrf.mxu0  ;;  %v1434_v46 = vunpack.c.h.bf16 %v674_v35  ;;  %v1433_v28 = vunpack.c.l.bf16 %v674_v35 }
 0x336   : > { %2776 = vmatpush2.xpose.msra.mxu0 %v1563_v21  ;;  %3289 = vmatpush3.xpose.msk.msra.mxu1 %vm1692_vm1, %v1357_v43  ;;  %v1956_v21 = vadd.f32 %v1955_v33, %v1605_v32  ;;  %v1446_v43 = vunpack.c.l.bf16 %v681_v31  ;;  %v1600_v31 = vsub.s32 0, %v3537_v13  ;;  %v2900_v33 = vld [vmem:[%s3511_s18 + $0x78] sm:$0x77] }
 0x337   : > { %2777 = vmatprep.subr.mxu0 %v1551_v44  ;;  %3290 = vmatprep.subr.msk.mxu1 %vm1692_vm1, %v1552_v45  ;;  %v1240_v44 = vunpack.c.l.bf16 %v577_v30  ;;  %v2026_v45 = vpop.f32.mrf.mxu1  ;;  %v2895_v30 = vld [vmem:[%s3511_s18 + $0x50] sm:$0xff]  ;;  %v2931_v35 = vunpack.c.l.bf16 %v2900_v33 }
 0x338   : > { %v2027_v54 = vadd.f32 %v2026_v45, %v1956_v21 }
 0x33a   : > { %2778 = vmatpush2.xpose.msra.mxu0 %v1550_v49  ;;  %3291 = vmatpush3.xpose.msk.msra.mxu1 %vm1692_vm1, %v1344_v50  ;;  %v563_v49 = vld [vmem:[%s3505_s15 + $0x718] ss:$52 sps:$4 sm:$0xff]   ;;  %v667_v50 = vld [vmem:[%s3505_s15 + $0xa50] sm:$0xff] }
 0x33b   : > { %2779 = vmatprep.subr.mxu0 %v1538_v51  ;;  %3292 = vmatprep.subr.msk.mxu1 %vm1692_vm1, %v1539_v53  ;;  %v4091_v51 = vpop.f32.mrf.mxu1  ;;  %v2097_v53 = vpop.f32.mrf.mxu0 }
 0x33c   : > { %v2098_v61 = vadd.f32 %v2097_v53, %v2027_v54  ;;  %v2889_v54 = vld [vmem:[%s3511_s18 + $0x20] sm:$0xff] }
 0x33e   : > { %2780 = vmatpush2.xpose.msra.mxu0 %v1537_v55  ;;  %3293 = vmatpush3.xpose.msk.msra.mxu1 %vm1692_vm1, %v1331_v56  ;;  %v1227_v55 = vunpack.c.h.bf16 %v563_v49  ;;  %v4094_v56 = vpop.f32.mrf.mxu0 }
 0x33f   : > { %2781 = vmatprep.subr.mxu0 %v1525_v59  ;;  %3294 = vmatprep.subr.msk.mxu1 %vm1692_vm1, %v1526_v60  ;;  %v1421_v59 = vunpack.c.h.bf16 %v667_v50  ;;  %v1422_v60 = vunpack.c.l.bf16 %v675_v40  ;;  %v2932_v40 = vunpack.c.h.bf16 %v2900_v33 }
 0x340   : > { %v2239_v3 = vpop.f32.mrf.mxu0 }
 0x342   : > { %2782 = vmatpush2.xpose.msra.mxu0 %v1524_v62  ;;  %3295 = vmatpush3.xpose.msk.msra.mxu1 %vm1692_vm1, %v1318_v63  ;;  %v661_v62 = vld [vmem:[%s3505_s15 + $0x9f0] ss:$52 sps:$4 sm:$0xff]   ;;  %v2168_v63 = vpop.f32.mrf.mxu1  ;;  %v4105_v7 = vpop.f32.mrf.mxu0 }
 0x343   : > { %2783 = vmatprep.subr.mxu0 %v1512_v0  ;;  %3296 = vmatprep.subr.msk.mxu1 %vm1692_vm1, %v1513_v1  ;;  %v1420_v0 = vunpack.c.l.bf16 %v667_v50  ;;  %v1214_v1 = vunpack.c.l.bf16 %v563_v49  ;;  %v1396_v57 = vunpack.c.l.bf16 %v661_v62  ;;  %v2894_v50 = vld [vmem:[%s3511_s18 + $0x48] sm:$0xff] }
 0x344   : > { %v4100_v2 = vpop.f32.mrf.mxu1 }
 0x346   : > { %2784 = vmatpush2.xpose.msra.mxu0 %v1511_v4  ;;  %3297 = vmatpush3.xpose.msk.msra.mxu1 %vm1692_vm1, %v1305_v5  ;;  %v1408_v4 = vunpack.c.h.bf16 %v660_v58  ;;  %v1409_v5 = vunpack.c.h.bf16 %v661_v62  ;;  %v2887_v62 = vld [vmem:[%s3511_s18 + $0x10] sm:$0xff] }
 0x347   : > { %2785 = vmatprep.subr.mxu0 %v1499_v6  ;;  %3298 = vmatprep.subr.msk.mxu1 %vm1692_vm1, %v1500_v27  ;;  %v549_v6 = vld [vmem:[%s3505_s15 + $0x6b0] ss:$52 sps:$4 sm:$0xff]   ;;  %v2169_v27 = vadd.f32 %v2168_v63, %v2098_v61  ;;  %v2919_v63 = vunpack.c.l.bf16 %v2894_v50 }
 0x348   : > { %v1188_v18 = vunpack.c.l.bf16 %v549_v6 }
 0x34a   : > { %2786 = vmatpush2.xpose.msra.mxu0 %v1498_v8  ;;  %3299 = vmatpush3.xpose.msk.msra.mxu1 %vm1692_vm1, %v1292_v9  ;;  %v2240_v8 = vadd.f32 %v2239_v3, %v2169_v27  ;;  %v1407_v9 = vunpack.c.l.bf16 %v660_v58  ;;  %v2910_v58 = vunpack.c.h.bf16 %v2889_v54  ;;  %v2890_v3 = vld [vmem:[%s3511_s18 + $0x28] sm:$0xff] }
 0x34b   : > { %2787 = vmatprep.subr.mxu0 %v1486_v10  ;;  %3300 = vmatprep.subr.msk.mxu1 %vm1692_vm1, %v1487_v11  ;;  %v1201_v10 = vunpack.c.h.bf16 %v549_v6  ;;  %v2310_v11 = vpop.f32.mrf.mxu1 }
 0x34e   : > { %2788 = vmatpush2.xpose.msra.mxu0 %v1485_v12  ;;  %3301 = vmatpush3.xpose.msk.msra.mxu1 %vm1692_vm1, %v1279_v14  ;;  %v2899_v12 = vld [vmem:[%s3511_s18 + $0x70] sm:$0x77]  ;;  %v2381_v14 = vpop.f32.mrf.mxu0 }
 0x34f   : > { %2789 = vmatprep.subr.mxu0 %v1473_v15  ;;  %3302 = vmatprep.subr.msk.mxu1 %vm1692_vm1, %v1474_v17  ;;  %v2311_v15 = vadd.f32 %v2310_v11, %v2240_v8  ;;  %v1394_v17 = vunpack.c.l.bf16 %v653_v52  ;;  %v2930_v16 = vunpack.c.h.bf16 %v2899_v12  ;;  %v2905_v52 = vunpack.c.l.bf16 %v2887_v62 }
 0x351   : > { %v2382_v19 = vadd.f32 %v2381_v14, %v2311_v15  ;;  %v2886_v14 = vld [vmem:[%s3511_s18 + $0x8] sm:$0xff] }
 0x352   : > { %2790 = vmatpush2.xpose.msra.mxu0 %v1472_v20  ;;  %3303 = vmatpush3.xpose.msk.msra.mxu1 %vm1692_vm1, %v1266_v22  ;;  %v2897_v20 = vld [vmem:[%s3511_s18 + $0x60] sm:$0xff]  ;;  %v2929_v22 = vunpack.c.l.bf16 %v2899_v12  ;;  %v2904_v15 = vunpack.c.h.bf16 %v2886_v14 }
 0x353   : > { %2791 = vmatprep.subr.mxu0 %v1460_v34  ;;  %3304 = vmatprep.subr.msk.mxu1 %vm1692_vm1, %v1461_v29  ;;  %v2926_v34 = vunpack.c.h.bf16 %v2897_v20  ;;  %v2882_v29 = vmax.f32 %v2382_v19, 0.0  ;;  %v2925_v32 = vunpack.c.l.bf16 %v2897_v20  ;;  %v2521_v19 = vpop.f32.mrf.mxu0 }
 0x356   : > { %2792 = vmatpush2.xpose.msra.mxu0 %v1459_v48  ;;  %3305 = vmatpush3.xpose.msk.msra.mxu1 %vm1692_vm1, %v1253_v24  ;;  %v2922_v48 = vunpack.c.h.bf16 %v2895_v30  ;;  %v2893_v24 = vld [vmem:[%s3511_s18 + $0x40] sm:$0xff] }
 0x357   : > { %2793 = vmatprep.subr.mxu0 %v1447_v38  ;;  %3306 = vmatprep.subr.msk.mxu1 %vm1692_vm1, %v1448_v39  ;;  %v2898_v38 = vld [vmem:[%s3511_s18 + $0x68] sm:$0xff]  ;;  %v1601_v39 = vrot.slane %v4071_v23, %v1600_v31  ;;  %v2917_v49 = vunpack.c.l.bf16 %v2893_v24 }
 0x358   : > { %v2928_v21 = vunpack.c.h.bf16 %v2898_v38  ;;  %v2927_v45 = vunpack.c.l.bf16 %v2898_v38 }
 0x35a   : > { %2794 = vmatpush2.xpose.msra.mxu0 %v1446_v43  ;;  %3307 = vmatpush3.xpose.msk.msra.mxu1 %vm1692_vm1, %v1240_v44  ;;  %v2896_v43 = vld [vmem:[%s3511_s18 + $0x58] sm:$0xff]  ;;  %v2891_v44 = vld [vmem:[%s3511_s18 + $0x30] sm:$0xff] }
 0x35b   : > { %2795 = vmatprep.subr.mxu0 %v1434_v46  ;;  %3308 = vmatprep.subr.msk.mxu1 %vm1692_vm1, %v1435_v47  ;;  %v1954_v46 = vadd.f32 %v4073_v25, %v1601_v39  ;;  %v2924_v47 = vunpack.c.h.bf16 %v2896_v43  ;;  %v2914_v53 = vunpack.c.h.bf16 %v2891_v44  ;;  %v2892_v25 = vld [vmem:[%s3511_s18 + $0x38] sm:$0xff] }
 0x35c   : > { %v2915_v6 = vunpack.c.l.bf16 %v2892_v25 }
 0x35e   : > { %2796 = vmatpush2.xpose.msra.mxu0 %v1433_v28  ;;  %3309 = vmatpush3.xpose.msk.msra.mxu1 %vm1692_vm1, %v1227_v55  ;;  %v2923_v28 = vunpack.c.l.bf16 %v2896_v43  ;;  %v2025_v55 = vadd.f32 %v4080_v37, %v1954_v46 }
 0x35f   : > { %2797 = vmatprep.subr.mxu0 %v1421_v59  ;;  %3310 = vmatprep.subr.msk.mxu1 %vm1692_vm1, %v1422_v60  ;;  %v2920_v59 = vunpack.c.h.bf16 %v2894_v50  ;;  %v2913_v60 = vunpack.c.l.bf16 %v2891_v44 }
 0x360   : > { %v2096_v61 = vadd.f32 %v4085_v41, %v2025_v55  ;;  %v2912_v41 = vunpack.c.h.bf16 %v2890_v3 }
 0x362   : > { %2798 = vmatpush2.xpose.msra.mxu0 %v1420_v0  ;;  %3311 = vmatpush3.xpose.msk.msra.mxu1 %vm1692_vm1, %v1214_v1  ;;  %v2916_v0 = vunpack.c.h.bf16 %v2892_v25  ;;  %v2909_v1 = vunpack.c.l.bf16 %v2889_v54  ;;  %v2167_v37 = vadd.f32 %v4091_v51, %v2096_v61 }
 0x363   : > { %2799 = vmatprep.subr.mxu0 %v1408_v4  ;;  %3312 = vmatprep.subr.msk.mxu1 %vm1692_vm1, %v1409_v5  ;;  %v2906_v4 = vunpack.c.h.bf16 %v2887_v62  ;;  %v2885_v5 = vld [vmem:[%s3511_s18] sm:$0xff] }
 0x364   : > { %v2238_v27 = vadd.f32 %v4094_v56, %v2167_v37  ;;  %v2902_v8 = vunpack.c.h.bf16 %v2885_v5  ;;  %v2901_v51 = vunpack.c.l.bf16 %v2885_v5 }
 0x366   : > { %2800 = vmatpush2.xpose.msra.mxu0 %v1407_v9  ;;  %3313 = vmatpush3.xpose.msk.msra.mxu1 %vm1692_vm1, %v1201_v10  ;;  %v2911_v9 = vunpack.c.l.bf16 %v2890_v3  ;;  %v2309_v10 = vadd.f32 %v4100_v2, %v2238_v27  ;;  %v2450_v2 = vpop.f32.mrf.mxu1 }
 0x367   : > { %2801 = vmatprep.subr.mxu0 %v1395_v36  ;;  %3314 = vmatprep.subr.msk.mxu1 %vm1692_vm1, %v1396_v57  ;;  %v2888_v36 = vld [vmem:[%s3511_s18 + $0x18] sm:$0xff] }
 0x368   : > { %v2380_v11 = vadd.f32 %v4105_v7, %v2309_v10  ;;  %v2908_v57 = vunpack.c.h.bf16 %v2888_v36  ;;  %v2907_v12 = vunpack.c.l.bf16 %v2888_v36  ;;  %v1612_v7 = vsub.s32 3, %v3537_v13 }
 0x36a   : > { %2802 = vmatpush2.xpose.msra.mxu0 %v1394_v17  ;;  %3315 = vmatpush3.xpose.msk.msra.mxu1 %vm1692_vm1, %v1188_v18  ;;  %v2881_v56 = vmax.f32 %v2380_v11, 0.0  ;;  %v2903_v17 = vunpack.c.l.bf16 %v2886_v14  ;;  %v1608_v18 = vsub.s32 2, %v3537_v13 }
 0x36b   : > { %2950 = vmatprep.subr.mxu0 %v2930_v16  ;;  %3020 = vmatprep.subr.mxu1 %v2932_v40  ;;  %v2452_v16 = vpop.f32.mrf.mxu1 }
 0x36c   : > { %v1609_v20 = vrot.slane %v4071_v23, %v1608_v18 }
 0x36d   : > { %2804 = vmatmul.mubr.f32.vlgmr.msra.gmra.mxu0 %v3698_v26  ;;  %3317 = vmatmul.mubr.msk.f32.vlgmr.msra.gmra.mxu1 %vm1692_vm1, %v4032_v42  ;;  %v2921_v26 = vunpack.c.l.bf16 %v2895_v30  ;;  %v2918_v42 = vunpack.c.h.bf16 %v2893_v24 }
 0x36e   : > { %2951 = vmatpush1.xpose.msra.mxu0 %v2929_v22  ;;  %2998 = vmatprep.mubr.f32.mxu0 %v2882_v29  ;;  %v2592_v22 = vpop.f32.mrf.mxu1  ;;  %v2523_v29 = vpop.f32.mrf.mxu0  ;;  %v2451_v30 = vadd.f32 %v2450_v2, %v1609_v20 }
 0x36f   : > { %2952 = vmatprep.subr.mxu0 %v2926_v34  ;;  %3021 = vmatpush1.xpose.msra.mxu1 %v2931_v35  ;;  %v1613_v34 = vrot.slane %v4071_v23, %v1612_v7 }
 0x370   : > { %3022 = vmatprep.subr.mxu1 %v2928_v21  ;;  %v2594_v31 = vpop.f32.mrf.mxu1  ;;  %v2522_v24 = vadd.f32 %v2521_v19, %v2451_v30 }
 0x372   : > { %2953 = vmatpush1.xpose.msra.mxu0 %v2925_v32  ;;  %v2593_v39 = vadd.f32 %v2592_v22, %v2522_v24 }
 0x373   : > { %2954 = vmatprep.subr.mxu0 %v2922_v48  ;;  %3023 = vmatpush1.xpose.msra.mxu1 %v2927_v45  ;;  %v2453_v48 = vadd.f32 %v2452_v16, %v1613_v34 }
 0x374   : > { %3024 = vmatprep.subr.mxu1 %v2924_v47 }
 0x375   : > { %v2524_v38 = vadd.f32 %v2523_v29, %v2453_v48 }
 0x376   : > { %2955 = vmatpush1.xpose.msra.mxu0 %v2921_v26 }
 0x377   : > { %2956 = vmatprep.subr.mxu0 %v2918_v42  ;;  %3025 = vmatpush1.xpose.msra.mxu1 %v2923_v28  ;;  %v2595_v40 = vadd.f32 %v2594_v31, %v2524_v38 }
 0x378   : > { %3026 = vmatprep.subr.mxu1 %v2920_v59 }
 0x37a   : > { %2957 = vmatpush1.xpose.msra.mxu0 %v2917_v49 }
 0x37b   : > { %2958 = vmatprep.subr.mxu0 %v2914_v53  ;;  %3027 = vmatpush1.xpose.msra.mxu1 %v2919_v63 }
 0x37c   : > { %3028 = vmatprep.subr.mxu1 %v2916_v0 }
 0x37e   : > { %2959 = vmatpush1.xpose.msra.mxu0 %v2913_v60  ;;  %v2933_v60 = vld [vmem:[#allocation2] sm:$0x3] }
 0x37f   : > { %2960 = vmatprep.subr.mxu0 %v2910_v58  ;;  %3029 = vmatpush1.xpose.msra.mxu1 %v2915_v6 }
 0x380   : > { %3030 = vmatprep.subr.mxu1 %v2912_v41 }
 0x382   : > { %2961 = vmatpush1.xpose.msra.mxu0 %v2909_v1 }
 0x383   : > { %2962 = vmatprep.subr.mxu0 %v2906_v4  ;;  %3031 = vmatpush1.xpose.msra.mxu1 %v2911_v9 }
 0x384   : > { %3032 = vmatprep.subr.mxu1 %v2908_v57 }
 0x386   : > { %2963 = vmatpush1.xpose.msra.mxu0 %v2905_v52 }
 0x387   : > { %2964 = vmatprep.subr.mxu0 %v2902_v8  ;;  %3033 = vmatpush1.xpose.msra.mxu1 %v2907_v12 }
 0x388   : > { %3034 = vmatprep.subr.mxu1 %v2904_v15 }
 0x38a   : > { %2965 = vmatpush1.xpose.msra.mxu0 %v2901_v51 }
 0x38b   : > { %3035 = vmatpush1.xpose.msra.mxu1 %v2903_v17 }
 0x38d   : > { %2999 = vmatmul.mubr.f32.vlgmr.msra.gmra.mxu0 %v2881_v56 }
 0x3ad   : > { %v2663_v32 = vpop.f32.mrf.mxu0 }
 0x3ae   : > { %v2664_v21 = vadd.f32 %v2663_v32, %v2593_v39 }
 0x3af   : > { %v2665_v35 = vpop.f32.mrf.mxu0 }
 0x3b0   : > { %v2666_v26 = vadd.f32 %v2665_v35, %v2595_v40 }
 0x3ed   : > { %v2734_v33 = vpop.f32.mrf.mxu1 }
 0x3ee   : > { %v2735_v43 = vadd.f32 %v2734_v33, %v2664_v21 }
 0x3ef   : > { %v2736_v13 = vpop.f32.mrf.mxu1 }
 0x3f0   : > { %v2737_v45 = vadd.f32 %v2736_v13, %v2666_v26 }
 0x42d   : > { %v2805_v42 = vpop.f32.mrf.mxu0  ;;  %v2876_v44 = vpop.f32.mrf.mxu1 }
 0x42e   : > { %v2806_v46 = vadd.f32 %v2805_v42, %v2735_v43 }
 0x42f   : > { %v2807_v23 = vpop.f32.mrf.mxu0  ;;  %v2878_v50 = vpop.f32.mrf.mxu1 }
 0x430   : > { %v2808_v47 = vadd.f32 %v2807_v23, %v2737_v45  ;;  %v2877_v49 = vadd.f32 %v2876_v44, %v2806_v46 }
 0x432   : > { %v2879_v53 = vadd.f32 %v2878_v50, %v2808_v47  ;;  %v2883_v28 = vmax.f32 %v2877_v49, 0.0 }
 0x434   : > { %v2884_v54 = vmax.f32 %v2879_v53, 0.0 }
 0x436   : > { %3068 = vmatprep.mubr.f32.mxu1 %v2884_v54 }
 0x437   : > { %3069 = vmatmul.mubr.f32.vlgmr.msra.gmra.mxu1 %v2883_v28 }
 0x44d   : > { %v3000_v55 = vpop.f32.mrf.mxu0 }
 0x44f   : > { %v3002_v59 = vpop.f32.mrf.mxu0 }
 0x4f7   : > { %v3070_v25 = vpop.f32.mrf.mxu1 }
 0x4f8   : > { %v3071_v61 = vadd.f32 %v3070_v25, %v3000_v55  ;;  %3080 = sbr.rel (%p3243_p11) target bundleno = 1287 (0x507), region = 71 }
 0x4f9   : > { %v3072_v58 = vpop.f32.mrf.mxu1 }
 0x4fa   : > { %v3074_v62 = vadd.f32 %v3071_v61, %v2933_v60 }
 0x4fc   : > { %3076 = vst.msk [vmem:[#allocation2] sm:$0x3] %vm3075_vm2, %v3074_v62 }
 0x4fd   : > { %v3244_v0 = vld [vmem:[%s4174_s4] ss:$0 sm:$0xff] }
 0x503   : > { %v3081_v63 = vld [vmem:[#allocation2] sm:$0x3] }
 0x504   : > { %v3089_v1 = vadd.f32 %v3244_v0, %v3081_v63 }
 0x506   : > { %3090 = vst.msk [vmem:[#allocation4] sm:$0x3] %vm3075_vm2, %v3089_v1 }
 0x507 PF: > { %p3323_p12 = scmp.eq.s32.totalorder %s3457_s21, 3  ;;  %s3410_s13 = smov [#allocation4]  }
 0x508   : > { %s3098_s14 = sshll.u32 %s3410_s13, 4  ;;  %s3099_s14 = int_to_ptr.vmem [resolvable:$true] %s3098_s14 }
 0x509   : > { %s3356_s15 = scalar_lea.vmem %s3099_s14, 32  ;;  %p3363_p2 = scmp.lt.s32.totalorder %s3099_s14, %s3099_s14 }
 0x50a   : > { %p3357_p13 = scmp.ne.s32.totalorder %s3099_s14, %s3356_s15  ;;  %p3364_p3 = scmp.lt.s32.totalorder %s3356_s15, %s3356_s15 }
 0x50c   : > { %p3358_p0 = pnand %p3357_p13, %p3323_p12  ;;  %p3365_p4 = por %p3364_p3, %p3363_p2 }
 0x50e   : > { %p3359_p1 = pneg %p3358_p0 }
 0x510   : > { %p3366_p5 = pnand %p3365_p4, %p3359_p1 }
 0x512   : > { %3369 = shalt.err (!%p3366_p5)
}
 0x513   : > { %3320 = dma.vmem_to_hbm [thread:$0]  (%p3323_p12), %s3099_s14, 32, %s4175_s5, [#allocation5]  }
 0x514   : > { %3393 = dma.done.wait (%p3323_p12), [#allocation5], 32  }
 0x515   : > { %3395 = vsyncadd (%p3323_p12), [#allocation5], 4294967264 }
 0x516 PF: > { %p13_p6 = scmp.ge.s32.totalorder %s3460_s22, 6   ;;  %s4176_s18 = smov %s3402_s19 }
 0x517   : > { %s4177_s19 = smov %s3469_s25  ;;  %s4178_s20 = smov %s3460_s22 }
 0x518   :  { %15 = sbr.rel (!%p13_p6) target bundleno = 2 (0x2), region = 109 }
 0x51d   :  { %3111 = vsyncpa [#allocation5], 1 }
 0x51e   :  { %3113 = vsyncpa [#allocation5 + $0x1], 1 }

</bundles_post_ra>
